<compile_context>
chip_gen: v7x
topology: tpu7x:2x2x1
jax: 0.10.0
libtpu: 0.0.40
codegen_flags: <defaults>
</compile_context>

<pallas_src>
import functools

import jax
import jax.numpy as jnp
from jax.experimental import pallas as pl
from jax.experimental.pallas import tpu as pltpu


def _leaky_relu(x, slope=0.2):
    # Valid for 0 < slope < 1: max(x, slope*x) == leaky_relu(x).
    return jnp.maximum(x, slope * x)


def discriminator_kernel(x_ref, c_ref,
                         w1x_ref, w1c_ref, b1_ref,
                         w2_ref, b2_ref,
                         w3_ref, b3_ref,
                         w4_ref, b4_ref,
                         o_ref):
    """Fused 4-layer MLP: (Linear + LeakyReLU) x3 + Linear + Sigmoid."""
    bf16 = jnp.bfloat16
    x = x_ref[...].astype(bf16)                                    # (TB, img_dim)
    c = c_ref[...].astype(bf16)                                    # (TB, 10)

    # Layer 1: split-weight formulation replaces the [x, c] concat.
    h = (jnp.dot(x, w1x_ref[...], preferred_element_type=jnp.float32)
         + jnp.dot(c, w1c_ref[...], preferred_element_type=jnp.float32)
         + b1_ref[...])
    h = _leaky_relu(h)                                             # (TB, 1024)
    # Dropout(0.3): identity in eval mode.

    h = jnp.dot(h.astype(bf16), w2_ref[...],
                preferred_element_type=jnp.float32) + b2_ref[...]
    h = _leaky_relu(h)                                             # (TB, 512)

    h = jnp.dot(h.astype(bf16), w3_ref[...],
                preferred_element_type=jnp.float32) + b3_ref[...]
    h = _leaky_relu(h)                                             # (TB, 256)

    # w4/b4 are zero-padded to 128 lanes -> lane-dense matmul + unmasked store.
    z = jnp.dot(h.astype(bf16), w4_ref[...],
                preferred_element_type=jnp.float32) + b4_ref[...]  # (TB, 128)
    o_ref[...] = jax.nn.sigmoid(z).astype(o_ref.dtype)             # column 0 is real


def init_params(key, img_dim):
    """Deterministic parameter init matching torch layer shapes (f32)."""
    d_in = img_dim + 10
    dims = [(d_in, 1024), (1024, 512), (512, 256), (256, 1)]
    keys = jax.random.split(key, 2 * len(dims) + 1)
    params = {"emb": jax.random.normal(keys[0], (10, 10), jnp.float32)}
    for i, (fan_in, fan_out) in enumerate(dims):
        bound = 1.0 / jnp.sqrt(float(fan_in))
        w = jax.random.uniform(keys[1 + 2 * i], (fan_in, fan_out),
                               jnp.float32, -bound, bound)
        b = jax.random.uniform(keys[2 + 2 * i], (1, fan_out),
                               jnp.float32, -bound, bound)
        if i == 0:
            # split W1 once so the kernel never needs a concatenated input
            params["w1x"], params["w1c"] = w[:img_dim], w[img_dim:]
        else:
            params[f"w{i + 1}"] = w
        params[f"b{i + 1}"] = b
    return params


def prepare_params(params):
    """One-time kernel-side weight prep (hoisted out of the per-call forward).

    Casts matmul weights to bf16 and zero-pads the final layer to 128 lanes so
    the forward never touches the f32 master weights.
    """
    bf16 = jnp.bfloat16
    return {
        "emb": params["emb"],                                      # f32 (gather in JAX)
        "w1x": params["w1x"].astype(bf16),
        "w1c": params["w1c"].astype(bf16),
        "b1": params["b1"],                                        # f32 bias (post-acc add)
        "w2": params["w2"].astype(bf16),
        "b2": params["b2"],
        "w3": params["w3"].astype(bf16),
        "b3": params["b3"],
        "w4": jnp.pad(params["w4"], ((0, 0), (0, 127))).astype(bf16),   # (256, 128)
        "b4": jnp.pad(params["b4"], ((0, 0), (0, 127))),                # (1, 128) f32
    }


def _pick_batch_tile(B):
    """Batch tile: multiple of 256 (MXU-aligned), prefer no padding and an even
    number of grid steps (v7x 2-TC load balance)."""
    candidates = (1024, 512, 256)
    for tb in candidates:
        n = B // tb
        if B % tb == 0 and n >= 2 and n % 2 == 0:
            return tb
    for tb in candidates:
        if B % tb == 0:
            return tb
    return 256  # ragged B: fall back to padding


@functools.partial(jax.jit, static_argnames=("batch_tile",))
def _forward_impl(prep, x, labels, batch_tile):
    B, img_dim = x.shape
    n_tiles = pl.cdiv(B, batch_tile)
    B_pad = n_tiles * batch_tile
    if B_pad != B:
        # Only reached when no 256-multiple tile divides B.
        x = jnp.pad(x, ((0, B_pad - B), (0, 0)))
        labels = jnp.pad(labels, (0, B_pad - B))

    # Glue: embedding gather (irregular access -> plain JAX, tiny).
    c = jnp.take(prep["emb"], labels, axis=0)                      # (B_pad, 10)

    def rep(arr):
        # Weight/bias blocks are full arrays with a constant index_map, so they
        # stay resident in VMEM across grid steps (no per-step re-DMA).
        nd = arr.ndim
        return pl.BlockSpec(arr.shape, lambda i, _nd=nd: (0,) * _nd)

    out = pl.pallas_call(
        discriminator_kernel,
        out_shape=jax.ShapeDtypeStruct((B_pad, 128), jnp.bfloat16),
        grid=(n_tiles,),
        in_specs=[
            pl.BlockSpec((batch_tile, img_dim), lambda i: (i, 0)),  # x tile
            pl.BlockSpec((batch_tile, 10), lambda i: (i, 0)),       # c tile
            rep(prep["w1x"]), rep(prep["w1c"]), rep(prep["b1"]),
            rep(prep["w2"]), rep(prep["b2"]),
            rep(prep["w3"]), rep(prep["b3"]),
            rep(prep["w4"]), rep(prep["b4"]),
        ],
        out_specs=pl.BlockSpec((batch_tile, 128), lambda i: (i, 0)),
        compiler_params=pltpu.CompilerParams(
            dimension_semantics=("parallel",),
            vmem_limit_bytes=48 * 1024 * 1024),
    )(x, c,
      prep["w1x"], prep["w1c"], prep["b1"],
      prep["w2"], prep["b2"],
      prep["w3"], prep["b3"],
      prep["w4"], prep["b4"])

    return out[:B, :1].astype(jnp.float32)                         # (B, 1)


def discriminator_forward(prep, x, labels):
    return _forward_impl(prep, x, labels,
                         batch_tile=_pick_batch_tile(x.shape[0]))


def reference_forward(params, x, labels):
    """Pure-JAX f32 reference of the torch forward (eval mode)."""
    c = jnp.take(params["emb"], labels, axis=0)
    h = _leaky_relu(x @ params["w1x"] + c @ params["w1c"] + params["b1"])
    h = _leaky_relu(h @ params["w2"] + params["b2"])
    h = _leaky_relu(h @ params["w3"] + params["b3"])
    return jax.nn.sigmoid(h @ params["w4"] + params["b4"])


if __name__ == "__main__":
    key = jax.random.PRNGKey(0)
    k_param, k_x, k_lab = jax.random.split(key, 3)

    # MNIST-sized img_dim; B = 512 -> batch_tile 256, 2 grid steps (both v7x
    # TensorCores get work) while staying a small, fast test.
    B, IMG_DIM = 512, 784
    params = init_params(k_param, IMG_DIM)
    prepared = prepare_params(params)       # one-time weight prep (hoisted)
    x = jax.random.normal(k_x, (B, IMG_DIM), jnp.float32)
    labels = jax.random.randint(k_lab, (B,), 0, 10, jnp.int32)

    out = jax.block_until_ready(discriminator_forward(prepared, x, labels))
    ref = reference_forward(params, x, labels)

    assert out.shape == (B, 1)
    assert bool(jnp.isfinite(out).all())
    # bf16 matmul operands + bf16 output store vs f32 reference -> loose tol.
    assert jnp.allclose(out, ref, atol=2e-2, rtol=2e-2), float(
        jnp.max(jnp.abs(out - ref)))

    print("KERNEL_OK")
</pallas_src>

<mosaic_0001>
module attributes {stable_mosaic.version = 11 : i64} {
  func.func @discriminator_kernel(%arg0: i32, %arg1: memref<256x784xf32, #tpu.memory_space<vmem>>, %arg2: memref<256x10xf32, #tpu.memory_space<vmem>>, %arg3: memref<784x1024xbf16, #tpu.memory_space<vmem>>, %arg4: memref<10x1024xbf16, #tpu.memory_space<vmem>>, %arg5: memref<1x1024xf32, #tpu.memory_space<vmem>>, %arg6: memref<1024x512xbf16, #tpu.memory_space<vmem>>, %arg7: memref<1x512xf32, #tpu.memory_space<vmem>>, %arg8: memref<512x256xbf16, #tpu.memory_space<vmem>>, %arg9: memref<1x256xf32, #tpu.memory_space<vmem>>, %arg10: memref<256x128xbf16, #tpu.memory_space<vmem>>, %arg11: memref<1x128xf32, #tpu.memory_space<vmem>>, %arg12: memref<256x128xbf16, #tpu.memory_space<vmem>>) attributes {dimension_semantics = [#tpu.dimension_semantics<parallel>], iteration_bounds = array<i64: 2>, scalar_prefetch = 0 : i64, scratch_operands = 0 : i64, tpu.core_type = #tpu.core_type<tc>, window_params = [{transform_indices = @transform_0, window_bounds = array<i64: 256, 784>}, {transform_indices = @transform_1, window_bounds = array<i64: 256, 10>}, {pipeline_mode = #tpu.pipeline_mode<synchronous>, transform_indices = @transform_2, window_bounds = array<i64: 784, 1024>}, {pipeline_mode = #tpu.pipeline_mode<synchronous>, transform_indices = @transform_3, window_bounds = array<i64: 10, 1024>}, {pipeline_mode = #tpu.pipeline_mode<synchronous>, transform_indices = @transform_4, window_bounds = array<i64: 1, 1024>}, {pipeline_mode = #tpu.pipeline_mode<synchronous>, transform_indices = @transform_5, window_bounds = array<i64: 1024, 512>}, {pipeline_mode = #tpu.pipeline_mode<synchronous>, transform_indices = @transform_6, window_bounds = array<i64: 1, 512>}, {pipeline_mode = #tpu.pipeline_mode<synchronous>, transform_indices = @transform_7, window_bounds = array<i64: 512, 256>}, {pipeline_mode = #tpu.pipeline_mode<synchronous>, transform_indices = @transform_8, window_bounds = array<i64: 1, 256>}, {pipeline_mode = #tpu.pipeline_mode<synchronous>, transform_indices = @transform_9, window_bounds = array<i64: 256, 128>}, {pipeline_mode = #tpu.pipeline_mode<synchronous>, transform_indices = @transform_10, window_bounds = array<i64: 1, 128>}, {transform_indices = @transform_11, window_bounds = array<i64: 256, 128>}]} {
    %c0 = arith.constant 0 : index
    %c0_0 = arith.constant 0 : index
    %0 = vector.load %arg1[%c0, %c0_0] : memref<256x784xf32, #tpu.memory_space<vmem>>, vector<256x784xf32>
    %1 = arith.truncf %0 : vector<256x784xf32> to vector<256x784xbf16>
    %c0_1 = arith.constant 0 : index
    %c0_2 = arith.constant 0 : index
    %2 = vector.load %arg2[%c0_1, %c0_2] : memref<256x10xf32, #tpu.memory_space<vmem>>, vector<256x10xf32>
    %3 = arith.truncf %2 : vector<256x10xf32> to vector<256x10xbf16>
    %c0_3 = arith.constant 0 : index
    %c0_4 = arith.constant 0 : index
    %4 = vector.load %arg3[%c0_3, %c0_4] : memref<784x1024xbf16, #tpu.memory_space<vmem>>, vector<784x1024xbf16>
    %cst = arith.constant dense<0.000000e+00> : vector<256x1024xf32>
    %5 = tpu.matmul %1, %4, %cst {dimension_numbers = #tpu.dot_dimension_numbers<[1], [0], [0], [1], [0, 0, 1, 1], [], []>} : vector<256x784xbf16>, vector<784x1024xbf16>, vector<256x1024xf32> -> vector<256x1024xf32>
    %c0_5 = arith.constant 0 : index
    %c0_6 = arith.constant 0 : index
    %6 = vector.load %arg4[%c0_5, %c0_6] : memref<10x1024xbf16, #tpu.memory_space<vmem>>, vector<10x1024xbf16>
    %cst_7 = arith.constant dense<0.000000e+00> : vector<256x1024xf32>
    %7 = tpu.matmul %3, %6, %cst_7 {dimension_numbers = #tpu.dot_dimension_numbers<[1], [0], [0], [1], [0, 0, 1, 1], [], []>} : vector<256x10xbf16>, vector<10x1024xbf16>, vector<256x1024xf32> -> vector<256x1024xf32>
    %8 = arith.addf %5, %7 : vector<256x1024xf32>
    %c0_8 = arith.constant 0 : index
    %c0_9 = arith.constant 0 : index
    %9 = vector.load %arg5[%c0_8, %c0_9] : memref<1x1024xf32, #tpu.memory_space<vmem>>, vector<1x1024xf32>
    %10 = vector.broadcast %9 : vector<1x1024xf32> to vector<256x1024xf32>
    %11 = arith.addf %8, %10 : vector<256x1024xf32>
    %cst_10 = arith.constant 2.000000e-01 : f32
    %12 = vector.broadcast %cst_10 : f32 to vector<256x1024xf32>
    %13 = arith.mulf %12, %11 : vector<256x1024xf32>
    %14 = arith.maximumf %11, %13 : vector<256x1024xf32>
    %15 = arith.truncf %14 : vector<256x1024xf32> to vector<256x1024xbf16>
    %c0_11 = arith.constant 0 : index
    %c0_12 = arith.constant 0 : index
    %16 = vector.load %arg6[%c0_11, %c0_12] : memref<1024x512xbf16, #tpu.memory_space<vmem>>, vector<1024x512xbf16>
    %cst_13 = arith.constant dense<0.000000e+00> : vector<256x512xf32>
    %17 = tpu.matmul %15, %16, %cst_13 {dimension_numbers = #tpu.dot_dimension_numbers<[1], [0], [0], [1], [0, 0, 1, 1], [], []>} : vector<256x1024xbf16>, vector<1024x512xbf16>, vector<256x512xf32> -> vector<256x512xf32>
    %c0_14 = arith.constant 0 : index
    %c0_15 = arith.constant 0 : index
    %18 = vector.load %arg7[%c0_14, %c0_15] : memref<1x512xf32, #tpu.memory_space<vmem>>, vector<1x512xf32>
    %19 = vector.broadcast %18 : vector<1x512xf32> to vector<256x512xf32>
    %20 = arith.addf %17, %19 : vector<256x512xf32>
    %cst_16 = arith.constant 2.000000e-01 : f32
    %21 = vector.broadcast %cst_16 : f32 to vector<256x512xf32>
    %22 = arith.mulf %21, %20 : vector<256x512xf32>
    %23 = arith.maximumf %20, %22 : vector<256x512xf32>
    %24 = arith.truncf %23 : vector<256x512xf32> to vector<256x512xbf16>
    %c0_17 = arith.constant 0 : index
    %c0_18 = arith.constant 0 : index
    %25 = vector.load %arg8[%c0_17, %c0_18] : memref<512x256xbf16, #tpu.memory_space<vmem>>, vector<512x256xbf16>
    %cst_19 = arith.constant dense<0.000000e+00> : vector<256x256xf32>
    %26 = tpu.matmul %24, %25, %cst_19 {dimension_numbers = #tpu.dot_dimension_numbers<[1], [0], [0], [1], [0, 0, 1, 1], [], []>} : vector<256x512xbf16>, vector<512x256xbf16>, vector<256x256xf32> -> vector<256x256xf32>
    %c0_20 = arith.constant 0 : index
    %c0_21 = arith.constant 0 : index
    %27 = vector.load %arg9[%c0_20, %c0_21] : memref<1x256xf32, #tpu.memory_space<vmem>>, vector<1x256xf32>
    %28 = vector.broadcast %27 : vector<1x256xf32> to vector<256x256xf32>
    %29 = arith.addf %26, %28 : vector<256x256xf32>
    %cst_22 = arith.constant 2.000000e-01 : f32
    %30 = vector.broadcast %cst_22 : f32 to vector<256x256xf32>
    %31 = arith.mulf %30, %29 : vector<256x256xf32>
    %32 = arith.maximumf %29, %31 : vector<256x256xf32>
    %33 = arith.truncf %32 : vector<256x256xf32> to vector<256x256xbf16>
    %c0_23 = arith.constant 0 : index
    %c0_24 = arith.constant 0 : index
    %34 = vector.load %arg10[%c0_23, %c0_24] : memref<256x128xbf16, #tpu.memory_space<vmem>>, vector<256x128xbf16>
    %cst_25 = arith.constant dense<0.000000e+00> : vector<256x128xf32>
    %35 = tpu.matmul %33, %34, %cst_25 {dimension_numbers = #tpu.dot_dimension_numbers<[1], [0], [0], [1], [0, 0, 1, 1], [], []>} : vector<256x256xbf16>, vector<256x128xbf16>, vector<256x128xf32> -> vector<256x128xf32>
    %c0_26 = arith.constant 0 : index
    %c0_27 = arith.constant 0 : index
    %36 = vector.load %arg11[%c0_26, %c0_27] : memref<1x128xf32, #tpu.memory_space<vmem>>, vector<1x128xf32>
    %37 = vector.broadcast %36 : vector<1x128xf32> to vector<256x128xf32>
    %38 = arith.addf %35, %37 : vector<256x128xf32>
    %39 = arith.negf %38 : vector<256x128xf32>
    %40 = math.exp %39 : vector<256x128xf32>
    %cst_28 = arith.constant 1.000000e+00 : f32
    %41 = vector.broadcast %cst_28 : f32 to vector<256x128xf32>
    %42 = arith.addf %41, %40 : vector<256x128xf32>
    %43 = arith.divf %41, %42 : vector<256x128xf32>
    %44 = arith.truncf %43 : vector<256x128xf32> to vector<256x128xbf16>
    %c0_29 = arith.constant 0 : index
    %c0_30 = arith.constant 0 : index
    %45 = vector.load %arg12[%c0_29, %c0_30] : memref<256x128xbf16, #tpu.memory_space<vmem>>, vector<256x128xbf16>
    tpu.vector_store %arg12[%c0_29, %c0_30], %44 {strides = array<i32>} : memref<256x128xbf16, #tpu.memory_space<vmem>>, vector<256x128xbf16>,
    return
  }
  func.func @transform_0(%arg0: i32) -> (i32, i32) {
    %c0_i32 = arith.constant 0 : i32
    %c0_i32_0 = arith.constant 0 : i32
    return %arg0, %c0_i32 : i32, i32
  }
  func.func @transform_1(%arg0: i32) -> (i32, i32) {
    %c0_i32 = arith.constant 0 : i32
    %c0_i32_0 = arith.constant 0 : i32
    return %arg0, %c0_i32 : i32, i32
  }
  func.func @transform_2(%arg0: i32) -> (i32, i32) {
    %c0_i32 = arith.constant 0 : i32
    %c0_i32_0 = arith.constant 0 : i32
    %c0_i32_1 = arith.constant 0 : i32
    return %c0_i32, %c0_i32_0 : i32, i32
  }
  func.func @transform_3(%arg0: i32) -> (i32, i32) {
    %c0_i32 = arith.constant 0 : i32
    %c0_i32_0 = arith.constant 0 : i32
    %c0_i32_1 = arith.constant 0 : i32
    return %c0_i32, %c0_i32_0 : i32, i32
  }
  func.func @transform_4(%arg0: i32) -> (i32, i32) {
    %c0_i32 = arith.constant 0 : i32
    %c0_i32_0 = arith.constant 0 : i32
    %c0_i32_1 = arith.constant 0 : i32
    return %c0_i32, %c0_i32_0 : i32, i32
  }
  func.func @transform_5(%arg0: i32) -> (i32, i32) {
    %c0_i32 = arith.constant 0 : i32
    %c0_i32_0 = arith.constant 0 : i32
    %c0_i32_1 = arith.constant 0 : i32
    return %c0_i32, %c0_i32_0 : i32, i32
  }
  func.func @transform_6(%arg0: i32) -> (i32, i32) {
    %c0_i32 = arith.constant 0 : i32
    %c0_i32_0 = arith.constant 0 : i32
    %c0_i32_1 = arith.constant 0 : i32
    return %c0_i32, %c0_i32_0 : i32, i32
  }
  func.func @transform_7(%arg0: i32) -> (i32, i32) {
    %c0_i32 = arith.constant 0 : i32
    %c0_i32_0 = arith.constant 0 : i32
    %c0_i32_1 = arith.constant 0 : i32
    return %c0_i32, %c0_i32_0 : i32, i32
  }
  func.func @transform_8(%arg0: i32) -> (i32, i32) {
    %c0_i32 = arith.constant 0 : i32
    %c0_i32_0 = arith.constant 0 : i32
    %c0_i32_1 = arith.constant 0 : i32
    return %c0_i32, %c0_i32_0 : i32, i32
  }
  func.func @transform_9(%arg0: i32) -> (i32, i32) {
    %c0_i32 = arith.constant 0 : i32
    %c0_i32_0 = arith.constant 0 : i32
    %c0_i32_1 = arith.constant 0 : i32
    return %c0_i32, %c0_i32_0 : i32, i32
  }
  func.func @transform_10(%arg0: i32) -> (i32, i32) {
    %c0_i32 = arith.constant 0 : i32
    %c0_i32_0 = arith.constant 0 : i32
    %c0_i32_1 = arith.constant 0 : i32
    return %c0_i32, %c0_i32_0 : i32, i32
  }
  func.func @transform_11(%arg0: i32) -> (i32, i32) {
    %c0_i32 = arith.constant 0 : i32
    %c0_i32_0 = arith.constant 0 : i32
    return %arg0, %c0_i32 : i32, i32
  }
}

</mosaic_0001>

<bundles_post_ra>
// kernel: _forward_impl.1
= control target key start
LH: loop header
LB: loop body
LE: loop exit
PB: predicated region body
PF: predicated region fallthrough
CT: control target
= control target key end

     0   :  { %s16749_s17 = smov 0   ;;  %s21698_s0 = inlined_call_operand.vmem [shape: f32[512,784], index: 0, kind: input, shape index: {}]   ;;  %s21699_s1 = inlined_call_operand.vmem [shape: f32[512,10], index: 1, kind: input, shape index: {}]   ;;  %s21700_s2 = inlined_call_operand.vmem [shape: bf16[784,1024], index: 2, kind: input, shape index: {}]   ;;  %s21701_s3 = inlined_call_operand.vmem [shape: bf16[10,1024], index: 3, kind: input, shape index: {}]   ;;  %s21702_s4 = inlined_call_operand.vmem [shape: f32[1,1024], index: 4, kind: input, shape index: {}]   ;;  %s21703_s5 = inlined_call_operand.vmem [shape: bf16[1024,512], index: 5, kind: input, shape index: {}]   ;;  %s21704_s6 = inlined_call_operand.vmem [shape: f32[1,512], index: 6, kind: input, shape index: {}]   ;;  %s21705_s7 = inlined_call_operand.vmem [shape: bf16[512,256], index: 7, kind: input, shape index: {}]   ;;  %s21706_s8 = inlined_call_operand.vmem [shape: f32[1,256], index: 8, kind: input, shape index: {}]   ;;  %s21707_s9 = inlined_call_operand.vmem [shape: bf16[256,128], index: 9, kind: input, shape index: {}]   ;;  %s21708_s10 = inlined_call_operand.vmem [shape: f32[1,128], index: 10, kind: input, shape index: {}]   ;;  %s21709_s11 = inlined_call_operand.vmem [shape: bf16[512,128], index: 11, kind: output, shape index: {}]  }
   0x1 LB: > { %s13193_s18 = sadd.s32 4294967295, %s16686_s17   ;;  %p13197_p0 = scmp.ge.s32.totalorder %s16686_s17, 1  ;;  %s16686_s17 = sphi %s16749_s17, %s21_s17  }
   0x2   : > { %p350_p1 = scmp.lt.s32.totalorder %s16686_s17, 3 }
   0x4   : > { %p351_p2 = pnand %p13197_p0, %p350_p1 }
   0x6   : > { %354 = sbr.rel (%p351_p2) target bundleno = 2568 (0xa08), region = 64 }
   0xd   : > { %v1192_v0 = vld [vmem:[%s21701_s3] sm:$0xff]  ;;  %vm1281_vm0 = vcmask 1044480   ;;  %v1193_v2 = vld [vmem:[%s21701_s3 + $0x8] sm:$0xff]  ;;  %v21710_v5 = vmov 0   ;;  %v1194_v7 = vld [vmem:[%s21701_s3 + $0x10] sm:$0xff]  ;;  %s13198_s12 = sshll.u32 %s13193_s18, 5 }
   0xe   : > { %v1196_v1 = vld [vmem:[%s21701_s3 + $0x20] sm:$0x11]  ;;  %1338 = vmatprep.mubr.bf16.mxu0 %v21710_v5  ;;  %1418 = vmatprep.mubr.bf16.mxu1 %v21710_v5  ;;  %v1197_v6 = vld [vmem:[%s21701_s3 + $0x28] sm:$0x11]  ;;  %v1198_v8 = vld [vmem:[%s21701_s3 + $0x30] sm:$0x11] }
   0xf   : > { %v13205_v3 = vcombine.high %v1192_v0, %v1196_v1  ;;  %v13204_v4 = vcombine.low %v1192_v0, %v1196_v1  ;;  %v13207_v9 = vcombine.high %v1193_v2, %v1197_v6  ;;  %v13209_v10 = vcombine.high %v1194_v7, %v1198_v8  ;;  %p397_p3 = scmp.lt.s32.totalorder %s13198_s12, 63  ;;  %v16788_v14 = vld [vmem:[%s21701_s3 + $0x18] sm:$0xff]  ;;  %v16803_v16 = vld [vmem:[%s21700_s2] sm:$0xff] }
  0x10   : > { %v13208_v12 = vcombine.low %v1194_v7, %v1198_v8  ;;  %v13206_v13 = vcombine.low %v1193_v2, %v1197_v6  ;;  %v16798_v15 = vld [vmem:[%s21701_s3 + $0x38] sm:$0x11]  ;;  %v16808_v17 = vld [vmem:[%s21700_s2 + $0x20] sm:$0xff]  ;;  %vm1232_vm1 = vcmask 80896   ;;  %vm4038_vm2 = vcmask 130048  }
  0x11   : > { %13212 = vmatprep.subr.msk.bf16.mxu0 %vm1281_vm0, %v13205_v3  ;;  %14378 = vmatprep.subr.msk.bf16.mxu1 %vm1281_vm0, %v13205_v3  ;;  %v1283_v11 = vsel %vm1281_vm0, %v13204_v4, 0  ;;  %s22544_s12 = smov (!%p397_p3, %s13198_s12), 63  ;;  %v13211_v26 = vcombine.high %v16788_v14, %v16798_v15  ;;  %v13281_v27 = vcombine.high %v16803_v16, %v16808_v17  ;;  %v808_v7 = vld [vmem:[%s21700_s2 + $0x40] sm:$0xff] }
  0x12   : > { %1307 = vmatpush1.bf16.msra.mxu0 %v1283_v11  ;;  %14379 = vmatpush1.bf16.msra.mxu1 %v1283_v11  ;;  %s13201_s13 = sshll.u32 %s22544_s12, 3  ;;  %v1295_v23 = vsel %vm1281_vm0, %v13208_v12, 0  ;;  %v1289_v25 = vsel %vm1281_vm0, %v13206_v13, 0  ;;  %v812_v8 = vld [vmem:[%s21700_s2 + $0x60] sm:$0xff]  ;;  %v16950_v12 = vld [vmem:[%s21700_s2 + $0x8] sm:$0xff]  ;;  %s16044_s26 = smul.u32 56, %s22544_s12 }
  0x13   : > { %13229 = vmatprep.subr.msk.bf16.mxu1 %vm1281_vm0, %v13207_v9  ;;  %13246 = vmatprep.subr.msk.bf16.mxu0 %vm1281_vm0, %v13209_v10  ;;  %s16793_s19 = scalar_lea.vmem %s21699_s1, %s13201_s13  ;;  %v16938_v9 = vld [vmem:[%s21700_s2 + $0x400] sm:$0xff]  ;;  %v13210_v10 = vcombine.low %v16788_v14, %v16798_v15  ;;  %v16955_v13 = vld [vmem:[%s21700_s2 + $0x28] sm:$0xff]  ;;  %v13280_v15 = vcombine.low %v16803_v16, %v16808_v17  ;;  %v13288_v16 = vcombine.low %v808_v7, %v812_v8  ;;  %s13203_s22 = sshll.u32 %s22544_s12, 2 }
  0x14   : > { %v752_v18 = vld [vmem:[%s16793_s19] sm:$0xff]  ;;  %v753_v19 = vld [vmem:[%s16793_s19 + $0x8] sm:$0xff]  ;;  %v754_v28 = vld [vmem:[%s16793_s19 + $0x10] sm:$0xff]  ;;  %v13282_v14 = vcombine.low %v16950_v12, %v16955_v13  ;;  %s17140_s29 = scalar_lea.vmem %s21698_s0, %s16044_s26 }
  0x15   : > { %v768_v20 = vld [vmem:[%s16793_s19 + $0x80] sm:$0xff]  ;;  %v16813_v21 = vpack.c.bf16 %v753_v19, %v752_v18  ;;  %v769_v22 = vld [vmem:[%s16793_s19 + $0x88] sm:$0xff]  ;;  %v755_v29 = vld [vmem:[%s16793_s19 + $0x18] sm:$0xff] }
  0x16   : > { %v16817_v24 = vpack.c.bf16 %v769_v22, %v768_v20  ;;  %v770_v30 = vld [vmem:[%s16793_s19 + $0x90] sm:$0xff]  ;;  %v771_v31 = vld [vmem:[%s16793_s19 + $0x98] sm:$0xff]  ;;  %v16835_v32 = vpack.c.bf16 %v755_v29, %v754_v28  ;;  %v756_v34 = vld [vmem:[%s16793_s19 + $0x20] sm:$0xff]  ;;  %v1301_v22 = vsel %vm1281_vm0, %v13210_v10, 0 }
  0x17   : > { %13213 = vmatmul.mubr.msk.bf16.vlgmr.msra.gmra.mrb[0].mxu0 %vm1232_vm1, %v16813_v21  ;;  %v16837_v33 = vpack.c.bf16 %v771_v31, %v770_v30  ;;  %v757_v35 = vld [vmem:[%s16793_s19 + $0x28] sm:$0xff]  ;;  %v772_v36 = vld [vmem:[%s16793_s19 + $0xa0] sm:$0xff]  ;;  %v758_v40 = vld [vmem:[%s16793_s19 + $0x30] sm:$0xff] }
  0x18   : > { %13221 = vmatmul.mubr.msk.bf16.vlgmr.msra.gmra.mrb[0].mxu1 %vm1232_vm1, %v16817_v24  ;;  %1693 = vmatpush1.bf16.msra.mxu0 %v1295_v23  ;;  %v773_v37 = vld [vmem:[%s16793_s19 + $0xa8] sm:$0xff]  ;;  %v16849_v38 = vpack.c.bf16 %v757_v35, %v756_v34  ;;  %v759_v41 = vld [vmem:[%s16793_s19 + $0x38] sm:$0xff]  ;;  %v774_v42 = vld [vmem:[%s16793_s19 + $0xb0] sm:$0xff]  ;;  %v13289_v23 = vcombine.high %v808_v7, %v812_v8 }
  0x19   : > { %1500 = vmatpush1.bf16.msra.mxu1 %v1289_v25  ;;  %1348 = vmatprep.mubr.bf16.mxu0 %v21710_v5  ;;  %v16851_v39 = vpack.c.bf16 %v773_v37, %v772_v36  ;;  %v775_v43 = vld [vmem:[%s16793_s19 + $0xb8] sm:$0xff]  ;;  %v16863_v44 = vpack.c.bf16 %v759_v41, %v758_v40  ;;  %v760_v46 = vld [vmem:[%s16793_s19 + $0x40] sm:$0xff]  ;;  %v761_v47 = vld [vmem:[%s16793_s19 + $0x48] sm:$0xff]  ;;  %v13283_v25 = vcombine.high %v16950_v12, %v16955_v13 }
  0x1a   : > { %1428 = vmatprep.mubr.bf16.mxu1 %v21710_v5  ;;  %13263 = vmatprep.subr.msk.bf16.mxu1 %vm1281_vm0, %v13211_v26  ;;  %v16865_v45 = vpack.c.bf16 %v775_v43, %v774_v42  ;;  %v776_v48 = vld [vmem:[%s16793_s19 + $0xc0] sm:$0xff]  ;;  %v777_v49 = vld [vmem:[%s16793_s19 + $0xc8] sm:$0xff]  ;;  %v16877_v50 = vpack.c.bf16 %v761_v47, %v760_v46  ;;  %v762_v52 = vld [vmem:[%s16793_s19 + $0x50] sm:$0xff] }
  0x1b   : > { %4087 = vmatprep.subr.bf16.mxu0 %v13281_v27  ;;  %v16879_v51 = vpack.c.bf16 %v777_v49, %v776_v48  ;;  %v763_v53 = vld [vmem:[%s16793_s19 + $0x58] sm:$0xff]  ;;  %v778_v54 = vld [vmem:[%s16793_s19 + $0xd0] sm:$0xff]  ;;  %v764_v58 = vld [vmem:[%s16793_s19 + $0x60] sm:$0xff] }
  0x1c   : > { %v779_v55 = vld [vmem:[%s16793_s19 + $0xd8] sm:$0xff]  ;;  %v16891_v56 = vpack.c.bf16 %v763_v53, %v762_v52  ;;  %v765_v59 = vld [vmem:[%s16793_s19 + $0x68] sm:$0xff]  ;;  %v780_v60 = vld [vmem:[%s16793_s19 + $0xe0] sm:$0xff] }
  0x1d   : > { %v16893_v57 = vpack.c.bf16 %v779_v55, %v778_v54  ;;  %v781_v61 = vld [vmem:[%s16793_s19 + $0xe8] sm:$0xff]  ;;  %v16905_v62 = vpack.c.bf16 %v765_v59, %v764_v58  ;;  %v766_v0 = vld [vmem:[%s16793_s19 + $0x70] sm:$0xff]  ;;  %v767_v1 = vld [vmem:[%s16793_s19 + $0x78] sm:$0xff] }
  0x1e   : > { %v16907_v63 = vpack.c.bf16 %v781_v61, %v780_v60  ;;  %v782_v2 = vld [vmem:[%s16793_s19 + $0xf0] sm:$0xff]  ;;  %v783_v3 = vld [vmem:[%s16793_s19 + $0xf8] sm:$0xff]  ;;  %v16919_v4 = vpack.c.bf16 %v767_v1, %v766_v0  ;;  %v16945_v11 = vld [vmem:[%s21700_s2 + $0x420] sm:$0xff] }
  0x1f   : > { %13214 = vmatmul.mubr.msk.bf16.gmra.mrb[4].mxu0 %vm1232_vm1, %v16835_v32  ;;  %v16921_v6 = vpack.c.bf16 %v783_v3, %v782_v2  ;;  %v13408_v18 = vcombine.low %v16938_v9, %v16945_v11  ;;  %v816_v19 = vld [vmem:[%s21700_s2 + $0x80] sm:$0xff] }
  0x20   : > { %13222 = vmatmul.mubr.msk.bf16.gmra.mrb[4].mxu1 %vm1232_vm1, %v16837_v33  ;;  %1358 = vmatprep.mubr.bf16.mxu0 %v21710_v5  ;;  %v820_v20 = vld [vmem:[%s21700_s2 + $0xa0] sm:$0xff] }
  0x21   : > { %1438 = vmatprep.mubr.bf16.mxu1 %v21710_v5  ;;  %v13297_v17 = vcombine.high %v816_v19, %v820_v20  ;;  %v824_v26 = vld [vmem:[%s21700_s2 + $0xc0] sm:$0xff]  ;;  %v13296_v28 = vcombine.low %v816_v19, %v820_v20 }
  0x22   : > { %v828_v27 = vld [vmem:[%s21700_s2 + $0xe0] sm:$0xff] }
  0x23   : > { %v832_v29 = vld [vmem:[%s21700_s2 + $0x100] sm:$0xff]  ;;  %v13305_v31 = vcombine.high %v824_v26, %v828_v27  ;;  %v13304_v34 = vcombine.low %v824_v26, %v828_v27 }
  0x24   : > { %v836_v30 = vld [vmem:[%s21700_s2 + $0x120] sm:$0xff] }
  0x25   : > { %v13313_v35 = vcombine.high %v832_v29, %v836_v30  ;;  %v840_v36 = vld [vmem:[%s21700_s2 + $0x140] sm:$0xff]  ;;  %v13312_v40 = vcombine.low %v832_v29, %v836_v30 }
  0x26   : > { %v844_v37 = vld [vmem:[%s21700_s2 + $0x160] sm:$0xff] }
  0x27   : > { %13215 = vmatmul.mubr.msk.bf16.gmra.mrb[8].mxu0 %vm1232_vm1, %v16849_v38  ;;  %v848_v41 = vld [vmem:[%s21700_s2 + $0x180] sm:$0xff]  ;;  %v13321_v43 = vcombine.high %v840_v36, %v844_v37  ;;  %v13320_v46 = vcombine.low %v840_v36, %v844_v37 }
  0x28   : > { %13223 = vmatmul.mubr.msk.bf16.gmra.mrb[8].mxu1 %vm1232_vm1, %v16851_v39  ;;  %1368 = vmatprep.mubr.bf16.mxu0 %v21710_v5  ;;  %v852_v42 = vld [vmem:[%s21700_s2 + $0x1a0] sm:$0xff] }
  0x29   : > { %1448 = vmatprep.mubr.bf16.mxu1 %v21710_v5  ;;  %v856_v47 = vld [vmem:[%s21700_s2 + $0x1c0] sm:$0xff]  ;;  %v13329_v49 = vcombine.high %v848_v41, %v852_v42  ;;  %v13328_v52 = vcombine.low %v848_v41, %v852_v42  ;;  %v13409_v42 = vcombine.high %v16938_v9, %v16945_v11 }
  0x2a   : > { %v860_v48 = vld [vmem:[%s21700_s2 + $0x1e0] sm:$0xff] }
  0x2b   : > { %v13337_v53 = vcombine.high %v856_v47, %v860_v48  ;;  %v864_v54 = vld [vmem:[%s21700_s2 + $0x200] sm:$0xff]  ;;  %v13336_v58 = vcombine.low %v856_v47, %v860_v48 }
  0x2c   : > { %v868_v55 = vld [vmem:[%s21700_s2 + $0x220] sm:$0xff] }
  0x2d   : > { %v872_v59 = vld [vmem:[%s21700_s2 + $0x240] sm:$0xff]  ;;  %v13345_v61 = vcombine.high %v864_v54, %v868_v55  ;;  %v13344_v0 = vcombine.low %v864_v54, %v868_v55  ;;  %v17173_v54 = vld [vmem:[%s21700_s2 + $0x408] sm:$0xff] }
  0x2e   : > { %v876_v60 = vld [vmem:[%s21700_s2 + $0x260] sm:$0xff]  ;;  %v17178_v55 = vld [vmem:[%s21700_s2 + $0x428] sm:$0xff] }
  0x2f   : > { %13216 = vmatmul.mubr.msk.bf16.gmra.mrb[12].mxu0 %vm1232_vm1, %v16863_v44  ;;  %v13353_v1 = vcombine.high %v872_v59, %v876_v60  ;;  %v880_v2 = vld [vmem:[%s21700_s2 + $0x280] sm:$0xff]  ;;  %v13352_v7 = vcombine.low %v872_v59, %v876_v60 }
  0x30   : > { %13224 = vmatmul.mubr.msk.bf16.gmra.mrb[12].mxu1 %vm1232_vm1, %v16865_v45  ;;  %1378 = vmatprep.mubr.bf16.mxu0 %v21710_v5  ;;  %v884_v3 = vld [vmem:[%s21700_s2 + $0x2a0] sm:$0xff] }
  0x31   : > { %1458 = vmatprep.mubr.bf16.mxu1 %v21710_v5  ;;  %v888_v8 = vld [vmem:[%s21700_s2 + $0x2c0] sm:$0xff]  ;;  %v13360_v19 = vcombine.low %v880_v2, %v884_v3 }
  0x32   : > { %v892_v10 = vld [vmem:[%s21700_s2 + $0x2e0] sm:$0xff] }
  0x33   : > { %v13369_v20 = vcombine.high %v888_v8, %v892_v10  ;;  %v912_v29 = vld [vmem:[%s21700_s2 + $0x380] sm:$0xff] }
  0x34   : > { %v916_v30 = vld [vmem:[%s21700_s2 + $0x3a0] sm:$0xff] }
  0x35   : > { %v13393_v36 = vcombine.high %v912_v29, %v916_v30  ;;  %v13392_v37 = vcombine.low %v912_v29, %v916_v30  ;;  %v416_v48 = vld [vmem:[%s17140_s29] sm:$0xff] }
  0x36   : > { %v952_v11 = vld [vmem:[%s21700_s2 + $0x4c0] sm:$0xff] }
  0x37   : > { %13217 = vmatmul.mubr.msk.bf16.gmra.mrb[16].mxu0 %vm1232_vm1, %v16877_v50  ;;  %v956_v12 = vld [vmem:[%s21700_s2 + $0x4e0] sm:$0xff] }
  0x38   : > { %13225 = vmatmul.mubr.msk.bf16.gmra.mrb[16].mxu1 %vm1232_vm1, %v16879_v51  ;;  %1388 = vmatprep.mubr.bf16.mxu0 %v21710_v5  ;;  %v1032_v60 = vld [vmem:[%s21700_s2 + $0x740] sm:$0xff] }
  0x39   : > { %1468 = vmatprep.mubr.bf16.mxu1 %v21710_v5  ;;  %v1040_v59 = vld [vmem:[%s21700_s2 + $0x780] sm:$0xff] }
  0x3f   : > { %13218 = vmatmul.mubr.msk.bf16.gmra.mrb[20].mxu0 %vm1232_vm1, %v16891_v56 }
  0x40   : > { %13226 = vmatmul.mubr.msk.bf16.gmra.mrb[20].mxu1 %vm1232_vm1, %v16893_v57  ;;  %1398 = vmatprep.mubr.bf16.mxu0 %v21710_v5 }
  0x41   : > { %1478 = vmatprep.mubr.bf16.mxu1 %v21710_v5 }
  0x47   : > { %13219 = vmatmul.mubr.msk.bf16.gmra.mrb[24].mxu0 %vm1232_vm1, %v16905_v62 }
  0x48   : > { %13227 = vmatmul.mubr.msk.bf16.gmra.mrb[24].mxu1 %vm1232_vm1, %v16907_v63  ;;  %1408 = vmatprep.mubr.bf16.mxu0 %v21710_v5 }
  0x49   : > { %1488 = vmatprep.mubr.bf16.mxu1 %v21710_v5 }
  0x4f   : > { %13220 = vmatmul.mubr.msk.bf16.gmra.mrb[28].mxu0 %vm1232_vm1, %v16919_v4 }
  0x50   : > { %13228 = vmatmul.mubr.msk.bf16.gmra.mrb[28].mxu1 %vm1232_vm1, %v16921_v6  ;;  %1724 = vmatprep.mubr.bf16.mxu0 %v21710_v5 }
  0x51   : > { %1531 = vmatprep.mubr.bf16.mxu1 %v21710_v5 }
  0x57   : > { %13247 = vmatmul.mubr.msk.bf16.vlgmr.msra.gmra.mrb[32].mxu0 %vm1232_vm1, %v16813_v21 }
  0x58   : > { %13230 = vmatmul.mubr.msk.bf16.vlgmr.msra.gmra.mrb[32].mxu1 %vm1232_vm1, %v16813_v21  ;;  %4088 = vmatpush1.bf16.msra.mxu0 %v13280_v15  ;;  %v13361_v15 = vcombine.high %v880_v2, %v884_v3  ;;  %v940_v2 = vld [vmem:[%s21700_s2 + $0x460] sm:$0xff]  ;;  %v809_v3 = vld [vmem:[%s21700_s2 + $0x48] sm:$0xff] }
  0x59   : > { %1886 = vmatpush1.bf16.msra.mxu1 %v1301_v22  ;;  %1541 = vmatprep.mubr.bf16.mxu1 %v21710_v5  ;;  %v896_v22 = vld [vmem:[%s21700_s2 + $0x300] sm:$0xff] }
  0x5a   : > { %1734 = vmatprep.mubr.bf16.mxu0 %v21710_v5  ;;  %4089 = vmatprep.subr.bf16.mxu0 %v13289_v23  ;;  %v900_v23 = vld [vmem:[%s21700_s2 + $0x320] sm:$0xff] }
  0x5b   : > { %4859 = vmatprep.subr.bf16.mxu1 %v13283_v25  ;;  %v13368_v25 = vcombine.low %v888_v8, %v892_v10  ;;  %v13377_v26 = vcombine.high %v896_v22, %v900_v23  ;;  %v13376_v27 = vcombine.low %v896_v22, %v900_v23  ;;  %v817_v22 = vld [vmem:[%s21700_s2 + $0x88] sm:$0xff] }
  0x5c   : > { %4090 = vmatpush1.bf16.msra.mxu0 %v13288_v16  ;;  %v904_v16 = vld [vmem:[%s21700_s2 + $0x340] sm:$0xff]  ;;  %v821_v23 = vld [vmem:[%s21700_s2 + $0xa8] sm:$0xff] }
  0x5d   : > { %4091 = vmatprep.subr.bf16.mxu0 %v13297_v17  ;;  %v908_v17 = vld [vmem:[%s21700_s2 + $0x360] sm:$0xff] }
  0x5f   : > { %13248 = vmatmul.mubr.msk.bf16.gmra.mrb[36].mxu0 %vm1232_vm1, %v16835_v32 }
  0x60   : > { %13231 = vmatmul.mubr.msk.bf16.gmra.mrb[36].mxu1 %vm1232_vm1, %v16835_v32  ;;  %1744 = vmatprep.mubr.bf16.mxu0 %v21710_v5 }
  0x61   : > { %1551 = vmatprep.mubr.bf16.mxu1 %v21710_v5  ;;  %4092 = vmatpush1.bf16.msra.mxu0 %v13296_v28  ;;  %v13385_v28 = vcombine.high %v904_v16, %v908_v17 }
  0x62   : > { %4093 = vmatprep.subr.bf16.mxu0 %v13305_v31  ;;  %v13384_v31 = vcombine.low %v904_v16, %v908_v17  ;;  %v430_v16 = vld [vmem:[%s17140_s29 + $0x70] sm:$0xff]  ;;  %v437_v17 = vld [vmem:[%s17140_s29 + $0xa8] sm:$0xff] }
  0x63   : > { %v17229_v9 = vpack.c.bf16 %v437_v17, %v430_v16  ;;  %v976_v16 = vld [vmem:[%s21700_s2 + $0x580] sm:$0xff] }
  0x64   : > { %v980_v17 = vld [vmem:[%s21700_s2 + $0x5a0] sm:$0xff] }
  0x65   : > { %4094 = vmatpush1.bf16.msra.mxu0 %v13304_v34  ;;  %v920_v34 = vld [vmem:[%s21700_s2 + $0x3c0] sm:$0xff]  ;;  %22031 = vst [vmem:[#allocation2_spill] sm:$0xff] %v17229_v9 }
  0x66   : > { %4095 = vmatprep.subr.bf16.mxu0 %v13313_v35  ;;  %v924_v35 = vld [vmem:[%s21700_s2 + $0x3e0] sm:$0xff] }
  0x67   : > { %13249 = vmatmul.mubr.msk.bf16.gmra.mrb[40].mxu0 %vm1232_vm1, %v16849_v38  ;;  %v13400_v41 = vcombine.low %v920_v34, %v924_v35 }
  0x68   : > { %13232 = vmatmul.mubr.msk.bf16.gmra.mrb[40].mxu1 %vm1232_vm1, %v16849_v38  ;;  %1754 = vmatprep.mubr.bf16.mxu0 %v21710_v5 }
  0x69   : > { %1561 = vmatprep.mubr.bf16.mxu1 %v21710_v5  ;;  %4096 = vmatpush1.bf16.msra.mxu0 %v13312_v40  ;;  %v13401_v40 = vcombine.high %v920_v34, %v924_v35  ;;  %v13433_v34 = vcombine.high %v952_v11, %v956_v12  ;;  %v444_v35 = vld [vmem:[%s17140_s29 + $0xe0] sm:$0xff] }
  0x6a   : > { %4097 = vmatprep.subr.bf16.mxu0 %v13321_v43  ;;  %v417_v43 = vld [vmem:[%s17140_s29 + $0x8] sm:$0xff] }
  0x6d   : > { %4098 = vmatpush1.bf16.msra.mxu0 %v13320_v46  ;;  %v424_v46 = vld [vmem:[%s17140_s29 + $0x40] sm:$0xff] }
  0x6e   : > { %4099 = vmatprep.subr.bf16.mxu0 %v13329_v49  ;;  %v17150_v47 = vpack.c.bf16 %v424_v46, %v417_v43  ;;  %v423_v49 = vld [vmem:[%s17140_s29 + $0x38] sm:$0xff]  ;;  %v837_v43 = vld [vmem:[%s21700_s2 + $0x128] sm:$0xff] }
  0x6f   : > { %13250 = vmatmul.mubr.msk.bf16.gmra.mrb[44].mxu0 %vm1232_vm1, %v16863_v44  ;;  %v459_v46 = vld [vmem:[%s17140_s29 + $0x158] sm:$0xff] }
  0x70   : > { %13233 = vmatmul.mubr.msk.bf16.gmra.mrb[44].mxu1 %vm1232_vm1, %v16863_v44  ;;  %1764 = vmatprep.mubr.bf16.mxu0 %v21710_v5 }
  0x71   : > { %1571 = vmatprep.mubr.bf16.mxu1 %v21710_v5  ;;  %4100 = vmatpush1.bf16.msra.mxu0 %v13328_v52  ;;  %v17162_v52 = vld [vmem:[%s21700_s2 + $0x800] sm:$0xff] }
  0x72   : > { %4101 = vmatprep.subr.bf16.mxu0 %v13337_v53  ;;  %v17168_v53 = vld [vmem:[%s21700_s2 + $0x820] sm:$0xff] }
  0x75   : > { %4102 = vmatpush1.bf16.msra.mxu0 %v13336_v58  ;;  %v431_v58 = vld [vmem:[%s17140_s29 + $0x78] sm:$0xff] }
  0x76   : > { %4103 = vmatprep.subr.bf16.mxu0 %v13345_v61  ;;  %v17185_v61 = vpack.c.bf16 %v423_v49, %v416_v48  ;;  %v466_v48 = vld [vmem:[%s17140_s29 + $0x190] sm:$0xff]  ;;  %v13432_v49 = vcombine.low %v952_v11, %v956_v12  ;;  %v13457_v12 = vcombine.high %v976_v16, %v980_v17 }
  0x77   : > { %13251 = vmatmul.mubr.msk.bf16.gmra.mrb[48].mxu0 %vm1232_vm1, %v16877_v50 }
  0x78   : > { %13234 = vmatmul.mubr.msk.bf16.gmra.mrb[48].mxu1 %vm1232_vm1, %v16877_v50  ;;  %1774 = vmatprep.mubr.bf16.mxu0 %v21710_v5 }
  0x79   : > { %1581 = vmatprep.mubr.bf16.mxu1 %v21710_v5  ;;  %4104 = vmatpush1.bf16.msra.mxu0 %v13344_v0  ;;  %v438_v0 = vld [vmem:[%s17140_s29 + $0xb0] sm:$0xff] }
  0x7a   : > { %4105 = vmatprep.subr.bf16.mxu0 %v13353_v1  ;;  %v936_v1 = vld [vmem:[%s21700_s2 + $0x440] sm:$0xff]  ;;  %v17200_v8 = vpack.c.bf16 %v438_v0, %v431_v58 }
  0x7b   : > { %v13417_v10 = vcombine.high %v936_v1, %v940_v2 }
  0x7d   : > { %4106 = vmatpush1.bf16.msra.mxu0 %v13352_v7  ;;  %v813_v7 = vld [vmem:[%s21700_s2 + $0x68] sm:$0xff] }
  0x7e   : > { %4107 = vmatprep.subr.bf16.mxu0 %v13361_v15  ;;  %v944_v15 = vld [vmem:[%s21700_s2 + $0x480] sm:$0xff] }
  0x7f   : > { %13252 = vmatmul.mubr.msk.bf16.gmra.mrb[52].mxu0 %vm1232_vm1, %v16891_v56 }
  0x80   : > { %13235 = vmatmul.mubr.msk.bf16.gmra.mrb[52].mxu1 %vm1232_vm1, %v16891_v56  ;;  %1784 = vmatprep.mubr.bf16.mxu0 %v21710_v5 }
  0x81   : > { %1591 = vmatprep.mubr.bf16.mxu1 %v21710_v5  ;;  %4108 = vmatpush1.bf16.msra.mxu0 %v13360_v19  ;;  %v948_v19 = vld [vmem:[%s21700_s2 + $0x4a0] sm:$0xff] }
  0x82   : > { %4109 = vmatprep.subr.bf16.mxu0 %v13369_v20  ;;  %v13291_v20 = vcombine.high %v809_v3, %v813_v7  ;;  %v13425_v29 = vcombine.high %v944_v15, %v948_v19  ;;  %v13424_v30 = vcombine.low %v944_v15, %v948_v19  ;;  %v845_v15 = vld [vmem:[%s21700_s2 + $0x168] sm:$0xff] }
  0x85   : > { %4110 = vmatpush1.bf16.msra.mxu0 %v13368_v25  ;;  %v13416_v25 = vcombine.low %v936_v1, %v940_v2  ;;  %v968_v2 = vld [vmem:[%s21700_s2 + $0x540] sm:$0xff] }
  0x86   : > { %4111 = vmatprep.subr.bf16.mxu0 %v13377_v26  ;;  %v13290_v26 = vcombine.low %v809_v3, %v813_v7  ;;  %v972_v3 = vld [vmem:[%s21700_s2 + $0x560] sm:$0xff]  ;;  %v17274_v7 = vpack.c.bf16 %v466_v48, %v459_v46 }
  0x87   : > { %13253 = vmatmul.mubr.msk.bf16.gmra.mrb[56].mxu0 %vm1232_vm1, %v16905_v62  ;;  %v13448_v11 = vcombine.low %v968_v2, %v972_v3 }
  0x88   : > { %13236 = vmatmul.mubr.msk.bf16.gmra.mrb[56].mxu1 %vm1232_vm1, %v16905_v62  ;;  %1794 = vmatprep.mubr.bf16.mxu0 %v21710_v5  ;;  %22034 = vst [vmem:[#allocation5_spill] sm:$0xff] %v17274_v7 }
  0x89   : > { %1601 = vmatprep.mubr.bf16.mxu1 %v21710_v5  ;;  %4112 = vmatpush1.bf16.msra.mxu0 %v13376_v27  ;;  %v445_v27 = vld [vmem:[%s17140_s29 + $0xe8] sm:$0xff] }
  0x8a   : > { %4113 = vmatprep.subr.bf16.mxu0 %v13385_v28  ;;  %v452_v28 = vld [vmem:[%s17140_s29 + $0x120] sm:$0xff] }
  0x8b   : > { %v17237_v13 = vpack.c.bf16 %v452_v28, %v445_v27  ;;  %v849_v27 = vld [vmem:[%s21700_s2 + $0x188] sm:$0xff] }
  0x8c   : > { %v853_v28 = vld [vmem:[%s21700_s2 + $0x1a8] sm:$0xff] }
  0x8d   : > { %4114 = vmatpush1.bf16.msra.mxu0 %v13384_v31  ;;  %22032 = vst [vmem:[#allocation3_spill] sm:$0xff] %v17237_v13  ;;  %v13298_v31 = vcombine.low %v817_v22, %v821_v23  ;;  %v13330_v46 = vcombine.low %v849_v27, %v853_v28 }
  0x8e   : > { %4115 = vmatprep.subr.bf16.mxu0 %v13393_v36 }
  0x8f   : > { %13254 = vmatmul.mubr.msk.bf16.gmra.mrb[60].mxu0 %vm1232_vm1, %v16919_v4 }
  0x90   : > { %13237 = vmatmul.mubr.msk.bf16.gmra.mrb[60].mxu1 %vm1232_vm1, %v16919_v4  ;;  %1804 = vmatprep.mubr.bf16.mxu0 %v21710_v5 }
  0x91   : > { %1611 = vmatprep.mubr.bf16.mxu1 %v21710_v5  ;;  %4116 = vmatpush1.bf16.msra.mxu0 %v13392_v37  ;;  %v960_v37 = vld [vmem:[%s21700_s2 + $0x500] sm:$0xff] }
  0x92   : > { %4117 = vmatprep.subr.bf16.mxu0 %v13401_v40  ;;  %v964_v40 = vld [vmem:[%s21700_s2 + $0x520] sm:$0xff] }
  0x93   : > { %v13441_v58 = vcombine.high %v960_v37, %v964_v40  ;;  %v13440_v19 = vcombine.low %v960_v37, %v964_v40  ;;  %v857_v37 = vld [vmem:[%s21700_s2 + $0x1c8] sm:$0xff] }
  0x94   : > { %v861_v40 = vld [vmem:[%s21700_s2 + $0x1e8] sm:$0xff] }
  0x95   : > { %4118 = vmatpush1.bf16.msra.mxu0 %v13400_v41  ;;  %v451_v41 = vld [vmem:[%s17140_s29 + $0x118] sm:$0xff] }
  0x96   : > { %4280 = vmatprep.subr.bf16.mxu0 %v13409_v42  ;;  %v833_v42 = vld [vmem:[%s21700_s2 + $0x108] sm:$0xff]  ;;  %v17266_v0 = vpack.c.bf16 %v451_v41, %v444_v35 }
  0x97   : > { %13255 = vmatmul.mubr.msk.bf16.gmra.mrb[64].mxu0 %vm1232_vm1, %v16817_v24  ;;  %v13315_v1 = vcombine.high %v833_v42, %v837_v43 }
  0x98   : > { %13238 = vmatmul.mubr.msk.bf16.gmra.mrb[64].mxu1 %vm1232_vm1, %v16817_v24  ;;  %1814 = vmatprep.mubr.bf16.mxu0 %v21710_v5  ;;  %22033 = vst [vmem:[#allocation4_spill] sm:$0xff] %v17266_v0 }
  0x99   : > { %1621 = vmatprep.mubr.bf16.mxu1 %v21710_v5 }
  0x9f   : > { %13256 = vmatmul.mubr.msk.bf16.gmra.mrb[68].mxu0 %vm1232_vm1, %v16837_v33 }
  0xa0   : > { %13239 = vmatmul.mubr.msk.bf16.gmra.mrb[68].mxu1 %vm1232_vm1, %v16837_v33  ;;  %1824 = vmatprep.mubr.bf16.mxu0 %v21710_v5 }
  0xa1   : > { %1631 = vmatprep.mubr.bf16.mxu1 %v21710_v5 }
  0xa7   : > { %13257 = vmatmul.mubr.msk.bf16.gmra.mrb[72].mxu0 %vm1232_vm1, %v16851_v39 }
  0xa8   : > { %13240 = vmatmul.mubr.msk.bf16.gmra.mrb[72].mxu1 %vm1232_vm1, %v16851_v39  ;;  %1834 = vmatprep.mubr.bf16.mxu0 %v21710_v5 }
  0xa9   : > { %1641 = vmatprep.mubr.bf16.mxu1 %v21710_v5 }
  0xaf   : > { %13258 = vmatmul.mubr.msk.bf16.gmra.mrb[76].mxu0 %vm1232_vm1, %v16865_v45 }
  0xb0   : > { %13241 = vmatmul.mubr.msk.bf16.gmra.mrb[76].mxu1 %vm1232_vm1, %v16865_v45  ;;  %1844 = vmatprep.mubr.bf16.mxu0 %v21710_v5 }
  0xb1   : > { %1651 = vmatprep.mubr.bf16.mxu1 %v21710_v5 }
  0xb7   : > { %13259 = vmatmul.mubr.msk.bf16.gmra.mrb[80].mxu0 %vm1232_vm1, %v16879_v51 }
  0xb8   : > { %13242 = vmatmul.mubr.msk.bf16.gmra.mrb[80].mxu1 %vm1232_vm1, %v16879_v51  ;;  %1854 = vmatprep.mubr.bf16.mxu0 %v21710_v5 }
  0xb9   : > { %1661 = vmatprep.mubr.bf16.mxu1 %v21710_v5 }
  0xbf   : > { %13260 = vmatmul.mubr.msk.bf16.gmra.mrb[84].mxu0 %vm1232_vm1, %v16893_v57 }
  0xc0   : > { %13243 = vmatmul.mubr.msk.bf16.gmra.mrb[84].mxu1 %vm1232_vm1, %v16893_v57  ;;  %1864 = vmatprep.mubr.bf16.mxu0 %v21710_v5 }
  0xc1   : > { %1671 = vmatprep.mubr.bf16.mxu1 %v21710_v5 }
  0xc7   : > { %13261 = vmatmul.mubr.msk.bf16.gmra.mrb[88].mxu0 %vm1232_vm1, %v16907_v63 }
  0xc8   : > { %13244 = vmatmul.mubr.msk.bf16.gmra.mrb[88].mxu1 %vm1232_vm1, %v16907_v63  ;;  %1874 = vmatprep.mubr.bf16.mxu0 %v21710_v5 }
  0xc9   : > { %1681 = vmatprep.mubr.bf16.mxu1 %v21710_v5 }
  0xcf   : > { %13262 = vmatmul.mubr.msk.bf16.gmra.mrb[92].mxu0 %vm1232_vm1, %v16921_v6 }
  0xd0   : > { %13245 = vmatmul.mubr.msk.bf16.gmra.mrb[92].mxu1 %vm1232_vm1, %v16921_v6  ;;  %4119 = vmatprep.mubr.bf16.mxu0 %v17150_v47 }
  0xd1   : > { %1917 = vmatprep.mubr.bf16.mxu1 %v21710_v5 }
  0xd7   : > { %4120 = vmatmul.mubr.bf16.vlgmr.msra.gmra.mrb[0].mxu0 %v17185_v61 }
  0xd8   : > { %13264 = vmatmul.mubr.msk.bf16.vlgmr.msra.gmra.mrb[96].mxu1 %vm1232_vm1, %v16813_v21  ;;  %4281 = vmatpush1.bf16.msra.mxu0 %v13408_v18  ;;  %v13299_v21 = vcombine.high %v817_v22, %v821_v23  ;;  %v825_v18 = vld [vmem:[%s21700_s2 + $0xc8] sm:$0xff]  ;;  %v13449_v22 = vcombine.high %v968_v2, %v972_v3  ;;  %v458_v23 = vld [vmem:[%s17140_s29 + $0x150] sm:$0xff]  ;;  %v479_v2 = vld [vmem:[%s17140_s29 + $0x1f8] sm:$0xff] }
  0xd9   : > { %4860 = vmatpush1.bf16.msra.mxu1 %v13282_v14  ;;  %1927 = vmatprep.mubr.bf16.mxu1 %v21710_v5  ;;  %v829_v14 = vld [vmem:[%s21700_s2 + $0xe8] sm:$0xff] }
  0xda   : > { %4129 = vmatprep.mubr.bf16.mxu0 %v17200_v8  ;;  %4282 = vmatprep.subr.bf16.mxu0 %v13417_v10  ;;  %v13307_v36 = vcombine.high %v825_v18, %v829_v14  ;;  %v841_v10 = vld [vmem:[%s21700_s2 + $0x148] sm:$0xff] }
  0xdb   : > { %4861 = vmatprep.subr.bf16.mxu1 %v13291_v20  ;;  %v13314_v20 = vcombine.low %v833_v42, %v837_v43  ;;  %v13456_v42 = vcombine.low %v976_v16, %v980_v17  ;;  %v865_v3 = vld [vmem:[%s21700_s2 + $0x208] sm:$0xff]  ;;  %v1000_v17 = vld [vmem:[%s21700_s2 + $0x640] sm:$0xff] }
  0xdc   : > { %4283 = vmatpush1.bf16.msra.mxu0 %v13416_v25  ;;  %v13323_v25 = vcombine.high %v841_v10, %v845_v15 }
  0xdd   : > { %4862 = vmatpush1.bf16.msra.mxu1 %v13290_v26  ;;  %4284 = vmatprep.subr.bf16.mxu0 %v13425_v29  ;;  %v465_v26 = vld [vmem:[%s17140_s29 + $0x188] sm:$0xff] }
  0xde   : > { %4863 = vmatprep.subr.bf16.mxu1 %v13299_v21  ;;  %v473_v29 = vld [vmem:[%s17140_s29 + $0x1c8] sm:$0xff]  ;;  %v480_v21 = vld [vmem:[%s17140_s29 + $0x200] sm:$0xff] }
  0xdf   : > { %4130 = vmatmul.mubr.bf16.gmra.mrb[4].mxu0 %v17229_v9 }
  0xe0   : > { %13265 = vmatmul.mubr.msk.bf16.gmra.mrb[100].mxu1 %vm1232_vm1, %v16835_v32  ;;  %4139 = vmatprep.mubr.bf16.mxu0 %v17237_v13  ;;  %v13306_v32 = vcombine.low %v825_v18, %v829_v14  ;;  %v17305_v14 = vpack.c.bf16 %v465_v26, %v458_v23  ;;  %v1004_v26 = vld [vmem:[%s21700_s2 + $0x660] sm:$0xff] }
  0xe1   : > { %1937 = vmatprep.mubr.bf16.mxu1 %v21710_v5  ;;  %4285 = vmatpush1.bf16.msra.mxu0 %v13424_v30  ;;  %v13331_v30 = vcombine.high %v849_v27, %v853_v28 }
  0xe2   : > { %4864 = vmatpush1.bf16.msra.mxu1 %v13298_v31  ;;  %4286 = vmatprep.subr.bf16.mxu0 %v13433_v34  ;;  %22036 = vst [vmem:[#allocation7_spill] sm:$0xff] %v17305_v14  ;;  %v984_v31 = vld [vmem:[%s21700_s2 + $0x5c0] sm:$0xff] }
  0xe3   : > { %4865 = vmatprep.subr.bf16.mxu1 %v13307_v36  ;;  %v988_v34 = vld [vmem:[%s21700_s2 + $0x5e0] sm:$0xff]  ;;  %v17315_v36 = vpack.c.bf16 %v480_v21, %v473_v29  ;;  %v873_v29 = vld [vmem:[%s21700_s2 + $0x248] sm:$0xff] }
  0xe4   : > { %v13465_v48 = vcombine.high %v984_v31, %v988_v34  ;;  %v877_v21 = vld [vmem:[%s21700_s2 + $0x268] sm:$0xff] }
  0xe5   : > { %4287 = vmatpush1.bf16.msra.mxu0 %v13432_v49  ;;  %22038 = vst [vmem:[#allocation9_spill] sm:$0xff] %v17315_v36  ;;  %v472_v49 = vld [vmem:[%s17140_s29 + $0x1c0] sm:$0xff] }
  0xe6   : > { %4866 = vmatpush1.bf16.msra.mxu1 %v13306_v32  ;;  %4288 = vmatprep.subr.bf16.mxu0 %v13441_v58  ;;  %v13339_v32 = vcombine.high %v857_v37, %v861_v40  ;;  %v992_v58 = vld [vmem:[%s21700_s2 + $0x600] sm:$0xff] }
  0xe7   : > { %4140 = vmatmul.mubr.bf16.gmra.mrb[8].mxu0 %v17266_v0  ;;  %4867 = vmatprep.subr.bf16.mxu1 %v13315_v1  ;;  %v996_v1 = vld [vmem:[%s21700_s2 + $0x620] sm:$0xff] }
  0xe8   : > { %13266 = vmatmul.mubr.msk.bf16.gmra.mrb[104].mxu1 %vm1232_vm1, %v16849_v38  ;;  %4149 = vmatprep.mubr.bf16.mxu0 %v17274_v7  ;;  %v13322_v38 = vcombine.low %v841_v10, %v845_v15  ;;  %v869_v10 = vld [vmem:[%s21700_s2 + $0x228] sm:$0xff]  ;;  %v487_v15 = vld [vmem:[%s17140_s29 + $0x238] sm:$0xff] }
  0xe9   : > { %1947 = vmatprep.mubr.bf16.mxu1 %v21710_v5  ;;  %4289 = vmatpush1.bf16.msra.mxu0 %v13440_v19  ;;  %v494_v19 = vld [vmem:[%s17140_s29 + $0x270] sm:$0xff]  ;;  %v13347_v16 = vcombine.high %v865_v3, %v869_v10 }
  0xea   : > { %4868 = vmatpush1.bf16.msra.mxu1 %v13314_v20  ;;  %4290 = vmatprep.subr.bf16.mxu0 %v13449_v22  ;;  %v13464_v20 = vcombine.low %v984_v31, %v988_v34  ;;  %v13473_v22 = vcombine.high %v992_v58, %v996_v1  ;;  %v17360_v28 = vpack.c.bf16 %v494_v19, %v487_v15  ;;  %v486_v34 = vld [vmem:[%s17140_s29 + $0x230] sm:$0xff]  ;;  %v1016_v19 = vld [vmem:[%s21700_s2 + $0x6c0] sm:$0xff] }
  0xeb   : > { %v17303_v18 = vpop.f32.mrb[0].mxu1  ;;  %4869 = vmatprep.subr.bf16.mxu1 %v13323_v25  ;;  %v17350_v25 = vpack.c.bf16 %v479_v2, %v472_v49  ;;  %v13481_v31 = vcombine.high %v1000_v17, %v1004_v26  ;;  %v885_v49 = vld [vmem:[%s21700_s2 + $0x2a8] sm:$0xff] }
  0xec   : > { %22035 = vst [vmem:[#allocation6_spill] sm:$0xff] %v17303_v18  ;;  %v17313_v35 = vpop.f32.mrb[1].mxu1  ;;  %22044 = vst [vmem:[#allocation15_spill] sm:$0xff] %v17360_v28  ;;  %v1096_v18 = vld [vmem:[%s21700_s2 + $0x940] sm:$0xff] }
  0xed   : > { %22037 = vst [vmem:[#allocation8_spill] sm:$0xff] %v17313_v35  ;;  %v17323_v41 = vpop.f32.mrb[2].mxu1  ;;  %4291 = vmatpush1.bf16.msra.mxu0 %v13448_v11  ;;  %22042 = vst [vmem:[#allocation13_spill] sm:$0xff] %v17350_v25 }
  0xee   : > { %22039 = vst [vmem:[#allocation10_spill] sm:$0xff] %v17323_v41  ;;  %v17325_v43 = vpop.f32.mrb[3].mxu1  ;;  %4870 = vmatpush1.bf16.msra.mxu1 %v13322_v38  ;;  %4292 = vmatprep.subr.bf16.mxu0 %v13457_v12  ;;  %v13472_v38 = vcombine.low %v992_v58, %v996_v1  ;;  %v508_v58 = vld [vmem:[%s17140_s29 + $0x2e0] sm:$0xff]  ;;  %v13480_v1 = vcombine.low %v1000_v17, %v1004_v26  ;;  %v893_v17 = vld [vmem:[%s21700_s2 + $0x2e8] sm:$0xff]  ;;  %v454_v41 = vld [vmem:[%s17140_s29 + $0x130] sm:$0xff] }
  0xef   : > { %22040 = vst [vmem:[#allocation11_spill] sm:$0xff] %v17325_v43  ;;  %4150 = vmatmul.mubr.bf16.gmra.mrb[12].mxu0 %v17305_v14  ;;  %4871 = vmatprep.subr.bf16.mxu1 %v13331_v30  ;;  %v13346_v30 = vcombine.low %v865_v3, %v869_v10  ;;  %v447_v43 = vld [vmem:[%s17140_s29 + $0xf8] sm:$0xff] }
  0xf0   : > { %13267 = vmatmul.mubr.msk.bf16.gmra.mrb[108].mxu1 %vm1232_vm1, %v16863_v44  ;;  %4159 = vmatprep.mubr.bf16.mxu0 %v17315_v36  ;;  %v13338_v44 = vcombine.low %v857_v37, %v861_v40  ;;  %v13355_v37 = vcombine.high %v873_v29, %v877_v21  ;;  %v1008_v40 = vld [vmem:[%s21700_s2 + $0x680] sm:$0xff] }
  0xf1   : > { %1957 = vmatprep.mubr.bf16.mxu1 %v21710_v5  ;;  %4293 = vmatpush1.bf16.msra.mxu0 %v13456_v42  ;;  %v1012_v42 = vld [vmem:[%s21700_s2 + $0x6a0] sm:$0xff] }
  0xf2   : > { %4872 = vmatpush1.bf16.msra.mxu1 %v13330_v46  ;;  %4294 = vmatprep.subr.bf16.mxu0 %v13465_v48  ;;  %v493_v46 = vld [vmem:[%s17140_s29 + $0x268] sm:$0xff]  ;;  %v13489_v2 = vcombine.high %v1008_v40, %v1012_v42 }
  0xf3   : > { %v17348_v23 = vpop.f32.mrb[4].mxu1  ;;  %4873 = vmatprep.subr.bf16.mxu1 %v13339_v32  ;;  %v881_v48 = vld [vmem:[%s21700_s2 + $0x288] sm:$0xff]  ;;  %v17395_v10 = vpack.c.bf16 %v493_v46, %v486_v34 }
  0xf4   : > { %22041 = vst [vmem:[#allocation12_spill] sm:$0xff] %v17348_v23  ;;  %v17358_v27 = vpop.f32.mrb[5].mxu1  ;;  %v501_v32 = vld [vmem:[%s17140_s29 + $0x2a8] sm:$0xff]  ;;  %v13363_v15 = vcombine.high %v881_v48, %v885_v49 }
  0xf5   : > { %22043 = vst [vmem:[#allocation14_spill] sm:$0xff] %v17358_v27  ;;  %v17368_v11 = vpop.f32.mrb[6].mxu1  ;;  %4295 = vmatpush1.bf16.msra.mxu0 %v13464_v20  ;;  %22048 = vst [vmem:[#allocation19_spill] sm:$0xff] %v17395_v10  ;;  %v1020_v20 = vld [vmem:[%s21700_s2 + $0x6e0] sm:$0xff]  ;;  %v897_v46 = vld [vmem:[%s21700_s2 + $0x308] sm:$0xff]  ;;  %v22092_v27 = vcombine.low %v17173_v54, %v17178_v55 }
  0xf6   : > { %22045 = vst [vmem:[#allocation16_spill] sm:$0xff] %v17368_v11  ;;  %v17370_v12 = vpop.f32.mrb[7].mxu1  ;;  %4874 = vmatpush1.bf16.msra.mxu1 %v13338_v44  ;;  %4296 = vmatprep.subr.bf16.mxu0 %v13473_v22  ;;  %v17405_v22 = vpack.c.bf16 %v508_v58, %v501_v32  ;;  %v522_v32 = vld [vmem:[%s17140_s29 + $0x350] sm:$0xff]  ;;  %v13496_v58 = vcombine.low %v1016_v19, %v1020_v20  ;;  %v439_v11 = vld [vmem:[%s17140_s29 + $0xb8] sm:$0xff] }
  0xf7   : > { %22046 = vst [vmem:[#allocation17_spill] sm:$0xff] %v17370_v12  ;;  %4160 = vmatmul.mubr.bf16.gmra.mrb[16].mxu0 %v17350_v25  ;;  %4875 = vmatprep.subr.bf16.mxu1 %v13347_v16  ;;  %v889_v16 = vld [vmem:[%s21700_s2 + $0x2c8] sm:$0xff]  ;;  %v432_v12 = vld [vmem:[%s17140_s29 + $0x80] sm:$0xff] }
  0xf8   : > { %13268 = vmatmul.mubr.msk.bf16.gmra.mrb[112].mxu1 %vm1232_vm1, %v16877_v50  ;;  %4169 = vmatprep.mubr.bf16.mxu0 %v17360_v28  ;;  %v13354_v50 = vcombine.low %v873_v29, %v877_v21  ;;  %22050 = vst [vmem:[#allocation21_spill] sm:$0xff] %v17405_v22  ;;  %v13488_v29 = vcombine.low %v1008_v40, %v1012_v42  ;;  %v1028_v40 = vld [vmem:[%s21700_s2 + $0x720] sm:$0xff]  ;;  %v507_v42 = vld [vmem:[%s17140_s29 + $0x2d8] sm:$0xff] }
  0xf9   : > { %1967 = vmatprep.mubr.bf16.mxu1 %v21710_v5  ;;  %4297 = vmatpush1.bf16.msra.mxu0 %v13472_v38  ;;  %v13362_v38 = vcombine.low %v881_v48, %v885_v49  ;;  %v13371_v34 = vcombine.high %v889_v16, %v893_v17  ;;  %v901_v48 = vld [vmem:[%s21700_s2 + $0x328] sm:$0xff]  ;;  %v515_v49 = vld [vmem:[%s17140_s29 + $0x318] sm:$0xff] }
  0xfa   : > { %4876 = vmatpush1.bf16.msra.mxu1 %v13346_v30  ;;  %4298 = vmatprep.subr.bf16.mxu0 %v13481_v31  ;;  %v13497_v30 = vcombine.high %v1016_v19, %v1020_v20  ;;  %v500_v31 = vld [vmem:[%s17140_s29 + $0x2a0] sm:$0xff]  ;;  %v17450_v20 = vpack.c.bf16 %v522_v32, %v515_v49  ;;  %v514_v49 = vld [vmem:[%s17140_s29 + $0x310] sm:$0xff] }
  0xfb   : > { %v17393_v3 = vpop.f32.mrb[8].mxu1  ;;  %4877 = vmatprep.subr.bf16.mxu1 %v13355_v37  ;;  %v1024_v37 = vld [vmem:[%s21700_s2 + $0x700] sm:$0xff] }
  0xfc   : > { %22047 = vst [vmem:[#allocation18_spill] sm:$0xff] %v17393_v3  ;;  %v17403_v44 = vpop.f32.mrb[9].mxu1  ;;  %22055 = vst [vmem:[#allocation26_spill] sm:$0xff] %v17450_v20 }
  0xfd   : > { %22049 = vst [vmem:[#allocation20_spill] sm:$0xff] %v17403_v44  ;;  %v17413_v26 = vpop.f32.mrb[10].mxu1  ;;  %4299 = vmatpush1.bf16.msra.mxu0 %v13480_v1  ;;  %v13505_v1 = vcombine.high %v1024_v37, %v1028_v40  ;;  %v945_v44 = vld [vmem:[%s21700_s2 + $0x488] sm:$0xff] }
  0xfe   : > { %22051 = vst [vmem:[#allocation22_spill] sm:$0xff] %v17413_v26  ;;  %v17415_v21 = vpop.f32.mrb[11].mxu1  ;;  %4878 = vmatpush1.bf16.msra.mxu1 %v13354_v50  ;;  %4300 = vmatprep.subr.bf16.mxu0 %v13489_v2  ;;  %v17440_v2 = vpack.c.bf16 %v507_v42, %v500_v31 }
  0xff   : > { %22052 = vst [vmem:[#allocation23_spill] sm:$0xff] %v17415_v21  ;;  %4170 = vmatmul.mubr.bf16.gmra.mrb[20].mxu0 %v17395_v10  ;;  %4879 = vmatprep.subr.bf16.mxu1 %v13363_v15  ;;  %v13379_v15 = vcombine.high %v897_v46, %v901_v48  ;;  %v1076_v21 = vld [vmem:[%s21700_s2 + $0x8a0] sm:$0xff] }
 0x100   : > { %13269 = vmatmul.mubr.msk.bf16.gmra.mrb[116].mxu1 %vm1232_vm1, %v16891_v56  ;;  %4179 = vmatprep.mubr.bf16.mxu0 %v17405_v22  ;;  %v13370_v56 = vcombine.low %v889_v16, %v893_v17  ;;  %v905_v16 = vld [vmem:[%s21700_s2 + $0x348] sm:$0xff] }
 0x101   : > { %1977 = vmatprep.mubr.bf16.mxu1 %v21710_v5  ;;  %4301 = vmatpush1.bf16.msra.mxu0 %v13488_v29  ;;  %v1036_v29 = vld [vmem:[%s21700_s2 + $0x760] sm:$0xff]  ;;  %v909_v17 = vld [vmem:[%s21700_s2 + $0x368] sm:$0xff] }
 0x102   : > { %4880 = vmatpush1.bf16.msra.mxu1 %v13362_v38  ;;  %4302 = vmatprep.subr.bf16.mxu0 %v13497_v30  ;;  %v13504_v30 = vcombine.low %v1024_v37, %v1028_v40  ;;  %v13513_v42 = vcombine.high %v1032_v60, %v1036_v29  ;;  %v13387_v32 = vcombine.high %v905_v16, %v909_v17  ;;  %v1044_v37 = vld [vmem:[%s21700_s2 + $0x7a0] sm:$0xff]  ;;  %v521_v40 = vld [vmem:[%s17140_s29 + $0x348] sm:$0xff] }
 0x103   : > { %v17438_v50 = vpop.f32.mrb[12].mxu1  ;;  %4881 = vmatprep.subr.bf16.mxu1 %v13371_v34  ;;  %v13378_v34 = vcombine.low %v897_v46, %v901_v48  ;;  %v913_v46 = vld [vmem:[%s21700_s2 + $0x388] sm:$0xff] }
 0x104   : > { %22053 = vst [vmem:[#allocation24_spill] sm:$0xff] %v17438_v50  ;;  %v17448_v19 = vpop.f32.mrb[13].mxu1  ;;  %v917_v48 = vld [vmem:[%s21700_s2 + $0x3a8] sm:$0xff]  ;;  %v1048_v50 = vld [vmem:[%s21700_s2 + $0x7c0] sm:$0xff] }
 0x105   : > { %22054 = vst [vmem:[#allocation25_spill] sm:$0xff] %v17448_v19  ;;  %v17458_v38 = vpop.f32.mrb[14].mxu1  ;;  %4303 = vmatpush1.bf16.msra.mxu0 %v13496_v58  ;;  %v529_v58 = vld [vmem:[%s17140_s29 + $0x388] sm:$0xff]  ;;  %v13395_v19 = vcombine.high %v913_v46, %v917_v48 }
 0x106   : > { %22056 = vst [vmem:[#allocation27_spill] sm:$0xff] %v17458_v38  ;;  %v17460_v31 = vpop.f32.mrb[15].mxu1  ;;  %4882 = vmatpush1.bf16.msra.mxu1 %v13370_v56  ;;  %4304 = vmatprep.subr.bf16.mxu0 %v13505_v1  ;;  %v536_v56 = vld [vmem:[%s17140_s29 + $0x3c0] sm:$0xff]  ;;  %v13512_v1 = vcombine.low %v1032_v60, %v1036_v29  ;;  %v17485_v38 = vpack.c.bf16 %v521_v40, %v514_v49  ;;  %v921_v29 = vld [vmem:[%s21700_s2 + $0x3c8] sm:$0xff] }
 0x107   : > { %22057 = vst [vmem:[#allocation28_spill] sm:$0xff] %v17460_v31  ;;  %4180 = vmatmul.mubr.bf16.gmra.mrb[24].mxu0 %v17440_v2  ;;  %4883 = vmatprep.subr.bf16.mxu1 %v13379_v15  ;;  %v13521_v15 = vcombine.high %v1040_v59, %v1044_v37  ;;  %v17495_v60 = vpack.c.bf16 %v536_v56, %v529_v58  ;;  %v528_v58 = vld [vmem:[%s17140_s29 + $0x380] sm:$0xff]  ;;  %v535_v56 = vld [vmem:[%s17140_s29 + $0x3b8] sm:$0xff] }
 0x108   : > { %13270 = vmatmul.mubr.msk.bf16.gmra.mrb[120].mxu1 %vm1232_vm1, %v16905_v62  ;;  %4189 = vmatprep.mubr.bf16.mxu0 %v17450_v20  ;;  %v13386_v62 = vcombine.low %v905_v16, %v909_v17  ;;  %v925_v16 = vld [vmem:[%s21700_s2 + $0x3e8] sm:$0xff]  ;;  %v13394_v49 = vcombine.low %v913_v46, %v917_v48 }
 0x109   : > { %1987 = vmatprep.mubr.bf16.mxu1 %v21710_v5  ;;  %4305 = vmatpush1.bf16.msra.mxu0 %v13504_v30  ;;  %v1052_v5 = vld [vmem:[%s21700_s2 + $0x7e0] sm:$0xff]  ;;  %v13403_v40 = vcombine.high %v921_v29, %v925_v16  ;;  %v13402_v46 = vcombine.low %v921_v29, %v925_v16  ;;  %v542_v16 = vld [vmem:[%s17140_s29 + $0x3f0] sm:$0xff] }
 0x10a   : > { %4884 = vmatpush1.bf16.msra.mxu1 %v13378_v34  ;;  %4306 = vmatprep.subr.bf16.mxu0 %v13513_v42  ;;  %v13520_v34 = vcombine.low %v1040_v59, %v1044_v37  ;;  %v543_v59 = vld [vmem:[%s17140_s29 + $0x3f8] sm:$0xff]  ;;  %v550_v37 = vld [vmem:[%s17140_s29 + $0x430] sm:$0xff] }
 0x10b   : > { %v17483_v31 = vpop.f32.mrb[16].mxu1  ;;  %4885 = vmatprep.subr.bf16.mxu1 %v13387_v32  ;;  %v13529_v32 = vcombine.high %v1048_v50, %v1052_v5 }
 0x10c   : > { %22058 = vst [vmem:[#allocation29_spill] sm:$0xff] %v17483_v31  ;;  %v17493_v30 = vpop.f32.mrb[17].mxu1  ;;  %v937_v31 = vld [vmem:[%s21700_s2 + $0x448] sm:$0xff] }
 0x10d   : > { %22059 = vst [vmem:[#allocation30_spill] sm:$0xff] %v17493_v30  ;;  %v17503_v17 = vpop.f32.mrb[18].mxu1  ;;  %4307 = vmatpush1.bf16.msra.mxu0 %v13512_v1  ;;  %v22062_v1 = vmov 0   ;;  %v1068_v30 = vld [vmem:[%s21700_s2 + $0x860] sm:$0xff] }
 0x10e   : > { %22060 = vst [vmem:[#allocation31_spill] sm:$0xff] %v17503_v17  ;;  %v17505_v42 = vpop.f32.mrb[19].mxu1  ;;  %4886 = vmatpush1.bf16.msra.mxu1 %v13386_v62  ;;  %4308 = vmatprep.subr.bf16.mxu0 %v13521_v15  ;;  %v13528_v62 = vcombine.low %v1048_v50, %v1052_v5  ;;  %v13411_v15 = vcombine.high %v17173_v54, %v17178_v55  ;;  %v1064_v17 = vld [vmem:[%s21700_s2 + $0x840] sm:$0xff] }
 0x10f   : > { %22061 = vst [vmem:[#allocation32_spill] sm:$0xff] %v17505_v42  ;;  %4190 = vmatmul.mubr.bf16.gmra.mrb[28].mxu0 %v17485_v38  ;;  %4887 = vmatprep.subr.bf16.mxu1 %v13395_v19  ;;  %v13537_v19 = vcombine.high %v17162_v52, %v17168_v53  ;;  %v17526_v5 = vpack.c.bf16 %v550_v37, %v543_v59  ;;  %v1084_v54 = vld [vmem:[%s21700_s2 + $0x8e0] sm:$0xff] }
 0x110   : > { %13271 = vmatmul.mubr.msk.bf16.gmra.mrb[124].mxu1 %vm1232_vm1, %v16919_v4  ;;  %4199 = vmatprep.mubr.bf16.mxu0 %v17495_v60  ;;  %v17520_v4 = vpack.c.bf16 %v535_v56, %v528_v58  ;;  %v13544_v3 = vcombine.low %v1064_v17, %v1068_v30  ;;  %v17722_v55 = vpack.c.bf16 %v454_v41, %v447_v43  ;;  %v446_v41 = vld [vmem:[%s17140_s29 + $0xf0] sm:$0xff] }
 0x111   : > { %1997 = vmatprep.mubr.bf16.mxu1 %v22062_v1  ;;  %4309 = vmatpush1.bf16.msra.mxu0 %v13520_v34  ;;  %22065 = vst [vmem:[#allocation35_spill] sm:$0xff] %v17526_v5 }
 0x112   : > { %4888 = vmatpush1.bf16.msra.mxu1 %v13394_v49  ;;  %4310 = vmatprep.subr.bf16.mxu0 %v13529_v32  ;;  %v549_v49 = vld [vmem:[%s17140_s29 + $0x428] sm:$0xff] }
 0x113   : > { %v17518_v48 = vpop.f32.mrb[20].mxu1  ;;  %4889 = vmatprep.subr.bf16.mxu1 %v13403_v40  ;;  %v557_v32 = vld [vmem:[%s17140_s29 + $0x468] sm:$0xff]  ;;  %v564_v40 = vld [vmem:[%s17140_s29 + $0x4a0] sm:$0xff]  ;;  %v17543_v56 = vpack.c.bf16 %v549_v49, %v542_v16  ;;  %v578_v16 = vld [vmem:[%s17140_s29 + $0x510] sm:$0xff] }
 0x114   : > { %22063 = vst [vmem:[#allocation33_spill] sm:$0xff] %v17518_v48  ;;  %v17524_v34 = vpop.f32.mrb[21].mxu1  ;;  %v17547_v37 = vpack.c.bf16 %v564_v40, %v557_v32  ;;  %v941_v48 = vld [vmem:[%s21700_s2 + $0x468] sm:$0xff] }
 0x115   : > { %22064 = vst [vmem:[#allocation34_spill] sm:$0xff] %v17524_v34  ;;  %v17528_v50 = vpop.f32.mrb[22].mxu1  ;;  %4311 = vmatpush1.bf16.msra.mxu0 %v13528_v62  ;;  %22069 = vst [vmem:[#allocation39_spill] sm:$0xff] %v17543_v56  ;;  %v1072_v34 = vld [vmem:[%s21700_s2 + $0x880] sm:$0xff]  ;;  %v13419_v26 = vcombine.high %v937_v31, %v941_v48  ;;  %v13418_v23 = vcombine.low %v937_v31, %v941_v48 }
 0x116   : > { %22066 = vst [vmem:[#allocation36_spill] sm:$0xff] %v17528_v50  ;;  %v17530_v29 = vpop.f32.mrb[23].mxu1  ;;  %4890 = vmatpush1.bf16.msra.mxu1 %v13402_v46  ;;  %4473 = vmatprep.subr.bf16.mxu0 %v13537_v19  ;;  %22071 = vst [vmem:[#allocation41_spill] sm:$0xff] %v17547_v37  ;;  %v556_v46 = vld [vmem:[%s17140_s29 + $0x460] sm:$0xff]  ;;  %v563_v19 = vld [vmem:[%s17140_s29 + $0x498] sm:$0xff]  ;;  %v13553_v35 = vcombine.high %v1072_v34, %v1076_v21 }
 0x117   : > { %22067 = vst [vmem:[#allocation37_spill] sm:$0xff] %v17530_v29  ;;  %4200 = vmatmul.mubr.bf16.gmra.mrb[96].mxu0 %v17520_v4  ;;  %5052 = vmatprep.subr.bf16.mxu1 %v13411_v15  ;;  %v571_v15 = vld [vmem:[%s17140_s29 + $0x4d8] sm:$0xff]  ;;  %v17564_v32 = vpack.c.bf16 %v563_v19, %v556_v46  ;;  %v570_v46 = vld [vmem:[%s17140_s29 + $0x4d0] sm:$0xff]  ;;  %v577_v19 = vld [vmem:[%s17140_s29 + $0x508] sm:$0xff] }
 0x118   : > { %13272 = vmatmul.mubr.msk.bf16.gmra.mrb[128].mxu1 %vm1232_vm1, %v16817_v24  ;;  %4209 = vmatprep.mubr.bf16.mxu0 %v17526_v5  ;;  %v634_v29 = vld [vmem:[%s17140_s29 + $0x6d0] sm:$0xff]  ;;  %v468_v48 = vld [vmem:[%s17140_s29 + $0x1a0] sm:$0xff] }
 0x119   : > { %2007 = vmatprep.mubr.bf16.mxu1 %v22062_v1  ;;  %22075 = vst [vmem:[#allocation45_spill] sm:$0xff] %v17564_v32  ;;  %v426_v50 = vld [vmem:[%s17140_s29 + $0x50] sm:$0xff] }
 0x11b   : > { %v17541_v58 = vpop.f32.mrb[24].mxu1 }
 0x11c   : > { %22068 = vst [vmem:[#allocation38_spill] sm:$0xff] %v17541_v58  ;;  %v17545_v59 = vpop.f32.mrb[25].mxu1  ;;  %v620_v58 = vld [vmem:[%s17140_s29 + $0x660] sm:$0xff] }
 0x11d   : > { %22070 = vst [vmem:[#allocation40_spill] sm:$0xff] %v17545_v59  ;;  %v17549_v24 = vpop.f32.mrb[26].mxu1  ;;  %v606_v59 = vld [vmem:[%s17140_s29 + $0x5f0] sm:$0xff] }
 0x11e   : > { %22072 = vst [vmem:[#allocation42_spill] sm:$0xff] %v17549_v24  ;;  %v17551_v62 = vpop.f32.mrb[27].mxu1 }
 0x11f   : > { %22073 = vst [vmem:[#allocation43_spill] sm:$0xff] %v17551_v62  ;;  %4210 = vmatmul.mubr.bf16.gmra.mrb[100].mxu0 %v17543_v56  ;;  %v17568_v62 = vpack.c.bf16 %v578_v16, %v571_v15  ;;  %v585_v15 = vld [vmem:[%s17140_s29 + $0x548] sm:$0xff]  ;;  %v592_v16 = vld [vmem:[%s17140_s29 + $0x580] sm:$0xff] }
 0x120   : > { %13273 = vmatmul.mubr.msk.bf16.gmra.mrb[132].mxu1 %vm1232_vm1, %v16837_v33  ;;  %4219 = vmatprep.mubr.bf16.mxu0 %v17547_v37 }
 0x121   : > { %2017 = vmatprep.mubr.bf16.mxu1 %v22062_v1  ;;  %22077 = vst [vmem:[#allocation47_spill] sm:$0xff] %v17568_v62 }
 0x123   : > { %v17562_v49 = vpop.f32.mrb[28].mxu1 }
 0x124   : > { %22074 = vst [vmem:[#allocation44_spill] sm:$0xff] %v17562_v49  ;;  %v17566_v40 = vpop.f32.mrb[29].mxu1  ;;  %v599_v49 = vld [vmem:[%s17140_s29 + $0x5b8] sm:$0xff] }
 0x125   : > { %22076 = vst [vmem:[#allocation46_spill] sm:$0xff] %v17566_v40  ;;  %v17570_v33 = vpop.f32.mrb[30].mxu1  ;;  %v591_v40 = vld [vmem:[%s17140_s29 + $0x578] sm:$0xff] }
 0x126   : > { %22078 = vst [vmem:[#allocation48_spill] sm:$0xff] %v17570_v33  ;;  %v17572_v24 = vpop.f32.mrb[31].mxu1  ;;  %v17583_v33 = vpack.c.bf16 %v577_v19, %v570_v46  ;;  %v17598_v19 = vpack.c.bf16 %v606_v59, %v599_v49  ;;  %v619_v49 = vld [vmem:[%s17140_s29 + $0x658] sm:$0xff] }
 0x127   : > { %22079 = vst [vmem:[#allocation49_spill] sm:$0xff] %v17572_v24  ;;  %4220 = vmatmul.mubr.bf16.gmra.mrb[104].mxu0 %v17564_v32  ;;  %v17585_v24 = vpack.c.bf16 %v592_v16, %v585_v15  ;;  %v605_v15 = vld [vmem:[%s17140_s29 + $0x5e8] sm:$0xff] }
 0x128   : > { %13274 = vmatmul.mubr.msk.bf16.gmra.mrb[136].mxu1 %vm1232_vm1, %v16851_v39  ;;  %4229 = vmatprep.mubr.bf16.mxu0 %v17568_v62  ;;  %22080 = vst [vmem:[#allocation50_spill] sm:$0xff] %v17583_v33  ;;  %v584_v39 = vld [vmem:[%s17140_s29 + $0x540] sm:$0xff]  ;;  %22083 = vst [vmem:[#allocation53_spill] sm:$0xff] %v17598_v19  ;;  %v613_v16 = vld [vmem:[%s17140_s29 + $0x628] sm:$0xff] }
 0x129   : > { %2027 = vmatprep.mubr.bf16.mxu1 %v22062_v1  ;;  %22081 = vst [vmem:[#allocation51_spill] sm:$0xff] %v17585_v24  ;;  %v17596_v46 = vpack.c.bf16 %v591_v40, %v584_v39  ;;  %v17611_v59 = vpack.c.bf16 %v620_v58, %v613_v16  ;;  %v627_v39 = vld [vmem:[%s17140_s29 + $0x698] sm:$0xff] }
 0x12a   : > { %v17624_v58 = vpack.c.bf16 %v634_v29, %v627_v39  ;;  %v419_v16 = vld [vmem:[%s17140_s29 + $0x18] sm:$0xff]  ;;  %v425_v29 = vld [vmem:[%s17140_s29 + $0x48] sm:$0xff]  ;;  %v17648_v39 = vld [vmem:[%s21700_s2 + $0xc00] sm:$0xff] }
 0x12b   : > { %22082 = vst [vmem:[#allocation52_spill] sm:$0xff] %v17596_v46  ;;  %22085 = vst [vmem:[#allocation55_spill] sm:$0xff] %v17611_v59 }
 0x12c   : > { %22087 = vst [vmem:[#allocation57_spill] sm:$0xff] %v17624_v58 }
 0x12f   : > { %4230 = vmatmul.mubr.bf16.gmra.mrb[108].mxu0 %v17583_v33 }
 0x130   : > { %13275 = vmatmul.mubr.msk.bf16.gmra.mrb[140].mxu1 %vm1232_vm1, %v16865_v45  ;;  %4239 = vmatprep.mubr.bf16.mxu0 %v17585_v24  ;;  %v598_v45 = vld [vmem:[%s17140_s29 + $0x5b0] sm:$0xff] }
 0x131   : > { %2037 = vmatprep.mubr.bf16.mxu1 %v22062_v1  ;;  %v17609_v40 = vpack.c.bf16 %v605_v15, %v598_v45  ;;  %v633_v15 = vld [vmem:[%s17140_s29 + $0x6c8] sm:$0xff] }
 0x133   : > { %22084 = vst [vmem:[#allocation54_spill] sm:$0xff] %v17609_v40 }
 0x137   : > { %4240 = vmatmul.mubr.bf16.gmra.mrb[112].mxu0 %v17596_v46 }
 0x138   : > { %13276 = vmatmul.mubr.msk.bf16.gmra.mrb[144].mxu1 %vm1232_vm1, %v16879_v51  ;;  %4249 = vmatprep.mubr.bf16.mxu0 %v17598_v19  ;;  %v612_v51 = vld [vmem:[%s17140_s29 + $0x620] sm:$0xff] }
 0x139   : > { %2047 = vmatprep.mubr.bf16.mxu1 %v22062_v1  ;;  %v17622_v45 = vpack.c.bf16 %v619_v49, %v612_v51  ;;  %v17637_v49 = vpack.c.bf16 %v426_v50, %v419_v16  ;;  %v17654_v50 = vld [vmem:[%s21700_s2 + $0xc20] sm:$0xff] }
 0x13a   : > { %v440_v16 = vld [vmem:[%s17140_s29 + $0xc0] sm:$0xff] }
 0x13b   : > { %22086 = vst [vmem:[#allocation56_spill] sm:$0xff] %v17622_v45  ;;  %22089 = vst [vmem:[#allocation59_spill] sm:$0xff] %v17637_v49 }
 0x13f   : > { %4250 = vmatmul.mubr.bf16.gmra.mrb[116].mxu0 %v17609_v40 }
 0x140   : > { %13277 = vmatmul.mubr.msk.bf16.gmra.mrb[148].mxu1 %vm1232_vm1, %v16893_v57  ;;  %4259 = vmatprep.mubr.bf16.mxu0 %v17611_v59  ;;  %v626_v57 = vld [vmem:[%s17140_s29 + $0x690] sm:$0xff] }
 0x141   : > { %2057 = vmatprep.mubr.bf16.mxu1 %v22062_v1  ;;  %v17635_v51 = vpack.c.bf16 %v633_v15, %v626_v57  ;;  %v17664_v57 = vld [vmem:[%s21700_s2 + $0x828] sm:$0xff] }
 0x142   : > { %v433_v15 = vld [vmem:[%s17140_s29 + $0x88] sm:$0xff] }
 0x143   : > { %22088 = vst [vmem:[#allocation58_spill] sm:$0xff] %v17635_v51 }
 0x147   : > { %4260 = vmatmul.mubr.bf16.gmra.mrb[120].mxu0 %v17622_v45 }
 0x148   : > { %13278 = vmatmul.mubr.msk.bf16.gmra.mrb[152].mxu1 %vm1232_vm1, %v16907_v63  ;;  %4269 = vmatprep.mubr.bf16.mxu0 %v17624_v58  ;;  %v418_v63 = vld [vmem:[%s17140_s29 + $0x10] sm:$0xff] }
 0x149   : > { %2067 = vmatprep.mubr.bf16.mxu1 %v22062_v1  ;;  %v17672_v42 = vpack.c.bf16 %v425_v29, %v418_v63  ;;  %v17686_v63 = vpack.c.bf16 %v440_v16, %v433_v15  ;;  %v13545_v29 = vcombine.high %v1064_v17, %v1068_v30  ;;  %v949_v15 = vld [vmem:[%s21700_s2 + $0x4a8] sm:$0xff]  ;;  %v22091_v16 = vcombine.low %v17162_v52, %v17168_v53  ;;  %v1080_v30 = vld [vmem:[%s21700_s2 + $0x8c0] sm:$0xff] }
 0x14a   : > { %v13427_v52 = vcombine.high %v945_v44, %v949_v15  ;;  %v17714_v53 = vpack.c.bf16 %v439_v11, %v432_v12  ;;  %v957_v11 = vld [vmem:[%s21700_s2 + $0x4e8] sm:$0xff]  ;;  %v13552_v12 = vcombine.low %v1072_v34, %v1076_v21  ;;  %v13561_v31 = vcombine.high %v1080_v30, %v1084_v54  ;;  %v1092_v17 = vld [vmem:[%s21700_s2 + $0x920] sm:$0xff] }
 0x14b   : > { %22090 = vst [vmem:[#allocation60_spill] sm:$0xff] %v17672_v42  ;;  %v461_v21 = vld [vmem:[%s17140_s29 + $0x168] sm:$0xff]  ;;  %v13560_v34 = vcombine.low %v1080_v30, %v1084_v54 }
 0x14c   : > { %v969_v30 = vld [vmem:[%s21700_s2 + $0x548] sm:$0xff] }
 0x14d   : > { %v973_v54 = vld [vmem:[%s21700_s2 + $0x568] sm:$0xff] }
 0x14f   : > { %4270 = vmatmul.mubr.bf16.gmra.mrb[124].mxu0 %v17635_v51 }
 0x150   : > { %13279 = vmatmul.mubr.msk.bf16.gmra.mrb[156].mxu1 %vm1232_vm1, %v16921_v6  ;;  %4312 = vmatprep.mubr.bf16.mxu0 %v17637_v49  ;;  %v17659_v6 = vld [vmem:[%s21700_s2 + $0x808] sm:$0xff] }
 0x151   : > { %4891 = vmatprep.mubr.bf16.mxu1 %v17150_v47 }
 0x157   : > { %4313 = vmatmul.mubr.bf16.vlgmr.msra.gmra.mrb[0].mxu0 %v17672_v42 }
 0x158   : > { %4474 = vmatpush1.bf16.msra.mxu0 %v22091_v16  ;;  %4892 = vmatmul.mubr.bf16.vlgmr.msra.gmra.mrb[32].mxu1 %v17185_v61 }
 0x159   : > { %5053 = vmatpush1.bf16.msra.mxu1 %v22092_v27  ;;  %4322 = vmatprep.mubr.bf16.mxu0 %v17686_v63  ;;  %v953_v27 = vld [vmem:[%s21700_s2 + $0x4c8] sm:$0xff] }
 0x15a   : > { %4475 = vmatprep.subr.bf16.mxu0 %v13545_v29  ;;  %4901 = vmatprep.mubr.bf16.mxu1 %v17200_v8  ;;  %v13435_v43 = vcombine.high %v953_v27, %v957_v11  ;;  %v13434_v29 = vcombine.low %v953_v27, %v957_v11 }
 0x15b   : > { %5054 = vmatprep.subr.bf16.mxu1 %v13419_v26  ;;  %v13426_v26 = vcombine.low %v945_v44, %v949_v15  ;;  %v965_v44 = vld [vmem:[%s21700_s2 + $0x528] sm:$0xff] }
 0x15c   : > { %4476 = vmatpush1.bf16.msra.mxu0 %v13544_v3  ;;  %v1088_v3 = vld [vmem:[%s21700_s2 + $0x900] sm:$0xff] }
 0x15d   : > { %5055 = vmatpush1.bf16.msra.mxu1 %v13418_v23  ;;  %4477 = vmatprep.subr.bf16.mxu0 %v13553_v35  ;;  %v453_v35 = vld [vmem:[%s17140_s29 + $0x128] sm:$0xff]  ;;  %v13569_v15 = vcombine.high %v1088_v3, %v1092_v17  ;;  %v13568_v27 = vcombine.low %v1088_v3, %v1092_v17  ;;  %v467_v3 = vld [vmem:[%s17140_s29 + $0x198] sm:$0xff] }
 0x15e   : > { %5056 = vmatprep.subr.bf16.mxu1 %v13427_v52  ;;  %v961_v23 = vld [vmem:[%s21700_s2 + $0x508] sm:$0xff]  ;;  %v17750_v16 = vpack.c.bf16 %v453_v35, %v446_v41  ;;  %v13451_v41 = vcombine.high %v969_v30, %v973_v54  ;;  %v1108_v35 = vld [vmem:[%s21700_s2 + $0x9a0] sm:$0xff] }
 0x15f   : > { %4323 = vmatmul.mubr.bf16.gmra.mrb[4].mxu0 %v17714_v53  ;;  %v13443_v52 = vcombine.high %v961_v23, %v965_v44  ;;  %v13442_v11 = vcombine.low %v961_v23, %v965_v44  ;;  %v977_v17 = vld [vmem:[%s21700_s2 + $0x588] sm:$0xff]  ;;  %v475_v44 = vld [vmem:[%s17140_s29 + $0x1d8] sm:$0xff] }
 0x160   : > { %4902 = vmatmul.mubr.bf16.gmra.mrb[36].mxu1 %v17229_v9  ;;  %4332 = vmatprep.mubr.bf16.mxu0 %v17722_v55  ;;  %22093 = vst [vmem:[#allocation61_spill] sm:$0xff] %v17750_v16  ;;  %v981_v23 = vld [vmem:[%s21700_s2 + $0x5a8] sm:$0xff] }
 0x161   : > { %4911 = vmatprep.mubr.bf16.mxu1 %v17237_v13  ;;  %4478 = vmatpush1.bf16.msra.mxu0 %v13552_v12  ;;  %v1100_v12 = vld [vmem:[%s21700_s2 + $0x960] sm:$0xff]  ;;  %v17758_v13 = vpack.c.bf16 %v468_v48, %v461_v21  ;;  %v482_v21 = vld [vmem:[%s17140_s29 + $0x210] sm:$0xff] }
 0x162   : > { %5057 = vmatpush1.bf16.msra.mxu1 %v13426_v26  ;;  %4479 = vmatprep.subr.bf16.mxu0 %v13561_v31  ;;  %v13577_v26 = vcombine.high %v1096_v18, %v1100_v12  ;;  %v460_v31 = vld [vmem:[%s17140_s29 + $0x160] sm:$0xff]  ;;  %v13576_v48 = vcombine.low %v1096_v18, %v1100_v12  ;;  %v17794_v9 = vpack.c.bf16 %v482_v21, %v475_v44  ;;  %v985_v18 = vld [vmem:[%s21700_s2 + $0x5c8] sm:$0xff] }
 0x163   : > { %5058 = vmatprep.subr.bf16.mxu1 %v13435_v43  ;;  %22094 = vst [vmem:[#allocation62_spill] sm:$0xff] %v17758_v13  ;;  %v1104_v43 = vld [vmem:[%s21700_s2 + $0x980] sm:$0xff]  ;;  %v989_v12 = vld [vmem:[%s21700_s2 + $0x5e8] sm:$0xff] }
 0x164   : > { %22096 = vst [vmem:[#allocation64_spill] sm:$0xff] %v17794_v9  ;;  %v13466_v21 = vcombine.low %v985_v18, %v989_v12 }
 0x165   : > { %4480 = vmatpush1.bf16.msra.mxu0 %v13560_v34  ;;  %v13450_v34 = vcombine.low %v969_v30, %v973_v54  ;;  %v13584_v30 = vcombine.low %v1104_v43, %v1108_v35  ;;  %v13458_v54 = vcombine.low %v977_v17, %v981_v23 }
 0x166   : > { %5059 = vmatpush1.bf16.msra.mxu1 %v13434_v29  ;;  %4481 = vmatprep.subr.bf16.mxu0 %v13569_v15  ;;  %v13585_v29 = vcombine.high %v1104_v43, %v1108_v35  ;;  %v17786_v15 = vpack.c.bf16 %v467_v3, %v460_v31  ;;  %v1120_v31 = vld [vmem:[%s21700_s2 + $0xa00] sm:$0xff]  ;;  %v481_v43 = vld [vmem:[%s17140_s29 + $0x208] sm:$0xff] }
 0x167   : > { %4333 = vmatmul.mubr.bf16.gmra.mrb[8].mxu0 %v17750_v16  ;;  %5060 = vmatprep.subr.bf16.mxu1 %v13443_v52  ;;  %v13459_v52 = vcombine.high %v977_v17, %v981_v23  ;;  %v993_v35 = vld [vmem:[%s21700_s2 + $0x608] sm:$0xff]  ;;  %v496_v23 = vld [vmem:[%s17140_s29 + $0x280] sm:$0xff] }
 0x168   : > { %4912 = vmatmul.mubr.bf16.gmra.mrb[40].mxu1 %v17266_v0  ;;  %4342 = vmatprep.mubr.bf16.mxu0 %v17758_v13  ;;  %22095 = vst [vmem:[#allocation63_spill] sm:$0xff] %v17786_v15  ;;  %v1112_v0 = vld [vmem:[%s21700_s2 + $0x9c0] sm:$0xff]  ;;  %v997_v3 = vld [vmem:[%s21700_s2 + $0x628] sm:$0xff] }
 0x169   : > { %4921 = vmatprep.mubr.bf16.mxu1 %v17274_v7  ;;  %4482 = vmatpush1.bf16.msra.mxu0 %v13568_v27  ;;  %v1116_v7 = vld [vmem:[%s21700_s2 + $0x9e0] sm:$0xff]  ;;  %v489_v17 = vld [vmem:[%s17140_s29 + $0x248] sm:$0xff] }
 0x16a   : > { %5061 = vmatpush1.bf16.msra.mxu1 %v13442_v11  ;;  %4483 = vmatprep.subr.bf16.mxu0 %v13577_v26  ;;  %v13593_v27 = vcombine.high %v1112_v0, %v1116_v7  ;;  %v474_v11 = vld [vmem:[%s17140_s29 + $0x1d0] sm:$0xff]  ;;  %v13467_v26 = vcombine.high %v985_v18, %v989_v12  ;;  %v13592_v44 = vcombine.low %v1112_v0, %v1116_v7  ;;  %v1001_v0 = vld [vmem:[%s21700_s2 + $0x648] sm:$0xff] }
 0x16b   : > { %5062 = vmatprep.subr.bf16.mxu1 %v13451_v41  ;;  %v1124_v41 = vld [vmem:[%s21700_s2 + $0xa20] sm:$0xff]  ;;  %v1005_v7 = vld [vmem:[%s21700_s2 + $0x668] sm:$0xff]  ;;  %v13474_v12 = vcombine.low %v993_v35, %v997_v3 }
 0x16c   : > { %v13600_v18 = vcombine.low %v1120_v31, %v1124_v41 }
 0x16d   : > { %4484 = vmatpush1.bf16.msra.mxu0 %v13576_v48  ;;  %v13601_v48 = vcombine.high %v1120_v31, %v1124_v41  ;;  %v495_v31 = vld [vmem:[%s17140_s29 + $0x278] sm:$0xff]  ;;  %v1009_v41 = vld [vmem:[%s21700_s2 + $0x688] sm:$0xff] }
 0x16e   : > { %5063 = vmatpush1.bf16.msra.mxu1 %v13450_v34  ;;  %4485 = vmatprep.subr.bf16.mxu0 %v13585_v29  ;;  %v17822_v34 = vpack.c.bf16 %v481_v43, %v474_v11  ;;  %v13475_v29 = vcombine.high %v993_v35, %v997_v3  ;;  %v1136_v11 = vld [vmem:[%s21700_s2 + $0xa80] sm:$0xff]  ;;  %v1013_v43 = vld [vmem:[%s21700_s2 + $0x6a8] sm:$0xff]  ;;  %v503_v35 = vld [vmem:[%s17140_s29 + $0x2b8] sm:$0xff] }
 0x16f   : > { %4343 = vmatmul.mubr.bf16.gmra.mrb[12].mxu0 %v17786_v15  ;;  %5064 = vmatprep.subr.bf16.mxu1 %v13459_v52  ;;  %v1128_v52 = vld [vmem:[%s21700_s2 + $0xa40] sm:$0xff]  ;;  %v510_v3 = vld [vmem:[%s17140_s29 + $0x2f0] sm:$0xff] }
 0x170   : > { %4922 = vmatmul.mubr.bf16.gmra.mrb[44].mxu1 %v17305_v14  ;;  %4352 = vmatprep.mubr.bf16.mxu0 %v17794_v9  ;;  %22097 = vst [vmem:[#allocation65_spill] sm:$0xff] %v17822_v34  ;;  %v17830_v14 = vpack.c.bf16 %v496_v23, %v489_v17  ;;  %v13482_v23 = vcombine.low %v1001_v0, %v1005_v7 }
 0x171   : > { %4931 = vmatprep.mubr.bf16.mxu1 %v17315_v36  ;;  %4486 = vmatpush1.bf16.msra.mxu0 %v13584_v30  ;;  %v1132_v36 = vld [vmem:[%s21700_s2 + $0xa60] sm:$0xff] }
 0x172   : > { %5065 = vmatpush1.bf16.msra.mxu1 %v13458_v54  ;;  %4487 = vmatprep.subr.bf16.mxu0 %v13593_v27  ;;  %22098 = vst [vmem:[#allocation66_spill] sm:$0xff] %v17830_v14  ;;  %v13609_v30 = vcombine.high %v1128_v52, %v1132_v36  ;;  %v488_v54 = vld [vmem:[%s17140_s29 + $0x240] sm:$0xff]  ;;  %v13483_v27 = vcombine.high %v1001_v0, %v1005_v7 }
 0x173   : > { %5066 = vmatprep.subr.bf16.mxu1 %v13467_v26  ;;  %v1140_v26 = vld [vmem:[%s21700_s2 + $0xaa0] sm:$0xff]  ;;  %v13608_v17 = vcombine.low %v1128_v52, %v1132_v36  ;;  %v1017_v36 = vld [vmem:[%s21700_s2 + $0x6c8] sm:$0xff]  ;;  %v13490_v7 = vcombine.low %v1009_v41, %v1013_v43 }
 0x174   : > { %v1021_v52 = vld [vmem:[%s21700_s2 + $0x6e8] sm:$0xff]  ;;  %v13616_v0 = vcombine.low %v1136_v11, %v1140_v26 }
 0x175   : > { %4488 = vmatpush1.bf16.msra.mxu0 %v13592_v44  ;;  %v13617_v44 = vcombine.high %v1136_v11, %v1140_v26  ;;  %v509_v11 = vld [vmem:[%s17140_s29 + $0x2e8] sm:$0xff] }
 0x176   : > { %5067 = vmatpush1.bf16.msra.mxu1 %v13466_v21  ;;  %4489 = vmatprep.subr.bf16.mxu0 %v13601_v48  ;;  %v17858_v21 = vpack.c.bf16 %v495_v31, %v488_v54  ;;  %v13491_v48 = vcombine.high %v1009_v41, %v1013_v43  ;;  %v1152_v54 = vld [vmem:[%s21700_s2 + $0xb00] sm:$0xff]  ;;  %v1025_v26 = vld [vmem:[%s21700_s2 + $0x708] sm:$0xff] }
 0x177   : > { %4353 = vmatmul.mubr.bf16.gmra.mrb[16].mxu0 %v17822_v34  ;;  %5068 = vmatprep.subr.bf16.mxu1 %v13475_v29  ;;  %v1144_v29 = vld [vmem:[%s21700_s2 + $0xac0] sm:$0xff]  ;;  %v1029_v31 = vld [vmem:[%s21700_s2 + $0x728] sm:$0xff] }
 0x178   : > { %4932 = vmatmul.mubr.bf16.gmra.mrb[48].mxu1 %v17350_v25  ;;  %4362 = vmatprep.mubr.bf16.mxu0 %v17830_v14  ;;  %22099 = vst [vmem:[#allocation67_spill] sm:$0xff] %v17858_v21  ;;  %v17866_v25 = vpack.c.bf16 %v510_v3, %v503_v35  ;;  %v517_v41 = vld [vmem:[%s17140_s29 + $0x328] sm:$0xff]  ;;  %v524_v43 = vld [vmem:[%s17140_s29 + $0x360] sm:$0xff]  ;;  %v13498_v3 = vcombine.low %v1017_v36, %v1021_v52 }
 0x179   : > { %4941 = vmatprep.mubr.bf16.mxu1 %v17360_v28  ;;  %4490 = vmatpush1.bf16.msra.mxu0 %v13600_v18  ;;  %v1148_v28 = vld [vmem:[%s21700_s2 + $0xae0] sm:$0xff] }
 0x17a   : > { %5069 = vmatpush1.bf16.msra.mxu1 %v13474_v12  ;;  %4491 = vmatprep.subr.bf16.mxu0 %v13609_v30  ;;  %22100 = vst [vmem:[#allocation68_spill] sm:$0xff] %v17866_v25  ;;  %v13625_v18 = vcombine.high %v1144_v29, %v1148_v28  ;;  %v502_v12 = vld [vmem:[%s17140_s29 + $0x2b0] sm:$0xff]  ;;  %v13499_v30 = vcombine.high %v1017_v36, %v1021_v52 }
 0x17b   : > { %5070 = vmatprep.subr.bf16.mxu1 %v13483_v27  ;;  %v1156_v27 = vld [vmem:[%s21700_s2 + $0xb20] sm:$0xff]  ;;  %v13624_v35 = vcombine.low %v1144_v29, %v1148_v28  ;;  %v1033_v28 = vld [vmem:[%s21700_s2 + $0x748] sm:$0xff]  ;;  %v13506_v52 = vcombine.low %v1025_v26, %v1029_v31 }
 0x17c   : > { %v1037_v29 = vld [vmem:[%s21700_s2 + $0x768] sm:$0xff]  ;;  %v13632_v36 = vcombine.low %v1152_v54, %v1156_v27 }
 0x17d   : > { %4492 = vmatpush1.bf16.msra.mxu0 %v13608_v17  ;;  %v13633_v17 = vcombine.high %v1152_v54, %v1156_v27  ;;  %v523_v54 = vld [vmem:[%s17140_s29 + $0x358] sm:$0xff]  ;;  %v1041_v27 = vld [vmem:[%s21700_s2 + $0x788] sm:$0xff] }
 0x17e   : > { %5071 = vmatpush1.bf16.msra.mxu1 %v13482_v23  ;;  %4493 = vmatprep.subr.bf16.mxu0 %v13617_v44  ;;  %v17894_v23 = vpack.c.bf16 %v509_v11, %v502_v12  ;;  %v13507_v44 = vcombine.high %v1025_v26, %v1029_v31  ;;  %v1168_v12 = vld [vmem:[%s21700_s2 + $0xb80] sm:$0xff]  ;;  %v1045_v11 = vld [vmem:[%s21700_s2 + $0x7a8] sm:$0xff]  ;;  %v531_v26 = vld [vmem:[%s17140_s29 + $0x398] sm:$0xff] }
 0x17f   : > { %4363 = vmatmul.mubr.bf16.gmra.mrb[20].mxu0 %v17858_v21  ;;  %5072 = vmatprep.subr.bf16.mxu1 %v13491_v48  ;;  %v1160_v48 = vld [vmem:[%s21700_s2 + $0xb40] sm:$0xff]  ;;  %v538_v31 = vld [vmem:[%s17140_s29 + $0x3d0] sm:$0xff] }
 0x180   : > { %4942 = vmatmul.mubr.bf16.gmra.mrb[52].mxu1 %v17395_v10  ;;  %4372 = vmatprep.mubr.bf16.mxu0 %v17866_v25  ;;  %22101 = vst [vmem:[#allocation69_spill] sm:$0xff] %v17894_v23  ;;  %v17902_v10 = vpack.c.bf16 %v524_v43, %v517_v41  ;;  %v13514_v43 = vcombine.low %v1033_v28, %v1037_v29 }
 0x181   : > { %4951 = vmatprep.mubr.bf16.mxu1 %v17405_v22  ;;  %4494 = vmatpush1.bf16.msra.mxu0 %v13616_v0  ;;  %v1164_v22 = vld [vmem:[%s21700_s2 + $0xb60] sm:$0xff] }
 0x182   : > { %5073 = vmatpush1.bf16.msra.mxu1 %v13490_v7  ;;  %4495 = vmatprep.subr.bf16.mxu0 %v13625_v18  ;;  %22102 = vst [vmem:[#allocation70_spill] sm:$0xff] %v17902_v10  ;;  %v13641_v0 = vcombine.high %v1160_v48, %v1164_v22  ;;  %v516_v7 = vld [vmem:[%s17140_s29 + $0x320] sm:$0xff]  ;;  %v13515_v18 = vcombine.high %v1033_v28, %v1037_v29 }
 0x183   : > { %5074 = vmatprep.subr.bf16.mxu1 %v13499_v30  ;;  %v1172_v30 = vld [vmem:[%s21700_s2 + $0xba0] sm:$0xff]  ;;  %v13640_v41 = vcombine.low %v1160_v48, %v1164_v22  ;;  %v1049_v22 = vld [vmem:[%s21700_s2 + $0x7c8] sm:$0xff]  ;;  %v13522_v29 = vcombine.low %v1041_v27, %v1045_v11 }
 0x184   : > { %v1053_v48 = vld [vmem:[%s21700_s2 + $0x7e8] sm:$0xff]  ;;  %v13648_v28 = vcombine.low %v1168_v12, %v1172_v30 }
 0x185   : > { %4496 = vmatpush1.bf16.msra.mxu0 %v13624_v35  ;;  %v13649_v35 = vcombine.high %v1168_v12, %v1172_v30  ;;  %v13530_v30 = vcombine.low %v1049_v22, %v1053_v48 }
 0x186   : > { %5075 = vmatpush1.bf16.msra.mxu1 %v13498_v3  ;;  %4497 = vmatprep.subr.bf16.mxu0 %v13633_v17  ;;  %v17930_v3 = vpack.c.bf16 %v523_v54, %v516_v7  ;;  %v13523_v17 = vcombine.high %v1041_v27, %v1045_v11  ;;  %v530_v7 = vld [vmem:[%s17140_s29 + $0x390] sm:$0xff]  ;;  %v545_v54 = vld [vmem:[%s17140_s29 + $0x408] sm:$0xff]  ;;  %v13665_v27 = vcombine.high %v17648_v39, %v17654_v50 }
 0x187   : > { %4373 = vmatmul.mubr.bf16.gmra.mrb[24].mxu0 %v17894_v23  ;;  %5076 = vmatprep.subr.bf16.mxu1 %v13507_v44  ;;  %v1176_v44 = vld [vmem:[%s21700_s2 + $0xbc0] sm:$0xff] }
 0x188   : > { %4952 = vmatmul.mubr.bf16.gmra.mrb[56].mxu1 %v17440_v2  ;;  %4382 = vmatprep.mubr.bf16.mxu0 %v17902_v10  ;;  %22103 = vst [vmem:[#allocation71_spill] sm:$0xff] %v17930_v3 }
 0x189   : > { %4961 = vmatprep.mubr.bf16.mxu1 %v17450_v20  ;;  %4498 = vmatpush1.bf16.msra.mxu0 %v13632_v36  ;;  %v1180_v20 = vld [vmem:[%s21700_s2 + $0xbe0] sm:$0xff]  ;;  %v17938_v36 = vpack.c.bf16 %v538_v31, %v531_v26  ;;  %v13539_v31 = vcombine.high %v17659_v6, %v17664_v57 }
 0x18a   : > { %5077 = vmatpush1.bf16.msra.mxu1 %v13506_v52  ;;  %4499 = vmatprep.subr.bf16.mxu0 %v13641_v0  ;;  %v13657_v52 = vcombine.high %v1176_v44, %v1180_v20  ;;  %v13531_v0 = vcombine.high %v1049_v22, %v1053_v48  ;;  %v552_v26 = vld [vmem:[%s17140_s29 + $0x440] sm:$0xff]  ;;  %v13656_v12 = vcombine.low %v1176_v44, %v1180_v20  ;;  %v558_v48 = vld [vmem:[%s17140_s29 + $0x470] sm:$0xff] }
 0x18b   : > { %5078 = vmatprep.subr.bf16.mxu1 %v13515_v18  ;;  %22104 = vst [vmem:[#allocation72_spill] sm:$0xff] %v17938_v36  ;;  %v537_v18 = vld [vmem:[%s17140_s29 + $0x3c8] sm:$0xff]  ;;  %v544_v20 = vld [vmem:[%s17140_s29 + $0x400] sm:$0xff] }
 0x18c   : > { %v17956_v11 = vpack.c.bf16 %v537_v18, %v530_v7  ;;  %v572_v18 = vld [vmem:[%s17140_s29 + $0x4e0] sm:$0xff] }
 0x18d   : > { %4500 = vmatpush1.bf16.msra.mxu0 %v13640_v41  ;;  %v17960_v41 = vpack.c.bf16 %v552_v26, %v545_v54  ;;  %v579_v54 = vld [vmem:[%s17140_s29 + $0x518] sm:$0xff] }
 0x18e   : > { %5079 = vmatpush1.bf16.msra.mxu1 %v13514_v43  ;;  %4501 = vmatprep.subr.bf16.mxu0 %v13649_v35  ;;  %22105 = vst [vmem:[#allocation73_spill] sm:$0xff] %v17956_v11  ;;  %v551_v43 = vld [vmem:[%s17140_s29 + $0x438] sm:$0xff] }
 0x18f   : > { %4383 = vmatmul.mubr.bf16.gmra.mrb[28].mxu0 %v17930_v3  ;;  %5080 = vmatprep.subr.bf16.mxu1 %v13523_v17  ;;  %22106 = vst [vmem:[#allocation74_spill] sm:$0xff] %v17960_v41  ;;  %v559_v35 = vld [vmem:[%s17140_s29 + $0x478] sm:$0xff]  ;;  %v566_v17 = vld [vmem:[%s17140_s29 + $0x4b0] sm:$0xff]  ;;  %v17970_v44 = vpack.c.bf16 %v551_v43, %v544_v20  ;;  %v593_v20 = vld [vmem:[%s17140_s29 + $0x588] sm:$0xff] }
 0x190   : > { %4962 = vmatmul.mubr.bf16.gmra.mrb[60].mxu1 %v17485_v38  ;;  %4392 = vmatprep.mubr.bf16.mxu0 %v17938_v36  ;;  %v17972_v22 = vpack.c.bf16 %v566_v17, %v559_v35  ;;  %v587_v26 = vld [vmem:[%s17140_s29 + $0x558] sm:$0xff]  ;;  %v601_v43 = vld [vmem:[%s17140_s29 + $0x5c8] sm:$0xff]  ;;  %v608_v35 = vld [vmem:[%s17140_s29 + $0x600] sm:$0xff] }
 0x191   : > { %4971 = vmatprep.mubr.bf16.mxu1 %v17495_v60  ;;  %4502 = vmatpush1.bf16.msra.mxu0 %v13648_v28  ;;  %22107 = vst [vmem:[#allocation75_spill] sm:$0xff] %v17970_v44  ;;  %v565_v28 = vld [vmem:[%s17140_s29 + $0x4a8] sm:$0xff] }
 0x192   : > { %5081 = vmatpush1.bf16.msra.mxu1 %v13522_v29  ;;  %4503 = vmatprep.subr.bf16.mxu0 %v13657_v52  ;;  %22108 = vst [vmem:[#allocation76_spill] sm:$0xff] %v17972_v22  ;;  %v573_v29 = vld [vmem:[%s17140_s29 + $0x4e8] sm:$0xff]  ;;  %v580_v52 = vld [vmem:[%s17140_s29 + $0x520] sm:$0xff] }
 0x193   : > { %5082 = vmatprep.subr.bf16.mxu1 %v13531_v0  ;;  %v17982_v0 = vpack.c.bf16 %v565_v28, %v558_v48  ;;  %v17984_v7 = vpack.c.bf16 %v580_v52, %v573_v29  ;;  %v18008_v48 = vpack.c.bf16 %v608_v35, %v601_v43  ;;  %v600_v28 = vld [vmem:[%s17140_s29 + $0x5c0] sm:$0xff]  ;;  %v607_v29 = vld [vmem:[%s17140_s29 + $0x5f8] sm:$0xff] }
 0x194   : > { %v615_v52 = vld [vmem:[%s17140_s29 + $0x638] sm:$0xff]  ;;  %v636_v43 = vld [vmem:[%s17140_s29 + $0x6e0] sm:$0xff] }
 0x195   : > { %4504 = vmatpush1.bf16.msra.mxu0 %v13656_v12  ;;  %22109 = vst [vmem:[#allocation77_spill] sm:$0xff] %v17982_v0  ;;  %22110 = vst [vmem:[#allocation78_spill] sm:$0xff] %v17984_v7  ;;  %v594_v12 = vld [vmem:[%s17140_s29 + $0x590] sm:$0xff] }
 0x196   : > { %5083 = vmatpush1.bf16.msra.mxu1 %v13530_v30  ;;  %4666 = vmatprep.subr.bf16.mxu0 %v13665_v27  ;;  %v17994_v30 = vpack.c.bf16 %v579_v54, %v572_v18  ;;  %v17996_v27 = vpack.c.bf16 %v594_v12, %v587_v26  ;;  %22114 = vst [vmem:[#allocation82_spill] sm:$0xff] %v18008_v48  ;;  %v622_v18 = vld [vmem:[%s17140_s29 + $0x670] sm:$0xff] }
 0x197   : > { %4393 = vmatmul.mubr.bf16.gmra.mrb[96].mxu0 %v17956_v11  ;;  %5245 = vmatprep.subr.bf16.mxu1 %v13539_v31  ;;  %v586_v31 = vld [vmem:[%s17140_s29 + $0x550] sm:$0xff]  ;;  %v18018_v54 = vpack.c.bf16 %v607_v29, %v600_v28  ;;  %v18020_v26 = vpack.c.bf16 %v622_v18, %v615_v52  ;;  %v628_v29 = vld [vmem:[%s17140_s29 + $0x6a0] sm:$0xff]  ;;  %v635_v52 = vld [vmem:[%s17140_s29 + $0x6d8] sm:$0xff] }
 0x198   : > { %4972 = vmatmul.mubr.bf16.gmra.mrb[64].mxu1 %v17520_v4  ;;  %4402 = vmatprep.mubr.bf16.mxu0 %v17960_v41  ;;  %22111 = vst [vmem:[#allocation79_spill] sm:$0xff] %v17994_v30  ;;  %22112 = vst [vmem:[#allocation80_spill] sm:$0xff] %v17996_v27  ;;  %v18006_v17 = vpack.c.bf16 %v593_v20, %v586_v31  ;;  %v614_v12 = vld [vmem:[%s17140_s29 + $0x630] sm:$0xff]  ;;  %v621_v31 = vld [vmem:[%s17140_s29 + $0x668] sm:$0xff] }
 0x199   : > { %4981 = vmatprep.mubr.bf16.mxu1 %v17526_v5  ;;  %22115 = vst [vmem:[#allocation83_spill] sm:$0xff] %v18018_v54  ;;  %22116 = vst [vmem:[#allocation84_spill] sm:$0xff] %v18020_v26  ;;  %v629_v20 = vld [vmem:[%s17140_s29 + $0x6a8] sm:$0xff]  ;;  %v18030_v35 = vpack.c.bf16 %v621_v31, %v614_v12  ;;  %v420_v31 = vld [vmem:[%s17140_s29 + $0x20] sm:$0xff] }
 0x19a   : > { %22113 = vst [vmem:[#allocation81_spill] sm:$0xff] %v18006_v17  ;;  %v18032_v28 = vpack.c.bf16 %v636_v43, %v629_v20  ;;  %v421_v18 = vld [vmem:[%s17140_s29 + $0x28] sm:$0xff]  ;;  %v427_v20 = vld [vmem:[%s17140_s29 + $0x58] sm:$0xff] }
 0x19b   : > { %22117 = vst [vmem:[#allocation85_spill] sm:$0xff] %v18030_v35  ;;  %v18055_v43 = vld [vmem:[%s21700_s2 + $0xc08] sm:$0xff] }
 0x19c   : > { %22118 = vst [vmem:[#allocation86_spill] sm:$0xff] %v18032_v28 }
 0x19f   : > { %4403 = vmatmul.mubr.bf16.gmra.mrb[100].mxu0 %v17970_v44 }
 0x1a0   : > { %4982 = vmatmul.mubr.bf16.gmra.mrb[68].mxu1 %v17543_v56  ;;  %4412 = vmatprep.mubr.bf16.mxu0 %v17972_v22  ;;  %v456_v56 = vld [vmem:[%s17140_s29 + $0x140] sm:$0xff] }
 0x1a1   : > { %4991 = vmatprep.mubr.bf16.mxu1 %v17547_v37  ;;  %v449_v37 = vld [vmem:[%s17140_s29 + $0x108] sm:$0xff] }
 0x1a7   : > { %4413 = vmatmul.mubr.bf16.gmra.mrb[104].mxu0 %v17982_v0 }
 0x1a8   : > { %4992 = vmatmul.mubr.bf16.gmra.mrb[72].mxu1 %v17564_v32  ;;  %4422 = vmatprep.mubr.bf16.mxu0 %v17984_v7 }
 0x1a9   : > { %5001 = vmatprep.mubr.bf16.mxu1 %v17568_v62  ;;  %v22123_v62 = vcombine.low %v17648_v39, %v17654_v50  ;;  %v1081_v39 = vld [vmem:[%s21700_s2 + $0x8c8] sm:$0xff] }
 0x1aa   : > { %v1089_v50 = vld [vmem:[%s21700_s2 + $0x908] sm:$0xff] }
 0x1af   : > { %4423 = vmatmul.mubr.bf16.gmra.mrb[108].mxu0 %v17994_v30 }
 0x1b0   : > { %5002 = vmatmul.mubr.bf16.gmra.mrb[76].mxu1 %v17583_v33  ;;  %4432 = vmatprep.mubr.bf16.mxu0 %v17996_v27 }
 0x1b1   : > { %5011 = vmatprep.mubr.bf16.mxu1 %v17585_v24 }
 0x1b7   : > { %4433 = vmatmul.mubr.bf16.gmra.mrb[112].mxu0 %v18006_v17 }
 0x1b8   : > { %5012 = vmatmul.mubr.bf16.gmra.mrb[80].mxu1 %v17596_v46  ;;  %4442 = vmatprep.mubr.bf16.mxu0 %v18008_v48 }
 0x1b9   : > { %5021 = vmatprep.mubr.bf16.mxu1 %v17598_v19  ;;  %v1069_v19 = vld [vmem:[%s21700_s2 + $0x868] sm:$0xff] }
 0x1bf   : > { %4443 = vmatmul.mubr.bf16.gmra.mrb[116].mxu0 %v18018_v54 }
 0x1c0   : > { %5022 = vmatmul.mubr.bf16.gmra.mrb[84].mxu1 %v17609_v40  ;;  %4452 = vmatprep.mubr.bf16.mxu0 %v18020_v26  ;;  %v18042_v40 = vpack.c.bf16 %v635_v52, %v628_v29  ;;  %v18065_v29 = vld [vmem:[%s21700_s2 + $0x10] sm:$0xff]  ;;  %v435_v52 = vld [vmem:[%s17140_s29 + $0x98] sm:$0xff] }
 0x1c1   : > { %5031 = vmatprep.mubr.bf16.mxu1 %v17611_v59  ;;  %v428_v59 = vld [vmem:[%s17140_s29 + $0x60] sm:$0xff] }
 0x1c2   : > { %22119 = vst [vmem:[#allocation87_spill] sm:$0xff] %v18042_v40  ;;  %v18044_v12 = vpack.c.bf16 %v428_v59, %v421_v18  ;;  %v18060_v59 = vld [vmem:[%s21700_s2 + $0xc28] sm:$0xff]  ;;  %v442_v18 = vld [vmem:[%s17140_s29 + $0xd0] sm:$0xff] }
 0x1c3   : > { %v18086_v46 = vpack.c.bf16 %v442_v18, %v435_v52  ;;  %v434_v52 = vld [vmem:[%s17140_s29 + $0x90] sm:$0xff]  ;;  %v441_v18 = vld [vmem:[%s17140_s29 + $0xc8] sm:$0xff] }
 0x1c4   : > { %22120 = vst [vmem:[#allocation88_spill] sm:$0xff] %v18044_v12 }
 0x1c5   : > { %22122 = vst [vmem:[#allocation90_spill] sm:$0xff] %v18086_v46 }
 0x1c7   : > { %4453 = vmatmul.mubr.bf16.gmra.mrb[120].mxu0 %v18030_v35 }
 0x1c8   : > { %5032 = vmatmul.mubr.bf16.gmra.mrb[88].mxu1 %v17622_v45  ;;  %4462 = vmatprep.mubr.bf16.mxu0 %v18032_v28  ;;  %v1065_v45 = vld [vmem:[%s21700_s2 + $0x848] sm:$0xff] }
 0x1c9   : > { %5041 = vmatprep.mubr.bf16.mxu1 %v17624_v58  ;;  %v18076_v58 = vpack.c.bf16 %v427_v20, %v420_v31  ;;  %v13547_v24 = vcombine.high %v1065_v45, %v1069_v19  ;;  %v1073_v31 = vld [vmem:[%s21700_s2 + $0x888] sm:$0xff]  ;;  %v13546_v32 = vcombine.low %v1065_v45, %v1069_v19  ;;  %v18118_v19 = vpack.c.bf16 %v456_v56, %v449_v37  ;;  %v448_v56 = vld [vmem:[%s17140_s29 + $0x100] sm:$0xff]  ;;  %v455_v37 = vld [vmem:[%s17140_s29 + $0x138] sm:$0xff] }
 0x1ca   : > { %v1077_v20 = vld [vmem:[%s21700_s2 + $0x8a8] sm:$0xff] }
 0x1cb   : > { %22121 = vst [vmem:[#allocation89_spill] sm:$0xff] %v18076_v58  ;;  %v13555_v5 = vcombine.high %v1073_v31, %v1077_v20  ;;  %22126 = vst [vmem:[#allocation92_spill] sm:$0xff] %v18118_v19 }
 0x1cf   : > { %4463 = vmatmul.mubr.bf16.gmra.mrb[124].mxu0 %v18042_v40 }
 0x1d0   : > { %5042 = vmatmul.mubr.bf16.gmra.mrb[92].mxu1 %v17635_v51  ;;  %4505 = vmatprep.mubr.bf16.mxu0 %v18044_v12  ;;  %v18074_v51 = vld [vmem:[%s21700_s2 + $0x30] sm:$0xff] }
 0x1d1   : > { %5084 = vmatprep.mubr.bf16.mxu1 %v17637_v49  ;;  %v13285_v33 = vcombine.high %v18065_v29, %v18074_v51  ;;  %v22124_v49 = vcombine.low %v17659_v6, %v17664_v57  ;;  %v1093_v6 = vld [vmem:[%s21700_s2 + $0x928] sm:$0xff] }
 0x1d2   : > { %v13571_v57 = vcombine.high %v1089_v50, %v1093_v6 }
 0x1d7   : > { %4506 = vmatmul.mubr.bf16.vlgmr.msra.gmra.mrb[0].mxu0 %v18076_v58 }
 0x1d8   : > { %4667 = vmatpush1.bf16.msra.mxu0 %v22123_v62  ;;  %5085 = vmatmul.mubr.bf16.vlgmr.msra.gmra.mrb[32].mxu1 %v17672_v42  ;;  %v18110_v62 = vpack.c.bf16 %v441_v18, %v434_v52  ;;  %v1101_v52 = vld [vmem:[%s21700_s2 + $0x968] sm:$0xff] }
 0x1d9   : > { %5246 = vmatpush1.bf16.msra.mxu1 %v22124_v49  ;;  %4515 = vmatprep.mubr.bf16.mxu0 %v18086_v46  ;;  %v1085_v49 = vld [vmem:[%s21700_s2 + $0x8e8] sm:$0xff] }
 0x1da   : > { %5094 = vmatprep.mubr.bf16.mxu1 %v17686_v63  ;;  %5247 = vmatprep.subr.bf16.mxu1 %v13547_v24  ;;  %22125 = vst [vmem:[#allocation91_spill] sm:$0xff] %v18110_v62  ;;  %v13554_v24 = vcombine.low %v1073_v31, %v1077_v20  ;;  %v13563_v45 = vcombine.high %v1081_v39, %v1085_v49  ;;  %v1097_v20 = vld [vmem:[%s21700_s2 + $0x948] sm:$0xff] }
 0x1db   : > { %5631 = vmatprep.subr.bf16.mxu0 %v13285_v33  ;;  %v13562_v33 = vcombine.low %v1081_v39, %v1085_v49  ;;  %v18134_v31 = vpack.c.bf16 %v455_v37, %v448_v56  ;;  %v13570_v39 = vcombine.low %v1089_v50, %v1093_v6  ;;  %v13579_v49 = vcombine.high %v1097_v20, %v1101_v52  ;;  %v462_v56 = vld [vmem:[%s17140_s29 + $0x170] sm:$0xff]  ;;  %v469_v37 = vld [vmem:[%s17140_s29 + $0x1a8] sm:$0xff]  ;;  %v484_v6 = vld [vmem:[%s17140_s29 + $0x220] sm:$0xff] }
 0x1dc   : > { %v477_v50 = vld [vmem:[%s17140_s29 + $0x1e8] sm:$0xff] }
 0x1dd   : > { %5248 = vmatpush1.bf16.msra.mxu1 %v13546_v32  ;;  %v470_v32 = vld [vmem:[%s17140_s29 + $0x1b0] sm:$0xff]  ;;  %22127 = vst [vmem:[#allocation93_spill] sm:$0xff] %v18134_v31 }
 0x1de   : > { %5249 = vmatprep.subr.bf16.mxu1 %v13555_v5  ;;  %v463_v5 = vld [vmem:[%s17140_s29 + $0x178] sm:$0xff] }
 0x1df   : > { %4516 = vmatmul.mubr.bf16.gmra.mrb[4].mxu0 %v18110_v62  ;;  %v18142_v18 = vpack.c.bf16 %v470_v32, %v463_v5  ;;  %v13578_v5 = vcombine.low %v1097_v20, %v1101_v52 }
 0x1e0   : > { %5095 = vmatmul.mubr.bf16.gmra.mrb[36].mxu1 %v17714_v53  ;;  %4525 = vmatprep.mubr.bf16.mxu0 %v18118_v19 }
 0x1e1   : > { %5104 = vmatprep.mubr.bf16.mxu1 %v17722_v55  ;;  %5250 = vmatpush1.bf16.msra.mxu1 %v13554_v24  ;;  %22128 = vst [vmem:[#allocation94_spill] sm:$0xff] %v18142_v18  ;;  %v1105_v24 = vld [vmem:[%s21700_s2 + $0x988] sm:$0xff] }
 0x1e2   : > { %5251 = vmatprep.subr.bf16.mxu1 %v13563_v45  ;;  %v1109_v45 = vld [vmem:[%s21700_s2 + $0x9a8] sm:$0xff] }
 0x1e3   : > { %v13587_v32 = vcombine.high %v1105_v24, %v1109_v45  ;;  %v13586_v20 = vcombine.low %v1105_v24, %v1109_v45  ;;  %v491_v24 = vld [vmem:[%s17140_s29 + $0x258] sm:$0xff]  ;;  %v498_v45 = vld [vmem:[%s17140_s29 + $0x290] sm:$0xff] }
 0x1e5   : > { %5252 = vmatpush1.bf16.msra.mxu1 %v13562_v33  ;;  %v18158_v33 = vpack.c.bf16 %v469_v37, %v462_v56  ;;  %v476_v56 = vld [vmem:[%s17140_s29 + $0x1e0] sm:$0xff]  ;;  %v483_v37 = vld [vmem:[%s17140_s29 + $0x218] sm:$0xff] }
 0x1e6   : > { %5253 = vmatprep.subr.bf16.mxu1 %v13571_v57  ;;  %v1113_v57 = vld [vmem:[%s21700_s2 + $0x9c8] sm:$0xff] }
 0x1e7   : > { %4526 = vmatmul.mubr.bf16.gmra.mrb[8].mxu0 %v18134_v31  ;;  %22129 = vst [vmem:[#allocation95_spill] sm:$0xff] %v18158_v33 }
 0x1e8   : > { %5105 = vmatmul.mubr.bf16.gmra.mrb[40].mxu1 %v17750_v16  ;;  %4535 = vmatprep.mubr.bf16.mxu0 %v18142_v18  ;;  %v18166_v16 = vpack.c.bf16 %v484_v6, %v477_v50 }
 0x1e9   : > { %5114 = vmatprep.mubr.bf16.mxu1 %v17758_v13  ;;  %5254 = vmatpush1.bf16.msra.mxu1 %v13570_v39  ;;  %v1117_v13 = vld [vmem:[%s21700_s2 + $0x9e8] sm:$0xff] }
 0x1ea   : > { %5255 = vmatprep.subr.bf16.mxu1 %v13579_v49  ;;  %22130 = vst [vmem:[#allocation96_spill] sm:$0xff] %v18166_v16  ;;  %v13595_v52 = vcombine.high %v1113_v57, %v1117_v13  ;;  %v1121_v39 = vld [vmem:[%s21700_s2 + $0xa08] sm:$0xff]  ;;  %v13594_v50 = vcombine.low %v1113_v57, %v1117_v13 }
 0x1eb   : > { %v1125_v49 = vld [vmem:[%s21700_s2 + $0xa28] sm:$0xff] }
 0x1ec   : > { %v13603_v6 = vcombine.high %v1121_v39, %v1125_v49  ;;  %v13602_v13 = vcombine.low %v1121_v39, %v1125_v49  ;;  %v505_v39 = vld [vmem:[%s17140_s29 + $0x2c8] sm:$0xff]  ;;  %v512_v49 = vld [vmem:[%s17140_s29 + $0x300] sm:$0xff] }
 0x1ed   : > { %5256 = vmatpush1.bf16.msra.mxu1 %v13578_v5  ;;  %v18182_v5 = vpack.c.bf16 %v483_v37, %v476_v56  ;;  %v490_v56 = vld [vmem:[%s17140_s29 + $0x250] sm:$0xff]  ;;  %v497_v37 = vld [vmem:[%s17140_s29 + $0x288] sm:$0xff] }
 0x1ee   : > { %5257 = vmatprep.subr.bf16.mxu1 %v13587_v32  ;;  %v1129_v32 = vld [vmem:[%s21700_s2 + $0xa48] sm:$0xff] }
 0x1ef   : > { %4536 = vmatmul.mubr.bf16.gmra.mrb[12].mxu0 %v18158_v33  ;;  %22131 = vst [vmem:[#allocation97_spill] sm:$0xff] %v18182_v5 }
 0x1f0   : > { %5115 = vmatmul.mubr.bf16.gmra.mrb[44].mxu1 %v17786_v15  ;;  %4545 = vmatprep.mubr.bf16.mxu0 %v18166_v16  ;;  %v18190_v15 = vpack.c.bf16 %v498_v45, %v491_v24 }
 0x1f1   : > { %5124 = vmatprep.mubr.bf16.mxu1 %v17794_v9  ;;  %5258 = vmatpush1.bf16.msra.mxu1 %v13586_v20  ;;  %v1133_v9 = vld [vmem:[%s21700_s2 + $0xa68] sm:$0xff] }
 0x1f2   : > { %5259 = vmatprep.subr.bf16.mxu1 %v13595_v52  ;;  %22132 = vst [vmem:[#allocation98_spill] sm:$0xff] %v18190_v15  ;;  %v13611_v57 = vcombine.high %v1129_v32, %v1133_v9  ;;  %v1137_v20 = vld [vmem:[%s21700_s2 + $0xa88] sm:$0xff]  ;;  %v13610_v24 = vcombine.low %v1129_v32, %v1133_v9 }
 0x1f3   : > { %v1141_v52 = vld [vmem:[%s21700_s2 + $0xaa8] sm:$0xff] }
 0x1f4   : > { %v13619_v45 = vcombine.high %v1137_v20, %v1141_v52  ;;  %v13618_v9 = vcombine.low %v1137_v20, %v1141_v52  ;;  %v519_v20 = vld [vmem:[%s17140_s29 + $0x338] sm:$0xff]  ;;  %v526_v52 = vld [vmem:[%s17140_s29 + $0x370] sm:$0xff] }
 0x1f5   : > { %5260 = vmatpush1.bf16.msra.mxu1 %v13594_v50  ;;  %v18206_v50 = vpack.c.bf16 %v497_v37, %v490_v56  ;;  %v504_v56 = vld [vmem:[%s17140_s29 + $0x2c0] sm:$0xff]  ;;  %v511_v37 = vld [vmem:[%s17140_s29 + $0x2f8] sm:$0xff] }
 0x1f6   : > { %5261 = vmatprep.subr.bf16.mxu1 %v13603_v6  ;;  %v1145_v6 = vld [vmem:[%s21700_s2 + $0xac8] sm:$0xff] }
 0x1f7   : > { %4546 = vmatmul.mubr.bf16.gmra.mrb[16].mxu0 %v18182_v5  ;;  %22133 = vst [vmem:[#allocation99_spill] sm:$0xff] %v18206_v50 }
 0x1f8   : > { %5125 = vmatmul.mubr.bf16.gmra.mrb[48].mxu1 %v17822_v34  ;;  %4555 = vmatprep.mubr.bf16.mxu0 %v18190_v15  ;;  %v18214_v34 = vpack.c.bf16 %v512_v49, %v505_v39 }
 0x1f9   : > { %5134 = vmatprep.mubr.bf16.mxu1 %v17830_v14  ;;  %5262 = vmatpush1.bf16.msra.mxu1 %v13602_v13  ;;  %v1149_v14 = vld [vmem:[%s21700_s2 + $0xae8] sm:$0xff] }
 0x1fa   : > { %5263 = vmatprep.subr.bf16.mxu1 %v13611_v57  ;;  %22134 = vst [vmem:[#allocation100_spill] sm:$0xff] %v18214_v34  ;;  %v13627_v32 = vcombine.high %v1145_v6, %v1149_v14  ;;  %v1153_v13 = vld [vmem:[%s21700_s2 + $0xb08] sm:$0xff]  ;;  %v13626_v39 = vcombine.low %v1145_v6, %v1149_v14 }
 0x1fb   : > { %v1157_v57 = vld [vmem:[%s21700_s2 + $0xb28] sm:$0xff] }
 0x1fc   : > { %v13635_v49 = vcombine.high %v1153_v13, %v1157_v57  ;;  %v13634_v14 = vcombine.low %v1153_v13, %v1157_v57  ;;  %v533_v13 = vld [vmem:[%s17140_s29 + $0x3a8] sm:$0xff]  ;;  %v540_v57 = vld [vmem:[%s17140_s29 + $0x3e0] sm:$0xff] }
 0x1fd   : > { %5264 = vmatpush1.bf16.msra.mxu1 %v13610_v24  ;;  %v18230_v24 = vpack.c.bf16 %v511_v37, %v504_v56  ;;  %v518_v56 = vld [vmem:[%s17140_s29 + $0x330] sm:$0xff]  ;;  %v525_v37 = vld [vmem:[%s17140_s29 + $0x368] sm:$0xff] }
 0x1fe   : > { %5265 = vmatprep.subr.bf16.mxu1 %v13619_v45  ;;  %v1161_v45 = vld [vmem:[%s21700_s2 + $0xb48] sm:$0xff] }
 0x1ff   : > { %4556 = vmatmul.mubr.bf16.gmra.mrb[20].mxu0 %v18206_v50  ;;  %22135 = vst [vmem:[#allocation101_spill] sm:$0xff] %v18230_v24 }
 0x200   : > { %5135 = vmatmul.mubr.bf16.gmra.mrb[52].mxu1 %v17858_v21  ;;  %4565 = vmatprep.mubr.bf16.mxu0 %v18214_v34  ;;  %v18238_v21 = vpack.c.bf16 %v526_v52, %v519_v20 }
 0x201   : > { %5144 = vmatprep.mubr.bf16.mxu1 %v17866_v25  ;;  %5266 = vmatpush1.bf16.msra.mxu1 %v13618_v9  ;;  %v1165_v25 = vld [vmem:[%s21700_s2 + $0xb68] sm:$0xff] }
 0x202   : > { %5267 = vmatprep.subr.bf16.mxu1 %v13627_v32  ;;  %22136 = vst [vmem:[#allocation102_spill] sm:$0xff] %v18238_v21  ;;  %v13643_v6 = vcombine.high %v1161_v45, %v1165_v25  ;;  %v1169_v9 = vld [vmem:[%s21700_s2 + $0xb88] sm:$0xff]  ;;  %v13642_v20 = vcombine.low %v1161_v45, %v1165_v25  ;;  %v532_v45 = vld [vmem:[%s17140_s29 + $0x3a0] sm:$0xff] }
 0x203   : > { %v1173_v32 = vld [vmem:[%s21700_s2 + $0xba8] sm:$0xff] }
 0x204   : > { %v13651_v52 = vcombine.high %v1169_v9, %v1173_v32 }
 0x205   : > { %5268 = vmatpush1.bf16.msra.mxu1 %v13626_v39  ;;  %v18254_v39 = vpack.c.bf16 %v525_v37, %v518_v56  ;;  %v547_v56 = vld [vmem:[%s17140_s29 + $0x418] sm:$0xff]  ;;  %v554_v37 = vld [vmem:[%s17140_s29 + $0x450] sm:$0xff] }
 0x206   : > { %5269 = vmatprep.subr.bf16.mxu1 %v13635_v49  ;;  %v1177_v49 = vld [vmem:[%s21700_s2 + $0xbc8] sm:$0xff] }
 0x207   : > { %4566 = vmatmul.mubr.bf16.gmra.mrb[24].mxu0 %v18230_v24  ;;  %22137 = vst [vmem:[#allocation103_spill] sm:$0xff] %v18254_v39 }
 0x208   : > { %5145 = vmatmul.mubr.bf16.gmra.mrb[56].mxu1 %v17894_v23  ;;  %4575 = vmatprep.mubr.bf16.mxu0 %v18238_v21  ;;  %v18262_v23 = vpack.c.bf16 %v540_v57, %v533_v13  ;;  %v18276_v57 = vpack.c.bf16 %v554_v37, %v547_v56  ;;  %v575_v56 = vld [vmem:[%s17140_s29 + $0x4f8] sm:$0xff]  ;;  %v582_v37 = vld [vmem:[%s17140_s29 + $0x530] sm:$0xff] }
 0x209   : > { %5154 = vmatprep.mubr.bf16.mxu1 %v17902_v10  ;;  %5270 = vmatpush1.bf16.msra.mxu1 %v13634_v14  ;;  %v1181_v10 = vld [vmem:[%s21700_s2 + $0xbe8] sm:$0xff]  ;;  %v13650_v14 = vcombine.low %v1169_v9, %v1173_v32  ;;  %v13667_v32 = vcombine.high %v18055_v43, %v18060_v59 }
 0x20a   : > { %5271 = vmatprep.subr.bf16.mxu1 %v13643_v6  ;;  %22138 = vst [vmem:[#allocation104_spill] sm:$0xff] %v18262_v23  ;;  %v13659_v25 = vcombine.high %v1177_v49, %v1181_v10  ;;  %v539_v6 = vld [vmem:[%s17140_s29 + $0x3d8] sm:$0xff]  ;;  %v13658_v9 = vcombine.low %v1177_v49, %v1181_v10  ;;  %22140 = vst [vmem:[#allocation106_spill] sm:$0xff] %v18276_v57  ;;  %v546_v10 = vld [vmem:[%s17140_s29 + $0x410] sm:$0xff] }
 0x20b   : > { %v18274_v13 = vpack.c.bf16 %v539_v6, %v532_v45  ;;  %v568_v49 = vld [vmem:[%s17140_s29 + $0x4c0] sm:$0xff]  ;;  %v567_v6 = vld [vmem:[%s17140_s29 + $0x4b8] sm:$0xff] }
 0x20c   : > { %v560_v45 = vld [vmem:[%s17140_s29 + $0x480] sm:$0xff] }
 0x20d   : > { %5272 = vmatpush1.bf16.msra.mxu1 %v13642_v20  ;;  %22139 = vst [vmem:[#allocation105_spill] sm:$0xff] %v18274_v13  ;;  %v553_v20 = vld [vmem:[%s17140_s29 + $0x448] sm:$0xff] }
 0x20e   : > { %5273 = vmatprep.subr.bf16.mxu1 %v13651_v52  ;;  %v561_v52 = vld [vmem:[%s17140_s29 + $0x488] sm:$0xff] }
 0x20f   : > { %4576 = vmatmul.mubr.bf16.gmra.mrb[28].mxu0 %v18254_v39 }
 0x210   : > { %5155 = vmatmul.mubr.bf16.gmra.mrb[60].mxu1 %v17930_v3  ;;  %4585 = vmatprep.mubr.bf16.mxu0 %v18262_v23 }
 0x211   : > { %5164 = vmatprep.mubr.bf16.mxu1 %v17938_v36  ;;  %5274 = vmatpush1.bf16.msra.mxu1 %v13650_v14  ;;  %v18286_v14 = vpack.c.bf16 %v553_v20, %v546_v10  ;;  %v574_v10 = vld [vmem:[%s17140_s29 + $0x4f0] sm:$0xff]  ;;  %v581_v20 = vld [vmem:[%s17140_s29 + $0x528] sm:$0xff]  ;;  %v22156_v36 = vcombine.low %v18055_v43, %v18060_v59 }
 0x212   : > { %5275 = vmatprep.subr.bf16.mxu1 %v13659_v25  ;;  %v18288_v25 = vpack.c.bf16 %v568_v49, %v561_v52  ;;  %v589_v52 = vld [vmem:[%s17140_s29 + $0x568] sm:$0xff]  ;;  %v596_v49 = vld [vmem:[%s17140_s29 + $0x5a0] sm:$0xff]  ;;  %v842_v59 = vld [vmem:[%s21700_s2 + $0x150] sm:$0xff] }
 0x213   : > { %22141 = vst [vmem:[#allocation107_spill] sm:$0xff] %v18286_v14 }
 0x214   : > { %22142 = vst [vmem:[#allocation108_spill] sm:$0xff] %v18288_v25 }
 0x215   : > { %5276 = vmatpush1.bf16.msra.mxu1 %v13658_v9  ;;  %v18298_v9 = vpack.c.bf16 %v567_v6, %v560_v45  ;;  %v18310_v45 = vpack.c.bf16 %v581_v20, %v574_v10  ;;  %v18312_v6 = vpack.c.bf16 %v596_v49, %v589_v52  ;;  %v602_v52 = vld [vmem:[%s17140_s29 + $0x5d0] sm:$0xff]  ;;  %v609_v49 = vld [vmem:[%s17140_s29 + $0x608] sm:$0xff] }
 0x216   : > { %5438 = vmatprep.subr.bf16.mxu1 %v13667_v32  ;;  %v18300_v32 = vpack.c.bf16 %v582_v37, %v575_v56  ;;  %v588_v56 = vld [vmem:[%s17140_s29 + $0x560] sm:$0xff]  ;;  %v595_v37 = vld [vmem:[%s17140_s29 + $0x598] sm:$0xff] }
 0x217   : > { %4586 = vmatmul.mubr.bf16.gmra.mrb[96].mxu0 %v18274_v13  ;;  %22143 = vst [vmem:[#allocation109_spill] sm:$0xff] %v18298_v9  ;;  %22145 = vst [vmem:[#allocation111_spill] sm:$0xff] %v18310_v45  ;;  %v18322_v10 = vpack.c.bf16 %v595_v37, %v588_v56  ;;  %v18334_v56 = vpack.c.bf16 %v609_v49, %v602_v52  ;;  %v623_v37 = vld [vmem:[%s17140_s29 + $0x678] sm:$0xff] }
 0x218   : > { %5165 = vmatmul.mubr.bf16.gmra.mrb[64].mxu1 %v17956_v11  ;;  %4595 = vmatprep.mubr.bf16.mxu0 %v18276_v57  ;;  %22144 = vst [vmem:[#allocation110_spill] sm:$0xff] %v18300_v32  ;;  %22146 = vst [vmem:[#allocation112_spill] sm:$0xff] %v18312_v6  ;;  %v443_v11 = vld [vmem:[%s17140_s29 + $0xd8] sm:$0xff] }
 0x219   : > { %5174 = vmatprep.mubr.bf16.mxu1 %v17960_v41  ;;  %22147 = vst [vmem:[#allocation113_spill] sm:$0xff] %v18322_v10  ;;  %22149 = vst [vmem:[#allocation115_spill] sm:$0xff] %v18334_v56  ;;  %v436_v41 = vld [vmem:[%s17140_s29 + $0xa0] sm:$0xff] }
 0x21f   : > { %4596 = vmatmul.mubr.bf16.gmra.mrb[100].mxu0 %v18286_v14 }
 0x220   : > { %5175 = vmatmul.mubr.bf16.gmra.mrb[68].mxu1 %v17970_v44  ;;  %4605 = vmatprep.mubr.bf16.mxu0 %v18288_v25 }
 0x221   : > { %5184 = vmatprep.mubr.bf16.mxu1 %v17972_v22 }
 0x227   : > { %4606 = vmatmul.mubr.bf16.gmra.mrb[104].mxu0 %v18298_v9 }
 0x228   : > { %5185 = vmatmul.mubr.bf16.gmra.mrb[72].mxu1 %v17982_v0  ;;  %4615 = vmatprep.mubr.bf16.mxu0 %v18300_v32  ;;  %v610_v0 = vld [vmem:[%s17140_s29 + $0x610] sm:$0xff] }
 0x229   : > { %5194 = vmatprep.mubr.bf16.mxu1 %v17984_v7  ;;  %v603_v7 = vld [vmem:[%s17140_s29 + $0x5d8] sm:$0xff] }
 0x22a   : > { %v18324_v20 = vpack.c.bf16 %v610_v0, %v603_v7  ;;  %v616_v7 = vld [vmem:[%s17140_s29 + $0x640] sm:$0xff] }
 0x22b   : > { %v18346_v22 = vpack.c.bf16 %v623_v37, %v616_v7  ;;  %v18367_v7 = vld [vmem:[%s21700_s2 + $0x410] sm:$0xff] }
 0x22c   : > { %22148 = vst [vmem:[#allocation114_spill] sm:$0xff] %v18324_v20  ;;  %v18372_v37 = vld [vmem:[%s21700_s2 + $0x430] sm:$0xff] }
 0x22d   : > { %22151 = vst [vmem:[#allocation117_spill] sm:$0xff] %v18346_v22 }
 0x22f   : > { %4616 = vmatmul.mubr.bf16.gmra.mrb[108].mxu0 %v18310_v45 }
 0x230   : > { %5195 = vmatmul.mubr.bf16.gmra.mrb[76].mxu1 %v17994_v30  ;;  %4625 = vmatprep.mubr.bf16.mxu0 %v18312_v6  ;;  %v624_v30 = vld [vmem:[%s17140_s29 + $0x680] sm:$0xff] }
 0x231   : > { %5204 = vmatprep.mubr.bf16.mxu1 %v17996_v27  ;;  %v617_v27 = vld [vmem:[%s17140_s29 + $0x648] sm:$0xff] }
 0x232   : > { %v18336_v0 = vpack.c.bf16 %v624_v30, %v617_v27  ;;  %v630_v30 = vld [vmem:[%s17140_s29 + $0x6b0] sm:$0xff]  ;;  %v637_v27 = vld [vmem:[%s17140_s29 + $0x6e8] sm:$0xff] }
 0x233   : > { %v18356_v49 = vpack.c.bf16 %v637_v27, %v630_v30  ;;  %v18377_v30 = vld [vmem:[%s21700_s2 + $0x18] sm:$0xff] }
 0x234   : > { %22150 = vst [vmem:[#allocation116_spill] sm:$0xff] %v18336_v0 }
 0x235   : > { %22153 = vst [vmem:[#allocation119_spill] sm:$0xff] %v18356_v49 }
 0x237   : > { %4626 = vmatmul.mubr.bf16.gmra.mrb[112].mxu0 %v18322_v10 }
 0x238   : > { %5205 = vmatmul.mubr.bf16.gmra.mrb[80].mxu1 %v18006_v17  ;;  %4635 = vmatprep.mubr.bf16.mxu0 %v18324_v20  ;;  %v638_v17 = vld [vmem:[%s17140_s29 + $0x6f0] sm:$0xff] }
 0x239   : > { %5214 = vmatprep.mubr.bf16.mxu1 %v18008_v48  ;;  %v631_v48 = vld [vmem:[%s17140_s29 + $0x6b8] sm:$0xff] }
 0x23a   : > { %v18348_v52 = vpack.c.bf16 %v638_v17, %v631_v48  ;;  %v422_v17 = vld [vmem:[%s17140_s29 + $0x30] sm:$0xff]  ;;  %v429_v48 = vld [vmem:[%s17140_s29 + $0x68] sm:$0xff] }
 0x23c   : > { %22152 = vst [vmem:[#allocation118_spill] sm:$0xff] %v18348_v52 }
 0x23f   : > { %4636 = vmatmul.mubr.bf16.gmra.mrb[116].mxu0 %v18334_v56 }
 0x240   : > { %5215 = vmatmul.mubr.bf16.gmra.mrb[84].mxu1 %v18018_v54  ;;  %4645 = vmatprep.mubr.bf16.mxu0 %v18336_v0  ;;  %v818_v54 = vld [vmem:[%s21700_s2 + $0x90] sm:$0xff] }
 0x241   : > { %5224 = vmatprep.mubr.bf16.mxu1 %v18020_v26  ;;  %v22155_v26 = vcombine.low %v18065_v29, %v18074_v51  ;;  %v826_v51 = vld [vmem:[%s21700_s2 + $0xd0] sm:$0xff] }
 0x242   : > { %v846_v29 = vld [vmem:[%s21700_s2 + $0x170] sm:$0xff] }
 0x247   : > { %4646 = vmatmul.mubr.bf16.gmra.mrb[120].mxu0 %v18346_v22 }
 0x248   : > { %5225 = vmatmul.mubr.bf16.gmra.mrb[88].mxu1 %v18030_v35  ;;  %4655 = vmatprep.mubr.bf16.mxu0 %v18348_v52  ;;  %v814_v35 = vld [vmem:[%s21700_s2 + $0x70] sm:$0xff] }
 0x249   : > { %5234 = vmatprep.mubr.bf16.mxu1 %v18032_v28  ;;  %v810_v28 = vld [vmem:[%s21700_s2 + $0x50] sm:$0xff] }
 0x24a   : > { %v13293_v27 = vcombine.high %v810_v28, %v814_v35  ;;  %v13292_v44 = vcombine.low %v810_v28, %v814_v35  ;;  %v450_v28 = vld [vmem:[%s17140_s29 + $0x110] sm:$0xff] }
 0x24f   : > { %4656 = vmatmul.mubr.bf16.gmra.mrb[124].mxu0 %v18356_v49 }
 0x250   : > { %5235 = vmatmul.mubr.bf16.gmra.mrb[92].mxu1 %v18042_v40  ;;  %4698 = vmatprep.mubr.bf16.mxu0 %v22062_v1  ;;  %v18386_v40 = vpack.c.bf16 %v429_v48, %v422_v17  ;;  %v822_v17 = vld [vmem:[%s21700_s2 + $0xb0] sm:$0xff] }
 0x251   : > { %5277 = vmatprep.mubr.bf16.mxu1 %v18044_v12  ;;  %v18384_v12 = vld [vmem:[%s21700_s2 + $0x38] sm:$0xff]  ;;  %v13301_v3 = vcombine.high %v818_v54, %v822_v17 }
 0x252   : > { %22154 = vst [vmem:[#allocation120_spill] sm:$0xff] %v18386_v40  ;;  %v13287_v48 = vcombine.high %v18377_v30, %v18384_v12 }
 0x257   : > { %13672 = vmatmul.mubr.msk.bf16.vlgmr.msra.gmra.mrb[0].mxu0 %vm4038_vm2, %v18386_v40 }
 0x258   : > { %5278 = vmatmul.mubr.bf16.vlgmr.msra.gmra.mrb[32].mxu1 %v18076_v58  ;;  %5632 = vmatpush1.bf16.msra.mxu0 %v22155_v26  ;;  %v18417_v58 = vpack.c.bf16 %v443_v11, %v436_v41  ;;  %v830_v26 = vld [vmem:[%s21700_s2 + $0xf0] sm:$0xff] }
 0x259   : > { %5439 = vmatpush1.bf16.msra.mxu1 %v22156_v36  ;;  %4708 = vmatprep.mubr.bf16.mxu0 %v22062_v1  ;;  %v13300_v36 = vcombine.low %v818_v54, %v822_v17  ;;  %v13309_v35 = vcombine.high %v826_v51, %v830_v26  ;;  %v834_v11 = vld [vmem:[%s21700_s2 + $0x110] sm:$0xff]  ;;  %v13325_v17 = vcombine.high %v842_v59, %v846_v29 }
 0x25a   : > { %5287 = vmatprep.mubr.bf16.mxu1 %v18086_v46  ;;  %5633 = vmatprep.subr.bf16.mxu0 %v13293_v27  ;;  %22157 = vst [vmem:[#allocation121_spill] sm:$0xff] %v18417_v58  ;;  %v838_v41 = vld [vmem:[%s21700_s2 + $0x130] sm:$0xff] }
 0x25b   : > { %6403 = vmatprep.subr.bf16.mxu1 %v13287_v48  ;;  %v13317_v54 = vcombine.high %v834_v11, %v838_v41  ;;  %v13316_v27 = vcombine.low %v834_v11, %v838_v41  ;;  %v850_v48 = vld [vmem:[%s21700_s2 + $0x190] sm:$0xff] }
 0x25c   : > { %5634 = vmatpush1.bf16.msra.mxu0 %v13292_v44  ;;  %v457_v44 = vld [vmem:[%s17140_s29 + $0x148] sm:$0xff] }
 0x25d   : > { %5635 = vmatprep.subr.bf16.mxu0 %v13301_v3  ;;  %v13308_v3 = vcombine.low %v826_v51, %v830_v26  ;;  %v18438_v43 = vpack.c.bf16 %v457_v44, %v450_v28  ;;  %v854_v51 = vld [vmem:[%s21700_s2 + $0x1b0] sm:$0xff]  ;;  %v464_v26 = vld [vmem:[%s17140_s29 + $0x180] sm:$0xff] }
 0x25e   : > { %v13333_v11 = vcombine.high %v850_v48, %v854_v51  ;;  %v858_v28 = vld [vmem:[%s21700_s2 + $0x1d0] sm:$0xff] }
 0x25f   : > { %13673 = vmatmul.mubr.msk.bf16.gmra.mrb[4].mxu0 %vm4038_vm2, %v18417_v58  ;;  %22158 = vst [vmem:[#allocation122_spill] sm:$0xff] %v18438_v43  ;;  %v862_v44 = vld [vmem:[%s21700_s2 + $0x1f0] sm:$0xff] }
 0x260   : > { %5288 = vmatmul.mubr.bf16.gmra.mrb[36].mxu1 %v18110_v62  ;;  %4718 = vmatprep.mubr.bf16.mxu0 %v22062_v1 }
 0x261   : > { %5297 = vmatprep.mubr.bf16.mxu1 %v18118_v19  ;;  %5636 = vmatpush1.bf16.msra.mxu0 %v13300_v36  ;;  %v471_v36 = vld [vmem:[%s17140_s29 + $0x1b8] sm:$0xff] }
 0x262   : > { %5637 = vmatprep.subr.bf16.mxu0 %v13309_v35  ;;  %v13324_v35 = vcombine.low %v842_v59, %v846_v29  ;;  %v18459_v41 = vpack.c.bf16 %v471_v36, %v464_v26  ;;  %v866_v59 = vld [vmem:[%s21700_s2 + $0x210] sm:$0xff] }
 0x263   : > { %v870_v29 = vld [vmem:[%s21700_s2 + $0x230] sm:$0xff] }
 0x264   : > { %22159 = vst [vmem:[#allocation123_spill] sm:$0xff] %v18459_v41  ;;  %v874_v36 = vld [vmem:[%s21700_s2 + $0x250] sm:$0xff] }
 0x265   : > { %5638 = vmatpush1.bf16.msra.mxu0 %v13308_v3  ;;  %v13332_v3 = vcombine.low %v850_v48, %v854_v51  ;;  %v13340_v48 = vcombine.low %v858_v28, %v862_v44  ;;  %v13349_v51 = vcombine.high %v866_v59, %v870_v29 }
 0x266   : > { %5639 = vmatprep.subr.bf16.mxu0 %v13317_v54  ;;  %v13341_v54 = vcombine.high %v858_v28, %v862_v44  ;;  %v882_v28 = vld [vmem:[%s21700_s2 + $0x290] sm:$0xff] }
 0x267   : > { %13674 = vmatmul.mubr.msk.bf16.gmra.mrb[8].mxu0 %vm4038_vm2, %v18438_v43  ;;  %v886_v44 = vld [vmem:[%s21700_s2 + $0x2b0] sm:$0xff] }
 0x268   : > { %5298 = vmatmul.mubr.bf16.gmra.mrb[40].mxu1 %v18134_v31  ;;  %4728 = vmatprep.mubr.bf16.mxu0 %v22062_v1 }
 0x269   : > { %5307 = vmatprep.mubr.bf16.mxu1 %v18142_v18  ;;  %5640 = vmatpush1.bf16.msra.mxu0 %v13316_v27  ;;  %v478_v27 = vld [vmem:[%s17140_s29 + $0x1f0] sm:$0xff] }
 0x26a   : > { %5641 = vmatprep.subr.bf16.mxu0 %v13325_v17  ;;  %v485_v17 = vld [vmem:[%s17140_s29 + $0x228] sm:$0xff] }
 0x26b   : > { %v18480_v26 = vpack.c.bf16 %v485_v17, %v478_v27  ;;  %v890_v17 = vld [vmem:[%s21700_s2 + $0x2d0] sm:$0xff] }
 0x26d   : > { %5642 = vmatpush1.bf16.msra.mxu0 %v13324_v35  ;;  %22160 = vst [vmem:[#allocation124_spill] sm:$0xff] %v18480_v26  ;;  %v878_v35 = vld [vmem:[%s21700_s2 + $0x270] sm:$0xff] }
 0x26e   : > { %5643 = vmatprep.subr.bf16.mxu0 %v13333_v11  ;;  %v13348_v11 = vcombine.low %v866_v59, %v870_v29  ;;  %v13356_v59 = vcombine.low %v874_v36, %v878_v35  ;;  %v13365_v29 = vcombine.high %v882_v28, %v886_v44 }
 0x26f   : > { %13675 = vmatmul.mubr.msk.bf16.gmra.mrb[12].mxu0 %vm4038_vm2, %v18459_v41 }
 0x270   : > { %5308 = vmatmul.mubr.bf16.gmra.mrb[44].mxu1 %v18158_v33  ;;  %4738 = vmatprep.mubr.bf16.mxu0 %v22062_v1 }
 0x271   : > { %5317 = vmatprep.mubr.bf16.mxu1 %v18166_v16  ;;  %5644 = vmatpush1.bf16.msra.mxu0 %v13332_v3  ;;  %v13357_v16 = vcombine.high %v874_v36, %v878_v35  ;;  %v492_v3 = vld [vmem:[%s17140_s29 + $0x260] sm:$0xff]  ;;  %v902_v36 = vld [vmem:[%s21700_s2 + $0x330] sm:$0xff] }
 0x272   : > { %5645 = vmatprep.subr.bf16.mxu0 %v13341_v54  ;;  %v499_v54 = vld [vmem:[%s17140_s29 + $0x298] sm:$0xff]  ;;  %v506_v35 = vld [vmem:[%s17140_s29 + $0x2d0] sm:$0xff] }
 0x273   : > { %v18501_v27 = vpack.c.bf16 %v499_v54, %v492_v3  ;;  %v906_v54 = vld [vmem:[%s21700_s2 + $0x350] sm:$0xff] }
 0x275   : > { %5646 = vmatpush1.bf16.msra.mxu0 %v13340_v48  ;;  %22161 = vst [vmem:[#allocation125_spill] sm:$0xff] %v18501_v27  ;;  %v894_v48 = vld [vmem:[%s21700_s2 + $0x2f0] sm:$0xff] }
 0x276   : > { %5647 = vmatprep.subr.bf16.mxu0 %v13349_v51  ;;  %v13364_v51 = vcombine.low %v882_v28, %v886_v44  ;;  %v13372_v28 = vcombine.low %v890_v17, %v894_v48 }
 0x277   : > { %13676 = vmatmul.mubr.msk.bf16.gmra.mrb[16].mxu0 %vm4038_vm2, %v18480_v26 }
 0x278   : > { %5318 = vmatmul.mubr.bf16.gmra.mrb[48].mxu1 %v18182_v5  ;;  %4748 = vmatprep.mubr.bf16.mxu0 %v22062_v1 }
 0x279   : > { %5327 = vmatprep.mubr.bf16.mxu1 %v18190_v15  ;;  %5648 = vmatpush1.bf16.msra.mxu0 %v13348_v11  ;;  %v13373_v15 = vcombine.high %v890_v17, %v894_v48  ;;  %v513_v11 = vld [vmem:[%s17140_s29 + $0x308] sm:$0xff]  ;;  %v918_v17 = vld [vmem:[%s21700_s2 + $0x3b0] sm:$0xff]  ;;  %v520_v48 = vld [vmem:[%s17140_s29 + $0x340] sm:$0xff] }
 0x27a   : > { %5649 = vmatprep.subr.bf16.mxu0 %v13357_v16  ;;  %v898_v16 = vld [vmem:[%s21700_s2 + $0x310] sm:$0xff]  ;;  %v18522_v3 = vpack.c.bf16 %v513_v11, %v506_v35 }
 0x27b   : > { %v13381_v44 = vcombine.high %v898_v16, %v902_v36  ;;  %v922_v11 = vld [vmem:[%s21700_s2 + $0x3d0] sm:$0xff] }
 0x27c   : > { %22162 = vst [vmem:[#allocation126_spill] sm:$0xff] %v18522_v3 }
 0x27d   : > { %5650 = vmatpush1.bf16.msra.mxu0 %v13356_v59  ;;  %v910_v59 = vld [vmem:[%s21700_s2 + $0x370] sm:$0xff] }
 0x27e   : > { %5651 = vmatprep.subr.bf16.mxu0 %v13365_v29  ;;  %v13380_v29 = vcombine.low %v898_v16, %v902_v36  ;;  %v13388_v16 = vcombine.low %v906_v54, %v910_v59 }
 0x27f   : > { %13677 = vmatmul.mubr.msk.bf16.gmra.mrb[20].mxu0 %vm4038_vm2, %v18501_v27 }
 0x280   : > { %5328 = vmatmul.mubr.bf16.gmra.mrb[52].mxu1 %v18206_v50  ;;  %4758 = vmatprep.mubr.bf16.mxu0 %v22062_v1 }
 0x281   : > { %5337 = vmatprep.mubr.bf16.mxu1 %v18214_v34  ;;  %5652 = vmatpush1.bf16.msra.mxu0 %v13364_v51  ;;  %v13389_v34 = vcombine.high %v906_v54, %v910_v59  ;;  %v527_v51 = vld [vmem:[%s17140_s29 + $0x378] sm:$0xff]  ;;  %v541_v54 = vld [vmem:[%s17140_s29 + $0x3e8] sm:$0xff] }
 0x282   : > { %5653 = vmatprep.subr.bf16.mxu0 %v13373_v15  ;;  %v914_v15 = vld [vmem:[%s21700_s2 + $0x390] sm:$0xff]  ;;  %v18543_v35 = vpack.c.bf16 %v527_v51, %v520_v48  ;;  %v555_v48 = vld [vmem:[%s17140_s29 + $0x458] sm:$0xff] }
 0x283   : > { %v13397_v36 = vcombine.high %v914_v15, %v918_v17  ;;  %v562_v51 = vld [vmem:[%s17140_s29 + $0x490] sm:$0xff] }
 0x284   : > { %22163 = vst [vmem:[#allocation127_spill] sm:$0xff] %v18543_v35 }
 0x285   : > { %5654 = vmatpush1.bf16.msra.mxu0 %v13372_v28  ;;  %v926_v28 = vld [vmem:[%s21700_s2 + $0x3f0] sm:$0xff] }
 0x286   : > { %5655 = vmatprep.subr.bf16.mxu0 %v13381_v44  ;;  %v13396_v44 = vcombine.low %v914_v15, %v918_v17  ;;  %v13404_v59 = vcombine.low %v922_v11, %v926_v28  ;;  %v548_v17 = vld [vmem:[%s17140_s29 + $0x420] sm:$0xff] }
 0x287   : > { %13678 = vmatmul.mubr.msk.bf16.gmra.mrb[24].mxu0 %vm4038_vm2, %v18522_v3 }
 0x288   : > { %5338 = vmatmul.mubr.bf16.gmra.mrb[56].mxu1 %v18230_v24  ;;  %4768 = vmatprep.mubr.bf16.mxu0 %v22062_v1  ;;  %v13405_v24 = vcombine.high %v922_v11, %v926_v28  ;;  %v576_v11 = vld [vmem:[%s17140_s29 + $0x500] sm:$0xff]  ;;  %v583_v28 = vld [vmem:[%s17140_s29 + $0x538] sm:$0xff] }
 0x289   : > { %5347 = vmatprep.mubr.bf16.mxu1 %v18238_v21  ;;  %5656 = vmatpush1.bf16.msra.mxu0 %v13380_v29  ;;  %v13413_v29 = vcombine.high %v18367_v7, %v18372_v37 }
 0x28a   : > { %5657 = vmatprep.subr.bf16.mxu0 %v13389_v34  ;;  %v534_v34 = vld [vmem:[%s17140_s29 + $0x3b0] sm:$0xff] }
 0x28b   : > { %v18560_v15 = vpack.c.bf16 %v541_v54, %v534_v34  ;;  %v590_v34 = vld [vmem:[%s17140_s29 + $0x570] sm:$0xff]  ;;  %v597_v54 = vld [vmem:[%s17140_s29 + $0x5a8] sm:$0xff] }
 0x28d   : > { %5658 = vmatpush1.bf16.msra.mxu0 %v13388_v16  ;;  %22164 = vst [vmem:[#allocation128_spill] sm:$0xff] %v18560_v15  ;;  %v569_v16 = vld [vmem:[%s17140_s29 + $0x4c8] sm:$0xff] }
 0x28e   : > { %5659 = vmatprep.subr.bf16.mxu0 %v13397_v36  ;;  %v18578_v36 = vpack.c.bf16 %v569_v16, %v562_v51  ;;  %v618_v51 = vld [vmem:[%s17140_s29 + $0x650] sm:$0xff]  ;;  %v625_v16 = vld [vmem:[%s17140_s29 + $0x688] sm:$0xff] }
 0x28f   : > { %13679 = vmatmul.mubr.msk.bf16.gmra.mrb[28].mxu0 %vm4038_vm2, %v18543_v35 }
 0x290   : > { %5348 = vmatmul.mubr.bf16.gmra.mrb[60].mxu1 %v18254_v39  ;;  %4778 = vmatprep.mubr.bf16.mxu0 %v22062_v1  ;;  %22166 = vst [vmem:[#allocation130_spill] sm:$0xff] %v18578_v36  ;;  %v907_v39 = vld [vmem:[%s21700_s2 + $0x358] sm:$0xff] }
 0x291   : > { %5357 = vmatprep.mubr.bf16.mxu1 %v18262_v23  ;;  %5660 = vmatpush1.bf16.msra.mxu0 %v13396_v44  ;;  %v18587_v44 = vpack.c.bf16 %v583_v28, %v576_v11  ;;  %v18614_v11 = vpack.c.bf16 %v625_v16, %v618_v51  ;;  %v632_v28 = vld [vmem:[%s17140_s29 + $0x6c0] sm:$0xff]  ;;  %v811_v51 = vld [vmem:[%s21700_s2 + $0x58] sm:$0xff] }
 0x292   : > { %5661 = vmatprep.subr.bf16.mxu0 %v13405_v24  ;;  %v18569_v24 = vpack.c.bf16 %v555_v48, %v548_v17  ;;  %v611_v17 = vld [vmem:[%s17140_s29 + $0x618] sm:$0xff] }
 0x293   : > { %22167 = vst [vmem:[#allocation131_spill] sm:$0xff] %v18587_v44  ;;  %22170 = vst [vmem:[#allocation134_spill] sm:$0xff] %v18614_v11  ;;  %v815_v16 = vld [vmem:[%s21700_s2 + $0x78] sm:$0xff] }
 0x294   : > { %22165 = vst [vmem:[#allocation129_spill] sm:$0xff] %v18569_v24  ;;  %v891_v23 = vld [vmem:[%s21700_s2 + $0x2d8] sm:$0xff] }
 0x295   : > { %5662 = vmatpush1.bf16.msra.mxu0 %v13404_v59  ;;  %v18596_v59 = vpack.c.bf16 %v597_v54, %v590_v34  ;;  %v639_v34 = vld [vmem:[%s17140_s29 + $0x6f8] sm:$0xff] }
 0x296   : > { %5824 = vmatprep.subr.bf16.mxu0 %v13413_v29  ;;  %v604_v29 = vld [vmem:[%s17140_s29 + $0x5e0] sm:$0xff]  ;;  %v18623_v54 = vpack.c.bf16 %v639_v34, %v632_v28  ;;  %v946_v34 = vld [vmem:[%s21700_s2 + $0x490] sm:$0xff]  ;;  %s21653_s29 = scalar_lea.vmem %s21709_s11, %s13203_s22 }
 0x297   : > { %13680 = vmatmul.mubr.msk.bf16.gmra.mrb[96].mxu0 %vm4038_vm2, %v18560_v15  ;;  %22168 = vst [vmem:[#allocation132_spill] sm:$0xff] %v18596_v59  ;;  %v18605_v48 = vpack.c.bf16 %v611_v17, %v604_v29  ;;  %v938_v29 = vld [vmem:[%s21700_s2 + $0x450] sm:$0xff] }
 0x298   : > { %5358 = vmatmul.mubr.bf16.gmra.mrb[64].mxu1 %v18274_v13  ;;  %4788 = vmatprep.mubr.bf16.mxu0 %v22062_v1  ;;  %22171 = vst [vmem:[#allocation135_spill] sm:$0xff] %v18623_v54  ;;  %v942_v17 = vld [vmem:[%s21700_s2 + $0x470] sm:$0xff]  ;;  %v875_v13 = vld [vmem:[%s21700_s2 + $0x258] sm:$0xff] }
 0x299   : > { %5367 = vmatprep.mubr.bf16.mxu1 %v18276_v57  ;;  %22169 = vst [vmem:[#allocation133_spill] sm:$0xff] %v18605_v48  ;;  %v13421_v28 = vcombine.high %v938_v29, %v942_v17  ;;  %v859_v57 = vld [vmem:[%s21700_s2 + $0x1d8] sm:$0xff] }
 0x29f   : > { %13681 = vmatmul.mubr.msk.bf16.gmra.mrb[100].mxu0 %vm4038_vm2, %v18569_v24 }
 0x2a0   : > { %5368 = vmatmul.mubr.bf16.gmra.mrb[68].mxu1 %v18286_v14  ;;  %4798 = vmatprep.mubr.bf16.mxu0 %v22062_v1  ;;  %v843_v14 = vld [vmem:[%s21700_s2 + $0x158] sm:$0xff] }
 0x2a1   : > { %5377 = vmatprep.mubr.bf16.mxu1 %v18288_v25  ;;  %v966_v25 = vld [vmem:[%s21700_s2 + $0x530] sm:$0xff] }
 0x2a7   : > { %13682 = vmatmul.mubr.msk.bf16.gmra.mrb[104].mxu0 %vm4038_vm2, %v18578_v36 }
 0x2a8   : > { %5378 = vmatmul.mubr.bf16.gmra.mrb[72].mxu1 %v18298_v9  ;;  %4808 = vmatprep.mubr.bf16.mxu0 %v22062_v1  ;;  %v962_v9 = vld [vmem:[%s21700_s2 + $0x510] sm:$0xff] }
 0x2a9   : > { %5387 = vmatprep.mubr.bf16.mxu1 %v18300_v32 }
 0x2af   : > { %13683 = vmatmul.mubr.msk.bf16.gmra.mrb[108].mxu0 %vm4038_vm2, %v18587_v44 }
 0x2b0   : > { %5388 = vmatmul.mubr.bf16.gmra.mrb[76].mxu1 %v18310_v45  ;;  %4818 = vmatprep.mubr.bf16.mxu0 %v22062_v1 }
 0x2b1   : > { %5397 = vmatprep.mubr.bf16.mxu1 %v18312_v6  ;;  %v13294_v6 = vcombine.low %v811_v51, %v815_v16 }
 0x2b7   : > { %13684 = vmatmul.mubr.msk.bf16.gmra.mrb[112].mxu0 %vm4038_vm2, %v18596_v59 }
 0x2b8   : > { %5398 = vmatmul.mubr.bf16.gmra.mrb[80].mxu1 %v18322_v10  ;;  %4828 = vmatprep.mubr.bf16.mxu0 %v22062_v1  ;;  %v22173_v10 = vcombine.low %v18377_v30, %v18384_v12  ;;  %v18678_v12 = vld [vmem:[%s21700_s2 + $0x418] sm:$0xff] }
 0x2b9   : > { %5407 = vmatprep.mubr.bf16.mxu1 %v18324_v20  ;;  %v13420_v20 = vcombine.low %v938_v29, %v942_v17  ;;  %v18691_v30 = vld [vmem:[%s21700_s2 + $0x438] sm:$0xff]  ;;  %v970_v17 = vld [vmem:[%s21700_s2 + $0x550] sm:$0xff] }
 0x2ba   : > { %v831_v29 = vld [vmem:[%s21700_s2 + $0xf8] sm:$0xff] }
 0x2bf   : > { %13685 = vmatmul.mubr.msk.bf16.gmra.mrb[116].mxu0 %vm4038_vm2, %v18605_v48 }
 0x2c0   : > { %5408 = vmatmul.mubr.bf16.gmra.mrb[84].mxu1 %v18334_v56  ;;  %4838 = vmatprep.mubr.bf16.mxu0 %v22062_v1  ;;  %v22172_v56 = vcombine.low %v18367_v7, %v18372_v37  ;;  %v958_v7 = vld [vmem:[%s21700_s2 + $0x4f0] sm:$0xff]  ;;  %v22174_v37 = vld [vmem:[#allocation2_spill] sm:$0xff] }
 0x2c1   : > { %5417 = vmatprep.mubr.bf16.mxu1 %v18336_v0  ;;  %v823_v0 = vld [vmem:[%s21700_s2 + $0xb8] sm:$0xff] }
 0x2c7   : > { %13686 = vmatmul.mubr.msk.bf16.gmra.mrb[120].mxu0 %vm4038_vm2, %v18614_v11 }
 0x2c8   : > { %5418 = vmatmul.mubr.bf16.gmra.mrb[88].mxu1 %v18346_v22  ;;  %4848 = vmatprep.mubr.bf16.mxu0 %v22062_v1  ;;  %v819_v22 = vld [vmem:[%s21700_s2 + $0x98] sm:$0xff] }
 0x2c9   : > { %5427 = vmatprep.mubr.bf16.mxu1 %v18348_v52  ;;  %v13295_v52 = vcombine.high %v811_v51, %v815_v16  ;;  %v13303_v32 = vcombine.high %v819_v22, %v823_v0  ;;  %v13302_v16 = vcombine.low %v819_v22, %v823_v0  ;;  %v835_v22 = vld [vmem:[%s21700_s2 + $0x118] sm:$0xff] }
 0x2cf   : > { %13687 = vmatmul.mubr.msk.bf16.gmra.mrb[124].mxu0 %vm4038_vm2, %v18623_v54 }
 0x2d0   : > { %5428 = vmatmul.mubr.bf16.gmra.mrb[92].mxu1 %v18356_v49  ;;  %5663 = vmatprep.mubr.bf16.mxu0 %v17150_v47  ;;  %v950_v49 = vld [vmem:[%s21700_s2 + $0x4b0] sm:$0xff] }
 0x2d1   : > { %5470 = vmatprep.mubr.bf16.mxu1 %v22062_v1  ;;  %v13429_v45 = vcombine.high %v946_v34, %v950_v49  ;;  %v13428_v51 = vcombine.low %v946_v34, %v950_v49  ;;  %v13445_v49 = vcombine.high %v962_v9, %v966_v25 }
 0x2d7   : > { %5664 = vmatmul.mubr.bf16.vlgmr.msra.gmra.mrb[32].mxu0 %v17185_v61 }
 0x2d8   : > { %13688 = vmatmul.mubr.msk.bf16.vlgmr.msra.gmra.mrb[32].mxu1 %vm4038_vm2, %v18386_v40  ;;  %5825 = vmatpush1.bf16.msra.mxu0 %v22172_v56  ;;  %v18668_v40 = vld [vmem:[%s21700_s2 + $0x810] sm:$0xff] }
 0x2d9   : > { %6404 = vmatpush1.bf16.msra.mxu1 %v22173_v10  ;;  %5480 = vmatprep.mubr.bf16.mxu1 %v22062_v1  ;;  %v18673_v56 = vld [vmem:[%s21700_s2 + $0x830] sm:$0xff] }
 0x2da   : > { %5673 = vmatprep.mubr.bf16.mxu0 %v17200_v8  ;;  %5826 = vmatprep.subr.bf16.mxu0 %v13421_v28  ;;  %v954_v10 = vld [vmem:[%s21700_s2 + $0x4d0] sm:$0xff] }
 0x2db   : > { %6405 = vmatprep.subr.bf16.mxu1 %v13295_v52  ;;  %v827_v52 = vld [vmem:[%s21700_s2 + $0xd8] sm:$0xff]  ;;  %v13437_v28 = vcombine.high %v954_v10, %v958_v7 }
 0x2dc   : > { %5827 = vmatpush1.bf16.msra.mxu0 %v13420_v20  ;;  %v13311_v20 = vcombine.high %v827_v52, %v831_v29  ;;  %v13310_v0 = vcombine.low %v827_v52, %v831_v29 }
 0x2dd   : > { %6406 = vmatpush1.bf16.msra.mxu1 %v13294_v6  ;;  %5828 = vmatprep.subr.bf16.mxu0 %v13429_v45  ;;  %v22175_v6 = vld [vmem:[#allocation3_spill] sm:$0xff]  ;;  %v13436_v45 = vcombine.low %v954_v10, %v958_v7  ;;  %v847_v10 = vld [vmem:[%s21700_s2 + $0x178] sm:$0xff]  ;;  %v13444_v7 = vcombine.low %v962_v9, %v966_v25 }
 0x2de   : > { %6407 = vmatprep.subr.bf16.mxu1 %v13303_v32  ;;  %v839_v32 = vld [vmem:[%s21700_s2 + $0x138] sm:$0xff] }
 0x2df   : > { %5674 = vmatmul.mubr.bf16.gmra.mrb[36].mxu0 %v22174_v37  ;;  %v13319_v34 = vcombine.high %v835_v22, %v839_v32  ;;  %v13318_v52 = vcombine.low %v835_v22, %v839_v32  ;;  %v22177_v25 = vld [vmem:[#allocation5_spill] sm:$0xff] }
 0x2e0   : > { %13689 = vmatmul.mubr.msk.bf16.gmra.mrb[36].mxu1 %vm4038_vm2, %v18417_v58  ;;  %5683 = vmatprep.mubr.bf16.mxu0 %v22175_v6  ;;  %v974_v58 = vld [vmem:[%s21700_s2 + $0x570] sm:$0xff]  ;;  %v851_v9 = vld [vmem:[%s21700_s2 + $0x198] sm:$0xff] }
 0x2e1   : > { %5490 = vmatprep.mubr.bf16.mxu1 %v22062_v1  ;;  %5829 = vmatpush1.bf16.msra.mxu0 %v13428_v51  ;;  %v13453_v29 = vcombine.high %v970_v17, %v974_v58  ;;  %v22176_v51 = vld [vmem:[#allocation4_spill] sm:$0xff]  ;;  %v855_v22 = vld [vmem:[%s21700_s2 + $0x1b8] sm:$0xff]  ;;  %v13452_v32 = vcombine.low %v970_v17, %v974_v58 }
 0x2e2   : > { %6408 = vmatpush1.bf16.msra.mxu1 %v13302_v16  ;;  %5830 = vmatprep.subr.bf16.mxu0 %v13437_v28  ;;  %v13327_v16 = vcombine.high %v843_v14, %v847_v10  ;;  %v978_v28 = vld [vmem:[%s21700_s2 + $0x590] sm:$0xff]  ;;  %v863_v58 = vld [vmem:[%s21700_s2 + $0x1f8] sm:$0xff]  ;;  %v13334_v17 = vcombine.low %v851_v9, %v855_v22 }
 0x2e3   : > { %6409 = vmatprep.subr.bf16.mxu1 %v13311_v20  ;;  %v982_v20 = vld [vmem:[%s21700_s2 + $0x5b0] sm:$0xff] }
 0x2e5   : > { %5831 = vmatpush1.bf16.msra.mxu0 %v13436_v45  ;;  %v13326_v45 = vcombine.low %v843_v14, %v847_v10  ;;  %v13460_v14 = vcombine.low %v978_v28, %v982_v20 }
 0x2e6   : > { %6410 = vmatpush1.bf16.msra.mxu1 %v13310_v0  ;;  %5832 = vmatprep.subr.bf16.mxu0 %v13445_v49  ;;  %v13461_v0 = vcombine.high %v978_v28, %v982_v20  ;;  %v13335_v49 = vcombine.high %v851_v9, %v855_v22  ;;  %v22179_v28 = vld [vmem:[#allocation9_spill] sm:$0xff] }
 0x2e7   : > { %5684 = vmatmul.mubr.bf16.gmra.mrb[40].mxu0 %v22176_v51  ;;  %6411 = vmatprep.subr.bf16.mxu1 %v13319_v34  ;;  %v986_v34 = vld [vmem:[%s21700_s2 + $0x5d0] sm:$0xff]  ;;  %v867_v20 = vld [vmem:[%s21700_s2 + $0x218] sm:$0xff] }
 0x2e8   : > { %13690 = vmatmul.mubr.msk.bf16.gmra.mrb[40].mxu1 %vm4038_vm2, %v18438_v43  ;;  %5693 = vmatprep.mubr.bf16.mxu0 %v22177_v25  ;;  %v990_v43 = vld [vmem:[%s21700_s2 + $0x5f0] sm:$0xff]  ;;  %v871_v9 = vld [vmem:[%s21700_s2 + $0x238] sm:$0xff] }
 0x2e9   : > { %5500 = vmatprep.mubr.bf16.mxu1 %v22062_v1  ;;  %5833 = vmatpush1.bf16.msra.mxu0 %v13444_v7  ;;  %v13469_v10 = vcombine.high %v986_v34, %v990_v43  ;;  %v22178_v7 = vld [vmem:[#allocation7_spill] sm:$0xff]  ;;  %v13468_v22 = vcombine.low %v986_v34, %v990_v43  ;;  %v879_v43 = vld [vmem:[%s21700_s2 + $0x278] sm:$0xff]  ;;  %v13350_v34 = vcombine.low %v867_v20, %v871_v9 }
 0x2ea   : > { %6412 = vmatpush1.bf16.msra.mxu1 %v13318_v52  ;;  %5834 = vmatprep.subr.bf16.mxu0 %v13453_v29  ;;  %v13343_v52 = vcombine.high %v859_v57, %v863_v58  ;;  %v994_v29 = vld [vmem:[%s21700_s2 + $0x610] sm:$0xff] }
 0x2eb   : > { %6413 = vmatprep.subr.bf16.mxu1 %v13327_v16  ;;  %v998_v16 = vld [vmem:[%s21700_s2 + $0x630] sm:$0xff] }
 0x2ed   : > { %5835 = vmatpush1.bf16.msra.mxu0 %v13452_v32  ;;  %v13342_v32 = vcombine.low %v859_v57, %v863_v58  ;;  %v13476_v57 = vcombine.low %v994_v29, %v998_v16 }
 0x2ee   : > { %6414 = vmatpush1.bf16.msra.mxu1 %v13326_v45  ;;  %5836 = vmatprep.subr.bf16.mxu0 %v13461_v0  ;;  %v13477_v45 = vcombine.high %v994_v29, %v998_v16  ;;  %v13351_v0 = vcombine.high %v867_v20, %v871_v9  ;;  %v22181_v29 = vld [vmem:[#allocation15_spill] sm:$0xff]  ;;  %v883_v16 = vld [vmem:[%s21700_s2 + $0x298] sm:$0xff] }
 0x2ef   : > { %5694 = vmatmul.mubr.bf16.gmra.mrb[44].mxu0 %v22178_v7  ;;  %6415 = vmatprep.subr.bf16.mxu1 %v13335_v49  ;;  %v1002_v49 = vld [vmem:[%s21700_s2 + $0x650] sm:$0xff]  ;;  %v887_v20 = vld [vmem:[%s21700_s2 + $0x2b8] sm:$0xff] }
 0x2f0   : > { %13691 = vmatmul.mubr.msk.bf16.gmra.mrb[44].mxu1 %vm4038_vm2, %v18459_v41  ;;  %5703 = vmatprep.mubr.bf16.mxu0 %v22179_v28  ;;  %v1006_v41 = vld [vmem:[%s21700_s2 + $0x670] sm:$0xff] }
 0x2f1   : > { %5510 = vmatprep.mubr.bf16.mxu1 %v22062_v1  ;;  %5837 = vmatpush1.bf16.msra.mxu0 %v13460_v14  ;;  %v13485_v58 = vcombine.high %v1002_v49, %v1006_v41  ;;  %v22180_v14 = vld [vmem:[#allocation13_spill] sm:$0xff]  ;;  %v13484_v9 = vcombine.low %v1002_v49, %v1006_v41  ;;  %v13366_v49 = vcombine.low %v883_v16, %v887_v20 }
 0x2f2   : > { %6416 = vmatpush1.bf16.msra.mxu1 %v13334_v17  ;;  %5838 = vmatprep.subr.bf16.mxu0 %v13469_v10  ;;  %v13359_v17 = vcombine.high %v875_v13, %v879_v43  ;;  %v1010_v10 = vld [vmem:[%s21700_s2 + $0x690] sm:$0xff]  ;;  %v895_v41 = vld [vmem:[%s21700_s2 + $0x2f8] sm:$0xff] }
 0x2f3   : > { %6417 = vmatprep.subr.bf16.mxu1 %v13343_v52  ;;  %v1014_v52 = vld [vmem:[%s21700_s2 + $0x6b0] sm:$0xff] }
 0x2f5   : > { %5839 = vmatpush1.bf16.msra.mxu0 %v13468_v22  ;;  %v13358_v22 = vcombine.low %v875_v13, %v879_v43  ;;  %v13492_v13 = vcombine.low %v1010_v10, %v1014_v52 }
 0x2f6   : > { %6418 = vmatpush1.bf16.msra.mxu1 %v13342_v32  ;;  %5840 = vmatprep.subr.bf16.mxu0 %v13477_v45  ;;  %v13493_v32 = vcombine.high %v1010_v10, %v1014_v52  ;;  %v13367_v45 = vcombine.high %v883_v16, %v887_v20  ;;  %v22183_v10 = vld [vmem:[#allocation21_spill] sm:$0xff] }
 0x2f7   : > { %5704 = vmatmul.mubr.bf16.gmra.mrb[48].mxu0 %v22180_v14  ;;  %6419 = vmatprep.subr.bf16.mxu1 %v13351_v0  ;;  %v1018_v0 = vld [vmem:[%s21700_s2 + $0x6d0] sm:$0xff]  ;;  %v899_v52 = vld [vmem:[%s21700_s2 + $0x318] sm:$0xff] }
 0x2f8   : > { %13692 = vmatmul.mubr.msk.bf16.gmra.mrb[48].mxu1 %vm4038_vm2, %v18480_v26  ;;  %5713 = vmatprep.mubr.bf16.mxu0 %v22181_v29  ;;  %v1022_v26 = vld [vmem:[%s21700_s2 + $0x6f0] sm:$0xff]  ;;  %v903_v16 = vld [vmem:[%s21700_s2 + $0x338] sm:$0xff] }
 0x2f9   : > { %5520 = vmatprep.mubr.bf16.mxu1 %v22062_v1  ;;  %5841 = vmatpush1.bf16.msra.mxu0 %v13476_v57  ;;  %v13501_v43 = vcombine.high %v1018_v0, %v1022_v26  ;;  %v22182_v57 = vld [vmem:[#allocation19_spill] sm:$0xff]  ;;  %v13500_v20 = vcombine.low %v1018_v0, %v1022_v26  ;;  %v911_v26 = vld [vmem:[%s21700_s2 + $0x378] sm:$0xff]  ;;  %v13382_v0 = vcombine.low %v899_v52, %v903_v16 }
 0x2fa   : > { %6420 = vmatpush1.bf16.msra.mxu1 %v13350_v34  ;;  %5842 = vmatprep.subr.bf16.mxu0 %v13485_v58  ;;  %v13375_v34 = vcombine.high %v891_v23, %v895_v41  ;;  %v1026_v58 = vld [vmem:[%s21700_s2 + $0x710] sm:$0xff] }
 0x2fb   : > { %6421 = vmatprep.subr.bf16.mxu1 %v13359_v17  ;;  %v1030_v17 = vld [vmem:[%s21700_s2 + $0x730] sm:$0xff] }
 0x2fd   : > { %5843 = vmatpush1.bf16.msra.mxu0 %v13484_v9  ;;  %v13374_v9 = vcombine.low %v891_v23, %v895_v41  ;;  %v13508_v23 = vcombine.low %v1026_v58, %v1030_v17 }
 0x2fe   : > { %6422 = vmatpush1.bf16.msra.mxu1 %v13358_v22  ;;  %5844 = vmatprep.subr.bf16.mxu0 %v13493_v32  ;;  %v13509_v22 = vcombine.high %v1026_v58, %v1030_v17  ;;  %v13383_v32 = vcombine.high %v899_v52, %v903_v16  ;;  %v915_v58 = vld [vmem:[%s21700_s2 + $0x398] sm:$0xff]  ;;  %v13390_v16 = vcombine.low %v907_v39, %v911_v26 }
 0x2ff   : > { %5714 = vmatmul.mubr.bf16.gmra.mrb[52].mxu0 %v22182_v57  ;;  %6423 = vmatprep.subr.bf16.mxu1 %v13367_v45  ;;  %v1034_v45 = vld [vmem:[%s21700_s2 + $0x750] sm:$0xff]  ;;  %v919_v17 = vld [vmem:[%s21700_s2 + $0x3b8] sm:$0xff] }
 0x300   : > { %13693 = vmatmul.mubr.msk.bf16.gmra.mrb[52].mxu1 %vm4038_vm2, %v18501_v27  ;;  %5723 = vmatprep.mubr.bf16.mxu0 %v22183_v10  ;;  %v1038_v27 = vld [vmem:[%s21700_s2 + $0x770] sm:$0xff] }
 0x301   : > { %5530 = vmatprep.mubr.bf16.mxu1 %v22062_v1  ;;  %5845 = vmatpush1.bf16.msra.mxu0 %v13492_v13  ;;  %v13517_v41 = vcombine.high %v1034_v45, %v1038_v27  ;;  %v13391_v13 = vcombine.high %v907_v39, %v911_v26  ;;  %v13516_v52 = vcombine.low %v1034_v45, %v1038_v27  ;;  %v927_v27 = vld [vmem:[%s21700_s2 + $0x3f8] sm:$0xff] }
 0x302   : > { %6424 = vmatpush1.bf16.msra.mxu1 %v13366_v49  ;;  %5846 = vmatprep.subr.bf16.mxu0 %v13501_v43  ;;  %v1042_v49 = vld [vmem:[%s21700_s2 + $0x790] sm:$0xff]  ;;  %v13398_v45 = vcombine.low %v915_v58, %v919_v17 }
 0x303   : > { %6425 = vmatprep.subr.bf16.mxu1 %v13375_v34  ;;  %v1046_v43 = vld [vmem:[%s21700_s2 + $0x7b0] sm:$0xff]  ;;  %v22184_v34 = vld [vmem:[#allocation26_spill] sm:$0xff] }
 0x304   : > { %v13524_v39 = vcombine.low %v1042_v49, %v1046_v43 }
 0x305   : > { %5847 = vmatpush1.bf16.msra.mxu0 %v13500_v20  ;;  %v13525_v20 = vcombine.high %v1042_v49, %v1046_v43  ;;  %v13415_v49 = vcombine.high %v18678_v12, %v18691_v30  ;;  %v22185_v43 = vld [vmem:[#allocation35_spill] sm:$0xff] }
 0x306   : > { %6426 = vmatpush1.bf16.msra.mxu1 %v13374_v9  ;;  %5848 = vmatprep.subr.bf16.mxu0 %v13509_v22  ;;  %v13399_v9 = vcombine.high %v915_v58, %v919_v17  ;;  %v1050_v22 = vld [vmem:[%s21700_s2 + $0x7d0] sm:$0xff]  ;;  %v22186_v58 = vld [vmem:[#allocation39_spill] sm:$0xff] }
 0x307   : > { %5724 = vmatmul.mubr.bf16.gmra.mrb[56].mxu0 %v17440_v2  ;;  %6427 = vmatprep.subr.bf16.mxu1 %v13383_v32  ;;  %v1054_v32 = vld [vmem:[%s21700_s2 + $0x7f0] sm:$0xff] }
 0x308   : > { %13694 = vmatmul.mubr.msk.bf16.gmra.mrb[56].mxu1 %vm4038_vm2, %v18522_v3  ;;  %5733 = vmatprep.mubr.bf16.mxu0 %v22184_v34  ;;  %v923_v3 = vld [vmem:[%s21700_s2 + $0x3d8] sm:$0xff]  ;;  %v13533_v26 = vcombine.high %v1050_v22, %v1054_v32 }
 0x309   : > { %5540 = vmatprep.mubr.bf16.mxu1 %v22062_v1  ;;  %5849 = vmatpush1.bf16.msra.mxu0 %v13508_v23  ;;  %v13407_v23 = vcombine.high %v923_v3, %v927_v27 }
 0x30a   : > { %6428 = vmatpush1.bf16.msra.mxu1 %v13382_v0  ;;  %5850 = vmatprep.subr.bf16.mxu0 %v13517_v41  ;;  %v13532_v0 = vcombine.low %v1050_v22, %v1054_v32  ;;  %v13406_v41 = vcombine.low %v923_v3, %v927_v27  ;;  %v7177_v3 = vlaneseq  ;;  %v22191_v22 = vld [vmem:[#allocation45_spill] sm:$0xff] }
 0x30b   : > { %6429 = vmatprep.subr.bf16.mxu1 %v13391_v13  ;;  %v13541_v13 = vcombine.high %v18668_v40, %v18673_v56 }
 0x30c   : > { %v18890_v17 = vshrl.u32 %v7177_v3, 7 }
 0x30d   : > { %5851 = vmatpush1.bf16.msra.mxu0 %v13516_v52  ;;  %v22188_v52 = vld [vmem:[#allocation41_spill] sm:$0xff] }
 0x30e   : > { %6430 = vmatpush1.bf16.msra.mxu1 %v13390_v16  ;;  %5852 = vmatprep.subr.bf16.mxu0 %v13525_v20  ;;  %22187 = vst [vmem:[#allocation2_spill] sm:$0xff] %v18890_v17  ;;  %v18897_v16 = vsub.s32 0, %v18890_v17  ;;  %v7175_v20 = vld [vmem:[%s21702_s4] sm:$0xff] }
 0x30f   : > { %5734 = vmatmul.mubr.bf16.gmra.mrb[60].mxu0 %v17485_v38  ;;  %6431 = vmatprep.subr.bf16.mxu1 %v13399_v9  ;;  %v18903_v9 = vsub.s32 1, %v18890_v17 }
 0x310   : > { %13695 = vmatmul.mubr.msk.bf16.gmra.mrb[60].mxu1 %vm4038_vm2, %v18543_v35  ;;  %5743 = vmatprep.mubr.bf16.mxu0 %v17495_v60  ;;  %22189 = vst [vmem:[#allocation3_spill] sm:$0xff] %v18897_v16  ;;  %v18907_v32 = vrot.slane %v7175_v20, %v18897_v16 }
 0x311   : > { %5550 = vmatprep.mubr.bf16.mxu1 %v22062_v1  ;;  %5853 = vmatpush1.bf16.msra.mxu0 %v13524_v39  ;;  %22190 = vst [vmem:[#allocation4_spill] sm:$0xff] %v18903_v9  ;;  %v18912_v27 = vrot.slane %v7175_v20, %v18903_v9  ;;  %v22192_v39 = vld [vmem:[#allocation47_spill] sm:$0xff]  ;;  %v22193_v9 = vld [vmem:[#allocation50_spill] sm:$0xff] }
 0x312   : > { %6432 = vmatpush1.bf16.msra.mxu1 %v13398_v45  ;;  %5854 = vmatprep.subr.bf16.mxu0 %v13533_v26 }
 0x313   : > { %6433 = vmatprep.subr.bf16.mxu1 %v13407_v23 }
 0x315   : > { %5855 = vmatpush1.bf16.msra.mxu0 %v13532_v0 }
 0x316   : > { %6434 = vmatpush1.bf16.msra.mxu1 %v13406_v41  ;;  %6017 = vmatprep.subr.bf16.mxu0 %v13541_v13 }
 0x317   : > { %5744 = vmatmul.mubr.bf16.gmra.mrb[64].mxu0 %v17520_v4  ;;  %6596 = vmatprep.subr.bf16.mxu1 %v13415_v49 }
 0x318   : > { %13696 = vmatmul.mubr.msk.bf16.gmra.mrb[64].mxu1 %vm4038_vm2, %v18560_v15  ;;  %5753 = vmatprep.mubr.bf16.mxu0 %v22185_v43  ;;  %v22194_v15 = vld [vmem:[#allocation51_spill] sm:$0xff] }
 0x319   : > { %5560 = vmatprep.mubr.bf16.mxu1 %v22062_v1 }
 0x31f   : > { %5754 = vmatmul.mubr.bf16.gmra.mrb[68].mxu0 %v22186_v58 }
 0x320   : > { %13697 = vmatmul.mubr.msk.bf16.gmra.mrb[68].mxu1 %vm4038_vm2, %v18569_v24  ;;  %5763 = vmatprep.mubr.bf16.mxu0 %v22188_v52 }
 0x321   : > { %5570 = vmatprep.mubr.bf16.mxu1 %v22062_v1 }
 0x327   : > { %5764 = vmatmul.mubr.bf16.gmra.mrb[72].mxu0 %v22191_v22 }
 0x328   : > { %13698 = vmatmul.mubr.msk.bf16.gmra.mrb[72].mxu1 %vm4038_vm2, %v18578_v36  ;;  %5773 = vmatprep.mubr.bf16.mxu0 %v22192_v39 }
 0x329   : > { %5580 = vmatprep.mubr.bf16.mxu1 %v22062_v1 }
 0x32a   : > { %v4700_v45 = vpop.f32.mrb[0].mxu0 }
 0x32b   : > { %v7217_v26 = vadd.f32 %v18907_v32, %v4700_v45  ;;  %v4702_v23 = vpop.f32.mrb[1].mxu0 }
 0x32c   : > { %v7218_v0 = vadd.f32 %v18912_v27, %v4702_v23  ;;  %v4704_v41 = vpop.f32.mrb[2].mxu0 }
 0x32d   : > { %v7473_v13 = vmul.f32 0.2, %v7217_v26  ;;  %v7225_v49 = vadd.f32 %v18907_v32, %v4704_v41  ;;  %v4706_v3 = vpop.f32.mrb[3].mxu0 }
 0x32e   : > { %v7474_v16 = vmul.f32 0.2, %v7218_v0  ;;  %v7226_v36 = vadd.f32 %v18912_v27, %v4706_v3 }
 0x32f   : > { %v7481_v20 = vmul.f32 0.2, %v7225_v49  ;;  %5774 = vmatmul.mubr.bf16.gmra.mrb[76].mxu0 %v22193_v9  ;;  %v7729_v45 = vmax.f32 %v7217_v26, %v7473_v13 }
 0x330   : > { %v7482_v24 = vmul.f32 0.2, %v7226_v36  ;;  %13699 = vmatmul.mubr.msk.bf16.gmra.mrb[76].mxu1 %vm4038_vm2, %v18587_v44  ;;  %5783 = vmatprep.mubr.bf16.mxu0 %v22194_v15  ;;  %v7730_v23 = vmax.f32 %v7218_v0, %v7474_v16 }
 0x331   : > { %v7737_v35 = vmax.f32 %v7225_v49, %v7481_v20  ;;  %5590 = vmatprep.mubr.bf16.mxu1 %v22062_v1 }
 0x332   : > { %v7738_v21 = vmax.f32 %v7226_v36, %v7482_v24  ;;  %v4710_v41 = vpop.f32.mrb[4].mxu0  ;;  %v22197_v24 = vld [vmem:[#allocation52_spill] sm:$0xff]  ;;  %v22198_v36 = vld [vmem:[#allocation53_spill] sm:$0xff] }
 0x333   : > { %v18925_v50 = vpack.c.bf16 %v7737_v35, %v7729_v45  ;;  %v7233_v3 = vadd.f32 %v18907_v32, %v4710_v41  ;;  %v4712_v5 = vpop.f32.mrb[5].mxu0 }
 0x334   : > { %v7234_v33 = vadd.f32 %v18912_v27, %v4712_v5  ;;  %v4714_v18 = vpop.f32.mrb[6].mxu0  ;;  %v18929_v31 = vpack.c.bf16 %v7738_v21, %v7730_v23 }
 0x335   : > { %22195 = vst [vmem:[#allocation5_spill] sm:$0xff] %v18925_v50  ;;  %v7489_v44 = vmul.f32 0.2, %v7233_v3  ;;  %v7241_v19 = vadd.f32 %v18907_v32, %v4714_v18  ;;  %v4716_v26 = vpop.f32.mrb[7].mxu0 }
 0x336   : > { %22196 = vst [vmem:[#allocation7_spill] sm:$0xff] %v18929_v31  ;;  %v7490_v13 = vmul.f32 0.2, %v7234_v33  ;;  %v7242_v49 = vadd.f32 %v18912_v27, %v4716_v26 }
 0x337   : > { %v7497_v16 = vmul.f32 0.2, %v7241_v19  ;;  %5784 = vmatmul.mubr.bf16.gmra.mrb[80].mxu0 %v22197_v24  ;;  %v7745_v5 = vmax.f32 %v7233_v3, %v7489_v44 }
 0x338   : > { %v7498_v35 = vmul.f32 0.2, %v7242_v49  ;;  %13700 = vmatmul.mubr.msk.bf16.gmra.mrb[80].mxu1 %vm4038_vm2, %v18596_v59  ;;  %5793 = vmatprep.mubr.bf16.mxu0 %v22198_v36  ;;  %v7746_v21 = vmax.f32 %v7234_v33, %v7490_v13  ;;  %v22201_v13 = vld [vmem:[#allocation54_spill] sm:$0xff] }
 0x339   : > { %v7753_v0 = vmax.f32 %v7241_v19, %v7497_v16  ;;  %5600 = vmatprep.mubr.bf16.mxu1 %v22062_v1  ;;  %v22202_v16 = vld [vmem:[#allocation55_spill] sm:$0xff] }
 0x33a   : > { %v7754_v20 = vmax.f32 %v7242_v49, %v7498_v35  ;;  %v4720_v18 = vpop.f32.mrb[8].mxu0 }
 0x33b   : > { %v7249_v45 = vadd.f32 %v18907_v32, %v4720_v18  ;;  %v4722_v23 = vpop.f32.mrb[9].mxu0  ;;  %v18939_v41 = vpack.c.bf16 %v7753_v0, %v7745_v5 }
 0x33c   : > { %v7250_v26 = vadd.f32 %v18912_v27, %v4722_v23  ;;  %v4724_v50 = vpop.f32.mrb[10].mxu0  ;;  %v18942_v31 = vpack.c.bf16 %v7754_v20, %v7746_v21 }
 0x33d   : > { %22199 = vst [vmem:[#allocation9_spill] sm:$0xff] %v18939_v41  ;;  %v7505_v59 = vmul.f32 0.2, %v7249_v45  ;;  %v7257_v62 = vadd.f32 %v18907_v32, %v4724_v50  ;;  %v4726_v44 = vpop.f32.mrb[11].mxu0 }
 0x33e   : > { %22200 = vst [vmem:[#allocation13_spill] sm:$0xff] %v18942_v31  ;;  %v7506_v19 = vmul.f32 0.2, %v7250_v26  ;;  %v7258_v3 = vadd.f32 %v18912_v27, %v4726_v44 }
 0x33f   : > { %v7513_v33 = vmul.f32 0.2, %v7257_v62  ;;  %5794 = vmatmul.mubr.bf16.gmra.mrb[84].mxu0 %v22201_v13  ;;  %v7761_v35 = vmax.f32 %v7249_v45, %v7505_v59 }
 0x340   : > { %v7514_v49 = vmul.f32 0.2, %v7258_v3  ;;  %13701 = vmatmul.mubr.msk.bf16.gmra.mrb[84].mxu1 %vm4038_vm2, %v18605_v48  ;;  %5803 = vmatprep.mubr.bf16.mxu0 %v22202_v16  ;;  %v7762_v0 = vmax.f32 %v7250_v26, %v7506_v19  ;;  %v22205_v19 = vld [vmem:[#allocation56_spill] sm:$0xff] }
 0x341   : > { %v7769_v5 = vmax.f32 %v7257_v62, %v7513_v33  ;;  %5610 = vmatprep.mubr.bf16.mxu1 %v22062_v1  ;;  %v22206_v33 = vld [vmem:[#allocation57_spill] sm:$0xff] }
 0x342   : > { %v7770_v21 = vmax.f32 %v7258_v3, %v7514_v49  ;;  %v4730_v50 = vpop.f32.mrb[12].mxu0 }
 0x343   : > { %v7265_v20 = vadd.f32 %v18907_v32, %v4730_v50  ;;  %v4732_v18 = vpop.f32.mrb[13].mxu0  ;;  %v18952_v23 = vpack.c.bf16 %v7769_v5, %v7761_v35 }
 0x344   : > { %v7266_v44 = vadd.f32 %v18912_v27, %v4732_v18  ;;  %v4734_v41 = vpop.f32.mrb[14].mxu0  ;;  %v18955_v31 = vpack.c.bf16 %v7770_v21, %v7762_v0 }
 0x345   : > { %22203 = vst [vmem:[#allocation15_spill] sm:$0xff] %v18952_v23  ;;  %v7521_v48 = vmul.f32 0.2, %v7265_v20  ;;  %v7273_v46 = vadd.f32 %v18907_v32, %v4734_v41  ;;  %v4736_v59 = vpop.f32.mrb[15].mxu0 }
 0x346   : > { %22204 = vst [vmem:[#allocation19_spill] sm:$0xff] %v18955_v31  ;;  %v7522_v62 = vmul.f32 0.2, %v7266_v44  ;;  %v7274_v45 = vadd.f32 %v18912_v27, %v4736_v59 }
 0x347   : > { %v7529_v26 = vmul.f32 0.2, %v7273_v46  ;;  %5804 = vmatmul.mubr.bf16.gmra.mrb[88].mxu0 %v22205_v19  ;;  %v7777_v49 = vmax.f32 %v7265_v20, %v7521_v48 }
 0x348   : > { %v7530_v3 = vmul.f32 0.2, %v7274_v45  ;;  %13702 = vmatmul.mubr.msk.bf16.gmra.mrb[88].mxu1 %vm4038_vm2, %v18614_v11  ;;  %5813 = vmatprep.mubr.bf16.mxu0 %v22206_v33  ;;  %v7778_v5 = vmax.f32 %v7266_v44, %v7522_v62  ;;  %v22209_v62 = vld [vmem:[#allocation58_spill] sm:$0xff] }
 0x349   : > { %v7785_v35 = vmax.f32 %v7273_v46, %v7529_v26  ;;  %5620 = vmatprep.mubr.bf16.mxu1 %v22062_v1  ;;  %v22210_v26 = vld [vmem:[#allocation59_spill] sm:$0xff] }
 0x34a   : > { %v7786_v0 = vmax.f32 %v7274_v45, %v7530_v3  ;;  %v4740_v41 = vpop.f32.mrb[16].mxu0 }
 0x34b   : > { %v7281_v21 = vadd.f32 %v18907_v32, %v4740_v41  ;;  %v4742_v50 = vpop.f32.mrb[17].mxu0  ;;  %v18965_v18 = vpack.c.bf16 %v7785_v35, %v7777_v49 }
 0x34c   : > { %v7282_v59 = vadd.f32 %v18912_v27, %v4742_v50  ;;  %v4744_v23 = vpop.f32.mrb[18].mxu0  ;;  %v18968_v31 = vpack.c.bf16 %v7786_v0, %v7778_v5  ;;  %v1070_v50 = vld [vmem:[%s21700_s2 + $0x870] sm:$0xff] }
 0x34d   : > { %22207 = vst [vmem:[#allocation21_spill] sm:$0xff] %v18965_v18  ;;  %v7289_v11 = vadd.f32 %v18907_v32, %v4744_v23  ;;  %v4746_v33 = vpop.f32.mrb[19].mxu0  ;;  %v7537_v48 = vmul.f32 0.2, %v7281_v21 }
 0x34e   : > { %22208 = vst [vmem:[#allocation26_spill] sm:$0xff] %v18968_v31  ;;  %v7538_v46 = vmul.f32 0.2, %v7282_v59  ;;  %v7290_v20 = vadd.f32 %v18912_v27, %v4746_v33  ;;  %v1066_v33 = vld [vmem:[%s21700_s2 + $0x850] sm:$0xff] }
 0x34f   : > { %v7545_v44 = vmul.f32 0.2, %v7289_v11  ;;  %5814 = vmatmul.mubr.bf16.gmra.mrb[92].mxu0 %v22209_v62  ;;  %v7793_v49 = vmax.f32 %v7281_v21, %v7537_v48  ;;  %v943_v21 = vld [vmem:[%s21700_s2 + $0x478] sm:$0xff]  ;;  %v19000_v31 = vld [vmem:[%s21700_s2 + $0x890] sm:$0xff] }
 0x350   : > { %v7546_v45 = vmul.f32 0.2, %v7290_v20  ;;  %13703 = vmatmul.mubr.msk.bf16.gmra.mrb[92].mxu1 %vm4038_vm2, %v18623_v54  ;;  %5856 = vmatprep.mubr.bf16.mxu0 %v22210_v26  ;;  %v7794_v35 = vmax.f32 %v7282_v59, %v7538_v46  ;;  %v22214_v26 = vcombine.low %v18678_v12, %v18691_v30 }
 0x351   : > { %v7801_v3 = vmax.f32 %v7289_v11, %v7545_v44  ;;  %6435 = vmatprep.mubr.bf16.mxu1 %v17150_v47  ;;  %v939_v47 = vld [vmem:[%s21700_s2 + $0x458] sm:$0xff] }
 0x352   : > { %v7802_v23 = vmax.f32 %v7290_v20, %v7546_v45  ;;  %v4750_v5 = vpop.f32.mrb[20].mxu0  ;;  %v13422_v54 = vcombine.low %v939_v47, %v943_v21 }
 0x353   : > { %v7297_v0 = vadd.f32 %v18907_v32, %v4750_v5  ;;  %v4752_v41 = vpop.f32.mrb[21].mxu0  ;;  %v18993_v48 = vpack.c.bf16 %v7801_v3, %v7793_v49  ;;  %v13423_v49 = vcombine.high %v939_v47, %v943_v21  ;;  %v959_v47 = vld [vmem:[%s21700_s2 + $0x4f8] sm:$0xff] }
 0x354   : > { %v7298_v18 = vadd.f32 %v18912_v27, %v4752_v41  ;;  %v4754_v11 = vpop.f32.mrb[22].mxu0  ;;  %v18991_v59 = vpack.c.bf16 %v7802_v23, %v7794_v35  ;;  %v13549_v41 = vcombine.high %v1066_v33, %v1070_v50  ;;  %v19005_v35 = vld [vmem:[%s21700_s2 + $0x8b0] sm:$0xff]  ;;  %v19011_v23 = vld [vmem:[%s21700_s2 + $0x498] sm:$0xff] }
 0x355   : > { %22212 = vst [vmem:[#allocation39_spill] sm:$0xff] %v18993_v48  ;;  %v7553_v46 = vmul.f32 0.2, %v7297_v0  ;;  %v7305_v20 = vadd.f32 %v18907_v32, %v4754_v11  ;;  %v4756_v44 = vpop.f32.mrb[23].mxu0  ;;  %v19016_v11 = vld [vmem:[%s21700_s2 + $0x4b8] sm:$0xff]  ;;  %v22213_v48 = vcombine.low %v18668_v40, %v18673_v56  ;;  %v13557_v62 = vcombine.high %v19000_v31, %v19005_v35  ;;  %v19034_v40 = vld [vmem:[%s21700_s2 + $0x8d0] sm:$0xff] }
 0x356   : > { %22211 = vst [vmem:[#allocation35_spill] sm:$0xff] %v18991_v59  ;;  %v7554_v45 = vmul.f32 0.2, %v7298_v18  ;;  %v7306_v5 = vadd.f32 %v18912_v27, %v4756_v44  ;;  %v13548_v59 = vcombine.low %v1066_v33, %v1070_v50  ;;  %v19039_v56 = vld [vmem:[%s21700_s2 + $0x8f0] sm:$0xff]  ;;  %v955_v50 = vld [vmem:[%s21700_s2 + $0x4d8] sm:$0xff] }
 0x357   : > { %v7561_v3 = vmul.f32 0.2, %v7305_v20  ;;  %5857 = vmatmul.mubr.bf16.vlgmr.msra.gmra.mrb[32].mxu0 %v17672_v42  ;;  %v7809_v1 = vmax.f32 %v7297_v0, %v7553_v46 }
 0x358   : > { %v7562_v44 = vmul.f32 0.2, %v7306_v5  ;;  %6018 = vmatpush1.bf16.msra.mxu0 %v22213_v48  ;;  %6436 = vmatmul.mubr.bf16.vlgmr.msra.gmra.mrb[96].mxu1 %v17185_v61  ;;  %v7810_v19 = vmax.f32 %v7298_v18, %v7554_v45  ;;  %v13431_v61 = vcombine.high %v19011_v23, %v19016_v11  ;;  %v19050_v18 = vld [vmem:[%s21700_s2 + $0xc30] sm:$0xff] }
 0x359   : > { %v7817_v42 = vmax.f32 %v7305_v20, %v7561_v3  ;;  %6597 = vmatpush1.bf16.msra.mxu1 %v22214_v26  ;;  %5866 = vmatprep.mubr.bf16.mxu0 %v17686_v63  ;;  %v19055_v26 = vld [vmem:[%s21700_s2 + $0x818] sm:$0xff]  ;;  %v13556_v20 = vcombine.low %v19000_v31, %v19005_v35  ;;  %v13430_v3 = vcombine.low %v19011_v23, %v19016_v11  ;;  %v1090_v31 = vld [vmem:[%s21700_s2 + $0x910] sm:$0xff] }
 0x35a   : > { %v7818_v16 = vmax.f32 %v7306_v5, %v7562_v44  ;;  %v4760_v13 = vpop.f32.mrb[24].mxu0  ;;  %6019 = vmatprep.subr.bf16.mxu0 %v13549_v41  ;;  %6445 = vmatprep.mubr.bf16.mxu1 %v17200_v8  ;;  %v19045_v8 = vld [vmem:[%s21700_s2 + $0xc10] sm:$0xff]  ;;  %v963_v23 = vld [vmem:[%s21700_s2 + $0x518] sm:$0xff] }
 0x35b   : > { %v7313_v12 = vadd.f32 %v18907_v32, %v4760_v13  ;;  %v4762_v30 = vpop.f32.mrb[25].mxu0  ;;  %6598 = vmatprep.subr.bf16.mxu1 %v13423_v49  ;;  %v19057_v0 = vpack.c.bf16 %v7817_v42, %v7809_v1  ;;  %v19071_v42 = vld [vmem:[%s21700_s2 + $0x838] sm:$0xff]  ;;  %v13564_v49 = vcombine.low %v19034_v40, %v19039_v56 }
 0x35c   : > { %v7314_v13 = vadd.f32 %v18912_v27, %v4762_v30  ;;  %v4764_v33 = vpop.f32.mrb[26].mxu0  ;;  %6020 = vmatpush1.bf16.msra.mxu0 %v13548_v59  ;;  %v19073_v1 = vpack.c.bf16 %v7818_v16, %v7810_v19  ;;  %v13565_v16 = vcombine.high %v19034_v40, %v19039_v56  ;;  %v967_v11 = vld [vmem:[%s21700_s2 + $0x538] sm:$0xff]  ;;  %v13438_v30 = vcombine.low %v955_v50, %v959_v47 }
 0x35d   : > { %22215 = vst [vmem:[#allocation41_spill] sm:$0xff] %v19057_v0  ;;  %v7569_v48 = vmul.f32 0.2, %v7313_v12  ;;  %v7321_v59 = vadd.f32 %v18907_v32, %v4764_v33  ;;  %v4766_v46 = vpop.f32.mrb[27].mxu0  ;;  %6599 = vmatpush1.bf16.msra.mxu1 %v13422_v54  ;;  %6021 = vmatprep.subr.bf16.mxu0 %v13557_v62  ;;  %v13439_v54 = vcombine.high %v955_v50, %v959_v47  ;;  %v1094_v62 = vld [vmem:[%s21700_s2 + $0x930] sm:$0xff] }
 0x35e   : > { %22216 = vst [vmem:[#allocation45_spill] sm:$0xff] %v19073_v1  ;;  %v7570_v5 = vmul.f32 0.2, %v7314_v13  ;;  %v7322_v41 = vadd.f32 %v18912_v27, %v4766_v46  ;;  %6600 = vmatprep.subr.bf16.mxu1 %v13431_v61  ;;  %v13573_v40 = vcombine.high %v1090_v31, %v1094_v62  ;;  %v13447_v21 = vcombine.high %v963_v23, %v967_v11 }
 0x35f   : > { %v7577_v19 = vmul.f32 0.2, %v7321_v59  ;;  %5867 = vmatmul.mubr.bf16.gmra.mrb[36].mxu0 %v17714_v53  ;;  %v7825_v44 = vmax.f32 %v7313_v12, %v7569_v48  ;;  %v1098_v12 = vld [vmem:[%s21700_s2 + $0x950] sm:$0xff]  ;;  %v971_v48 = vld [vmem:[%s21700_s2 + $0x558] sm:$0xff] }
 0x360   : > { %v7578_v35 = vmul.f32 0.2, %v7322_v41  ;;  %6446 = vmatmul.mubr.bf16.gmra.mrb[100].mxu1 %v22174_v37  ;;  %5876 = vmatprep.mubr.bf16.mxu0 %v17722_v55  ;;  %v7826_v37 = vmax.f32 %v7314_v13, %v7570_v5 }
 0x361   : > { %v7833_v61 = vmax.f32 %v7321_v59, %v7577_v19  ;;  %6455 = vmatprep.mubr.bf16.mxu1 %v22175_v6  ;;  %6022 = vmatpush1.bf16.msra.mxu0 %v13556_v20  ;;  %v1102_v6 = vld [vmem:[%s21700_s2 + $0x970] sm:$0xff]  ;;  %v975_v59 = vld [vmem:[%s21700_s2 + $0x578] sm:$0xff] }
 0x362   : > { %v7834_v33 = vmax.f32 %v7322_v41, %v7578_v35  ;;  %v4770_v46 = vpop.f32.mrb[28].mxu0  ;;  %6601 = vmatpush1.bf16.msra.mxu1 %v13430_v3  ;;  %6023 = vmatprep.subr.bf16.mxu0 %v13565_v16  ;;  %v13572_v16 = vcombine.low %v1090_v31, %v1094_v62  ;;  %v13581_v35 = vcombine.high %v1098_v12, %v1102_v6  ;;  %v1110_v31 = vld [vmem:[%s21700_s2 + $0x9b0] sm:$0xff] }
 0x363   : > { %v7329_v56 = vadd.f32 %v18907_v32, %v4770_v46  ;;  %v4772_v45 = vpop.f32.mrb[29].mxu0  ;;  %6602 = vmatprep.subr.bf16.mxu1 %v13439_v54  ;;  %v19110_v50 = vpack.c.bf16 %v7833_v61, %v7825_v44  ;;  %v13446_v54 = vcombine.low %v963_v23, %v967_v11  ;;  %v22219_v61 = vld [vmem:[#allocation61_spill] sm:$0xff]  ;;  %v13455_v46 = vcombine.high %v971_v48, %v975_v59 }
 0x364   : > { %v7330_v13 = vadd.f32 %v18912_v27, %v4772_v45  ;;  %v4774_v47 = vpop.f32.mrb[30].mxu0  ;;  %v19119_v20 = vpack.c.bf16 %v7834_v33, %v7826_v37  ;;  %v1106_v37 = vld [vmem:[%s21700_s2 + $0x990] sm:$0xff]  ;;  %v13580_v23 = vcombine.low %v1098_v12, %v1102_v6  ;;  %v979_v11 = vld [vmem:[%s21700_s2 + $0x598] sm:$0xff]  ;;  %v22221_v6 = vld [vmem:[#allocation6_spill] sm:$0xff] }
 0x365   : > { %22217 = vst [vmem:[#allocation47_spill] sm:$0xff] %v19110_v50  ;;  %v7585_v5 = vmul.f32 0.2, %v7329_v56  ;;  %v7337_v41 = vadd.f32 %v18907_v32, %v4774_v47  ;;  %v4776_v3 = vpop.f32.mrb[31].mxu0  ;;  %6024 = vmatpush1.bf16.msra.mxu0 %v13564_v49  ;;  %v22220_v49 = vld [vmem:[#allocation62_spill] sm:$0xff]  ;;  %v13589_v12 = vcombine.high %v1106_v37, %v1110_v31 }
 0x366   : > { %22218 = vst [vmem:[#allocation50_spill] sm:$0xff] %v19119_v20  ;;  %v7586_v19 = vmul.f32 0.2, %v7330_v13  ;;  %v7338_v45 = vadd.f32 %v18912_v27, %v4776_v3  ;;  %6603 = vmatpush1.bf16.msra.mxu1 %v13438_v30  ;;  %6025 = vmatprep.subr.bf16.mxu0 %v13573_v40  ;;  %v13454_v40 = vcombine.low %v971_v48, %v975_v59 }
 0x367   : > { %v7593_v44 = vmul.f32 0.2, %v7337_v41  ;;  %5877 = vmatmul.mubr.bf16.gmra.mrb[40].mxu0 %v22219_v61  ;;  %6604 = vmatprep.subr.bf16.mxu1 %v13447_v21  ;;  %v983_v21 = vld [vmem:[%s21700_s2 + $0x5b8] sm:$0xff]  ;;  %v7841_v30 = vmax.f32 %v7329_v56, %v7585_v5  ;;  %v1114_v56 = vld [vmem:[%s21700_s2 + $0x9d0] sm:$0xff] }
 0x368   : > { %v7594_v62 = vmul.f32 0.2, %v7338_v45  ;;  %6456 = vmatmul.mubr.bf16.gmra.mrb[104].mxu1 %v22176_v51  ;;  %5886 = vmatprep.mubr.bf16.mxu0 %v22220_v49  ;;  %v7842_v47 = vmax.f32 %v7330_v13, %v7586_v19  ;;  %v13463_v0 = vcombine.high %v979_v11, %v983_v21  ;;  %v22223_v13 = vld [vmem:[#allocation8_spill] sm:$0xff] }
 0x369   : > { %v7849_v33 = vmax.f32 %v7337_v41, %v7593_v44  ;;  %6465 = vmatprep.mubr.bf16.mxu1 %v22177_v25  ;;  %6026 = vmatpush1.bf16.msra.mxu0 %v13572_v16  ;;  %v1118_v25 = vld [vmem:[%s21700_s2 + $0x9f0] sm:$0xff]  ;;  %v987_v41 = vld [vmem:[%s21700_s2 + $0x5d8] sm:$0xff] }
 0x36a   : > { %v7850_v3 = vmax.f32 %v7338_v45, %v7594_v62  ;;  %v4780_v51 = vpop.f32.mrb[96].mxu0  ;;  %6605 = vmatpush1.bf16.msra.mxu1 %v13446_v54  ;;  %6027 = vmatprep.subr.bf16.mxu0 %v13581_v35  ;;  %v991_v16 = vld [vmem:[%s21700_s2 + $0x5f8] sm:$0xff]  ;;  %v22225_v54 = vld [vmem:[#allocation10_spill] sm:$0xff]  ;;  %v13462_v62 = vcombine.low %v979_v11, %v983_v21  ;;  %v22228_v21 = vld [vmem:[#allocation64_spill] sm:$0xff] }
 0x36b   : > { %v14380_v50 = vadd.f32 %v4780_v51, %v22221_v6  ;;  %v4782_v20 = vpop.f32.mrb[97].mxu0  ;;  %6606 = vmatprep.subr.bf16.mxu1 %v13455_v46  ;;  %v19146_v48 = vpack.c.bf16 %v7849_v33, %v7841_v30  ;;  %v13588_v46 = vcombine.low %v1106_v37, %v1110_v31  ;;  %v22226_v30 = vld [vmem:[#allocation11_spill] sm:$0xff]  ;;  %v13597_v51 = vcombine.high %v1114_v56, %v1118_v25  ;;  %v1126_v37 = vld [vmem:[%s21700_s2 + $0xa30] sm:$0xff] }
 0x36c   : > { %v14381_v59 = vadd.f32 %v4782_v20, %v22223_v13  ;;  %v4784_v5 = vpop.f32.mrb[98].mxu0  ;;  %v19155_v19 = vpack.c.bf16 %v7850_v3, %v7842_v47  ;;  %v22227_v47 = vld [vmem:[#allocation63_spill] sm:$0xff] }
 0x36d   : > { %22222 = vst [vmem:[#allocation51_spill] sm:$0xff] %v19146_v48  ;;  %v7345_v45 = vadd.f32 %v14380_v50, %v18907_v32  ;;  %v14382_v35 = vadd.f32 %v4784_v5, %v22225_v54  ;;  %v4786_v44 = vpop.f32.mrb[99].mxu0  ;;  %6028 = vmatpush1.bf16.msra.mxu0 %v13580_v23  ;;  %v13471_v50 = vcombine.high %v987_v41, %v991_v16  ;;  %v1122_v23 = vld [vmem:[%s21700_s2 + $0xa10] sm:$0xff] }
 0x36e   : > { %22224 = vst [vmem:[#allocation52_spill] sm:$0xff] %v19155_v19  ;;  %v7346_v20 = vadd.f32 %v14381_v59, %v18912_v27  ;;  %v14383_v33 = vadd.f32 %v4786_v44, %v22226_v30  ;;  %6607 = vmatpush1.bf16.msra.mxu1 %v13454_v40  ;;  %6029 = vmatprep.subr.bf16.mxu0 %v13589_v12  ;;  %v999_v40 = vld [vmem:[%s21700_s2 + $0x638] sm:$0xff]  ;;  %v19182_v44 = vld [vmem:[%s21700_s2 + $0xa50] sm:$0xff] }
 0x36f   : > { %v7601_v6 = vmul.f32 0.2, %v7345_v45  ;;  %v7353_v13 = vadd.f32 %v14382_v35, %v18907_v32  ;;  %5887 = vmatmul.mubr.bf16.gmra.mrb[44].mxu0 %v22227_v47  ;;  %6608 = vmatprep.subr.bf16.mxu1 %v13463_v0  ;;  %v995_v0 = vld [vmem:[%s21700_s2 + $0x618] sm:$0xff]  ;;  %v13596_v12 = vcombine.low %v1114_v56, %v1118_v25  ;;  %v13604_v54 = vcombine.low %v1122_v23, %v1126_v37  ;;  %v19187_v30 = vld [vmem:[%s21700_s2 + $0xa70] sm:$0xff] }
 0x370   : > { %v7602_v31 = vmul.f32 0.2, %v7346_v20  ;;  %v7354_v11 = vadd.f32 %v14383_v33, %v18912_v27  ;;  %6466 = vmatmul.mubr.bf16.gmra.mrb[108].mxu1 %v22178_v7  ;;  %5896 = vmatprep.mubr.bf16.mxu0 %v22228_v21  ;;  %v13470_v7 = vcombine.low %v987_v41, %v991_v16  ;;  %v13605_v35 = vcombine.high %v1122_v23, %v1126_v37  ;;  %v22229_v56 = vld [vmem:[#allocation12_spill] sm:$0xff]  ;;  %v1003_v19 = vld [vmem:[%s21700_s2 + $0x658] sm:$0xff] }
 0x371   : > { %v7609_v3 = vmul.f32 0.2, %v7353_v13  ;;  %6475 = vmatprep.mubr.bf16.mxu1 %v22179_v28  ;;  %6030 = vmatpush1.bf16.msra.mxu0 %v13588_v46  ;;  %v7857_v28 = vmax.f32 %v7345_v45, %v7601_v6  ;;  %v13478_v48 = vcombine.low %v995_v0, %v999_v40  ;;  %v1007_v45 = vld [vmem:[%s21700_s2 + $0x678] sm:$0xff] }
 0x372   : > { %v7610_v59 = vmul.f32 0.2, %v7354_v11  ;;  %v4790_v5 = vpop.f32.mrb[100].mxu0  ;;  %6609 = vmatpush1.bf16.msra.mxu1 %v13462_v62  ;;  %6031 = vmatprep.subr.bf16.mxu0 %v13597_v51  ;;  %v13479_v62 = vcombine.high %v995_v0, %v999_v40  ;;  %v7858_v41 = vmax.f32 %v7346_v20, %v7602_v31  ;;  %v22230_v51 = vld [vmem:[#allocation14_spill] sm:$0xff]  ;;  %v13613_v20 = vcombine.high %v19182_v44, %v19187_v30  ;;  %v22233_v0 = vld [vmem:[#allocation17_spill] sm:$0xff] }
 0x373   : > { %v7865_v46 = vmax.f32 %v7353_v13, %v7609_v3  ;;  %v14384_v25 = vadd.f32 %v4790_v5, %v22229_v56  ;;  %v4792_v33 = vpop.f32.mrb[101].mxu0  ;;  %6610 = vmatprep.subr.bf16.mxu1 %v13471_v50  ;;  %v22231_v13 = vld [vmem:[#allocation16_spill] sm:$0xff] }
 0x374   : > { %v7866_v16 = vmax.f32 %v7354_v11, %v7610_v59  ;;  %v14385_v23 = vadd.f32 %v4792_v33, %v22230_v51  ;;  %v4794_v37 = vpop.f32.mrb[102].mxu0  ;;  %v13612_v51 = vcombine.low %v19182_v44, %v19187_v30  ;;  %v22237_v44 = vld [vmem:[#allocation18_spill] sm:$0xff] }
 0x375   : > { %v7361_v6 = vadd.f32 %v14384_v25, %v18907_v32  ;;  %v14386_v3 = vadd.f32 %v4794_v37, %v22231_v13  ;;  %v4796_v50 = vpop.f32.mrb[103].mxu0  ;;  %6032 = vmatpush1.bf16.msra.mxu0 %v13596_v12  ;;  %v19201_v31 = vpack.c.bf16 %v7865_v46, %v7857_v28  ;;  %v22235_v25 = vld [vmem:[#allocation65_spill] sm:$0xff]  ;;  %v13487_v12 = vcombine.high %v1003_v19, %v1007_v45  ;;  %v1138_v28 = vld [vmem:[%s21700_s2 + $0xa90] sm:$0xff] }
 0x376   : > { %v7362_v11 = vadd.f32 %v14385_v23, %v18912_v27  ;;  %v14387_v40 = vadd.f32 %v4796_v50, %v22233_v0  ;;  %6611 = vmatpush1.bf16.msra.mxu1 %v13470_v7  ;;  %6033 = vmatprep.subr.bf16.mxu0 %v13605_v35  ;;  %v19205_v59 = vpack.c.bf16 %v7866_v16, %v7858_v41  ;;  %v1142_v46 = vld [vmem:[%s21700_s2 + $0xab0] sm:$0xff]  ;;  %v22236_v35 = vld [vmem:[#allocation66_spill] sm:$0xff]  ;;  %v1015_v41 = vld [vmem:[%s21700_s2 + $0x6b8] sm:$0xff] }
 0x377   : > { %22232 = vst [vmem:[#allocation53_spill] sm:$0xff] %v19201_v31  ;;  %v7617_v5 = vmul.f32 0.2, %v7361_v6  ;;  %v7369_v56 = vadd.f32 %v14386_v3, %v18907_v32  ;;  %5897 = vmatmul.mubr.bf16.gmra.mrb[48].mxu0 %v22235_v25  ;;  %6612 = vmatprep.subr.bf16.mxu1 %v13479_v62  ;;  %v1011_v62 = vld [vmem:[%s21700_s2 + $0x698] sm:$0xff]  ;;  %v13620_v13 = vcombine.low %v1138_v28, %v1142_v46  ;;  %v19230_v50 = vld [vmem:[%s21700_s2 + $0xad0] sm:$0xff] }
 0x378   : > { %22234 = vst [vmem:[#allocation61_spill] sm:$0xff] %v19205_v59  ;;  %v7618_v33 = vmul.f32 0.2, %v7362_v11  ;;  %v7370_v7 = vadd.f32 %v14387_v40, %v18912_v27  ;;  %6476 = vmatmul.mubr.bf16.gmra.mrb[112].mxu1 %v22180_v14  ;;  %5906 = vmatprep.mubr.bf16.mxu0 %v22236_v35  ;;  %v13486_v14 = vcombine.low %v1003_v19, %v1007_v45  ;;  %v1019_v59 = vld [vmem:[%s21700_s2 + $0x6d8] sm:$0xff] }
 0x379   : > { %v7625_v16 = vmul.f32 0.2, %v7369_v56  ;;  %6485 = vmatprep.mubr.bf16.mxu1 %v22181_v29  ;;  %6034 = vmatpush1.bf16.msra.mxu0 %v13604_v54  ;;  %v13621_v3 = vcombine.high %v1138_v28, %v1142_v46  ;;  %v19235_v29 = vld [vmem:[%s21700_s2 + $0xaf0] sm:$0xff]  ;;  %v7873_v54 = vmax.f32 %v7361_v6, %v7617_v5  ;;  %v13494_v31 = vcombine.low %v1011_v62, %v1015_v41  ;;  %v1023_v6 = vld [vmem:[%s21700_s2 + $0x6f8] sm:$0xff] }
 0x37a   : > { %v7626_v23 = vmul.f32 0.2, %v7370_v7  ;;  %v4800_v37 = vpop.f32.mrb[104].mxu0  ;;  %6613 = vmatpush1.bf16.msra.mxu1 %v13478_v48  ;;  %6035 = vmatprep.subr.bf16.mxu0 %v13613_v20  ;;  %v13495_v48 = vcombine.high %v1011_v62, %v1015_v41  ;;  %v7874_v19 = vmax.f32 %v7362_v11, %v7618_v33  ;;  %v22238_v20 = vld [vmem:[#allocation20_spill] sm:$0xff]  ;;  %v13629_v11 = vcombine.high %v19230_v50, %v19235_v29  ;;  %v22241_v62 = vld [vmem:[#allocation23_spill] sm:$0xff] }
 0x37b   : > { %v7881_v0 = vmax.f32 %v7369_v56, %v7625_v16  ;;  %v14388_v30 = vadd.f32 %v4800_v37, %v22237_v44  ;;  %v4802_v40 = vpop.f32.mrb[105].mxu0  ;;  %6614 = vmatprep.subr.bf16.mxu1 %v13487_v12  ;;  %v22239_v56 = vld [vmem:[#allocation22_spill] sm:$0xff] }
 0x37c   : > { %v7882_v45 = vmax.f32 %v7370_v7, %v7626_v23  ;;  %v14389_v28 = vadd.f32 %v4802_v40, %v22238_v20  ;;  %v4804_v46 = vpop.f32.mrb[106].mxu0  ;;  %v13628_v20 = vcombine.low %v19230_v50, %v19235_v29  ;;  %v22245_v50 = vld [vmem:[#allocation24_spill] sm:$0xff] }
 0x37d   : > { %v7377_v5 = vadd.f32 %v14388_v30, %v18907_v32  ;;  %v14390_v16 = vadd.f32 %v4804_v46, %v22239_v56  ;;  %v4806_v12 = vpop.f32.mrb[107].mxu0  ;;  %6036 = vmatpush1.bf16.msra.mxu0 %v13612_v51  ;;  %v19249_v33 = vpack.c.bf16 %v7881_v0, %v7873_v54  ;;  %v22243_v30 = vld [vmem:[#allocation67_spill] sm:$0xff]  ;;  %v13503_v51 = vcombine.high %v1019_v59, %v1023_v6  ;;  %v1154_v54 = vld [vmem:[%s21700_s2 + $0xb10] sm:$0xff] }
 0x37e   : > { %v7378_v7 = vadd.f32 %v14389_v28, %v18912_v27  ;;  %v14391_v41 = vadd.f32 %v4806_v12, %v22241_v62  ;;  %6615 = vmatpush1.bf16.msra.mxu1 %v13486_v14  ;;  %6037 = vmatprep.subr.bf16.mxu0 %v13621_v3  ;;  %v19253_v23 = vpack.c.bf16 %v7882_v45, %v7874_v19  ;;  %v1158_v0 = vld [vmem:[%s21700_s2 + $0xb30] sm:$0xff]  ;;  %v1031_v19 = vld [vmem:[%s21700_s2 + $0x738] sm:$0xff] }
 0x37f   : > { %22240 = vst [vmem:[#allocation62_spill] sm:$0xff] %v19249_v33  ;;  %v7633_v37 = vmul.f32 0.2, %v7377_v5  ;;  %v7385_v44 = vadd.f32 %v14390_v16, %v18907_v32  ;;  %5907 = vmatmul.mubr.bf16.gmra.mrb[52].mxu0 %v22243_v30  ;;  %6616 = vmatprep.subr.bf16.mxu1 %v13495_v48  ;;  %v22244_v3 = vld [vmem:[#allocation68_spill] sm:$0xff]  ;;  %v1027_v48 = vld [vmem:[%s21700_s2 + $0x718] sm:$0xff]  ;;  %v13636_v56 = vcombine.low %v1154_v54, %v1158_v0 }
 0x380   : > { %22242 = vst [vmem:[#allocation6_spill] sm:$0xff] %v19253_v23  ;;  %v7634_v40 = vmul.f32 0.2, %v7378_v7  ;;  %v7386_v14 = vadd.f32 %v14391_v41, %v18912_v27  ;;  %6486 = vmatmul.mubr.bf16.gmra.mrb[116].mxu1 %v22182_v57  ;;  %5916 = vmatprep.mubr.bf16.mxu0 %v22244_v3  ;;  %v13502_v57 = vcombine.low %v1019_v59, %v1023_v6  ;;  %v19278_v12 = vld [vmem:[%s21700_s2 + $0xb50] sm:$0xff]  ;;  %v1035_v23 = vld [vmem:[%s21700_s2 + $0x758] sm:$0xff] }
 0x381   : > { %v7641_v45 = vmul.f32 0.2, %v7385_v44  ;;  %6495 = vmatprep.mubr.bf16.mxu1 %v22183_v10  ;;  %6038 = vmatpush1.bf16.msra.mxu0 %v13620_v13  ;;  %v13637_v16 = vcombine.high %v1154_v54, %v1158_v0  ;;  %v19283_v10 = vld [vmem:[%s21700_s2 + $0xb70] sm:$0xff]  ;;  %v7889_v13 = vmax.f32 %v7377_v5, %v7633_v37  ;;  %v13510_v33 = vcombine.low %v1027_v48, %v1031_v19  ;;  %v1039_v5 = vld [vmem:[%s21700_s2 + $0x778] sm:$0xff] }
 0x382   : > { %v7642_v28 = vmul.f32 0.2, %v7386_v14  ;;  %v4810_v46 = vpop.f32.mrb[108].mxu0  ;;  %6617 = vmatpush1.bf16.msra.mxu1 %v13494_v31  ;;  %6039 = vmatprep.subr.bf16.mxu0 %v13629_v11  ;;  %v13511_v31 = vcombine.high %v1027_v48, %v1031_v19  ;;  %v7890_v59 = vmax.f32 %v7378_v7, %v7634_v40  ;;  %v22246_v11 = vld [vmem:[#allocation25_spill] sm:$0xff]  ;;  %v13645_v7 = vcombine.high %v19278_v12, %v19283_v10  ;;  %v22249_v48 = vld [vmem:[#allocation28_spill] sm:$0xff] }
 0x383   : > { %v7897_v62 = vmax.f32 %v7385_v44, %v7641_v45  ;;  %v14392_v29 = vadd.f32 %v4810_v46, %v22245_v50  ;;  %v4812_v41 = vpop.f32.mrb[109].mxu0  ;;  %6618 = vmatprep.subr.bf16.mxu1 %v13503_v51  ;;  %v22247_v44 = vld [vmem:[#allocation27_spill] sm:$0xff] }
 0x384   : > { %v7898_v6 = vmax.f32 %v7386_v14, %v7642_v28  ;;  %v14393_v54 = vadd.f32 %v4812_v41, %v22246_v11  ;;  %v4814_v0 = vpop.f32.mrb[110].mxu0  ;;  %v13644_v11 = vcombine.low %v19278_v12, %v19283_v10 }
 0x385   : > { %v7393_v37 = vadd.f32 %v14392_v29, %v18907_v32  ;;  %v14394_v45 = vadd.f32 %v4814_v0, %v22247_v44  ;;  %v4816_v51 = vpop.f32.mrb[111].mxu0  ;;  %6040 = vmatpush1.bf16.msra.mxu0 %v13628_v20  ;;  %v19297_v40 = vpack.c.bf16 %v7897_v62, %v7889_v13  ;;  %v22251_v29 = vld [vmem:[#allocation69_spill] sm:$0xff]  ;;  %v13519_v20 = vcombine.high %v1035_v23, %v1039_v5  ;;  %v1170_v13 = vld [vmem:[%s21700_s2 + $0xb90] sm:$0xff] }
 0x386   : > { %v7394_v14 = vadd.f32 %v14393_v54, %v18912_v27  ;;  %v14395_v19 = vadd.f32 %v4816_v51, %v22249_v48  ;;  %6619 = vmatpush1.bf16.msra.mxu1 %v13502_v57  ;;  %6041 = vmatprep.subr.bf16.mxu0 %v13637_v16  ;;  %v19301_v28 = vpack.c.bf16 %v7898_v6, %v7890_v59  ;;  %v1174_v62 = vld [vmem:[%s21700_s2 + $0xbb0] sm:$0xff]  ;;  %v22252_v16 = vld [vmem:[#allocation70_spill] sm:$0xff]  ;;  %v1047_v59 = vld [vmem:[%s21700_s2 + $0x7b8] sm:$0xff] }
 0x387   : > { %22248 = vst [vmem:[#allocation8_spill] sm:$0xff] %v19297_v40  ;;  %v7649_v46 = vmul.f32 0.2, %v7393_v37  ;;  %v7401_v50 = vadd.f32 %v14394_v45, %v18907_v32  ;;  %5917 = vmatmul.mubr.bf16.gmra.mrb[56].mxu0 %v22251_v29  ;;  %6620 = vmatprep.subr.bf16.mxu1 %v13511_v31  ;;  %v1043_v31 = vld [vmem:[%s21700_s2 + $0x798] sm:$0xff]  ;;  %v13652_v44 = vcombine.low %v1170_v13, %v1174_v62  ;;  %v1178_v51 = vld [vmem:[%s21700_s2 + $0xbd0] sm:$0xff] }
 0x388   : > { %22250 = vst [vmem:[#allocation10_spill] sm:$0xff] %v19301_v28  ;;  %v7650_v41 = vmul.f32 0.2, %v7394_v14  ;;  %v7402_v57 = vadd.f32 %v14395_v19, %v18912_v27  ;;  %6496 = vmatmul.mubr.bf16.gmra.mrb[120].mxu1 %v17440_v2  ;;  %5926 = vmatprep.mubr.bf16.mxu0 %v22252_v16  ;;  %v13518_v2 = vcombine.low %v1035_v23, %v1039_v5  ;;  %v1182_v48 = vld [vmem:[%s21700_s2 + $0xbf0] sm:$0xff]  ;;  %v22253_v19 = vld [vmem:[#allocation29_spill] sm:$0xff]  ;;  %v22254_v23 = vld [vmem:[#allocation30_spill] sm:$0xff] }
 0x389   : > { %v7657_v6 = vmul.f32 0.2, %v7401_v50  ;;  %6505 = vmatprep.mubr.bf16.mxu1 %v22184_v34  ;;  %6042 = vmatpush1.bf16.msra.mxu0 %v13636_v56  ;;  %v13653_v45 = vcombine.high %v1170_v13, %v1174_v62  ;;  %v7905_v34 = vmax.f32 %v7393_v37, %v7649_v46  ;;  %v13527_v10 = vcombine.high %v1043_v31, %v1047_v59  ;;  %v1051_v28 = vld [vmem:[%s21700_s2 + $0x7d8] sm:$0xff] }
 0x38a   : > { %v7658_v54 = vmul.f32 0.2, %v7402_v57  ;;  %v4820_v0 = vpop.f32.mrb[112].mxu0  ;;  %6621 = vmatpush1.bf16.msra.mxu1 %v13510_v33  ;;  %6043 = vmatprep.subr.bf16.mxu0 %v13645_v7  ;;  %v7906_v33 = vmax.f32 %v7394_v14, %v7650_v41  ;;  %v13526_v62 = vcombine.low %v1043_v31, %v1047_v59  ;;  %v1055_v37 = vld [vmem:[%s21700_s2 + $0x7f8] sm:$0xff]  ;;  %v13661_v14 = vcombine.high %v1178_v51, %v1182_v48  ;;  %v22257_v31 = vld [vmem:[#allocation32_spill] sm:$0xff] }
 0x38b   : > { %v7913_v56 = vmax.f32 %v7401_v50, %v7657_v6  ;;  %v14396_v40 = vadd.f32 %v4820_v0, %v22253_v19  ;;  %v4822_v12 = vpop.f32.mrb[113].mxu0  ;;  %6622 = vmatprep.subr.bf16.mxu1 %v13519_v20  ;;  %v22255_v50 = vld [vmem:[#allocation31_spill] sm:$0xff] }
 0x38c   : > { %v7914_v7 = vmax.f32 %v7402_v57, %v7658_v54  ;;  %v14397_v5 = vadd.f32 %v4822_v12, %v22254_v23  ;;  %v4824_v13 = vpop.f32.mrb[114].mxu0  ;;  %v22259_v12 = vld [vmem:[#allocation71_spill] sm:$0xff] }
 0x38d   : > { %v7409_v46 = vadd.f32 %v14396_v40, %v18907_v32  ;;  %v14398_v6 = vadd.f32 %v4824_v13, %v22255_v50  ;;  %v4826_v20 = vpop.f32.mrb[115].mxu0  ;;  %6044 = vmatpush1.bf16.msra.mxu0 %v13644_v11  ;;  %v19339_v41 = vpack.c.bf16 %v7913_v56, %v7905_v34  ;;  %v13535_v40 = vcombine.high %v1051_v28, %v1055_v37  ;;  %v22260_v34 = vld [vmem:[#allocation72_spill] sm:$0xff]  ;;  %v22261_v50 = vld [vmem:[#allocation33_spill] sm:$0xff] }
 0x38e   : > { %v7410_v57 = vadd.f32 %v14397_v5, %v18912_v27  ;;  %v14399_v59 = vadd.f32 %v4826_v20, %v22257_v31  ;;  %6623 = vmatpush1.bf16.msra.mxu1 %v13518_v2  ;;  %6045 = vmatprep.subr.bf16.mxu0 %v13653_v45  ;;  %v19343_v54 = vpack.c.bf16 %v7914_v7, %v7906_v33 }
 0x38f   : > { %22256 = vst [vmem:[#allocation11_spill] sm:$0xff] %v19339_v41  ;;  %v7665_v0 = vmul.f32 0.2, %v7409_v46  ;;  %v7417_v19 = vadd.f32 %v14398_v6, %v18907_v32  ;;  %5927 = vmatmul.mubr.bf16.gmra.mrb[60].mxu0 %v22259_v12  ;;  %6624 = vmatprep.subr.bf16.mxu1 %v13527_v10  ;;  %v13660_v2 = vcombine.low %v1178_v51, %v1182_v48  ;;  %v22262_v51 = vld [vmem:[#allocation34_spill] sm:$0xff] }
 0x390   : > { %22258 = vst [vmem:[#allocation63_spill] sm:$0xff] %v19343_v54  ;;  %v7666_v23 = vmul.f32 0.2, %v7410_v57  ;;  %v7418_v11 = vadd.f32 %v14399_v59, %v18912_v27  ;;  %6506 = vmatmul.mubr.bf16.gmra.mrb[124].mxu1 %v17485_v38  ;;  %5936 = vmatprep.mubr.bf16.mxu0 %v22260_v34  ;;  %v13534_v7 = vcombine.low %v1051_v28, %v1055_v37  ;;  %v22263_v28 = vld [vmem:[#allocation36_spill] sm:$0xff] }
 0x391   : > { %v7673_v56 = vmul.f32 0.2, %v7417_v19  ;;  %6515 = vmatprep.mubr.bf16.mxu1 %v17495_v60  ;;  %6046 = vmatpush1.bf16.msra.mxu0 %v13652_v44  ;;  %v13669_v10 = vcombine.high %v19045_v8, %v19050_v18  ;;  %v7921_v5 = vmax.f32 %v7409_v46, %v7665_v0  ;;  %v13543_v20 = vcombine.high %v19055_v26, %v19071_v42  ;;  %v22265_v0 = vld [vmem:[#allocation37_spill] sm:$0xff] }
 0x392   : > { %v7674_v45 = vmul.f32 0.2, %v7418_v11  ;;  %v4830_v33 = vpop.f32.mrb[116].mxu0  ;;  %6625 = vmatpush1.bf16.msra.mxu1 %v13526_v62  ;;  %6047 = vmatprep.subr.bf16.mxu0 %v13661_v14  ;;  %v7922_v60 = vmax.f32 %v7410_v57, %v7666_v23 }
 0x393   : > { %v7929_v13 = vmax.f32 %v7417_v19, %v7673_v56  ;;  %v14400_v6 = vadd.f32 %v4830_v33, %v22261_v50  ;;  %v4832_v38 = vpop.f32.mrb[117].mxu0  ;;  %6626 = vmatprep.subr.bf16.mxu1 %v13535_v40  ;;  %v22269_v50 = vld [vmem:[#allocation38_spill] sm:$0xff] }
 0x394   : > { %v7930_v44 = vmax.f32 %v7418_v11, %v7674_v45  ;;  %v14401_v48 = vadd.f32 %v4832_v38, %v22262_v51  ;;  %v4834_v31 = vpop.f32.mrb[118].mxu0  ;;  %v22267_v11 = vld [vmem:[#allocation73_spill] sm:$0xff] }
 0x395   : > { %v7425_v62 = vadd.f32 %v14400_v6, %v18907_v32  ;;  %v14402_v37 = vadd.f32 %v4834_v31, %v22263_v28  ;;  %v4836_v14 = vpop.f32.mrb[119].mxu0  ;;  %6048 = vmatpush1.bf16.msra.mxu0 %v13660_v2  ;;  %v19359_v46 = vpack.c.bf16 %v7929_v13, %v7921_v5  ;;  %v22268_v2 = vld [vmem:[#allocation74_spill] sm:$0xff] }
 0x396   : > { %v7426_v59 = vadd.f32 %v14401_v48, %v18912_v27  ;;  %v14403_v19 = vadd.f32 %v4836_v14, %v22265_v0  ;;  %6627 = vmatpush1.bf16.msra.mxu1 %v13534_v7  ;;  %6210 = vmatprep.subr.bf16.mxu0 %v13669_v10  ;;  %v19363_v40 = vpack.c.bf16 %v7930_v44, %v7922_v60  ;;  %v22273_v0 = vld [vmem:[#allocation43_spill] sm:$0xff] }
 0x397   : > { %22264 = vst [vmem:[#allocation64_spill] sm:$0xff] %v19359_v46  ;;  %v7681_v57 = vmul.f32 0.2, %v7425_v62  ;;  %v7433_v23 = vadd.f32 %v14402_v37, %v18907_v32  ;;  %5937 = vmatmul.mubr.bf16.gmra.mrb[64].mxu0 %v22267_v11  ;;  %6789 = vmatprep.subr.bf16.mxu1 %v13543_v20  ;;  %v22270_v20 = vld [vmem:[#allocation40_spill] sm:$0xff]  ;;  %v22313_v46 = vld [vmem:[#allocation89_spill] sm:$0xff] }
 0x398   : > { %22266 = vst [vmem:[#allocation12_spill] sm:$0xff] %v19363_v40  ;;  %v7682_v56 = vmul.f32 0.2, %v7426_v59  ;;  %v7434_v45 = vadd.f32 %v14403_v19, %v18912_v27  ;;  %6516 = vmatmul.mubr.bf16.gmra.mrb[128].mxu1 %v17520_v4  ;;  %5946 = vmatprep.mubr.bf16.mxu0 %v22268_v2  ;;  %v22271_v4 = vld [vmem:[#allocation42_spill] sm:$0xff] }
 0x399   : > { %v7689_v33 = vmul.f32 0.2, %v7433_v23  ;;  %6525 = vmatprep.mubr.bf16.mxu1 %v22185_v43  ;;  %v7937_v5 = vmax.f32 %v7425_v62, %v7681_v57 }
 0x39a   : > { %v7690_v7 = vmul.f32 0.2, %v7434_v45  ;;  %v4840_v10 = vpop.f32.mrb[120].mxu0  ;;  %v7938_v60 = vmax.f32 %v7426_v59, %v7682_v56 }
 0x39b   : > { %v7945_v13 = vmax.f32 %v7433_v23, %v7689_v33  ;;  %v14404_v6 = vadd.f32 %v4840_v10, %v22269_v50  ;;  %v4842_v38 = vpop.f32.mrb[121].mxu0  ;;  %v22275_v23 = vld [vmem:[#allocation75_spill] sm:$0xff]  ;;  %v22276_v33 = vld [vmem:[#allocation76_spill] sm:$0xff] }
 0x39c   : > { %v7946_v44 = vmax.f32 %v7434_v45, %v7690_v7  ;;  %v14405_v51 = vadd.f32 %v4842_v38, %v22270_v20  ;;  %v4844_v48 = vpop.f32.mrb[122].mxu0 }
 0x39d   : > { %v7441_v31 = vadd.f32 %v14404_v6, %v18907_v32  ;;  %v14406_v28 = vadd.f32 %v4844_v48, %v22271_v4  ;;  %v4846_v37 = vpop.f32.mrb[123].mxu0  ;;  %v19375_v14 = vpack.c.bf16 %v7945_v13, %v7937_v5  ;;  %v22277_v6 = vld [vmem:[#allocation44_spill] sm:$0xff] }
 0x39e   : > { %v7442_v43 = vadd.f32 %v14405_v51, %v18912_v27  ;;  %v14407_v62 = vadd.f32 %v4846_v37, %v22273_v0  ;;  %v19379_v19 = vpack.c.bf16 %v7946_v44, %v7938_v60  ;;  %v22278_v51 = vld [vmem:[#allocation46_spill] sm:$0xff]  ;;  %v22279_v37 = vld [vmem:[#allocation48_spill] sm:$0xff] }
 0x39f   : > { %22272 = vst [vmem:[#allocation14_spill] sm:$0xff] %v19375_v14  ;;  %v7697_v57 = vmul.f32 0.2, %v7441_v31  ;;  %v7449_v59 = vadd.f32 %v14406_v28, %v18907_v32  ;;  %5947 = vmatmul.mubr.bf16.gmra.mrb[68].mxu0 %v22275_v23  ;;  %v21943_v28 = vsub.s32 2, %v18890_v17 }
 0x3a0   : > { %22274 = vst [vmem:[#allocation16_spill] sm:$0xff] %v19379_v19  ;;  %v7698_v56 = vmul.f32 0.2, %v7442_v43  ;;  %v7450_v45 = vadd.f32 %v14407_v62, %v18912_v27  ;;  %6526 = vmatmul.mubr.bf16.gmra.mrb[132].mxu1 %v22186_v58  ;;  %5956 = vmatprep.mubr.bf16.mxu0 %v22276_v33 }
 0x3a1   : > { %v7705_v7 = vmul.f32 0.2, %v7449_v59  ;;  %6535 = vmatprep.mubr.bf16.mxu1 %v22188_v52  ;;  %v7953_v13 = vmax.f32 %v7441_v31, %v7697_v57  ;;  %v21942_v52 = vsub.s32 3, %v18890_v17  ;;  %v22281_v57 = vld [vmem:[#allocation49_spill] sm:$0xff] }
 0x3a2   : > { %v7706_v10 = vmul.f32 0.2, %v7450_v45  ;;  %v4850_v5 = vpop.f32.mrb[124].mxu0  ;;  %v7954_v44 = vmax.f32 %v7442_v43, %v7698_v56 }
 0x3a3   : > { %v7961_v50 = vmax.f32 %v7449_v59, %v7705_v7  ;;  %v14408_v38 = vadd.f32 %v4850_v5, %v22277_v6  ;;  %v4852_v60 = vpop.f32.mrb[125].mxu0  ;;  %v22283_v7 = vld [vmem:[#allocation77_spill] sm:$0xff]  ;;  %v22284_v6 = vld [vmem:[#allocation78_spill] sm:$0xff] }
 0x3a4   : > { %v7962_v20 = vmax.f32 %v7450_v45, %v7706_v10  ;;  %v14409_v48 = vadd.f32 %v4852_v60, %v22278_v51  ;;  %v4854_v4 = vpop.f32.mrb[126].mxu0 }
 0x3a5   : > { %v7457_v58 = vadd.f32 %v14408_v38, %v18907_v32  ;;  %v14410_v0 = vadd.f32 %v4854_v4, %v22279_v37  ;;  %v4856_v62 = vpop.f32.mrb[127].mxu0  ;;  %v19393_v14 = vpack.c.bf16 %v7961_v50, %v7953_v13  ;;  %v16678_v13 = vld [vmem:[%s21702_s4] sm:$0xff] }
 0x3a6   : > { %v7458_v31 = vadd.f32 %v14409_v48, %v18912_v27  ;;  %v14411_v59 = vadd.f32 %v4856_v62, %v22281_v57  ;;  %v19397_v43 = vpack.c.bf16 %v7962_v20, %v7954_v44  ;;  %v19408_v50 = vrot.slane %v16678_v13, %v21943_v28 }
 0x3a7   : > { %22280 = vst [vmem:[#allocation17_spill] sm:$0xff] %v19393_v14  ;;  %v7713_v56 = vmul.f32 0.2, %v7457_v58  ;;  %v7465_v45 = vadd.f32 %v14410_v0, %v18907_v32  ;;  %5957 = vmatmul.mubr.bf16.gmra.mrb[72].mxu0 %v22283_v7  ;;  %v19413_v32 = vrot.slane %v16678_v13, %v21942_v52 }
 0x3a8   : > { %22282 = vst [vmem:[#allocation65_spill] sm:$0xff] %v19397_v43  ;;  %v7714_v10 = vmul.f32 0.2, %v7458_v31  ;;  %v7466_v5 = vadd.f32 %v14411_v59, %v18912_v27  ;;  %6536 = vmatmul.mubr.bf16.gmra.mrb[136].mxu1 %v22191_v22  ;;  %5966 = vmatprep.mubr.bf16.mxu0 %v22284_v6 }
 0x3a9   : > { %v7721_v38 = vmul.f32 0.2, %v7465_v45  ;;  %6545 = vmatprep.mubr.bf16.mxu1 %v22192_v39  ;;  %v7969_v60 = vmax.f32 %v7457_v58, %v7713_v56  ;;  %v22287_v56 = vld [vmem:[#allocation79_spill] sm:$0xff] }
 0x3aa   : > { %v7722_v27 = vmul.f32 0.2, %v7466_v5  ;;  %v7970_v20 = vmax.f32 %v7458_v31, %v7714_v10 }
 0x3ab   : > { %v7977_v22 = vmax.f32 %v7465_v45, %v7721_v38  ;;  %v5472_v44 = vpop.f32.mrb[32].mxu1  ;;  %v22288_v45 = vld [vmem:[#allocation80_spill] sm:$0xff] }
 0x3ac   : > { %v7978_v51 = vmax.f32 %v7466_v5, %v7722_v27  ;;  %v7219_v48 = vadd.f32 %v19408_v50, %v5472_v44  ;;  %v5474_v4 = vpop.f32.mrb[33].mxu1 }
 0x3ad   : > { %v7220_v37 = vadd.f32 %v19413_v32, %v5474_v4  ;;  %v5476_v0 = vpop.f32.mrb[34].mxu1  ;;  %v19418_v62 = vpack.c.bf16 %v7977_v22, %v7969_v60 }
 0x3ae   : > { %v7475_v57 = vmul.f32 0.2, %v7219_v48  ;;  %v7227_v59 = vadd.f32 %v19408_v50, %v5476_v0  ;;  %v5478_v13 = vpop.f32.mrb[35].mxu1  ;;  %v19421_v52 = vpack.c.bf16 %v7978_v51, %v7970_v20 }
 0x3af   : > { %22285 = vst [vmem:[#allocation66_spill] sm:$0xff] %v19418_v62  ;;  %v7476_v39 = vmul.f32 0.2, %v7220_v37  ;;  %v7228_v58 = vadd.f32 %v19413_v32, %v5478_v13  ;;  %5967 = vmatmul.mubr.bf16.gmra.mrb[76].mxu0 %v22287_v56 }
 0x3b0   : > { %22286 = vst [vmem:[#allocation18_spill] sm:$0xff] %v19421_v52  ;;  %v7483_v31 = vmul.f32 0.2, %v7227_v59  ;;  %6546 = vmatmul.mubr.bf16.gmra.mrb[140].mxu1 %v22193_v9  ;;  %5976 = vmatprep.mubr.bf16.mxu0 %v22288_v45  ;;  %v7731_v5 = vmax.f32 %v7219_v48, %v7475_v57 }
 0x3b1   : > { %v7484_v10 = vmul.f32 0.2, %v7228_v58  ;;  %6555 = vmatprep.mubr.bf16.mxu1 %v22194_v15  ;;  %v7732_v27 = vmax.f32 %v7220_v37, %v7476_v39  ;;  %v22291_v37 = vld [vmem:[#allocation81_spill] sm:$0xff] }
 0x3b2   : > { %v7739_v38 = vmax.f32 %v7227_v59, %v7483_v31  ;;  %v22292_v59 = vld [vmem:[#allocation82_spill] sm:$0xff] }
 0x3b3   : > { %v7740_v60 = vmax.f32 %v7228_v58, %v7484_v10  ;;  %v5482_v22 = vpop.f32.mrb[36].mxu1 }
 0x3b4   : > { %v19428_v44 = vpack.c.bf16 %v7739_v38, %v7731_v5  ;;  %v7235_v20 = vadd.f32 %v19408_v50, %v5482_v22  ;;  %v5484_v51 = vpop.f32.mrb[37].mxu1 }
 0x3b5   : > { %v7236_v4 = vadd.f32 %v19413_v32, %v5484_v51  ;;  %v5486_v0 = vpop.f32.mrb[38].mxu1  ;;  %v19432_v13 = vpack.c.bf16 %v7740_v60, %v7732_v27 }
 0x3b6   : > { %22289 = vst [vmem:[#allocation20_spill] sm:$0xff] %v19428_v44  ;;  %v7491_v9 = vmul.f32 0.2, %v7235_v20  ;;  %v7243_v28 = vadd.f32 %v19408_v50, %v5486_v0  ;;  %v5488_v62 = vpop.f32.mrb[39].mxu1 }
 0x3b7   : > { %22290 = vst [vmem:[#allocation22_spill] sm:$0xff] %v19432_v13  ;;  %v7492_v15 = vmul.f32 0.2, %v7236_v4  ;;  %v7244_v48 = vadd.f32 %v19413_v32, %v5488_v62  ;;  %5977 = vmatmul.mubr.bf16.gmra.mrb[80].mxu0 %v22291_v37 }
 0x3b8   : > { %v7499_v57 = vmul.f32 0.2, %v7243_v28  ;;  %6556 = vmatmul.mubr.bf16.gmra.mrb[144].mxu1 %v22197_v24  ;;  %5986 = vmatprep.mubr.bf16.mxu0 %v22292_v59  ;;  %v7747_v58 = vmax.f32 %v7235_v20, %v7491_v9  ;;  %v22295_v20 = vld [vmem:[#allocation83_spill] sm:$0xff]  ;;  %v22296_v9 = vld [vmem:[#allocation54_spill] sm:$0xff] }
 0x3b9   : > { %v7500_v39 = vmul.f32 0.2, %v7244_v48  ;;  %6565 = vmatprep.mubr.bf16.mxu1 %v22198_v36  ;;  %v7748_v10 = vmax.f32 %v7236_v4, %v7492_v15  ;;  %v22297_v15 = vld [vmem:[#allocation84_spill] sm:$0xff] }
 0x3ba   : > { %v7755_v31 = vmax.f32 %v7243_v28, %v7499_v57  ;;  %v22298_v57 = vld [vmem:[#allocation55_spill] sm:$0xff] }
 0x3bb   : > { %v7756_v5 = vmax.f32 %v7244_v48, %v7500_v39  ;;  %v5492_v38 = vpop.f32.mrb[40].mxu1 }
 0x3bc   : > { %v7251_v27 = vadd.f32 %v19408_v50, %v5492_v38  ;;  %v5494_v60 = vpop.f32.mrb[41].mxu1  ;;  %v19441_v22 = vpack.c.bf16 %v7755_v31, %v7747_v58 }
 0x3bd   : > { %v7252_v62 = vadd.f32 %v19413_v32, %v5494_v60  ;;  %v5496_v51 = vpop.f32.mrb[42].mxu1  ;;  %v19444_v0 = vpack.c.bf16 %v7756_v5, %v7748_v10 }
 0x3be   : > { %22293 = vst [vmem:[#allocation23_spill] sm:$0xff] %v19441_v22  ;;  %v7507_v24 = vmul.f32 0.2, %v7251_v27  ;;  %v7259_v44 = vadd.f32 %v19408_v50, %v5496_v51  ;;  %v5498_v13 = vpop.f32.mrb[43].mxu1 }
 0x3bf   : > { %22294 = vst [vmem:[#allocation67_spill] sm:$0xff] %v19444_v0  ;;  %v7508_v36 = vmul.f32 0.2, %v7252_v62  ;;  %v7260_v28 = vadd.f32 %v19413_v32, %v5498_v13  ;;  %5987 = vmatmul.mubr.bf16.gmra.mrb[84].mxu0 %v22295_v20 }
 0x3c0   : > { %v7515_v4 = vmul.f32 0.2, %v7259_v44  ;;  %6566 = vmatmul.mubr.bf16.gmra.mrb[148].mxu1 %v22296_v9  ;;  %5996 = vmatprep.mubr.bf16.mxu0 %v22297_v15  ;;  %v7763_v39 = vmax.f32 %v7251_v27, %v7507_v24  ;;  %v22301_v27 = vld [vmem:[#allocation85_spill] sm:$0xff]  ;;  %v22302_v24 = vld [vmem:[#allocation56_spill] sm:$0xff] }
 0x3c1   : > { %v7516_v48 = vmul.f32 0.2, %v7260_v28  ;;  %6575 = vmatprep.mubr.bf16.mxu1 %v22298_v57  ;;  %v7764_v31 = vmax.f32 %v7252_v62, %v7508_v36  ;;  %v22303_v36 = vld [vmem:[#allocation86_spill] sm:$0xff] }
 0x3c2   : > { %v7771_v58 = vmax.f32 %v7259_v44, %v7515_v4  ;;  %v22304_v4 = vld [vmem:[#allocation57_spill] sm:$0xff] }
 0x3c3   : > { %v7772_v10 = vmax.f32 %v7260_v28, %v7516_v48  ;;  %v5502_v5 = vpop.f32.mrb[44].mxu1 }
 0x3c4   : > { %v7267_v38 = vadd.f32 %v19408_v50, %v5502_v5  ;;  %v5504_v60 = vpop.f32.mrb[45].mxu1  ;;  %v19453_v51 = vpack.c.bf16 %v7771_v58, %v7763_v39 }
 0x3c5   : > { %v7268_v13 = vadd.f32 %v19413_v32, %v5504_v60  ;;  %v5506_v22 = vpop.f32.mrb[46].mxu1  ;;  %v19456_v0 = vpack.c.bf16 %v7772_v10, %v7764_v31 }
 0x3c6   : > { %22299 = vst [vmem:[#allocation68_spill] sm:$0xff] %v19453_v51  ;;  %v7523_v9 = vmul.f32 0.2, %v7267_v38  ;;  %v7275_v52 = vadd.f32 %v19408_v50, %v5506_v22  ;;  %v5508_v14 = vpop.f32.mrb[47].mxu1 }
 0x3c7   : > { %22300 = vst [vmem:[#allocation24_spill] sm:$0xff] %v19456_v0  ;;  %v7524_v57 = vmul.f32 0.2, %v7268_v13  ;;  %v7276_v44 = vadd.f32 %v19413_v32, %v5508_v14  ;;  %5997 = vmatmul.mubr.bf16.gmra.mrb[88].mxu0 %v22301_v27 }
 0x3c8   : > { %v7531_v62 = vmul.f32 0.2, %v7275_v52  ;;  %6576 = vmatmul.mubr.bf16.gmra.mrb[152].mxu1 %v22302_v24  ;;  %6006 = vmatprep.mubr.bf16.mxu0 %v22303_v36  ;;  %v7779_v48 = vmax.f32 %v7267_v38, %v7523_v9  ;;  %v22307_v38 = vld [vmem:[#allocation87_spill] sm:$0xff]  ;;  %v22308_v9 = vld [vmem:[#allocation58_spill] sm:$0xff] }
 0x3c9   : > { %v7532_v28 = vmul.f32 0.2, %v7276_v44  ;;  %6585 = vmatprep.mubr.bf16.mxu1 %v22304_v4  ;;  %v7780_v58 = vmax.f32 %v7268_v13, %v7524_v57  ;;  %v22309_v57 = vld [vmem:[#allocation88_spill] sm:$0xff] }
 0x3ca   : > { %v7787_v39 = vmax.f32 %v7275_v52, %v7531_v62  ;;  %v22310_v62 = vld [vmem:[#allocation59_spill] sm:$0xff] }
 0x3cb   : > { %v7788_v31 = vmax.f32 %v7276_v44, %v7532_v28  ;;  %v5512_v10 = vpop.f32.mrb[48].mxu1  ;;  %v19479_v28 = vld [vmem:[%s21700_s2 + $0xc18] sm:$0xff] }
 0x3cc   : > { %v7283_v22 = vadd.f32 %v19408_v50, %v5512_v10  ;;  %v5514_v5 = vpop.f32.mrb[49].mxu1  ;;  %v19465_v60 = vpack.c.bf16 %v7787_v39, %v7779_v48 }
 0x3cd   : > { %v7284_v14 = vadd.f32 %v19413_v32, %v5514_v5  ;;  %v5516_v51 = vpop.f32.mrb[50].mxu1  ;;  %v19468_v0 = vpack.c.bf16 %v7788_v31, %v7780_v58  ;;  %v1067_v5 = vld [vmem:[%s21700_s2 + $0x858] sm:$0xff] }
 0x3ce   : > { %22305 = vst [vmem:[#allocation25_spill] sm:$0xff] %v19465_v60  ;;  %v7539_v24 = vmul.f32 0.2, %v7283_v22  ;;  %v7291_v43 = vadd.f32 %v19408_v50, %v5516_v51  ;;  %v5518_v19 = vpop.f32.mrb[51].mxu1  ;;  %v19484_v51 = vld [vmem:[%s21700_s2 + $0xc38] sm:$0xff] }
 0x3cf   : > { %22306 = vst [vmem:[#allocation27_spill] sm:$0xff] %v19468_v0  ;;  %v7540_v4 = vmul.f32 0.2, %v7284_v14  ;;  %v7292_v52 = vadd.f32 %v19413_v32, %v5518_v19  ;;  %6007 = vmatmul.mubr.bf16.gmra.mrb[92].mxu0 %v22307_v38 }
 0x3d0   : > { %v7547_v13 = vmul.f32 0.2, %v7291_v43  ;;  %6586 = vmatmul.mubr.bf16.gmra.mrb[156].mxu1 %v22308_v9  ;;  %6049 = vmatprep.mubr.bf16.mxu0 %v22309_v57  ;;  %v7795_v19 = vmax.f32 %v7283_v22, %v7539_v24  ;;  %v1071_v9 = vld [vmem:[%s21700_s2 + $0x878] sm:$0xff] }
 0x3d1   : > { %v7548_v44 = vmul.f32 0.2, %v7292_v52  ;;  %6628 = vmatprep.mubr.bf16.mxu1 %v22310_v62  ;;  %v7796_v58 = vmax.f32 %v7284_v14, %v7540_v4 }
 0x3d2   : > { %v7803_v48 = vmax.f32 %v7291_v43, %v7547_v13  ;;  %v13551_v13 = vcombine.high %v1067_v5, %v1071_v9 }
 0x3d3   : > { %v7804_v31 = vmax.f32 %v7292_v52, %v7548_v44  ;;  %v5522_v10 = vpop.f32.mrb[52].mxu1 }
 0x3d4   : > { %v7299_v62 = vadd.f32 %v19408_v50, %v5522_v10  ;;  %v5524_v60 = vpop.f32.mrb[53].mxu1  ;;  %v19495_v0 = vpack.c.bf16 %v7803_v48, %v7795_v19  ;;  %v1075_v19 = vld [vmem:[%s21700_s2 + $0x898] sm:$0xff]  ;;  %v16056_v48 = vld [vmem:[%s21703_s5 + $0x4] ss:$16 sps:$4 sm:$0xff]  }
 0x3d5   : > { %v7300_v43 = vadd.f32 %v19413_v32, %v5524_v60  ;;  %v5526_v22 = vpop.f32.mrb[54].mxu1  ;;  %v19498_v24 = vpack.c.bf16 %v7804_v31, %v7796_v58  ;;  %v1079_v60 = vld [vmem:[%s21700_s2 + $0x8b8] sm:$0xff]  ;;  %v22314_v31 = vcombine.low %v19045_v8, %v19050_v18  ;;  %v22315_v10 = vld [vmem:[#allocation60_spill] sm:$0xff] }
 0x3d6   : > { %22311 = vst [vmem:[#allocation28_spill] sm:$0xff] %v19495_v0  ;;  %v7555_v14 = vmul.f32 0.2, %v7299_v62  ;;  %v7307_v4 = vadd.f32 %v19408_v50, %v5526_v22  ;;  %v5528_v52 = vpop.f32.mrb[55].mxu1  ;;  %v22317_v0 = vld [vmem:[#allocation90_spill] sm:$0xff]  ;;  %v13559_v54 = vcombine.high %v1075_v19, %v1079_v60  ;;  %v1083_v18 = vld [vmem:[%s21700_s2 + $0x8d8] sm:$0xff] }
 0x3d7   : > { %22312 = vst [vmem:[#allocation69_spill] sm:$0xff] %v19498_v24  ;;  %v7556_v44 = vmul.f32 0.2, %v7300_v43  ;;  %v7308_v39 = vadd.f32 %v19413_v32, %v5528_v52  ;;  %6050 = vmatmul.mubr.bf16.vlgmr.msra.gmra.mrb[32].mxu0 %v22313_v46  ;;  %v22316_v52 = vcombine.low %v19055_v26, %v19071_v42  ;;  %v13550_v24 = vcombine.low %v1067_v5, %v1071_v9  ;;  %v1087_v26 = vld [vmem:[%s21700_s2 + $0x8f8] sm:$0xff] }
 0x3d8   : > { %v7563_v58 = vmul.f32 0.2, %v7307_v4  ;;  %6211 = vmatpush1.bf16.msra.mxu0 %v22314_v31  ;;  %6629 = vmatmul.mubr.bf16.vlgmr.msra.gmra.mrb[96].mxu1 %v22315_v10  ;;  %v7811_v40 = vmax.f32 %v7299_v62, %v7555_v14  ;;  %v22318_v31 = vld [vmem:[#allocation91_spill] sm:$0xff] }
 0x3d9   : > { %v7564_v22 = vmul.f32 0.2, %v7308_v39  ;;  %6790 = vmatpush1.bf16.msra.mxu1 %v22316_v52  ;;  %6059 = vmatprep.mubr.bf16.mxu0 %v22317_v0  ;;  %v7812_v17 = vmax.f32 %v7300_v43, %v7556_v44  ;;  %v13567_v44 = vcombine.high %v1083_v18, %v1087_v26 }
 0x3da   : > { %v7819_v41 = vmax.f32 %v7307_v4, %v7563_v58  ;;  %6638 = vmatprep.mubr.bf16.mxu1 %v17686_v63  ;;  %6791 = vmatprep.subr.bf16.mxu1 %v13551_v13 }
 0x3db   : > { %v7820_v1 = vmax.f32 %v7308_v39, %v7564_v22  ;;  %v5532_v8 = vpop.f32.mrb[56].mxu1  ;;  %9671 = vmatprep.subr.bf16.mxu0 %v16056_v48  ;;  %v13558_v39 = vcombine.low %v1075_v19, %v1079_v60 }
 0x3dc   : > { %v7315_v42 = vadd.f32 %v19408_v50, %v5532_v8  ;;  %v5534_v5 = vpop.f32.mrb[57].mxu1  ;;  %v19528_v9 = vpack.c.bf16 %v7819_v41, %v7811_v40  ;;  %v1091_v41 = vld [vmem:[%s21700_s2 + $0x918] sm:$0xff]  ;;  %v22319_v40 = vld [vmem:[#allocation92_spill] sm:$0xff] }
 0x3dd   : > { %v7316_v63 = vadd.f32 %v19413_v32, %v5534_v5  ;;  %v5536_v62 = vpop.f32.mrb[58].mxu1  ;;  %6792 = vmatpush1.bf16.msra.mxu1 %v13550_v24  ;;  %v19531_v43 = vpack.c.bf16 %v7820_v1, %v7812_v17  ;;  %v1095_v17 = vld [vmem:[%s21700_s2 + $0x938] sm:$0xff]  ;;  %v13566_v24 = vcombine.low %v1083_v18, %v1087_v26 }
 0x3de   : > { %v7571_v14 = vmul.f32 0.2, %v7315_v42  ;;  %v7323_v4 = vadd.f32 %v19408_v50, %v5536_v62  ;;  %v5538_v13 = vpop.f32.mrb[59].mxu1  ;;  %6793 = vmatprep.subr.bf16.mxu1 %v13559_v54  ;;  %v13575_v10 = vcombine.high %v1091_v41, %v1095_v17  ;;  %v1099_v5 = vld [vmem:[%s21700_s2 + $0x958] sm:$0xff] }
 0x3df   : > { %v7572_v58 = vmul.f32 0.2, %v7316_v63  ;;  %v7324_v48 = vadd.f32 %v19413_v32, %v5538_v13  ;;  %6060 = vmatmul.mubr.bf16.gmra.mrb[36].mxu0 %v22318_v31 }
 0x3e0   : > { %v7579_v1 = vmul.f32 0.2, %v7323_v4  ;;  %6639 = vmatmul.mubr.bf16.gmra.mrb[100].mxu1 %v17714_v53  ;;  %6069 = vmatprep.mubr.bf16.mxu0 %v22319_v40  ;;  %v7827_v19 = vmax.f32 %v7315_v42, %v7571_v14  ;;  %v1103_v53 = vld [vmem:[%s21700_s2 + $0x978] sm:$0xff]  ;;  %v13574_v42 = vcombine.low %v1091_v41, %v1095_v17 }
 0x3e1   : > { %v7580_v54 = vmul.f32 0.2, %v7324_v48  ;;  %6648 = vmatprep.mubr.bf16.mxu1 %v17722_v55  ;;  %6794 = vmatpush1.bf16.msra.mxu1 %v13558_v39  ;;  %v7828_v22 = vmax.f32 %v7316_v63, %v7572_v58  ;;  %v1111_v41 = vld [vmem:[%s21700_s2 + $0x9b8] sm:$0xff] }
 0x3e2   : > { %v7835_v60 = vmax.f32 %v7323_v4, %v7579_v1  ;;  %6795 = vmatprep.subr.bf16.mxu1 %v13567_v44  ;;  %v13583_v44 = vcombine.high %v1099_v5, %v1103_v53  ;;  %v22321_v1 = vld [vmem:[#allocation93_spill] sm:$0xff] }
 0x3e3   : > { %v7836_v52 = vmax.f32 %v7324_v48, %v7580_v54  ;;  %v5542_v8 = vpop.f32.mrb[60].mxu1  ;;  %v1107_v54 = vld [vmem:[%s21700_s2 + $0x998] sm:$0xff] }
 0x3e4   : > { %v7331_v62 = vadd.f32 %v19408_v50, %v5542_v8  ;;  %v5544_v55 = vpop.f32.mrb[61].mxu1  ;;  %v19552_v39 = vpack.c.bf16 %v7835_v60, %v7827_v19  ;;  %v13582_v60 = vcombine.low %v1099_v5, %v1103_v53 }
 0x3e5   : > { %v7332_v18 = vadd.f32 %v19413_v32, %v5544_v55  ;;  %v5546_v26 = vpop.f32.mrb[62].mxu1  ;;  %6796 = vmatpush1.bf16.msra.mxu1 %v13566_v24  ;;  %v19555_v63 = vpack.c.bf16 %v7836_v52, %v7828_v22  ;;  %v22322_v24 = vld [vmem:[#allocation94_spill] sm:$0xff]  ;;  %v13591_v52 = vcombine.high %v1107_v54, %v1111_v41 }
 0x3e6   : > { %22320 = vst [vmem:[#allocation70_spill] sm:$0xff] %v19552_v39  ;;  %v7587_v14 = vmul.f32 0.2, %v7331_v62  ;;  %v7339_v4 = vadd.f32 %v19408_v50, %v5546_v26  ;;  %v5548_v13 = vpop.f32.mrb[63].mxu1  ;;  %6797 = vmatprep.subr.bf16.mxu1 %v13575_v10 }
 0x3e7   : > { %v7588_v58 = vmul.f32 0.2, %v7332_v18  ;;  %v7340_v48 = vadd.f32 %v19413_v32, %v5548_v13  ;;  %6070 = vmatmul.mubr.bf16.gmra.mrb[40].mxu0 %v22321_v1  ;;  %v1115_v13 = vld [vmem:[%s21700_s2 + $0x9d8] sm:$0xff] }
 0x3e8   : > { %v7595_v17 = vmul.f32 0.2, %v7339_v4  ;;  %6649 = vmatmul.mubr.bf16.gmra.mrb[104].mxu1 %v22219_v61  ;;  %6079 = vmatprep.mubr.bf16.mxu0 %v22322_v24  ;;  %v7843_v10 = vmax.f32 %v7331_v62, %v7587_v14  ;;  %v1119_v61 = vld [vmem:[%s21700_s2 + $0x9f8] sm:$0xff]  ;;  %v13590_v62 = vcombine.low %v1107_v54, %v1111_v41 }
 0x3e9   : > { %v7596_v19 = vmul.f32 0.2, %v7340_v48  ;;  %6658 = vmatprep.mubr.bf16.mxu1 %v22220_v49  ;;  %6798 = vmatpush1.bf16.msra.mxu1 %v13574_v42  ;;  %v7844_v8 = vmax.f32 %v7332_v18, %v7588_v58  ;;  %v13599_v58 = vcombine.high %v1115_v13, %v1119_v61  ;;  %v1127_v54 = vld [vmem:[%s21700_s2 + $0xa38] sm:$0xff] }
 0x3ea   : > { %v7851_v22 = vmax.f32 %v7339_v4, %v7595_v17  ;;  %6799 = vmatprep.subr.bf16.mxu1 %v13583_v44 }
 0x3eb   : > { %v7852_v55 = vmax.f32 %v7340_v48, %v7596_v19  ;;  %v5552_v26 = vpop.f32.mrb[64].mxu1  ;;  %v22325_v19 = vld [vmem:[#allocation95_spill] sm:$0xff] }
 0x3ec   : > { %v7347_v39 = vadd.f32 %v19408_v50, %v5552_v26  ;;  %v5554_v49 = vpop.f32.mrb[65].mxu1  ;;  %v19576_v42 = vpack.c.bf16 %v7851_v22, %v7843_v10  ;;  %v1123_v10 = vld [vmem:[%s21700_s2 + $0xa18] sm:$0xff] }
 0x3ed   : > { %v7348_v5 = vadd.f32 %v19413_v32, %v5554_v49  ;;  %v5556_v53 = vpop.f32.mrb[66].mxu1  ;;  %6800 = vmatpush1.bf16.msra.mxu1 %v13582_v60  ;;  %v19579_v18 = vpack.c.bf16 %v7852_v55, %v7844_v8  ;;  %v22326_v60 = vld [vmem:[#allocation96_spill] sm:$0xff]  ;;  %v13607_v26 = vcombine.high %v1123_v10, %v1127_v54 }
 0x3ee   : > { %22323 = vst [vmem:[#allocation29_spill] sm:$0xff] %v19576_v42  ;;  %v7603_v14 = vmul.f32 0.2, %v7347_v39  ;;  %v7355_v4 = vadd.f32 %v19408_v50, %v5556_v53  ;;  %v5558_v44 = vpop.f32.mrb[67].mxu1  ;;  %6801 = vmatprep.subr.bf16.mxu1 %v13591_v52  ;;  %v13598_v52 = vcombine.low %v1115_v13, %v1119_v61  ;;  %v1131_v42 = vld [vmem:[%s21700_s2 + $0xa58] sm:$0xff]  ;;  %v13606_v61 = vcombine.low %v1123_v10, %v1127_v54 }
 0x3ef   : > { %22324 = vst [vmem:[#allocation30_spill] sm:$0xff] %v19579_v18  ;;  %v7604_v48 = vmul.f32 0.2, %v7348_v5  ;;  %v7356_v17 = vadd.f32 %v19413_v32, %v5558_v44  ;;  %6080 = vmatmul.mubr.bf16.gmra.mrb[44].mxu0 %v22325_v19  ;;  %v1143_v10 = vld [vmem:[%s21700_s2 + $0xab8] sm:$0xff] }
 0x3f0   : > { %v7611_v41 = vmul.f32 0.2, %v7355_v4  ;;  %6659 = vmatmul.mubr.bf16.gmra.mrb[108].mxu1 %v22227_v47  ;;  %6089 = vmatprep.mubr.bf16.mxu0 %v22326_v60  ;;  %v7859_v8 = vmax.f32 %v7347_v39, %v7603_v14  ;;  %v1135_v47 = vld [vmem:[%s21700_s2 + $0xa78] sm:$0xff] }
 0x3f1   : > { %v7612_v22 = vmul.f32 0.2, %v7356_v17  ;;  %6668 = vmatprep.mubr.bf16.mxu1 %v22228_v21  ;;  %6802 = vmatpush1.bf16.msra.mxu1 %v13590_v62  ;;  %v7860_v49 = vmax.f32 %v7348_v5, %v7604_v48  ;;  %v13615_v48 = vcombine.high %v1131_v42, %v1135_v47 }
 0x3f2   : > { %v7867_v55 = vmax.f32 %v7355_v4, %v7611_v41  ;;  %6803 = vmatprep.subr.bf16.mxu1 %v13599_v58 }
 0x3f3   : > { %v7868_v53 = vmax.f32 %v7356_v17, %v7612_v22  ;;  %v5562_v44 = vpop.f32.mrb[68].mxu1  ;;  %v22329_v22 = vld [vmem:[#allocation97_spill] sm:$0xff] }
 0x3f4   : > { %v7363_v18 = vadd.f32 %v19408_v50, %v5562_v44  ;;  %v5564_v21 = vpop.f32.mrb[69].mxu1  ;;  %v19600_v62 = vpack.c.bf16 %v7867_v55, %v7859_v8  ;;  %v1139_v8 = vld [vmem:[%s21700_s2 + $0xa98] sm:$0xff] }
 0x3f5   : > { %v7364_v39 = vadd.f32 %v19413_v32, %v5564_v21  ;;  %v5566_v13 = vpop.f32.mrb[70].mxu1  ;;  %6804 = vmatpush1.bf16.msra.mxu1 %v13598_v52  ;;  %v19603_v5 = vpack.c.bf16 %v7868_v53, %v7860_v49  ;;  %v22330_v52 = vld [vmem:[#allocation98_spill] sm:$0xff]  ;;  %v13623_v44 = vcombine.high %v1139_v8, %v1143_v10 }
 0x3f6   : > { %22327 = vst [vmem:[#allocation31_spill] sm:$0xff] %v19600_v62  ;;  %v7619_v14 = vmul.f32 0.2, %v7363_v18  ;;  %v7371_v4 = vadd.f32 %v19408_v50, %v5566_v13  ;;  %v5568_v58 = vpop.f32.mrb[71].mxu1  ;;  %6805 = vmatprep.subr.bf16.mxu1 %v13607_v26  ;;  %v13614_v26 = vcombine.low %v1131_v42, %v1135_v47  ;;  %v1147_v62 = vld [vmem:[%s21700_s2 + $0xad8] sm:$0xff]  ;;  %v13622_v47 = vcombine.low %v1139_v8, %v1143_v10 }
 0x3f7   : > { %22328 = vst [vmem:[#allocation32_spill] sm:$0xff] %v19603_v5  ;;  %v7620_v17 = vmul.f32 0.2, %v7364_v39  ;;  %v7372_v41 = vadd.f32 %v19413_v32, %v5568_v58  ;;  %6090 = vmatmul.mubr.bf16.gmra.mrb[48].mxu0 %v22329_v22  ;;  %v1159_v8 = vld [vmem:[%s21700_s2 + $0xb38] sm:$0xff] }
 0x3f8   : > { %v7627_v54 = vmul.f32 0.2, %v7371_v4  ;;  %6669 = vmatmul.mubr.bf16.gmra.mrb[112].mxu1 %v22235_v25  ;;  %6099 = vmatprep.mubr.bf16.mxu0 %v22330_v52  ;;  %v7875_v49 = vmax.f32 %v7363_v18, %v7619_v14  ;;  %v1151_v25 = vld [vmem:[%s21700_s2 + $0xaf8] sm:$0xff] }
 0x3f9   : > { %v7628_v55 = vmul.f32 0.2, %v7372_v41  ;;  %6678 = vmatprep.mubr.bf16.mxu1 %v22236_v35  ;;  %6806 = vmatpush1.bf16.msra.mxu1 %v13606_v61  ;;  %v7876_v21 = vmax.f32 %v7364_v39, %v7620_v17  ;;  %v13631_v17 = vcombine.high %v1147_v62, %v1151_v25 }
 0x3fa   : > { %v7883_v53 = vmax.f32 %v7371_v4, %v7627_v54  ;;  %6807 = vmatprep.subr.bf16.mxu1 %v13615_v48 }
 0x3fb   : > { %v7884_v13 = vmax.f32 %v7372_v41, %v7628_v55  ;;  %v5572_v58 = vpop.f32.mrb[72].mxu1  ;;  %v22333_v55 = vld [vmem:[#allocation99_spill] sm:$0xff] }
 0x3fc   : > { %v7379_v5 = vadd.f32 %v19408_v50, %v5572_v58  ;;  %v5574_v35 = vpop.f32.mrb[73].mxu1  ;;  %v19624_v61 = vpack.c.bf16 %v7883_v53, %v7875_v49  ;;  %v1155_v49 = vld [vmem:[%s21700_s2 + $0xb18] sm:$0xff] }
 0x3fd   : > { %v7380_v42 = vadd.f32 %v19413_v32, %v5574_v35  ;;  %v5576_v18 = vpop.f32.mrb[74].mxu1  ;;  %6808 = vmatpush1.bf16.msra.mxu1 %v13614_v26  ;;  %v19627_v39 = vpack.c.bf16 %v7884_v13, %v7876_v21  ;;  %v22334_v26 = vld [vmem:[#allocation100_spill] sm:$0xff]  ;;  %v13639_v58 = vcombine.high %v1155_v49, %v1159_v8 }
 0x3fe   : > { %22331 = vst [vmem:[#allocation71_spill] sm:$0xff] %v19624_v61  ;;  %v7635_v14 = vmul.f32 0.2, %v7379_v5  ;;  %v7387_v4 = vadd.f32 %v19408_v50, %v5576_v18  ;;  %v5578_v48 = vpop.f32.mrb[75].mxu1  ;;  %6809 = vmatprep.subr.bf16.mxu1 %v13623_v44  ;;  %v13630_v44 = vcombine.low %v1147_v62, %v1151_v25  ;;  %v1163_v61 = vld [vmem:[%s21700_s2 + $0xb58] sm:$0xff]  ;;  %v13638_v25 = vcombine.low %v1155_v49, %v1159_v8 }
 0x3ff   : > { %22332 = vst [vmem:[#allocation72_spill] sm:$0xff] %v19627_v39  ;;  %v7636_v41 = vmul.f32 0.2, %v7380_v42  ;;  %v7388_v54 = vadd.f32 %v19413_v32, %v5578_v48  ;;  %6100 = vmatmul.mubr.bf16.gmra.mrb[52].mxu0 %v22333_v55  ;;  %v1175_v49 = vld [vmem:[%s21700_s2 + $0xbb8] sm:$0xff] }
 0x400   : > { %v7643_v10 = vmul.f32 0.2, %v7387_v4  ;;  %6679 = vmatmul.mubr.bf16.gmra.mrb[116].mxu1 %v22243_v30  ;;  %6109 = vmatprep.mubr.bf16.mxu0 %v22334_v26  ;;  %v7891_v21 = vmax.f32 %v7379_v5, %v7635_v14  ;;  %v1167_v30 = vld [vmem:[%s21700_s2 + $0xb78] sm:$0xff] }
 0x401   : > { %v7644_v53 = vmul.f32 0.2, %v7388_v54  ;;  %6688 = vmatprep.mubr.bf16.mxu1 %v22244_v3  ;;  %6810 = vmatpush1.bf16.msra.mxu1 %v13622_v47  ;;  %v7892_v35 = vmax.f32 %v7380_v42, %v7636_v41  ;;  %v13647_v41 = vcombine.high %v1163_v61, %v1167_v30 }
 0x402   : > { %v7899_v13 = vmax.f32 %v7387_v4, %v7643_v10  ;;  %6811 = vmatprep.subr.bf16.mxu1 %v13631_v17 }
 0x403   : > { %v7900_v18 = vmax.f32 %v7388_v54, %v7644_v53  ;;  %v5582_v48 = vpop.f32.mrb[76].mxu1  ;;  %v22337_v53 = vld [vmem:[#allocation101_spill] sm:$0xff] }
 0x404   : > { %v7395_v39 = vadd.f32 %v19408_v50, %v5582_v48  ;;  %v5584_v3 = vpop.f32.mrb[77].mxu1  ;;  %v19648_v47 = vpack.c.bf16 %v7899_v13, %v7891_v21  ;;  %v1171_v21 = vld [vmem:[%s21700_s2 + $0xb98] sm:$0xff] }
 0x405   : > { %v7396_v62 = vadd.f32 %v19413_v32, %v5584_v3  ;;  %v5586_v5 = vpop.f32.mrb[78].mxu1  ;;  %6812 = vmatpush1.bf16.msra.mxu1 %v13630_v44  ;;  %v19651_v42 = vpack.c.bf16 %v7900_v18, %v7892_v35  ;;  %v22338_v44 = vld [vmem:[#allocation102_spill] sm:$0xff]  ;;  %v13655_v48 = vcombine.high %v1171_v21, %v1175_v49 }
 0x406   : > { %22335 = vst [vmem:[#allocation33_spill] sm:$0xff] %v19648_v47  ;;  %v7651_v14 = vmul.f32 0.2, %v7395_v39  ;;  %v7403_v4 = vadd.f32 %v19408_v50, %v5586_v5  ;;  %v5588_v17 = vpop.f32.mrb[79].mxu1  ;;  %6813 = vmatprep.subr.bf16.mxu1 %v13639_v58  ;;  %v13646_v58 = vcombine.low %v1163_v61, %v1167_v30  ;;  %v1179_v47 = vld [vmem:[%s21700_s2 + $0xbd8] sm:$0xff]  ;;  %v13654_v30 = vcombine.low %v1171_v21, %v1175_v49 }
 0x407   : > { %22336 = vst [vmem:[#allocation34_spill] sm:$0xff] %v19651_v42  ;;  %v7652_v54 = vmul.f32 0.2, %v7396_v62  ;;  %v7404_v10 = vadd.f32 %v19413_v32, %v5588_v17  ;;  %6110 = vmatmul.mubr.bf16.gmra.mrb[56].mxu0 %v22337_v53 }
 0x408   : > { %v7659_v8 = vmul.f32 0.2, %v7403_v4  ;;  %6689 = vmatmul.mubr.bf16.gmra.mrb[120].mxu1 %v22251_v29  ;;  %6119 = vmatprep.mubr.bf16.mxu0 %v22338_v44  ;;  %v7907_v35 = vmax.f32 %v7395_v39, %v7651_v14  ;;  %v1183_v29 = vld [vmem:[%s21700_s2 + $0xbf8] sm:$0xff] }
 0x409   : > { %v7660_v13 = vmul.f32 0.2, %v7404_v10  ;;  %6698 = vmatprep.mubr.bf16.mxu1 %v22252_v16  ;;  %6814 = vmatpush1.bf16.msra.mxu1 %v13638_v25  ;;  %v7908_v3 = vmax.f32 %v7396_v62, %v7652_v54  ;;  %v13663_v54 = vcombine.high %v1179_v47, %v1183_v29  ;;  %v13662_v21 = vcombine.low %v1179_v47, %v1183_v29 }
 0x40a   : > { %v7915_v18 = vmax.f32 %v7403_v4, %v7659_v8  ;;  %6815 = vmatprep.subr.bf16.mxu1 %v13647_v41 }
 0x40b   : > { %v7916_v5 = vmax.f32 %v7404_v10, %v7660_v13  ;;  %v5592_v17 = vpop.f32.mrb[80].mxu1  ;;  %v22341_v13 = vld [vmem:[#allocation103_spill] sm:$0xff] }
 0x40c   : > { %v7411_v42 = vadd.f32 %v19408_v50, %v5592_v17  ;;  %v5594_v16 = vpop.f32.mrb[81].mxu1  ;;  %v19672_v25 = vpack.c.bf16 %v7915_v18, %v7907_v35  ;;  %v22342_v18 = vld [vmem:[#allocation104_spill] sm:$0xff] }
 0x40d   : > { %v7412_v61 = vadd.f32 %v19413_v32, %v5594_v16  ;;  %v5596_v39 = vpop.f32.mrb[82].mxu1  ;;  %6816 = vmatpush1.bf16.msra.mxu1 %v13646_v58  ;;  %v19675_v62 = vpack.c.bf16 %v7916_v5, %v7908_v3 }
 0x40e   : > { %22339 = vst [vmem:[#allocation36_spill] sm:$0xff] %v19672_v25  ;;  %v7667_v14 = vmul.f32 0.2, %v7411_v42  ;;  %v7419_v4 = vadd.f32 %v19408_v50, %v5596_v39  ;;  %v5598_v41 = vpop.f32.mrb[83].mxu1  ;;  %6817 = vmatprep.subr.bf16.mxu1 %v13655_v48  ;;  %v13671_v48 = vcombine.high %v19479_v28, %v19484_v51 }
 0x40f   : > { %22340 = vst [vmem:[#allocation37_spill] sm:$0xff] %v19675_v62  ;;  %v7668_v10 = vmul.f32 0.2, %v7412_v61  ;;  %v7420_v8 = vadd.f32 %v19413_v32, %v5598_v41  ;;  %6120 = vmatmul.mubr.bf16.gmra.mrb[60].mxu0 %v22341_v13 }
 0x410   : > { %v7675_v35 = vmul.f32 0.2, %v7419_v4  ;;  %6699 = vmatmul.mubr.bf16.gmra.mrb[124].mxu1 %v22259_v12  ;;  %6129 = vmatprep.mubr.bf16.mxu0 %v22342_v18  ;;  %v7923_v49 = vmax.f32 %v7411_v42, %v7667_v14  ;;  %v22343_v14 = vld [vmem:[#allocation105_spill] sm:$0xff] }
 0x411   : > { %v7676_v58 = vmul.f32 0.2, %v7420_v8  ;;  %6708 = vmatprep.mubr.bf16.mxu1 %v22260_v34  ;;  %6818 = vmatpush1.bf16.msra.mxu1 %v13654_v30  ;;  %v7924_v5 = vmax.f32 %v7412_v61, %v7668_v10 }
 0x412   : > { %v7931_v3 = vmax.f32 %v7419_v4, %v7675_v35  ;;  %6819 = vmatprep.subr.bf16.mxu1 %v13663_v54  ;;  %v22344_v54 = vld [vmem:[#allocation106_spill] sm:$0xff] }
 0x413   : > { %v7932_v17 = vmax.f32 %v7420_v8, %v7676_v58  ;;  %v5602_v16 = vpop.f32.mrb[84].mxu1 }
 0x414   : > { %v7427_v39 = vadd.f32 %v19408_v50, %v5602_v16  ;;  %v5604_v41 = vpop.f32.mrb[85].mxu1  ;;  %v19686_v12 = vpack.c.bf16 %v7931_v3, %v7923_v49 }
 0x415   : > { %v7428_v25 = vadd.f32 %v19413_v32, %v5604_v41  ;;  %v5606_v62 = vpop.f32.mrb[86].mxu1  ;;  %6820 = vmatpush1.bf16.msra.mxu1 %v13662_v21  ;;  %v19689_v34 = vpack.c.bf16 %v7932_v17, %v7924_v5 }
 0x416   : > { %v7683_v47 = vmul.f32 0.2, %v7427_v39  ;;  %v7435_v42 = vadd.f32 %v19408_v50, %v5606_v62  ;;  %v5608_v29 = vpop.f32.mrb[87].mxu1  ;;  %6982 = vmatprep.subr.bf16.mxu1 %v13671_v48 }
 0x417   : > { %v7684_v30 = vmul.f32 0.2, %v7428_v25  ;;  %v7436_v61 = vadd.f32 %v19413_v32, %v5608_v29  ;;  %6130 = vmatmul.mubr.bf16.gmra.mrb[64].mxu0 %v22343_v14 }
 0x418   : > { %v7691_v4 = vmul.f32 0.2, %v7435_v42  ;;  %6709 = vmatmul.mubr.bf16.gmra.mrb[128].mxu1 %v22267_v11  ;;  %6139 = vmatprep.mubr.bf16.mxu0 %v22344_v54  ;;  %v7939_v8 = vmax.f32 %v7427_v39, %v7683_v47 }
 0x419   : > { %v7692_v10 = vmul.f32 0.2, %v7436_v61  ;;  %6718 = vmatprep.mubr.bf16.mxu1 %v22268_v2  ;;  %v7940_v58 = vmax.f32 %v7428_v25, %v7684_v30  ;;  %v22347_v25 = vld [vmem:[#allocation107_spill] sm:$0xff] }
 0x41a   : > { %v7947_v35 = vmax.f32 %v7435_v42, %v7691_v4  ;;  %v22348_v42 = vld [vmem:[#allocation108_spill] sm:$0xff] }
 0x41b   : > { %v7948_v21 = vmax.f32 %v7436_v61, %v7692_v10  ;;  %v5612_v62 = vpop.f32.mrb[88].mxu1 }
 0x41c   : > { %v7443_v49 = vadd.f32 %v19408_v50, %v5612_v62  ;;  %v5614_v3 = vpop.f32.mrb[89].mxu1  ;;  %v19698_v48 = vpack.c.bf16 %v7947_v35, %v7939_v8 }
 0x41d   : > { %v7444_v5 = vadd.f32 %v19413_v32, %v5614_v3  ;;  %v5616_v17 = vpop.f32.mrb[90].mxu1  ;;  %v19701_v16 = vpack.c.bf16 %v7948_v21, %v7940_v58 }
 0x41e   : > { %22345 = vst [vmem:[#allocation73_spill] sm:$0xff] %v19698_v48  ;;  %v7699_v11 = vmul.f32 0.2, %v7443_v49  ;;  %v7451_v41 = vadd.f32 %v19408_v50, %v5616_v17  ;;  %v5618_v29 = vpop.f32.mrb[91].mxu1 }
 0x41f   : > { %22346 = vst [vmem:[#allocation74_spill] sm:$0xff] %v19701_v16  ;;  %v7700_v2 = vmul.f32 0.2, %v7444_v5  ;;  %v7452_v39 = vadd.f32 %v19413_v32, %v5618_v29  ;;  %6140 = vmatmul.mubr.bf16.gmra.mrb[68].mxu0 %v22347_v25 }
 0x420   : > { %v7707_v47 = vmul.f32 0.2, %v7451_v41  ;;  %6719 = vmatmul.mubr.bf16.gmra.mrb[132].mxu1 %v22275_v23  ;;  %6149 = vmatprep.mubr.bf16.mxu0 %v22348_v42  ;;  %v7955_v61 = vmax.f32 %v7443_v49, %v7699_v11 }
 0x421   : > { %v7708_v30 = vmul.f32 0.2, %v7452_v39  ;;  %6728 = vmatprep.mubr.bf16.mxu1 %v22276_v33  ;;  %v7956_v10 = vmax.f32 %v7444_v5, %v7700_v2  ;;  %v22349_v5 = vld [vmem:[#allocation109_spill] sm:$0xff] }
 0x422   : > { %v7963_v4 = vmax.f32 %v7451_v41, %v7707_v47  ;;  %v22350_v41 = vld [vmem:[#allocation110_spill] sm:$0xff] }
 0x423   : > { %v7964_v8 = vmax.f32 %v7452_v39, %v7708_v30  ;;  %v5622_v35 = vpop.f32.mrb[92].mxu1 }
 0x424   : > { %v7459_v58 = vadd.f32 %v19408_v50, %v5622_v35  ;;  %v5624_v21 = vpop.f32.mrb[93].mxu1  ;;  %v19710_v62 = vpack.c.bf16 %v7963_v4, %v7955_v61  ;;  %v16068_v35 = vld [vmem:[%s21703_s5 + $0x84] ss:$16 sps:$4 sm:$0xff]  }
 0x425   : > { %v7460_v3 = vadd.f32 %v19413_v32, %v5624_v21  ;;  %v5626_v17 = vpop.f32.mrb[94].mxu1  ;;  %v19713_v29 = vpack.c.bf16 %v7964_v8, %v7956_v10  ;;  %v22353_v10 = vld [vmem:[#allocation111_spill] sm:$0xff]  ;;  %v16062_v8 = vld [vmem:[%s21703_s5 + $0x44] ss:$16 sps:$4 sm:$0xff]   ;;  %v16069_v21 = vld [vmem:[%s21703_s5 + $0xa0] ss:$16 sps:$4 sm:$0xff]  }
 0x426   : > { %v7715_v23 = vmul.f32 0.2, %v7459_v58  ;;  %v7467_v48 = vadd.f32 %v19408_v50, %v5626_v17  ;;  %v5628_v16 = vpop.f32.mrb[95].mxu1  ;;  %v16072_v17 = vld [vmem:[%s21703_s5 + $0xc0] ss:$16 sps:$4 sm:$0xff]  }
 0x427   : > { %v7716_v33 = vmul.f32 0.2, %v7460_v3  ;;  %v7468_v49 = vadd.f32 %v19413_v32, %v5628_v16  ;;  %6150 = vmatmul.mubr.bf16.gmra.mrb[72].mxu0 %v22349_v5  ;;  %v22354_v32 = vld [vmem:[#allocation112_spill] sm:$0xff] }
 0x428   : > { %v7723_v11 = vmul.f32 0.2, %v7467_v48  ;;  %6729 = vmatmul.mubr.bf16.gmra.mrb[136].mxu1 %v22283_v7  ;;  %6159 = vmatprep.mubr.bf16.mxu0 %v22350_v41  ;;  %v7971_v39 = vmax.f32 %v7459_v58, %v7715_v23  ;;  %v22355_v7 = vld [vmem:[#allocation113_spill] sm:$0xff]  ;;  %v22358_v16 = vld [vmem:[#allocation116_spill] sm:$0xff] }
 0x429   : > { %v7724_v2 = vmul.f32 0.2, %v7468_v49  ;;  %6738 = vmatprep.mubr.bf16.mxu1 %v22284_v6  ;;  %v7972_v30 = vmax.f32 %v7460_v3, %v7716_v33  ;;  %v22356_v6 = vld [vmem:[#allocation114_spill] sm:$0xff] }
 0x42a   : > { %v7979_v47 = vmax.f32 %v7467_v48, %v7723_v11  ;;  %v22357_v48 = vld [vmem:[#allocation115_spill] sm:$0xff]  ;;  %v16066_v58 = vld [vmem:[%s21703_s5 + $0x80] ss:$16 sps:$4 sm:$0xff]   ;;  %v16074_v3 = vld [vmem:[%s21703_s5 + $0xc4] ss:$16 sps:$4 sm:$0xff]  }
 0x42b   : > { %v7980_v61 = vmax.f32 %v7468_v49, %v7724_v2  ;;  %v16075_v23 = vld [vmem:[%s21703_s5 + $0xe0] ss:$16 sps:$4 sm:$0xff]   ;;  %v16080_v33 = vld [vmem:[%s21703_s5 + $0x104] ss:$16 sps:$4 sm:$0xff]  }
 0x42c   : > { %v19721_v4 = vpack.c.bf16 %v7979_v47, %v7971_v39  ;;  %v16078_v49 = vld [vmem:[%s21703_s5 + $0x100] ss:$16 sps:$4 sm:$0xff]   ;;  %v16086_v2 = vld [vmem:[%s21703_s5 + $0x144] ss:$16 sps:$4 sm:$0xff]  }
 0x42d   : > { %v19723_v50 = vpack.c.bf16 %v7980_v61, %v7972_v30  ;;  %v16081_v11 = vld [vmem:[%s21703_s5 + $0x120] ss:$16 sps:$4 sm:$0xff]   ;;  %v16092_v30 = vld [vmem:[%s21703_s5 + $0x184] ss:$16 sps:$4 sm:$0xff]  }
 0x42e   : > { %22351 = vst [vmem:[#allocation38_spill] sm:$0xff] %v19721_v4  ;;  %v16084_v39 = vld [vmem:[%s21703_s5 + $0x140] ss:$16 sps:$4 sm:$0xff]  }
 0x42f   : > { %22352 = vst [vmem:[#allocation40_spill] sm:$0xff] %v19723_v50  ;;  %6160 = vmatmul.mubr.bf16.gmra.mrb[76].mxu0 %v22353_v10  ;;  %v16087_v47 = vld [vmem:[%s21703_s5 + $0x160] ss:$16 sps:$4 sm:$0xff]  }
 0x430   : > { %6739 = vmatmul.mubr.bf16.gmra.mrb[140].mxu1 %v22287_v56  ;;  %6169 = vmatprep.mubr.bf16.mxu0 %v22354_v32  ;;  %v22359_v56 = vld [vmem:[#allocation117_spill] sm:$0xff]  ;;  %v16090_v61 = vld [vmem:[%s21703_s5 + $0x180] ss:$16 sps:$4 sm:$0xff]  }
 0x431   : > { %6748 = vmatprep.mubr.bf16.mxu1 %v22288_v45  ;;  %v22360_v45 = vld [vmem:[#allocation118_spill] sm:$0xff] }
 0x437   : > { %6170 = vmatmul.mubr.bf16.gmra.mrb[80].mxu0 %v22355_v7 }
 0x438   : > { %6749 = vmatmul.mubr.bf16.gmra.mrb[144].mxu1 %v22291_v37  ;;  %6179 = vmatprep.mubr.bf16.mxu0 %v22356_v6  ;;  %v22361_v37 = vld [vmem:[#allocation119_spill] sm:$0xff] }
 0x439   : > { %6758 = vmatprep.mubr.bf16.mxu1 %v22292_v59  ;;  %v22362_v59 = vmov 0  }
 0x43f   : > { %6180 = vmatmul.mubr.bf16.gmra.mrb[84].mxu0 %v22357_v48 }
 0x440   : > { %6759 = vmatmul.mubr.bf16.gmra.mrb[148].mxu1 %v22295_v20  ;;  %6189 = vmatprep.mubr.bf16.mxu0 %v22358_v16  ;;  %v16054_v20 = vld [vmem:[%s21703_s5] ss:$16 sps:$4 sm:$0xff]  }
 0x441   : > { %6768 = vmatprep.mubr.bf16.mxu1 %v22297_v15  ;;  %v16059_v15 = vld [vmem:[%s21703_s5 + $0x24] ss:$16 sps:$4 sm:$0xff]  }
 0x447   : > { %6190 = vmatmul.mubr.bf16.gmra.mrb[88].mxu0 %v22359_v56 }
 0x448   : > { %6769 = vmatmul.mubr.bf16.gmra.mrb[152].mxu1 %v22301_v27  ;;  %6199 = vmatprep.mubr.bf16.mxu0 %v22360_v45  ;;  %v22363_v27 = vld [vmem:[#allocation120_spill] sm:$0xff] }
 0x449   : > { %6778 = vmatprep.mubr.bf16.mxu1 %v22303_v36  ;;  %v16107_v36 = vld [vmem:[%s21703_s5 + $0xc] ss:$16 sps:$4 sm:$0xff]  }
 0x44f   : > { %6200 = vmatmul.mubr.bf16.gmra.mrb[92].mxu0 %v22361_v37 }
 0x450   : > { %6779 = vmatmul.mubr.bf16.gmra.mrb[156].mxu1 %v22307_v38  ;;  %6242 = vmatprep.mubr.bf16.mxu0 %v22362_v59  ;;  %v16057_v38 = vld [vmem:[%s21703_s5 + $0x20] ss:$16 sps:$4 sm:$0xff]  }
 0x451   : > { %6821 = vmatprep.mubr.bf16.mxu1 %v22309_v57  ;;  %v22364_v57 = vcombine.low %v19479_v28, %v19484_v51  ;;  %v16065_v28 = vld [vmem:[%s21703_s5 + $0x64] ss:$16 sps:$4 sm:$0xff]   ;;  %v22365_v51 = vld [vmem:[#allocation121_spill] sm:$0xff] }
 0x457   : > { %13704 = vmatmul.mubr.msk.bf16.vlgmr.msra.gmra.mrb[32].mxu0 %vm4038_vm2, %v22363_v27 }
 0x458   : > { %6822 = vmatmul.mubr.bf16.vlgmr.msra.gmra.mrb[96].mxu1 %v22313_v46  ;;  %9672 = vmatpush1.bf16.msra.mxu0 %v16054_v20  ;;  %v16060_v46 = vld [vmem:[%s21703_s5 + $0x40] ss:$16 sps:$4 sm:$0xff]  }
 0x459   : > { %6983 = vmatpush1.bf16.msra.mxu1 %v22364_v57  ;;  %6252 = vmatprep.mubr.bf16.mxu0 %v22362_v59  ;;  %v16093_v20 = vld [vmem:[%s21703_s5 + $0x1a0] ss:$16 sps:$4 sm:$0xff]   ;;  %v16104_v57 = vld [vmem:[%s21703_s5 + $0x204] ss:$16 sps:$4 sm:$0xff]  }
 0x45a   : > { %6831 = vmatprep.mubr.bf16.mxu1 %v22317_v0  ;;  %9673 = vmatprep.subr.bf16.mxu0 %v16059_v15  ;;  %v16063_v0 = vld [vmem:[%s21703_s5 + $0x60] ss:$16 sps:$4 sm:$0xff]   ;;  %v16098_v15 = vld [vmem:[%s21703_s5 + $0x1c4] ss:$16 sps:$4 sm:$0xff]  }
 0x45b   : > { %10443 = vmatprep.subr.bf16.mxu1 %v16107_v36  ;;  %v16096_v36 = vld [vmem:[%s21703_s5 + $0x1c0] ss:$16 sps:$4 sm:$0xff]  }
 0x45c   : > { %9674 = vmatpush1.bf16.msra.mxu0 %v16057_v38  ;;  %v16099_v38 = vld [vmem:[%s21703_s5 + $0x1e0] ss:$16 sps:$4 sm:$0xff]  }
 0x45d   : > { %9675 = vmatprep.subr.bf16.mxu0 %v16062_v8  ;;  %v22372_v8 = vld [vmem:[#allocation128_spill] sm:$0xff] }
 0x45f   : > { %13705 = vmatmul.mubr.msk.bf16.gmra.mrb[36].mxu0 %vm4038_vm2, %v22365_v51 }
 0x460   : > { %6832 = vmatmul.mubr.bf16.gmra.mrb[100].mxu1 %v22318_v31  ;;  %6262 = vmatprep.mubr.bf16.mxu0 %v22362_v59  ;;  %v16071_v31 = vld [vmem:[%s21703_s5 + $0xa4] ss:$16 sps:$4 sm:$0xff]  }
 0x461   : > { %6841 = vmatprep.mubr.bf16.mxu1 %v22319_v40  ;;  %9676 = vmatpush1.bf16.msra.mxu0 %v16060_v46  ;;  %v22366_v40 = vld [vmem:[#allocation122_spill] sm:$0xff] }
 0x462   : > { %9677 = vmatprep.subr.bf16.mxu0 %v16065_v28  ;;  %v16114_v46 = vld [vmem:[%s21703_s5 + $0x240] ss:$16 sps:$4 sm:$0xff]   ;;  %v16117_v28 = vld [vmem:[%s21703_s5 + $0x48] ss:$16 sps:$4 sm:$0xff]  }
 0x465   : > { %9678 = vmatpush1.bf16.msra.mxu0 %v16063_v0  ;;  %v16122_v0 = vld [vmem:[%s21703_s5 + $0x264] ss:$16 sps:$4 sm:$0xff]  }
 0x466   : > { %9679 = vmatprep.subr.bf16.mxu0 %v16068_v35  ;;  %v22383_v35 = vld [vmem:[#allocation9_spill] sm:$0xff] }
 0x467   : > { %13706 = vmatmul.mubr.msk.bf16.gmra.mrb[40].mxu0 %vm4038_vm2, %v22366_v40 }
 0x468   : > { %6842 = vmatmul.mubr.bf16.gmra.mrb[104].mxu1 %v22321_v1  ;;  %6272 = vmatprep.mubr.bf16.mxu0 %v22362_v59  ;;  %v16077_v1 = vld [vmem:[%s21703_s5 + $0xe4] ss:$16 sps:$4 sm:$0xff]  }
 0x469   : > { %6851 = vmatprep.mubr.bf16.mxu1 %v22322_v24  ;;  %9680 = vmatpush1.bf16.msra.mxu0 %v16066_v58  ;;  %v22367_v24 = vld [vmem:[#allocation123_spill] sm:$0xff] }
 0x46a   : > { %9681 = vmatprep.subr.bf16.mxu0 %v16071_v31  ;;  %v16125_v58 = vld [vmem:[%s21703_s5 + $0x6c] ss:$16 sps:$4 sm:$0xff]  }
 0x46b   : > { %v22384_v31 = vld [vmem:[#allocation19_spill] sm:$0xff] }
 0x46d   : > { %9682 = vmatpush1.bf16.msra.mxu0 %v16069_v21  ;;  %v16120_v21 = vld [vmem:[%s21703_s5 + $0x260] ss:$16 sps:$4 sm:$0xff]  }
 0x46e   : > { %9683 = vmatprep.subr.bf16.mxu0 %v16074_v3  ;;  %v16123_v3 = vld [vmem:[%s21703_s5 + $0x68] ss:$16 sps:$4 sm:$0xff]  }
 0x46f   : > { %13707 = vmatmul.mubr.msk.bf16.gmra.mrb[44].mxu0 %vm4038_vm2, %v22367_v24 }
 0x470   : > { %6852 = vmatmul.mubr.bf16.gmra.mrb[108].mxu1 %v22325_v19  ;;  %6282 = vmatprep.mubr.bf16.mxu0 %v22362_v59  ;;  %v16083_v19 = vld [vmem:[%s21703_s5 + $0x124] ss:$16 sps:$4 sm:$0xff]  }
 0x471   : > { %6861 = vmatprep.mubr.bf16.mxu1 %v22326_v60  ;;  %9684 = vmatpush1.bf16.msra.mxu0 %v16072_v17  ;;  %v22368_v60 = vld [vmem:[#allocation124_spill] sm:$0xff] }
 0x472   : > { %9685 = vmatprep.subr.bf16.mxu0 %v16077_v1  ;;  %v16128_v17 = vld [vmem:[%s21703_s5 + $0x284] ss:$16 sps:$4 sm:$0xff]   ;;  %v16126_v1 = vld [vmem:[%s21703_s5 + $0x280] ss:$16 sps:$4 sm:$0xff]  }
 0x475   : > { %9686 = vmatpush1.bf16.msra.mxu0 %v16075_v23  ;;  %v16129_v23 = vld [vmem:[%s21703_s5 + $0x88] ss:$16 sps:$4 sm:$0xff]  }
 0x476   : > { %9687 = vmatprep.subr.bf16.mxu0 %v16080_v33  ;;  %v16134_v33 = vld [vmem:[%s21703_s5 + $0x2a4] ss:$16 sps:$4 sm:$0xff]  }
 0x477   : > { %13708 = vmatmul.mubr.msk.bf16.gmra.mrb[48].mxu0 %vm4038_vm2, %v22368_v60 }
 0x478   : > { %6862 = vmatmul.mubr.bf16.gmra.mrb[112].mxu1 %v22329_v22  ;;  %6292 = vmatprep.mubr.bf16.mxu0 %v22362_v59  ;;  %v16089_v22 = vld [vmem:[%s21703_s5 + $0x164] ss:$16 sps:$4 sm:$0xff]  }
 0x479   : > { %6871 = vmatprep.mubr.bf16.mxu1 %v22330_v52  ;;  %9688 = vmatpush1.bf16.msra.mxu0 %v16078_v49  ;;  %v22369_v52 = vld [vmem:[#allocation125_spill] sm:$0xff]  ;;  %v22385_v49 = vld [vmem:[#allocation15_spill] sm:$0xff] }
 0x47a   : > { %9689 = vmatprep.subr.bf16.mxu0 %v16083_v19  ;;  %v16137_v19 = vld [vmem:[%s21703_s5 + $0xac] ss:$16 sps:$4 sm:$0xff]  }
 0x47d   : > { %9690 = vmatpush1.bf16.msra.mxu0 %v16081_v11  ;;  %v22386_v11 = vld [vmem:[#allocation26_spill] sm:$0xff] }
 0x47e   : > { %9691 = vmatprep.subr.bf16.mxu0 %v16086_v2  ;;  %v16132_v2 = vld [vmem:[%s21703_s5 + $0x2a0] ss:$16 sps:$4 sm:$0xff]  }
 0x47f   : > { %13709 = vmatmul.mubr.msk.bf16.gmra.mrb[52].mxu0 %vm4038_vm2, %v22369_v52 }
 0x480   : > { %6872 = vmatmul.mubr.bf16.gmra.mrb[116].mxu1 %v22333_v55  ;;  %6302 = vmatprep.mubr.bf16.mxu0 %v22362_v59  ;;  %v16095_v55 = vld [vmem:[%s21703_s5 + $0x1a4] ss:$16 sps:$4 sm:$0xff]  }
 0x481   : > { %6881 = vmatprep.mubr.bf16.mxu1 %v22334_v26  ;;  %9692 = vmatpush1.bf16.msra.mxu0 %v16084_v39  ;;  %v22370_v26 = vld [vmem:[#allocation126_spill] sm:$0xff]  ;;  %v16135_v39 = vld [vmem:[%s21703_s5 + $0xa8] ss:$16 sps:$4 sm:$0xff]  }
 0x482   : > { %9693 = vmatprep.subr.bf16.mxu0 %v16089_v22  ;;  %v16140_v22 = vld [vmem:[%s21703_s5 + $0x2c4] ss:$16 sps:$4 sm:$0xff]  }
 0x485   : > { %9694 = vmatpush1.bf16.msra.mxu0 %v16087_v47  ;;  %v16138_v47 = vld [vmem:[%s21703_s5 + $0x2c0] ss:$16 sps:$4 sm:$0xff]  }
 0x486   : > { %9695 = vmatprep.subr.bf16.mxu0 %v16092_v30  ;;  %v16141_v30 = vld [vmem:[%s21703_s5 + $0xc8] ss:$16 sps:$4 sm:$0xff]  }
 0x487   : > { %13710 = vmatmul.mubr.msk.bf16.gmra.mrb[56].mxu0 %vm4038_vm2, %v22370_v26 }
 0x488   : > { %6882 = vmatmul.mubr.bf16.gmra.mrb[120].mxu1 %v22337_v53  ;;  %6312 = vmatprep.mubr.bf16.mxu0 %v22362_v59  ;;  %v16101_v53 = vld [vmem:[%s21703_s5 + $0x1e4] ss:$16 sps:$4 sm:$0xff]  }
 0x489   : > { %6891 = vmatprep.mubr.bf16.mxu1 %v22338_v44  ;;  %9696 = vmatpush1.bf16.msra.mxu0 %v16090_v61  ;;  %v22371_v44 = vld [vmem:[#allocation127_spill] sm:$0xff]  ;;  %v16146_v61 = vld [vmem:[%s21703_s5 + $0x2e4] ss:$16 sps:$4 sm:$0xff]  }
 0x48a   : > { %9697 = vmatprep.subr.bf16.mxu0 %v16095_v55  ;;  %v22387_v55 = vld [vmem:[#allocation21_spill] sm:$0xff] }
 0x48d   : > { %9698 = vmatpush1.bf16.msra.mxu0 %v16093_v20  ;;  %v16149_v20 = vld [vmem:[%s21703_s5 + $0xec] ss:$16 sps:$4 sm:$0xff]  }
 0x48e   : > { %9699 = vmatprep.subr.bf16.mxu0 %v16098_v15  ;;  %v22388_v15 = vld [vmem:[#allocation35_spill] sm:$0xff] }
 0x48f   : > { %13711 = vmatmul.mubr.msk.bf16.gmra.mrb[60].mxu0 %vm4038_vm2, %v22371_v44 }
 0x490   : > { %6892 = vmatmul.mubr.bf16.gmra.mrb[124].mxu1 %v22341_v13  ;;  %6322 = vmatprep.mubr.bf16.mxu0 %v22362_v59  ;;  %v22373_v13 = vld [vmem:[#allocation129_spill] sm:$0xff] }
 0x491   : > { %6901 = vmatprep.mubr.bf16.mxu1 %v22342_v18  ;;  %9700 = vmatpush1.bf16.msra.mxu0 %v16096_v36  ;;  %v22374_v18 = vld [vmem:[#allocation130_spill] sm:$0xff] }
 0x492   : > { %9701 = vmatprep.subr.bf16.mxu0 %v16101_v53  ;;  %v16144_v36 = vld [vmem:[%s21703_s5 + $0x2e0] ss:$16 sps:$4 sm:$0xff]   ;;  %v16147_v53 = vld [vmem:[%s21703_s5 + $0xe8] ss:$16 sps:$4 sm:$0xff]  }
 0x495   : > { %9702 = vmatpush1.bf16.msra.mxu0 %v16099_v38  ;;  %v16152_v38 = vld [vmem:[%s21703_s5 + $0x304] ss:$16 sps:$4 sm:$0xff]  }
 0x496   : > { %9864 = vmatprep.subr.bf16.mxu0 %v16104_v57  ;;  %v16150_v57 = vld [vmem:[%s21703_s5 + $0x300] ss:$16 sps:$4 sm:$0xff]  }
 0x497   : > { %13712 = vmatmul.mubr.msk.bf16.gmra.mrb[64].mxu0 %vm4038_vm2, %v22372_v8 }
 0x498   : > { %6902 = vmatmul.mubr.bf16.gmra.mrb[128].mxu1 %v22343_v14  ;;  %6332 = vmatprep.mubr.bf16.mxu0 %v22362_v59  ;;  %v22375_v14 = vld [vmem:[#allocation131_spill] sm:$0xff] }
 0x499   : > { %6911 = vmatprep.mubr.bf16.mxu1 %v22344_v54  ;;  %v22376_v54 = vld [vmem:[#allocation132_spill] sm:$0xff] }
 0x49f   : > { %13713 = vmatmul.mubr.msk.bf16.gmra.mrb[68].mxu0 %vm4038_vm2, %v22373_v13 }
 0x4a0   : > { %6912 = vmatmul.mubr.bf16.gmra.mrb[132].mxu1 %v22347_v25  ;;  %6342 = vmatprep.mubr.bf16.mxu0 %v22362_v59  ;;  %v22377_v25 = vld [vmem:[#allocation133_spill] sm:$0xff] }
 0x4a1   : > { %6921 = vmatprep.mubr.bf16.mxu1 %v22348_v42  ;;  %v22378_v42 = vld [vmem:[#allocation134_spill] sm:$0xff] }
 0x4a7   : > { %13714 = vmatmul.mubr.msk.bf16.gmra.mrb[72].mxu0 %vm4038_vm2, %v22374_v18 }
 0x4a8   : > { %6922 = vmatmul.mubr.bf16.gmra.mrb[136].mxu1 %v22349_v5  ;;  %6352 = vmatprep.mubr.bf16.mxu0 %v22362_v59  ;;  %v22379_v5 = vld [vmem:[#allocation135_spill] sm:$0xff] }
 0x4a9   : > { %6931 = vmatprep.mubr.bf16.mxu1 %v22350_v41  ;;  %v22380_v41 = vld [vmem:[#allocation7_spill] sm:$0xff] }
 0x4af   : > { %13715 = vmatmul.mubr.msk.bf16.gmra.mrb[76].mxu0 %vm4038_vm2, %v22375_v14 }
 0x4b0   : > { %6932 = vmatmul.mubr.bf16.gmra.mrb[140].mxu1 %v22353_v10  ;;  %6362 = vmatprep.mubr.bf16.mxu0 %v22362_v59  ;;  %v16102_v10 = vld [vmem:[%s21703_s5 + $0x200] ss:$16 sps:$4 sm:$0xff]  }
 0x4b1   : > { %6941 = vmatprep.mubr.bf16.mxu1 %v22354_v32  ;;  %v16105_v32 = vld [vmem:[%s21703_s5 + $0x8] ss:$16 sps:$4 sm:$0xff]  }
 0x4b7   : > { %13716 = vmatmul.mubr.msk.bf16.gmra.mrb[80].mxu0 %vm4038_vm2, %v22376_v54 }
 0x4b8   : > { %6942 = vmatmul.mubr.bf16.gmra.mrb[144].mxu1 %v22355_v7  ;;  %6372 = vmatprep.mubr.bf16.mxu0 %v22362_v59  ;;  %v16110_v7 = vld [vmem:[%s21703_s5 + $0x224] ss:$16 sps:$4 sm:$0xff]  }
 0x4b9   : > { %6951 = vmatprep.mubr.bf16.mxu1 %v22356_v6  ;;  %v22381_v6 = vld [vmem:[#allocation5_spill] sm:$0xff] }
 0x4bf   : > { %13717 = vmatmul.mubr.msk.bf16.gmra.mrb[84].mxu0 %vm4038_vm2, %v22377_v25 }
 0x4c0   : > { %6952 = vmatmul.mubr.bf16.gmra.mrb[148].mxu1 %v22357_v48  ;;  %6382 = vmatprep.mubr.bf16.mxu0 %v22362_v59  ;;  %v16113_v48 = vld [vmem:[%s21703_s5 + $0x2c] ss:$16 sps:$4 sm:$0xff]  }
 0x4c1   : > { %6961 = vmatprep.mubr.bf16.mxu1 %v22358_v16  ;;  %v16108_v16 = vld [vmem:[%s21703_s5 + $0x220] ss:$16 sps:$4 sm:$0xff]  }
 0x4c7   : > { %13718 = vmatmul.mubr.msk.bf16.gmra.mrb[88].mxu0 %vm4038_vm2, %v22378_v42 }
 0x4c8   : > { %6962 = vmatmul.mubr.bf16.gmra.mrb[152].mxu1 %v22359_v56  ;;  %6392 = vmatprep.mubr.bf16.mxu0 %v22362_v59  ;;  %v22382_v56 = vld [vmem:[#allocation13_spill] sm:$0xff] }
 0x4c9   : > { %6971 = vmatprep.mubr.bf16.mxu1 %v22360_v45  ;;  %v16111_v45 = vld [vmem:[%s21703_s5 + $0x28] ss:$16 sps:$4 sm:$0xff]  }
 0x4cf   : > { %13719 = vmatmul.mubr.msk.bf16.gmra.mrb[92].mxu0 %vm4038_vm2, %v22379_v5 }
 0x4d0   : > { %6972 = vmatmul.mubr.bf16.gmra.mrb[156].mxu1 %v22361_v37  ;;  %9703 = vmatprep.mubr.bf16.mxu0 %v22380_v41  ;;  %v16116_v37 = vld [vmem:[%s21703_s5 + $0x244] ss:$16 sps:$4 sm:$0xff]  }
 0x4d1   : > { %7014 = vmatprep.mubr.bf16.mxu1 %v22362_v59 }
 0x4d7   : > { %9704 = vmatmul.mubr.bf16.vlgmr.msra.gmra.mrb[128].mxu0 %v22381_v6 }
 0x4d8   : > { %13720 = vmatmul.mubr.msk.bf16.vlgmr.msra.gmra.mrb[96].mxu1 %vm4038_vm2, %v22363_v27  ;;  %9865 = vmatpush1.bf16.msra.mxu0 %v16102_v10  ;;  %v16119_v27 = vld [vmem:[%s21703_s5 + $0x4c] ss:$16 sps:$4 sm:$0xff]   ;;  %v16153_v10 = vld [vmem:[%s21703_s5 + $0x108] ss:$16 sps:$4 sm:$0xff]  }
 0x4d9   : > { %10444 = vmatpush1.bf16.msra.mxu1 %v16105_v32  ;;  %9713 = vmatprep.mubr.bf16.mxu0 %v22382_v56  ;;  %v16158_v32 = vld [vmem:[%s21703_s5 + $0x324] ss:$16 sps:$4 sm:$0xff]  }
 0x4da   : > { %7024 = vmatprep.mubr.bf16.mxu1 %v22362_v59  ;;  %9866 = vmatprep.subr.bf16.mxu0 %v16110_v7  ;;  %v22389_v7 = vld [vmem:[#allocation39_spill] sm:$0xff] }
 0x4db   : > { %10445 = vmatprep.subr.bf16.mxu1 %v16113_v48  ;;  %v16161_v48 = vld [vmem:[%s21703_s5 + $0x12c] ss:$16 sps:$4 sm:$0xff]  }
 0x4dc   : > { %9867 = vmatpush1.bf16.msra.mxu0 %v16108_v16  ;;  %v22390_v16 = vld [vmem:[#allocation45_spill] sm:$0xff] }
 0x4dd   : > { %10446 = vmatpush1.bf16.msra.mxu1 %v16111_v45  ;;  %9868 = vmatprep.subr.bf16.mxu0 %v16116_v37  ;;  %v16156_v45 = vld [vmem:[%s21703_s5 + $0x320] ss:$16 sps:$4 sm:$0xff]   ;;  %v16159_v37 = vld [vmem:[%s21703_s5 + $0x128] ss:$16 sps:$4 sm:$0xff]  }
 0x4de   : > { %10447 = vmatprep.subr.bf16.mxu1 %v16119_v27  ;;  %v16164_v27 = vld [vmem:[%s21703_s5 + $0x344] ss:$16 sps:$4 sm:$0xff]  }
 0x4df   : > { %9714 = vmatmul.mubr.bf16.gmra.mrb[132].mxu0 %v22383_v35 }
 0x4e0   : > { %13721 = vmatmul.mubr.msk.bf16.gmra.mrb[100].mxu1 %vm4038_vm2, %v22365_v51  ;;  %9723 = vmatprep.mubr.bf16.mxu0 %v22384_v31  ;;  %v16131_v51 = vld [vmem:[%s21703_s5 + $0x8c] ss:$16 sps:$4 sm:$0xff]  }
 0x4e1   : > { %7034 = vmatprep.mubr.bf16.mxu1 %v22362_v59  ;;  %9869 = vmatpush1.bf16.msra.mxu0 %v16114_v46  ;;  %v16162_v46 = vld [vmem:[%s21703_s5 + $0x340] ss:$16 sps:$4 sm:$0xff]  }
 0x4e2   : > { %10448 = vmatpush1.bf16.msra.mxu1 %v16117_v28  ;;  %9870 = vmatprep.subr.bf16.mxu0 %v16122_v0  ;;  %v16165_v28 = vld [vmem:[%s21703_s5 + $0x148] ss:$16 sps:$4 sm:$0xff]   ;;  %v16170_v0 = vld [vmem:[%s21703_s5 + $0x364] ss:$16 sps:$4 sm:$0xff]  }
 0x4e3   : > { %10449 = vmatprep.subr.bf16.mxu1 %v16125_v58  ;;  %v22391_v58 = vld [vmem:[#allocation41_spill] sm:$0xff] }
 0x4e5   : > { %9871 = vmatpush1.bf16.msra.mxu0 %v16120_v21  ;;  %v16173_v21 = vld [vmem:[%s21703_s5 + $0x16c] ss:$16 sps:$4 sm:$0xff]  }
 0x4e6   : > { %10450 = vmatpush1.bf16.msra.mxu1 %v16123_v3  ;;  %9872 = vmatprep.subr.bf16.mxu0 %v16128_v17  ;;  %v22392_v3 = vld [vmem:[#allocation50_spill] sm:$0xff] }
 0x4e7   : > { %9724 = vmatmul.mubr.bf16.gmra.mrb[136].mxu0 %v22385_v49  ;;  %10451 = vmatprep.subr.bf16.mxu1 %v16131_v51  ;;  %v16168_v17 = vld [vmem:[%s21703_s5 + $0x360] ss:$16 sps:$4 sm:$0xff]   ;;  %v16171_v51 = vld [vmem:[%s21703_s5 + $0x168] ss:$16 sps:$4 sm:$0xff]  }
 0x4e8   : > { %13722 = vmatmul.mubr.msk.bf16.gmra.mrb[104].mxu1 %vm4038_vm2, %v22366_v40  ;;  %9733 = vmatprep.mubr.bf16.mxu0 %v22386_v11  ;;  %v16143_v40 = vld [vmem:[%s21703_s5 + $0xcc] ss:$16 sps:$4 sm:$0xff]  }
 0x4e9   : > { %7044 = vmatprep.mubr.bf16.mxu1 %v22362_v59  ;;  %9873 = vmatpush1.bf16.msra.mxu0 %v16126_v1  ;;  %v16176_v1 = vld [vmem:[%s21703_s5 + $0x384] ss:$16 sps:$4 sm:$0xff]  }
 0x4ea   : > { %10452 = vmatpush1.bf16.msra.mxu1 %v16129_v23  ;;  %9874 = vmatprep.subr.bf16.mxu0 %v16134_v33  ;;  %v16174_v23 = vld [vmem:[%s21703_s5 + $0x380] ss:$16 sps:$4 sm:$0xff]   ;;  %v16177_v33 = vld [vmem:[%s21703_s5 + $0x188] ss:$16 sps:$4 sm:$0xff]  }
 0x4eb   : > { %10453 = vmatprep.subr.bf16.mxu1 %v16137_v19  ;;  %v16182_v19 = vld [vmem:[%s21703_s5 + $0x3a4] ss:$16 sps:$4 sm:$0xff]  }
 0x4ed   : > { %9875 = vmatpush1.bf16.msra.mxu0 %v16132_v2  ;;  %v22393_v2 = vld [vmem:[#allocation47_spill] sm:$0xff] }
 0x4ee   : > { %10454 = vmatpush1.bf16.msra.mxu1 %v16135_v39  ;;  %9876 = vmatprep.subr.bf16.mxu0 %v16140_v22  ;;  %v16185_v39 = vld [vmem:[%s21703_s5 + $0x1ac] ss:$16 sps:$4 sm:$0xff]   ;;  %v22394_v22 = vld [vmem:[#allocation52_spill] sm:$0xff] }
 0x4ef   : > { %9734 = vmatmul.mubr.bf16.gmra.mrb[140].mxu0 %v22387_v55  ;;  %10455 = vmatprep.subr.bf16.mxu1 %v16143_v40  ;;  %v16180_v40 = vld [vmem:[%s21703_s5 + $0x3a0] ss:$16 sps:$4 sm:$0xff]  }
 0x4f0   : > { %13723 = vmatmul.mubr.msk.bf16.gmra.mrb[108].mxu1 %vm4038_vm2, %v22367_v24  ;;  %9743 = vmatprep.mubr.bf16.mxu0 %v22388_v15  ;;  %v16155_v24 = vld [vmem:[%s21703_s5 + $0x10c] ss:$16 sps:$4 sm:$0xff]  }
 0x4f1   : > { %7054 = vmatprep.mubr.bf16.mxu1 %v22362_v59  ;;  %9877 = vmatpush1.bf16.msra.mxu0 %v16138_v47  ;;  %v16183_v47 = vld [vmem:[%s21703_s5 + $0x1a8] ss:$16 sps:$4 sm:$0xff]  }
 0x4f2   : > { %10456 = vmatpush1.bf16.msra.mxu1 %v16141_v30  ;;  %9878 = vmatprep.subr.bf16.mxu0 %v16146_v61  ;;  %v16188_v30 = vld [vmem:[%s21703_s5 + $0x3c4] ss:$16 sps:$4 sm:$0xff]   ;;  %v16186_v61 = vld [vmem:[%s21703_s5 + $0x3c0] ss:$16 sps:$4 sm:$0xff]  }
 0x4f3   : > { %10457 = vmatprep.subr.bf16.mxu1 %v16149_v20  ;;  %v16189_v20 = vld [vmem:[%s21703_s5 + $0x1c8] ss:$16 sps:$4 sm:$0xff]  }
 0x4f5   : > { %9879 = vmatpush1.bf16.msra.mxu0 %v16144_v36  ;;  %v16194_v36 = vld [vmem:[%s21703_s5 + $0x3e4] ss:$16 sps:$4 sm:$0xff]  }
 0x4f6   : > { %10458 = vmatpush1.bf16.msra.mxu1 %v16147_v53  ;;  %9880 = vmatprep.subr.bf16.mxu0 %v16152_v38  ;;  %v22395_v53 = vld [vmem:[#allocation51_spill] sm:$0xff] }
 0x4f7   : > { %9744 = vmatmul.mubr.bf16.gmra.mrb[144].mxu0 %v22389_v7  ;;  %10459 = vmatprep.subr.bf16.mxu1 %v16155_v24  ;;  %v16197_v38 = vld [vmem:[%s21703_s5 + $0x1ec] ss:$16 sps:$4 sm:$0xff]  }
 0x4f8   : > { %13724 = vmatmul.mubr.msk.bf16.gmra.mrb[112].mxu1 %vm4038_vm2, %v22368_v60  ;;  %9753 = vmatprep.mubr.bf16.mxu0 %v22390_v16  ;;  %v16167_v60 = vld [vmem:[%s21703_s5 + $0x14c] ss:$16 sps:$4 sm:$0xff]  }
 0x4f9   : > { %7064 = vmatprep.mubr.bf16.mxu1 %v22362_v59  ;;  %9881 = vmatpush1.bf16.msra.mxu0 %v16150_v57  ;;  %v22396_v24 = vld [vmem:[#allocation61_spill] sm:$0xff]  ;;  %v16192_v57 = vld [vmem:[%s21703_s5 + $0x3e0] ss:$16 sps:$4 sm:$0xff]  }
 0x4fa   : > { %10460 = vmatpush1.bf16.msra.mxu1 %v16153_v10  ;;  %9882 = vmatprep.subr.bf16.mxu0 %v16158_v32  ;;  %v16195_v10 = vld [vmem:[%s21703_s5 + $0x1e8] ss:$16 sps:$4 sm:$0xff]   ;;  %v16200_v32 = vld [vmem:[%s21703_s5 + $0x404] ss:$16 sps:$4 sm:$0xff]  }
 0x4fb   : > { %10461 = vmatprep.subr.bf16.mxu1 %v16161_v48  ;;  %v22397_v48 = vld [vmem:[#allocation53_spill] sm:$0xff] }
 0x4fd   : > { %9883 = vmatpush1.bf16.msra.mxu0 %v16156_v45  ;;  %v22398_v45 = vld [vmem:[#allocation6_spill] sm:$0xff] }
 0x4fe   : > { %10462 = vmatpush1.bf16.msra.mxu1 %v16159_v37  ;;  %9884 = vmatprep.subr.bf16.mxu0 %v16164_v27  ;;  %v22399_v37 = vld [vmem:[#allocation62_spill] sm:$0xff] }
 0x4ff   : > { %9754 = vmatmul.mubr.bf16.gmra.mrb[148].mxu0 %v22391_v58  ;;  %10463 = vmatprep.subr.bf16.mxu1 %v16167_v60  ;;  %v22400_v27 = vld [vmem:[#allocation10_spill] sm:$0xff] }
 0x500   : > { %13725 = vmatmul.mubr.msk.bf16.gmra.mrb[116].mxu1 %vm4038_vm2, %v22369_v52  ;;  %9763 = vmatprep.mubr.bf16.mxu0 %v22392_v3  ;;  %v16179_v52 = vld [vmem:[%s21703_s5 + $0x18c] ss:$16 sps:$4 sm:$0xff]   ;;  %v22401_v60 = vld [vmem:[#allocation2_spill] sm:$0xff] }
 0x501   : > { %7074 = vmatprep.mubr.bf16.mxu1 %v22362_v59  ;;  %9885 = vmatpush1.bf16.msra.mxu0 %v16162_v46  ;;  %v7195_v46 = vsub.s32 4, %v22401_v60 }
 0x502   : > { %10464 = vmatpush1.bf16.msra.mxu1 %v16165_v28  ;;  %9886 = vmatprep.subr.bf16.mxu0 %v16170_v0  ;;  %v7199_v28 = vsub.s32 5, %v22401_v60  ;;  %v22402_v0 = vld [vmem:[#allocation8_spill] sm:$0xff] }
 0x503   : > { %10465 = vmatprep.subr.bf16.mxu1 %v16173_v21 }
 0x505   : > { %9887 = vmatpush1.bf16.msra.mxu0 %v16168_v17 }
 0x506   : > { %10466 = vmatpush1.bf16.msra.mxu1 %v16171_v51  ;;  %9888 = vmatprep.subr.bf16.mxu0 %v16176_v1 }
 0x507   : > { %9764 = vmatmul.mubr.bf16.gmra.mrb[152].mxu0 %v22393_v2  ;;  %10467 = vmatprep.subr.bf16.mxu1 %v16179_v52 }
 0x508   : > { %13726 = vmatmul.mubr.msk.bf16.gmra.mrb[120].mxu1 %vm4038_vm2, %v22370_v26  ;;  %9773 = vmatprep.mubr.bf16.mxu0 %v22394_v22  ;;  %v16191_v26 = vld [vmem:[%s21703_s5 + $0x1cc] ss:$16 sps:$4 sm:$0xff]  }
 0x509   : > { %7084 = vmatprep.mubr.bf16.mxu1 %v22362_v59  ;;  %9889 = vmatpush1.bf16.msra.mxu0 %v16174_v23 }
 0x50a   : > { %10468 = vmatpush1.bf16.msra.mxu1 %v16177_v33  ;;  %9890 = vmatprep.subr.bf16.mxu0 %v16182_v19 }
 0x50b   : > { %10469 = vmatprep.subr.bf16.mxu1 %v16185_v39 }
 0x50d   : > { %9891 = vmatpush1.bf16.msra.mxu0 %v16180_v40 }
 0x50e   : > { %10470 = vmatpush1.bf16.msra.mxu1 %v16183_v47  ;;  %9892 = vmatprep.subr.bf16.mxu0 %v16188_v30 }
 0x50f   : > { %9774 = vmatmul.mubr.bf16.gmra.mrb[156].mxu0 %v22395_v53  ;;  %10471 = vmatprep.subr.bf16.mxu1 %v16191_v26  ;;  %v22404_v26 = vld [vmem:[#allocation11_spill] sm:$0xff] }
 0x510   : > { %13727 = vmatmul.mubr.msk.bf16.gmra.mrb[124].mxu1 %vm4038_vm2, %v22371_v44  ;;  %9783 = vmatprep.mubr.bf16.mxu0 %v22396_v24  ;;  %v16203_v44 = vld [vmem:[%s21703_s5 + $0x20c] ss:$16 sps:$4 sm:$0xff]  }
 0x511   : > { %7094 = vmatprep.mubr.bf16.mxu1 %v22362_v59  ;;  %9893 = vmatpush1.bf16.msra.mxu0 %v16186_v61 }
 0x512   : > { %10472 = vmatpush1.bf16.msra.mxu1 %v16189_v20  ;;  %9894 = vmatprep.subr.bf16.mxu0 %v16194_v36  ;;  %v22405_v20 = vld [vmem:[#allocation12_spill] sm:$0xff] }
 0x513   : > { %10473 = vmatprep.subr.bf16.mxu1 %v16197_v38 }
 0x515   : > { %9895 = vmatpush1.bf16.msra.mxu0 %v16192_v57 }
 0x516   : > { %10474 = vmatpush1.bf16.msra.mxu1 %v16195_v10  ;;  %10057 = vmatprep.subr.bf16.mxu0 %v16200_v32 }
 0x517   : > { %9784 = vmatmul.mubr.bf16.gmra.mrb[160].mxu0 %v22397_v48  ;;  %10636 = vmatprep.subr.bf16.mxu1 %v16203_v44 }
 0x518   : > { %13728 = vmatmul.mubr.msk.bf16.gmra.mrb[128].mxu1 %vm4038_vm2, %v22372_v8  ;;  %9793 = vmatprep.mubr.bf16.mxu0 %v22398_v45  ;;  %v20175_v8 = vld [vmem:[%s21702_s4] sm:$0xff] }
 0x519   : > { %7104 = vmatprep.mubr.bf16.mxu1 %v22362_v59  ;;  %v20178_v21 = vrot.slane %v20175_v8, %v7195_v46  ;;  %v20184_v17 = vrot.slane %v20175_v8, %v7199_v28 }
 0x51f   : > { %9794 = vmatmul.mubr.bf16.gmra.mrb[164].mxu0 %v22399_v37 }
 0x520   : > { %13729 = vmatmul.mubr.msk.bf16.gmra.mrb[132].mxu1 %vm4038_vm2, %v22373_v13  ;;  %9803 = vmatprep.mubr.bf16.mxu0 %v22400_v27  ;;  %v22403_v13 = vld [vmem:[#allocation63_spill] sm:$0xff] }
 0x521   : > { %7114 = vmatprep.mubr.bf16.mxu1 %v22362_v59 }
 0x527   : > { %9804 = vmatmul.mubr.bf16.gmra.mrb[168].mxu0 %v22402_v0 }
 0x528   : > { %13730 = vmatmul.mubr.msk.bf16.gmra.mrb[136].mxu1 %vm4038_vm2, %v22374_v18  ;;  %9813 = vmatprep.mubr.bf16.mxu0 %v22403_v13 }
 0x529   : > { %7124 = vmatprep.mubr.bf16.mxu1 %v22362_v59 }
 0x52a   : > { %v6244_v51 = vpop.f32.mrb[32].mxu0 }
 0x52b   : > { %v7221_v1 = vadd.f32 %v20178_v21, %v6244_v51  ;;  %v6246_v52 = vpop.f32.mrb[33].mxu0 }
 0x52c   : > { %v7222_v23 = vadd.f32 %v20184_v17, %v6246_v52  ;;  %v6248_v33 = vpop.f32.mrb[34].mxu0 }
 0x52d   : > { %v7477_v19 = vmul.f32 0.2, %v7221_v1  ;;  %v7229_v39 = vadd.f32 %v20178_v21, %v6248_v33  ;;  %v6250_v40 = vpop.f32.mrb[35].mxu0 }
 0x52e   : > { %v7478_v47 = vmul.f32 0.2, %v7222_v23  ;;  %v7230_v18 = vadd.f32 %v20184_v17, %v6250_v40 }
 0x52f   : > { %v7485_v30 = vmul.f32 0.2, %v7229_v39  ;;  %9814 = vmatmul.mubr.bf16.gmra.mrb[172].mxu0 %v22404_v26  ;;  %v7733_v36 = vmax.f32 %v7221_v1, %v7477_v19 }
 0x530   : > { %v7486_v61 = vmul.f32 0.2, %v7230_v18  ;;  %13731 = vmatmul.mubr.msk.bf16.gmra.mrb[140].mxu1 %vm4038_vm2, %v22375_v14  ;;  %9823 = vmatprep.mubr.bf16.mxu0 %v22405_v20  ;;  %v7734_v57 = vmax.f32 %v7222_v23, %v7478_v47  ;;  %v22408_v47 = vld [vmem:[#allocation64_spill] sm:$0xff] }
 0x531   : > { %v7741_v38 = vmax.f32 %v7229_v39, %v7485_v30  ;;  %7134 = vmatprep.mubr.bf16.mxu1 %v22362_v59  ;;  %v22409_v30 = vld [vmem:[#allocation16_spill] sm:$0xff] }
 0x532   : > { %v7742_v10 = vmax.f32 %v7230_v18, %v7486_v61  ;;  %v6254_v32 = vpop.f32.mrb[36].mxu0 }
 0x533   : > { %v20196_v44 = vpack.c.bf16 %v7741_v38, %v7733_v36  ;;  %v7237_v46 = vadd.f32 %v20178_v21, %v6254_v32  ;;  %v6256_v28 = vpop.f32.mrb[37].mxu0 }
 0x534   : > { %v7238_v51 = vadd.f32 %v20184_v17, %v6256_v28  ;;  %v6258_v52 = vpop.f32.mrb[38].mxu0  ;;  %v20200_v33 = vpack.c.bf16 %v7742_v10, %v7734_v57 }
 0x535   : > { %22406 = vst [vmem:[#allocation42_spill] sm:$0xff] %v20196_v44  ;;  %v7493_v14 = vmul.f32 0.2, %v7237_v46  ;;  %v7245_v40 = vadd.f32 %v20178_v21, %v6258_v52  ;;  %v6260_v1 = vpop.f32.mrb[39].mxu0 }
 0x536   : > { %22407 = vst [vmem:[#allocation43_spill] sm:$0xff] %v20200_v33  ;;  %v7494_v19 = vmul.f32 0.2, %v7238_v51  ;;  %v7246_v39 = vadd.f32 %v20184_v17, %v6260_v1 }
 0x537   : > { %v7501_v23 = vmul.f32 0.2, %v7245_v40  ;;  %9824 = vmatmul.mubr.bf16.gmra.mrb[176].mxu0 %v22408_v47  ;;  %v7749_v61 = vmax.f32 %v7237_v46, %v7493_v14 }
 0x538   : > { %v7502_v18 = vmul.f32 0.2, %v7246_v39  ;;  %13732 = vmatmul.mubr.msk.bf16.gmra.mrb[144].mxu1 %vm4038_vm2, %v22376_v54  ;;  %9833 = vmatprep.mubr.bf16.mxu0 %v22409_v30  ;;  %v7750_v38 = vmax.f32 %v7238_v51, %v7494_v19  ;;  %v22412_v19 = vld [vmem:[#allocation14_spill] sm:$0xff] }
 0x539   : > { %v7757_v36 = vmax.f32 %v7245_v40, %v7501_v23  ;;  %7144 = vmatprep.mubr.bf16.mxu1 %v22362_v59  ;;  %v22413_v23 = vld [vmem:[#allocation65_spill] sm:$0xff] }
 0x53a   : > { %v7758_v57 = vmax.f32 %v7246_v39, %v7502_v18  ;;  %v6264_v10 = vpop.f32.mrb[40].mxu0 }
 0x53b   : > { %v7253_v32 = vadd.f32 %v20178_v21, %v6264_v10  ;;  %v6266_v28 = vpop.f32.mrb[41].mxu0  ;;  %v20210_v52 = vpack.c.bf16 %v7757_v36, %v7749_v61 }
 0x53c   : > { %v7254_v1 = vadd.f32 %v20184_v17, %v6266_v28  ;;  %v6268_v44 = vpop.f32.mrb[42].mxu0  ;;  %v20213_v33 = vpack.c.bf16 %v7758_v57, %v7750_v38 }
 0x53d   : > { %22410 = vst [vmem:[#allocation75_spill] sm:$0xff] %v20210_v52  ;;  %v7509_v54 = vmul.f32 0.2, %v7253_v32  ;;  %v7261_v4 = vadd.f32 %v20178_v21, %v6268_v44  ;;  %v6270_v46 = vpop.f32.mrb[43].mxu0 }
 0x53e   : > { %22411 = vst [vmem:[#allocation76_spill] sm:$0xff] %v20213_v33  ;;  %v7510_v14 = vmul.f32 0.2, %v7254_v1  ;;  %v7262_v40 = vadd.f32 %v20184_v17, %v6270_v46 }
 0x53f   : > { %v7517_v51 = vmul.f32 0.2, %v7261_v4  ;;  %9834 = vmatmul.mubr.bf16.gmra.mrb[180].mxu0 %v22412_v19  ;;  %v7765_v18 = vmax.f32 %v7253_v32, %v7509_v54 }
 0x540   : > { %v7518_v39 = vmul.f32 0.2, %v7262_v40  ;;  %13733 = vmatmul.mubr.msk.bf16.gmra.mrb[148].mxu1 %vm4038_vm2, %v22377_v25  ;;  %9843 = vmatprep.mubr.bf16.mxu0 %v22413_v23  ;;  %v7766_v36 = vmax.f32 %v7254_v1, %v7510_v14  ;;  %v22416_v14 = vld [vmem:[#allocation17_spill] sm:$0xff] }
 0x541   : > { %v7773_v61 = vmax.f32 %v7261_v4, %v7517_v51  ;;  %7154 = vmatprep.mubr.bf16.mxu1 %v22362_v59  ;;  %v22417_v51 = vld [vmem:[#allocation18_spill] sm:$0xff] }
 0x542   : > { %v7774_v38 = vmax.f32 %v7262_v40, %v7518_v39  ;;  %v6274_v44 = vpop.f32.mrb[44].mxu0 }
 0x543   : > { %v7269_v57 = vadd.f32 %v20178_v21, %v6274_v44  ;;  %v6276_v10 = vpop.f32.mrb[45].mxu0  ;;  %v20223_v28 = vpack.c.bf16 %v7773_v61, %v7765_v18 }
 0x544   : > { %v7270_v46 = vadd.f32 %v20184_v17, %v6276_v10  ;;  %v6278_v52 = vpop.f32.mrb[46].mxu0  ;;  %v20226_v33 = vpack.c.bf16 %v7774_v38, %v7766_v36 }
 0x545   : > { %22414 = vst [vmem:[#allocation44_spill] sm:$0xff] %v20223_v28  ;;  %v7525_v25 = vmul.f32 0.2, %v7269_v57  ;;  %v7277_v50 = vadd.f32 %v20178_v21, %v6278_v52  ;;  %v6280_v32 = vpop.f32.mrb[47].mxu0 }
 0x546   : > { %22415 = vst [vmem:[#allocation46_spill] sm:$0xff] %v20226_v33  ;;  %v7526_v4 = vmul.f32 0.2, %v7270_v46  ;;  %v7278_v54 = vadd.f32 %v20184_v17, %v6280_v32 }
 0x547   : > { %v7533_v1 = vmul.f32 0.2, %v7277_v50  ;;  %9844 = vmatmul.mubr.bf16.gmra.mrb[184].mxu0 %v22416_v14  ;;  %v7781_v39 = vmax.f32 %v7269_v57, %v7525_v25  ;;  %v22419_v25 = vld [vmem:[#allocation66_spill] sm:$0xff] }
 0x548   : > { %v7534_v40 = vmul.f32 0.2, %v7278_v54  ;;  %13734 = vmatmul.mubr.msk.bf16.gmra.mrb[152].mxu1 %vm4038_vm2, %v22378_v42  ;;  %9853 = vmatprep.mubr.bf16.mxu0 %v22417_v51  ;;  %v7782_v61 = vmax.f32 %v7270_v46, %v7526_v4 }
 0x549   : > { %v7789_v18 = vmax.f32 %v7277_v50, %v7533_v1  ;;  %7164 = vmatprep.mubr.bf16.mxu1 %v22362_v59 }
 0x54a   : > { %v7790_v36 = vmax.f32 %v7278_v54, %v7534_v40  ;;  %v6284_v52 = vpop.f32.mrb[48].mxu0  ;;  %v22420_v54 = vld [vmem:[#allocation22_spill] sm:$0xff] }
 0x54b   : > { %v7285_v38 = vadd.f32 %v20178_v21, %v6284_v52  ;;  %v6286_v44 = vpop.f32.mrb[49].mxu0  ;;  %v20236_v10 = vpack.c.bf16 %v7789_v18, %v7781_v39 }
 0x54c   : > { %v7286_v32 = vadd.f32 %v20184_v17, %v6286_v44  ;;  %v6288_v28 = vpop.f32.mrb[50].mxu0  ;;  %v20239_v33 = vpack.c.bf16 %v7790_v36, %v7782_v61 }
 0x54d   : > { %22418 = vst [vmem:[#allocation48_spill] sm:$0xff] %v20236_v10  ;;  %v7541_v42 = vmul.f32 0.2, %v7285_v38  ;;  %v7293_v51 = vadd.f32 %v20178_v21, %v6288_v28  ;;  %v6290_v57 = vpop.f32.mrb[51].mxu0 }
 0x54e   : > { %v7542_v50 = vmul.f32 0.2, %v7286_v32  ;;  %v7294_v59 = vadd.f32 %v20184_v17, %v6290_v57 }
 0x54f   : > { %v7549_v46 = vmul.f32 0.2, %v7293_v51  ;;  %9854 = vmatmul.mubr.bf16.gmra.mrb[188].mxu0 %v22419_v25  ;;  %v7797_v1 = vmax.f32 %v7285_v38, %v7541_v42 }
 0x550   : > { %v7550_v4 = vmul.f32 0.2, %v7294_v59  ;;  %13735 = vmatmul.mubr.msk.bf16.gmra.mrb[156].mxu1 %vm4038_vm2, %v22379_v5  ;;  %9896 = vmatprep.mubr.bf16.mxu0 %v22420_v54  ;;  %v7798_v39 = vmax.f32 %v7286_v32, %v7542_v50  ;;  %v16198_v5 = vld [vmem:[%s21703_s5 + $0x400] ss:$16 sps:$4 sm:$0xff]   ;;  %v16201_v32 = vld [vmem:[%s21703_s5 + $0x208] ss:$16 sps:$4 sm:$0xff]  }
 0x551   : > { %v7805_v40 = vmax.f32 %v7293_v51, %v7549_v46  ;;  %10475 = vmatprep.mubr.bf16.mxu1 %v22380_v41 }
 0x552   : > { %v7806_v18 = vmax.f32 %v7294_v59, %v7550_v4  ;;  %v6294_v28 = vpop.f32.mrb[52].mxu0  ;;  %v16206_v59 = vld [vmem:[%s21703_s5 + $0x424] ss:$16 sps:$4 sm:$0xff]  }
 0x553   : > { %v7301_v61 = vadd.f32 %v20178_v21, %v6294_v28  ;;  %v6296_v36 = vpop.f32.mrb[53].mxu0  ;;  %v20249_v52 = vpack.c.bf16 %v7805_v40, %v7797_v1  ;;  %v22423_v4 = vld [vmem:[#allocation20_spill] sm:$0xff]  ;;  %v16209_v1 = vld [vmem:[%s21703_s5 + $0x22c] ss:$16 sps:$4 sm:$0xff]  }
 0x554   : > { %v7302_v44 = vadd.f32 %v20184_v17, %v6296_v36  ;;  %v6298_v57 = vpop.f32.mrb[54].mxu0  ;;  %v20255_v10 = vpack.c.bf16 %v7806_v18, %v7798_v39  ;;  %v16204_v39 = vld [vmem:[%s21703_s5 + $0x420] ss:$16 sps:$4 sm:$0xff]   ;;  %v22424_v36 = vld [vmem:[#allocation67_spill] sm:$0xff] }
 0x555   : > { %22421 = vst [vmem:[#allocation49_spill] sm:$0xff] %v20249_v52  ;;  %v7557_v51 = vmul.f32 0.2, %v7301_v61  ;;  %v7309_v41 = vadd.f32 %v20178_v21, %v6298_v57  ;;  %v6300_v38 = vpop.f32.mrb[55].mxu0  ;;  %v16207_v57 = vld [vmem:[%s21703_s5 + $0x228] ss:$16 sps:$4 sm:$0xff]  }
 0x556   : > { %22422 = vst [vmem:[#allocation77_spill] sm:$0xff] %v20255_v10  ;;  %v7558_v42 = vmul.f32 0.2, %v7302_v44  ;;  %v7310_v50 = vadd.f32 %v20184_v17, %v6300_v38  ;;  %v16212_v38 = vld [vmem:[%s21703_s5 + $0x444] ss:$16 sps:$4 sm:$0xff]  }
 0x557   : > { %v7565_v46 = vmul.f32 0.2, %v7309_v41  ;;  %9897 = vmatmul.mubr.bf16.vlgmr.msra.gmra.mrb[128].mxu0 %v22423_v4  ;;  %v7813_v18 = vmax.f32 %v7301_v61, %v7557_v51  ;;  %v16215_v61 = vld [vmem:[%s21703_s5 + $0x24c] ss:$16 sps:$4 sm:$0xff]  }
 0x558   : > { %v7566_v40 = vmul.f32 0.2, %v7310_v50  ;;  %10058 = vmatpush1.bf16.msra.mxu0 %v16198_v5  ;;  %10476 = vmatmul.mubr.bf16.vlgmr.msra.gmra.mrb[160].mxu1 %v22381_v6  ;;  %v7814_v5 = vmax.f32 %v7302_v44, %v7558_v42 }
 0x559   : > { %v7821_v28 = vmax.f32 %v7309_v41, %v7565_v46  ;;  %10637 = vmatpush1.bf16.msra.mxu1 %v16201_v32  ;;  %9906 = vmatprep.mubr.bf16.mxu0 %v22424_v36 }
 0x55a   : > { %v7822_v52 = vmax.f32 %v7310_v50, %v7566_v40  ;;  %10485 = vmatprep.mubr.bf16.mxu1 %v22382_v56  ;;  %v6304_v6 = vpop.f32.mrb[56].mxu0  ;;  %10059 = vmatprep.subr.bf16.mxu0 %v16206_v59  ;;  %v16210_v59 = vld [vmem:[%s21703_s5 + $0x440] ss:$16 sps:$4 sm:$0xff]  }
 0x55b   : > { %v7317_v51 = vadd.f32 %v20178_v21, %v6304_v6  ;;  %v6306_v41 = vpop.f32.mrb[57].mxu0  ;;  %10638 = vmatprep.subr.bf16.mxu1 %v16209_v1  ;;  %v20285_v32 = vpack.c.bf16 %v7821_v28, %v7813_v18  ;;  %v16213_v18 = vld [vmem:[%s21703_s5 + $0x248] ss:$16 sps:$4 sm:$0xff]   ;;  %v16221_v28 = vld [vmem:[%s21703_s5 + $0x26c] ss:$16 sps:$4 sm:$0xff]  }
 0x55c   : > { %v7318_v46 = vadd.f32 %v20184_v17, %v6306_v41  ;;  %v6308_v10 = vpop.f32.mrb[58].mxu0  ;;  %10060 = vmatpush1.bf16.msra.mxu0 %v16204_v39  ;;  %v20288_v44 = vpack.c.bf16 %v7822_v52, %v7814_v5  ;;  %v16218_v52 = vld [vmem:[%s21703_s5 + $0x464] ss:$16 sps:$4 sm:$0xff]   ;;  %v22426_v39 = vld [vmem:[#allocation23_spill] sm:$0xff] }
 0x55d   : > { %22425 = vst [vmem:[#allocation78_spill] sm:$0xff] %v20285_v32  ;;  %v7573_v42 = vmul.f32 0.2, %v7317_v51  ;;  %v7325_v56 = vadd.f32 %v20178_v21, %v6308_v10  ;;  %v6310_v50 = vpop.f32.mrb[59].mxu0  ;;  %10639 = vmatpush1.bf16.msra.mxu1 %v16207_v57  ;;  %10061 = vmatprep.subr.bf16.mxu0 %v16212_v38  ;;  %v22427_v38 = vld [vmem:[#allocation24_spill] sm:$0xff] }
 0x55e   : > { %v7574_v40 = vmul.f32 0.2, %v7318_v46  ;;  %v7326_v1 = vadd.f32 %v20184_v17, %v6310_v50  ;;  %10640 = vmatprep.subr.bf16.mxu1 %v16215_v61  ;;  %v16216_v61 = vld [vmem:[%s21703_s5 + $0x460] ss:$16 sps:$4 sm:$0xff]  }
 0x55f   : > { %v7581_v10 = vmul.f32 0.2, %v7325_v56  ;;  %9907 = vmatmul.mubr.bf16.gmra.mrb[132].mxu0 %v22426_v39  ;;  %v7829_v5 = vmax.f32 %v7317_v51, %v7573_v42  ;;  %v16224_v51 = vld [vmem:[%s21703_s5 + $0x484] ss:$16 sps:$4 sm:$0xff]  }
 0x560   : > { %v7582_v57 = vmul.f32 0.2, %v7326_v1  ;;  %10486 = vmatmul.mubr.bf16.gmra.mrb[164].mxu1 %v22383_v35  ;;  %9916 = vmatprep.mubr.bf16.mxu0 %v22427_v38  ;;  %v7830_v41 = vmax.f32 %v7318_v46, %v7574_v40  ;;  %v16219_v35 = vld [vmem:[%s21703_s5 + $0x268] ss:$16 sps:$4 sm:$0xff]   ;;  %v16227_v46 = vld [vmem:[%s21703_s5 + $0x28c] ss:$16 sps:$4 sm:$0xff]  }
 0x561   : > { %v7837_v6 = vmax.f32 %v7325_v56, %v7581_v10  ;;  %10495 = vmatprep.mubr.bf16.mxu1 %v22384_v31  ;;  %10062 = vmatpush1.bf16.msra.mxu0 %v16210_v59 }
 0x562   : > { %v7838_v50 = vmax.f32 %v7326_v1, %v7582_v57  ;;  %v6314_v32 = vpop.f32.mrb[60].mxu0  ;;  %10641 = vmatpush1.bf16.msra.mxu1 %v16213_v18  ;;  %10063 = vmatprep.subr.bf16.mxu0 %v16218_v52 }
 0x563   : > { %v7333_v31 = vadd.f32 %v20178_v21, %v6314_v32  ;;  %v6316_v42 = vpop.f32.mrb[61].mxu0  ;;  %10642 = vmatprep.subr.bf16.mxu1 %v16221_v28  ;;  %v20321_v56 = vpack.c.bf16 %v7837_v6, %v7829_v5  ;;  %v16222_v32 = vld [vmem:[%s21703_s5 + $0x480] ss:$16 sps:$4 sm:$0xff]   ;;  %v16225_v5 = vld [vmem:[%s21703_s5 + $0x288] ss:$16 sps:$4 sm:$0xff]  }
 0x564   : > { %v7334_v59 = vadd.f32 %v20184_v17, %v6316_v42  ;;  %v6318_v40 = vpop.f32.mrb[62].mxu0  ;;  %v20324_v1 = vpack.c.bf16 %v7838_v50, %v7830_v41  ;;  %v16230_v6 = vld [vmem:[%s21703_s5 + $0x4a4] ss:$16 sps:$4 sm:$0xff]  }
 0x565   : > { %22428 = vst [vmem:[#allocation79_spill] sm:$0xff] %v20321_v56  ;;  %v7589_v18 = vmul.f32 0.2, %v7333_v31  ;;  %v7341_v52 = vadd.f32 %v20178_v21, %v6318_v40  ;;  %v6320_v10 = vpop.f32.mrb[63].mxu0  ;;  %10064 = vmatpush1.bf16.msra.mxu0 %v16216_v61  ;;  %v22430_v50 = vld [vmem:[#allocation68_spill] sm:$0xff] }
 0x566   : > { %22429 = vst [vmem:[#allocation80_spill] sm:$0xff] %v20324_v1  ;;  %v7590_v28 = vmul.f32 0.2, %v7334_v59  ;;  %v7342_v57 = vadd.f32 %v20184_v17, %v6320_v10  ;;  %10643 = vmatpush1.bf16.msra.mxu1 %v16219_v35  ;;  %10065 = vmatprep.subr.bf16.mxu0 %v16224_v51  ;;  %v16233_v61 = vld [vmem:[%s21703_s5 + $0x2ac] ss:$16 sps:$4 sm:$0xff]  }
 0x567   : > { %v7597_v41 = vmul.f32 0.2, %v7341_v52  ;;  %9917 = vmatmul.mubr.bf16.gmra.mrb[136].mxu0 %v22430_v50  ;;  %10644 = vmatprep.subr.bf16.mxu1 %v16227_v46  ;;  %v22431_v35 = vld [vmem:[#allocation27_spill] sm:$0xff]  ;;  %v7845_v51 = vmax.f32 %v7333_v31, %v7589_v18  ;;  %v16228_v10 = vld [vmem:[%s21703_s5 + $0x4a0] ss:$16 sps:$4 sm:$0xff]  }
 0x568   : > { %v7598_v42 = vmul.f32 0.2, %v7342_v57  ;;  %10496 = vmatmul.mubr.bf16.gmra.mrb[168].mxu1 %v22385_v49  ;;  %9926 = vmatprep.mubr.bf16.mxu0 %v22431_v35  ;;  %v7846_v56 = vmax.f32 %v7334_v59, %v7590_v28  ;;  %v16231_v49 = vld [vmem:[%s21703_s5 + $0x2a8] ss:$16 sps:$4 sm:$0xff]   ;;  %v16236_v31 = vld [vmem:[%s21703_s5 + $0x4c4] ss:$16 sps:$4 sm:$0xff]  }
 0x569   : > { %v7853_v40 = vmax.f32 %v7341_v52, %v7597_v41  ;;  %10505 = vmatprep.mubr.bf16.mxu1 %v22386_v11  ;;  %10066 = vmatpush1.bf16.msra.mxu0 %v16222_v32  ;;  %v16239_v59 = vld [vmem:[%s21703_s5 + $0x2cc] ss:$16 sps:$4 sm:$0xff]  }
 0x56a   : > { %v7854_v46 = vmax.f32 %v7342_v57, %v7598_v42  ;;  %v6324_v1 = vpop.f32.mrb[64].mxu0  ;;  %10645 = vmatpush1.bf16.msra.mxu1 %v16225_v5  ;;  %10067 = vmatprep.subr.bf16.mxu0 %v16230_v6 }
 0x56b   : > { %v7349_v11 = vadd.f32 %v20178_v21, %v6324_v1  ;;  %v6326_v18 = vpop.f32.mrb[65].mxu0  ;;  %10646 = vmatprep.subr.bf16.mxu1 %v16233_v61  ;;  %v20357_v52 = vpack.c.bf16 %v7853_v40, %v7845_v51  ;;  %v16234_v1 = vld [vmem:[%s21703_s5 + $0x4c0] ss:$16 sps:$4 sm:$0xff]   ;;  %v16237_v51 = vld [vmem:[%s21703_s5 + $0x2c8] ss:$16 sps:$4 sm:$0xff]  }
 0x56c   : > { %v7350_v32 = vadd.f32 %v20184_v17, %v6326_v18  ;;  %v6328_v28 = vpop.f32.mrb[66].mxu0  ;;  %v20360_v57 = vpack.c.bf16 %v7854_v46, %v7846_v56  ;;  %v16242_v56 = vld [vmem:[%s21703_s5 + $0x4e4] ss:$16 sps:$4 sm:$0xff]   ;;  %v22434_v46 = vld [vmem:[#allocation25_spill] sm:$0xff] }
 0x56d   : > { %22432 = vst [vmem:[#allocation81_spill] sm:$0xff] %v20357_v52  ;;  %v7605_v5 = vmul.f32 0.2, %v7349_v11  ;;  %v7357_v6 = vadd.f32 %v20178_v21, %v6328_v28  ;;  %v6330_v41 = vpop.f32.mrb[67].mxu0  ;;  %10068 = vmatpush1.bf16.msra.mxu0 %v16228_v10  ;;  %v16245_v10 = vld [vmem:[%s21703_s5 + $0x2ec] ss:$16 sps:$4 sm:$0xff]  }
 0x56e   : > { %22433 = vst [vmem:[#allocation82_spill] sm:$0xff] %v20360_v57  ;;  %v7606_v61 = vmul.f32 0.2, %v7350_v32  ;;  %v7358_v42 = vadd.f32 %v20184_v17, %v6330_v41  ;;  %10647 = vmatpush1.bf16.msra.mxu1 %v16231_v49  ;;  %10069 = vmatprep.subr.bf16.mxu0 %v16236_v31  ;;  %v22435_v49 = vld [vmem:[#allocation69_spill] sm:$0xff]  ;;  %v16240_v41 = vld [vmem:[%s21703_s5 + $0x4e0] ss:$16 sps:$4 sm:$0xff]  }
 0x56f   : > { %v7613_v40 = vmul.f32 0.2, %v7357_v6  ;;  %9927 = vmatmul.mubr.bf16.gmra.mrb[140].mxu0 %v22434_v46  ;;  %10648 = vmatprep.subr.bf16.mxu1 %v16239_v59  ;;  %v7861_v31 = vmax.f32 %v7349_v11, %v7605_v5  ;;  %v16248_v11 = vld [vmem:[%s21703_s5 + $0x504] ss:$16 sps:$4 sm:$0xff]  }
 0x570   : > { %v7614_v18 = vmul.f32 0.2, %v7358_v42  ;;  %10506 = vmatmul.mubr.bf16.gmra.mrb[172].mxu1 %v22387_v55  ;;  %9936 = vmatprep.mubr.bf16.mxu0 %v22435_v49  ;;  %v7862_v52 = vmax.f32 %v7350_v32, %v7606_v61  ;;  %v16243_v55 = vld [vmem:[%s21703_s5 + $0x2e8] ss:$16 sps:$4 sm:$0xff]   ;;  %v16251_v32 = vld [vmem:[%s21703_s5 + $0x30c] ss:$16 sps:$4 sm:$0xff]  }
 0x571   : > { %v7869_v28 = vmax.f32 %v7357_v6, %v7613_v40  ;;  %10515 = vmatprep.mubr.bf16.mxu1 %v22388_v15  ;;  %10070 = vmatpush1.bf16.msra.mxu0 %v16234_v1 }
 0x572   : > { %v7870_v59 = vmax.f32 %v7358_v42, %v7614_v18  ;;  %v6334_v57 = vpop.f32.mrb[68].mxu0  ;;  %10649 = vmatpush1.bf16.msra.mxu1 %v16237_v51  ;;  %10071 = vmatprep.subr.bf16.mxu0 %v16242_v56 }
 0x573   : > { %v7365_v15 = vadd.f32 %v20178_v21, %v6334_v57  ;;  %v6336_v5 = vpop.f32.mrb[69].mxu0  ;;  %10650 = vmatprep.subr.bf16.mxu1 %v16245_v10  ;;  %v20393_v6 = vpack.c.bf16 %v7869_v28, %v7861_v31  ;;  %v16246_v57 = vld [vmem:[%s21703_s5 + $0x500] ss:$16 sps:$4 sm:$0xff]   ;;  %v16249_v31 = vld [vmem:[%s21703_s5 + $0x308] ss:$16 sps:$4 sm:$0xff]  }
 0x574   : > { %v7366_v1 = vadd.f32 %v20184_v17, %v6336_v5  ;;  %v6338_v61 = vpop.f32.mrb[70].mxu0  ;;  %v20396_v42 = vpack.c.bf16 %v7870_v59, %v7862_v52  ;;  %v16254_v52 = vld [vmem:[%s21703_s5 + $0x524] ss:$16 sps:$4 sm:$0xff]  }
 0x575   : > { %22436 = vst [vmem:[#allocation83_spill] sm:$0xff] %v20393_v6  ;;  %v7621_v51 = vmul.f32 0.2, %v7365_v15  ;;  %v7373_v56 = vadd.f32 %v20178_v21, %v6338_v61  ;;  %v6340_v40 = vpop.f32.mrb[71].mxu0  ;;  %10072 = vmatpush1.bf16.msra.mxu0 %v16240_v41  ;;  %v22438_v59 = vld [vmem:[#allocation28_spill] sm:$0xff] }
 0x576   : > { %22437 = vst [vmem:[#allocation54_spill] sm:$0xff] %v20396_v42  ;;  %v7622_v10 = vmul.f32 0.2, %v7366_v1  ;;  %v7374_v18 = vadd.f32 %v20184_v17, %v6340_v40  ;;  %10651 = vmatpush1.bf16.msra.mxu1 %v16243_v55  ;;  %10073 = vmatprep.subr.bf16.mxu0 %v16248_v11  ;;  %v16257_v41 = vld [vmem:[%s21703_s5 + $0x32c] ss:$16 sps:$4 sm:$0xff]  }
 0x577   : > { %v7629_v28 = vmul.f32 0.2, %v7373_v56  ;;  %9937 = vmatmul.mubr.bf16.gmra.mrb[144].mxu0 %v22438_v59  ;;  %10652 = vmatprep.subr.bf16.mxu1 %v16251_v32  ;;  %v7877_v55 = vmax.f32 %v7365_v15, %v7621_v51  ;;  %v16252_v61 = vld [vmem:[%s21703_s5 + $0x520] ss:$16 sps:$4 sm:$0xff]   ;;  %v16260_v15 = vld [vmem:[%s21703_s5 + $0x544] ss:$16 sps:$4 sm:$0xff]  }
 0x578   : > { %v7630_v5 = vmul.f32 0.2, %v7374_v18  ;;  %10516 = vmatmul.mubr.bf16.gmra.mrb[176].mxu1 %v22389_v7  ;;  %9946 = vmatprep.mubr.bf16.mxu0 %v19531_v43  ;;  %v7878_v40 = vmax.f32 %v7366_v1, %v7622_v10  ;;  %v16255_v7 = vld [vmem:[%s21703_s5 + $0x328] ss:$16 sps:$4 sm:$0xff]   ;;  %v16263_v1 = vld [vmem:[%s21703_s5 + $0x34c] ss:$16 sps:$4 sm:$0xff]  }
 0x579   : > { %v7885_v11 = vmax.f32 %v7373_v56, %v7629_v28  ;;  %10525 = vmatprep.mubr.bf16.mxu1 %v22390_v16  ;;  %10074 = vmatpush1.bf16.msra.mxu0 %v16246_v57 }
 0x57a   : > { %v7886_v32 = vmax.f32 %v7374_v18, %v7630_v5  ;;  %v6344_v6 = vpop.f32.mrb[72].mxu0  ;;  %10653 = vmatpush1.bf16.msra.mxu1 %v16249_v31  ;;  %10075 = vmatprep.subr.bf16.mxu0 %v16254_v52 }
 0x57b   : > { %v7381_v16 = vadd.f32 %v20178_v21, %v6344_v6  ;;  %v6346_v51 = vpop.f32.mrb[73].mxu0  ;;  %10654 = vmatprep.subr.bf16.mxu1 %v16257_v41  ;;  %v20429_v56 = vpack.c.bf16 %v7885_v11, %v7877_v55  ;;  %v16258_v6 = vld [vmem:[%s21703_s5 + $0x540] ss:$16 sps:$4 sm:$0xff]   ;;  %v16261_v55 = vld [vmem:[%s21703_s5 + $0x348] ss:$16 sps:$4 sm:$0xff]  }
 0x57c   : > { %v7382_v57 = vadd.f32 %v20184_v17, %v6346_v51  ;;  %v6348_v10 = vpop.f32.mrb[74].mxu0  ;;  %v20432_v18 = vpack.c.bf16 %v7886_v32, %v7878_v40  ;;  %v16266_v11 = vld [vmem:[%s21703_s5 + $0x564] ss:$16 sps:$4 sm:$0xff]   ;;  %v16264_v51 = vld [vmem:[%s21703_s5 + $0x560] ss:$16 sps:$4 sm:$0xff]  }
 0x57d   : > { %22439 = vst [vmem:[#allocation84_spill] sm:$0xff] %v20429_v56  ;;  %v7637_v31 = vmul.f32 0.2, %v7381_v16  ;;  %v7389_v52 = vadd.f32 %v20178_v21, %v6348_v10  ;;  %v6350_v28 = vpop.f32.mrb[75].mxu0  ;;  %10076 = vmatpush1.bf16.msra.mxu0 %v16252_v61  ;;  %v16269_v61 = vld [vmem:[%s21703_s5 + $0x36c] ss:$16 sps:$4 sm:$0xff]  }
 0x57e   : > { %22440 = vst [vmem:[#allocation55_spill] sm:$0xff] %v20432_v18  ;;  %v7638_v41 = vmul.f32 0.2, %v7382_v57  ;;  %v7390_v5 = vadd.f32 %v20184_v17, %v6350_v28  ;;  %10655 = vmatpush1.bf16.msra.mxu1 %v16255_v7  ;;  %10077 = vmatprep.subr.bf16.mxu0 %v16260_v15  ;;  %v22451_v56 = vld [vmem:[#allocation31_spill] sm:$0xff] }
 0x57f   : > { %v7645_v40 = vmul.f32 0.2, %v7389_v52  ;;  %9947 = vmatmul.mubr.bf16.gmra.mrb[148].mxu0 %v19528_v9  ;;  %10656 = vmatprep.subr.bf16.mxu1 %v16263_v1  ;;  %v7893_v7 = vmax.f32 %v7381_v16, %v7637_v31  ;;  %v16272_v16 = vld [vmem:[%s21703_s5 + $0x584] ss:$16 sps:$4 sm:$0xff]  }
 0x580   : > { %v7646_v32 = vmul.f32 0.2, %v7390_v5  ;;  %10526 = vmatmul.mubr.bf16.gmra.mrb[180].mxu1 %v22391_v58  ;;  %9956 = vmatprep.mubr.bf16.mxu0 %v19555_v63  ;;  %v7894_v10 = vmax.f32 %v7382_v57, %v7638_v41  ;;  %v16267_v58 = vld [vmem:[%s21703_s5 + $0x368] ss:$16 sps:$4 sm:$0xff]   ;;  %v16275_v57 = vld [vmem:[%s21703_s5 + $0x38c] ss:$16 sps:$4 sm:$0xff]  }
 0x581   : > { %v7901_v15 = vmax.f32 %v7389_v52, %v7645_v40  ;;  %10535 = vmatprep.mubr.bf16.mxu1 %v22392_v3  ;;  %10078 = vmatpush1.bf16.msra.mxu0 %v16258_v6 }
 0x582   : > { %v7902_v1 = vmax.f32 %v7390_v5, %v7646_v32  ;;  %v6354_v28 = vpop.f32.mrb[76].mxu0  ;;  %10657 = vmatpush1.bf16.msra.mxu1 %v16261_v55  ;;  %10079 = vmatprep.subr.bf16.mxu0 %v16266_v11 }
 0x583   : > { %v7397_v3 = vadd.f32 %v20178_v21, %v6354_v28  ;;  %v6356_v31 = vpop.f32.mrb[77].mxu0  ;;  %10658 = vmatprep.subr.bf16.mxu1 %v16269_v61  ;;  %v20465_v52 = vpack.c.bf16 %v7901_v15, %v7893_v7  ;;  %v16270_v61 = vld [vmem:[%s21703_s5 + $0x580] ss:$16 sps:$4 sm:$0xff]   ;;  %v16273_v7 = vld [vmem:[%s21703_s5 + $0x388] ss:$16 sps:$4 sm:$0xff]  }
 0x584   : > { %v7398_v6 = vadd.f32 %v20184_v17, %v6356_v31  ;;  %v6358_v41 = vpop.f32.mrb[78].mxu0  ;;  %v20468_v5 = vpack.c.bf16 %v7902_v1, %v7894_v10  ;;  %v16278_v15 = vld [vmem:[%s21703_s5 + $0x5a4] ss:$16 sps:$4 sm:$0xff]  }
 0x585   : > { %22441 = vst [vmem:[#allocation85_spill] sm:$0xff] %v20465_v52  ;;  %v7653_v55 = vmul.f32 0.2, %v7397_v3  ;;  %v7405_v11 = vadd.f32 %v20178_v21, %v6358_v41  ;;  %v6360_v40 = vpop.f32.mrb[79].mxu0  ;;  %10080 = vmatpush1.bf16.msra.mxu0 %v16264_v51  ;;  %v22443_v1 = vld [vmem:[#allocation70_spill] sm:$0xff] }
 0x586   : > { %22442 = vst [vmem:[#allocation56_spill] sm:$0xff] %v20468_v5  ;;  %v7654_v32 = vmul.f32 0.2, %v7398_v6  ;;  %v7406_v28 = vadd.f32 %v20184_v17, %v6360_v40  ;;  %10659 = vmatpush1.bf16.msra.mxu1 %v16267_v58  ;;  %10081 = vmatprep.subr.bf16.mxu0 %v16272_v16  ;;  %v16281_v51 = vld [vmem:[%s21703_s5 + $0x3ac] ss:$16 sps:$4 sm:$0xff]   ;;  %v22444_v58 = vld [vmem:[#allocation30_spill] sm:$0xff] }
 0x587   : > { %v7661_v10 = vmul.f32 0.2, %v7405_v11  ;;  %9957 = vmatmul.mubr.bf16.gmra.mrb[152].mxu0 %v22443_v1  ;;  %10660 = vmatprep.subr.bf16.mxu1 %v16275_v57  ;;  %v7909_v16 = vmax.f32 %v7397_v3, %v7653_v55  ;;  %v16276_v40 = vld [vmem:[%s21703_s5 + $0x5a0] ss:$16 sps:$4 sm:$0xff]   ;;  %v16284_v3 = vld [vmem:[%s21703_s5 + $0x5c4] ss:$16 sps:$4 sm:$0xff]  }
 0x588   : > { %v7662_v31 = vmul.f32 0.2, %v7406_v28  ;;  %10536 = vmatmul.mubr.bf16.gmra.mrb[184].mxu1 %v22393_v2  ;;  %9966 = vmatprep.mubr.bf16.mxu0 %v22444_v58  ;;  %v7910_v52 = vmax.f32 %v7398_v6, %v7654_v32  ;;  %v16279_v2 = vld [vmem:[%s21703_s5 + $0x3a8] ss:$16 sps:$4 sm:$0xff]   ;;  %v16287_v6 = vld [vmem:[%s21703_s5 + $0x3cc] ss:$16 sps:$4 sm:$0xff]  }
 0x589   : > { %v7917_v41 = vmax.f32 %v7405_v11, %v7661_v10  ;;  %10545 = vmatprep.mubr.bf16.mxu1 %v22394_v22  ;;  %10082 = vmatpush1.bf16.msra.mxu0 %v16270_v61 }
 0x58a   : > { %v7918_v57 = vmax.f32 %v7406_v28, %v7662_v31  ;;  %v6364_v5 = vpop.f32.mrb[80].mxu0  ;;  %10661 = vmatpush1.bf16.msra.mxu1 %v16273_v7  ;;  %10083 = vmatprep.subr.bf16.mxu0 %v16278_v15 }
 0x58b   : > { %v7413_v22 = vadd.f32 %v20178_v21, %v6364_v5  ;;  %v6366_v55 = vpop.f32.mrb[81].mxu0  ;;  %10662 = vmatprep.subr.bf16.mxu1 %v16281_v51  ;;  %v20501_v11 = vpack.c.bf16 %v7917_v41, %v7909_v16  ;;  %v16282_v5 = vld [vmem:[%s21703_s5 + $0x5c0] ss:$16 sps:$4 sm:$0xff]   ;;  %v16285_v16 = vld [vmem:[%s21703_s5 + $0x3c8] ss:$16 sps:$4 sm:$0xff]  }
 0x58c   : > { %v7414_v61 = vadd.f32 %v20184_v17, %v6366_v55  ;;  %v6368_v32 = vpop.f32.mrb[82].mxu0  ;;  %v20504_v28 = vpack.c.bf16 %v7918_v57, %v7910_v52  ;;  %v16290_v52 = vld [vmem:[%s21703_s5 + $0x5e4] ss:$16 sps:$4 sm:$0xff]   ;;  %v22447_v57 = vld [vmem:[#allocation29_spill] sm:$0xff] }
 0x58d   : > { %22445 = vst [vmem:[#allocation86_spill] sm:$0xff] %v20501_v11  ;;  %v7669_v7 = vmul.f32 0.2, %v7413_v22  ;;  %v7421_v15 = vadd.f32 %v20178_v21, %v6368_v32  ;;  %v6370_v10 = vpop.f32.mrb[83].mxu0  ;;  %10084 = vmatpush1.bf16.msra.mxu0 %v16276_v40  ;;  %v16293_v40 = vld [vmem:[%s21703_s5 + $0x3ec] ss:$16 sps:$4 sm:$0xff]  }
 0x58e   : > { %22446 = vst [vmem:[#allocation57_spill] sm:$0xff] %v20504_v28  ;;  %v7670_v51 = vmul.f32 0.2, %v7414_v61  ;;  %v7422_v31 = vadd.f32 %v20184_v17, %v6370_v10  ;;  %10663 = vmatpush1.bf16.msra.mxu1 %v16279_v2  ;;  %10085 = vmatprep.subr.bf16.mxu0 %v16284_v3  ;;  %v22448_v2 = vld [vmem:[#allocation32_spill] sm:$0xff] }
 0x58f   : > { %v7677_v41 = vmul.f32 0.2, %v7421_v15  ;;  %9967 = vmatmul.mubr.bf16.gmra.mrb[156].mxu0 %v22447_v57  ;;  %10664 = vmatprep.subr.bf16.mxu1 %v16287_v6  ;;  %v7925_v3 = vmax.f32 %v7413_v22, %v7669_v7  ;;  %v16288_v10 = vld [vmem:[%s21703_s5 + $0x5e0] ss:$16 sps:$4 sm:$0xff]   ;;  %v16296_v22 = vld [vmem:[%s21703_s5 + $0x604] ss:$16 sps:$4 sm:$0xff]  }
 0x590   : > { %v7678_v55 = vmul.f32 0.2, %v7422_v31  ;;  %10546 = vmatmul.mubr.bf16.gmra.mrb[188].mxu1 %v22395_v53  ;;  %9976 = vmatprep.mubr.bf16.mxu0 %v22448_v2  ;;  %v7926_v11 = vmax.f32 %v7414_v61, %v7670_v51  ;;  %v16291_v53 = vld [vmem:[%s21703_s5 + $0x3e8] ss:$16 sps:$4 sm:$0xff]   ;;  %v16299_v61 = vld [vmem:[%s21703_s5 + $0x40c] ss:$16 sps:$4 sm:$0xff]  }
 0x591   : > { %v7933_v32 = vmax.f32 %v7421_v15, %v7677_v41  ;;  %10555 = vmatprep.mubr.bf16.mxu1 %v22396_v24  ;;  %10086 = vmatpush1.bf16.msra.mxu0 %v16282_v5 }
 0x592   : > { %v7934_v6 = vmax.f32 %v7422_v31, %v7678_v55  ;;  %v6374_v28 = vpop.f32.mrb[84].mxu0  ;;  %10665 = vmatpush1.bf16.msra.mxu1 %v16285_v16  ;;  %10087 = vmatprep.subr.bf16.mxu0 %v16290_v52 }
 0x593   : > { %v7429_v24 = vadd.f32 %v20178_v21, %v6374_v28  ;;  %v6376_v7 = vpop.f32.mrb[85].mxu0  ;;  %10666 = vmatprep.subr.bf16.mxu1 %v16293_v40  ;;  %v20537_v15 = vpack.c.bf16 %v7933_v32, %v7925_v3  ;;  %v22452_v32 = vld [vmem:[#allocation72_spill] sm:$0xff] }
 0x594   : > { %v7430_v5 = vadd.f32 %v20184_v17, %v6376_v7  ;;  %v6378_v51 = vpop.f32.mrb[86].mxu0  ;;  %v20540_v31 = vpack.c.bf16 %v7934_v6, %v7926_v11 }
 0x595   : > { %22449 = vst [vmem:[#allocation87_spill] sm:$0xff] %v20537_v15  ;;  %v7685_v16 = vmul.f32 0.2, %v7429_v24  ;;  %v7437_v52 = vadd.f32 %v20178_v21, %v6378_v51  ;;  %v6380_v41 = vpop.f32.mrb[87].mxu0  ;;  %10088 = vmatpush1.bf16.msra.mxu0 %v16288_v10 }
 0x596   : > { %22450 = vst [vmem:[#allocation58_spill] sm:$0xff] %v20540_v31  ;;  %v7686_v55 = vmul.f32 0.2, %v7430_v5  ;;  %v7438_v28 = vadd.f32 %v20184_v17, %v6380_v41  ;;  %10667 = vmatpush1.bf16.msra.mxu1 %v16291_v53  ;;  %10250 = vmatprep.subr.bf16.mxu0 %v16296_v22 }
 0x597   : > { %v7693_v40 = vmul.f32 0.2, %v7437_v52  ;;  %9977 = vmatmul.mubr.bf16.gmra.mrb[160].mxu0 %v22451_v56  ;;  %10829 = vmatprep.subr.bf16.mxu1 %v16299_v61  ;;  %v7941_v11 = vmax.f32 %v7429_v24, %v7685_v16 }
 0x598   : > { %v7694_v3 = vmul.f32 0.2, %v7438_v28  ;;  %10556 = vmatmul.mubr.bf16.gmra.mrb[192].mxu1 %v22397_v48  ;;  %9986 = vmatprep.mubr.bf16.mxu0 %v22452_v32  ;;  %v7942_v7 = vmax.f32 %v7430_v5, %v7686_v55 }
 0x599   : > { %v7949_v6 = vmax.f32 %v7437_v52, %v7693_v40  ;;  %10565 = vmatprep.mubr.bf16.mxu1 %v22398_v45  ;;  %v22455_v52 = vld [vmem:[#allocation71_spill] sm:$0xff] }
 0x59a   : > { %v7950_v10 = vmax.f32 %v7438_v28, %v7694_v3  ;;  %v6384_v51 = vpop.f32.mrb[88].mxu0  ;;  %v22456_v28 = vld [vmem:[#allocation34_spill] sm:$0xff] }
 0x59b   : > { %v7445_v41 = vadd.f32 %v20178_v21, %v6384_v51  ;;  %v6386_v53 = vpop.f32.mrb[89].mxu0  ;;  %v20549_v22 = vpack.c.bf16 %v7949_v6, %v7941_v11 }
 0x59c   : > { %v7446_v15 = vadd.f32 %v20184_v17, %v6386_v53  ;;  %v6388_v61 = vpop.f32.mrb[90].mxu0  ;;  %v20552_v31 = vpack.c.bf16 %v7950_v10, %v7942_v7 }
 0x59d   : > { %22453 = vst [vmem:[#allocation88_spill] sm:$0xff] %v20549_v22  ;;  %v7701_v48 = vmul.f32 0.2, %v7445_v41  ;;  %v7453_v32 = vadd.f32 %v20178_v21, %v6388_v61  ;;  %v6390_v24 = vpop.f32.mrb[91].mxu0  ;;  %v7203_v22 = vsub.s32 6, %v22401_v60 }
 0x59e   : > { %22454 = vst [vmem:[#allocation59_spill] sm:$0xff] %v20552_v31  ;;  %v7702_v16 = vmul.f32 0.2, %v7446_v15  ;;  %v7454_v45 = vadd.f32 %v20184_v17, %v6390_v24 }
 0x59f   : > { %v7709_v5 = vmul.f32 0.2, %v7453_v32  ;;  %9987 = vmatmul.mubr.bf16.gmra.mrb[164].mxu0 %v22455_v52  ;;  %v7957_v40 = vmax.f32 %v7445_v41, %v7701_v48 }
 0x5a0   : > { %v7710_v55 = vmul.f32 0.2, %v7454_v45  ;;  %10566 = vmatmul.mubr.bf16.gmra.mrb[196].mxu1 %v22399_v37  ;;  %9996 = vmatprep.mubr.bf16.mxu0 %v22456_v28  ;;  %v7958_v11 = vmax.f32 %v7446_v15, %v7702_v16 }
 0x5a1   : > { %v7965_v3 = vmax.f32 %v7453_v32, %v7709_v5  ;;  %10575 = vmatprep.mubr.bf16.mxu1 %v22400_v27  ;;  %v7207_v27 = vsub.s32 7, %v22401_v60 }
 0x5a2   : > { %v7966_v6 = vmax.f32 %v7454_v45, %v7710_v55  ;;  %v6394_v7 = vpop.f32.mrb[92].mxu0  ;;  %v22457_v45 = vld [vmem:[#allocation33_spill] sm:$0xff] }
 0x5a3   : > { %v7461_v10 = vadd.f32 %v20178_v21, %v6394_v7  ;;  %v6396_v51 = vpop.f32.mrb[93].mxu0  ;;  %v20561_v53 = vpack.c.bf16 %v7965_v3, %v7957_v40  ;;  %v22458_v55 = vld [vmem:[#allocation37_spill] sm:$0xff]  ;;  %v20574_v40 = vrot.slane %v20175_v8, %v7203_v22 }
 0x5a4   : > { %v7462_v61 = vadd.f32 %v20184_v17, %v6396_v51  ;;  %v6398_v24 = vpop.f32.mrb[94].mxu0  ;;  %v20565_v37 = vpack.c.bf16 %v7966_v6, %v7958_v11 }
 0x5a5   : > { %v7717_v31 = vmul.f32 0.2, %v7461_v10  ;;  %v7469_v32 = vadd.f32 %v20178_v21, %v6398_v24  ;;  %v6400_v41 = vpop.f32.mrb[95].mxu0  ;;  %v20578_v21 = vrot.slane %v20175_v8, %v7207_v27 }
 0x5a6   : > { %v7718_v15 = vmul.f32 0.2, %v7462_v61  ;;  %v7470_v48 = vadd.f32 %v20184_v17, %v6400_v41 }
 0x5a7   : > { %v7725_v16 = vmul.f32 0.2, %v7469_v32  ;;  %9997 = vmatmul.mubr.bf16.gmra.mrb[168].mxu0 %v22457_v45  ;;  %v7973_v3 = vmax.f32 %v7461_v10, %v7717_v31 }
 0x5a8   : > { %v7726_v5 = vmul.f32 0.2, %v7470_v48  ;;  %10576 = vmatmul.mubr.bf16.gmra.mrb[200].mxu1 %v22402_v0  ;;  %10006 = vmatprep.mubr.bf16.mxu0 %v22458_v55  ;;  %v7974_v6 = vmax.f32 %v7462_v61, %v7718_v15  ;;  %v22461_v61 = vld [vmem:[#allocation36_spill] sm:$0xff] }
 0x5a9   : > { %v7981_v11 = vmax.f32 %v7469_v32, %v7725_v16  ;;  %10585 = vmatprep.mubr.bf16.mxu1 %v22403_v13 }
 0x5aa   : > { %v7982_v17 = vmax.f32 %v7470_v48, %v7726_v5 }
 0x5ab   : > { %v7016_v7 = vpop.f32.mrb[96].mxu1  ;;  %v20580_v51 = vpack.c.bf16 %v7981_v11, %v7973_v3 }
 0x5ac   : > { %v7223_v24 = vadd.f32 %v20574_v40, %v7016_v7  ;;  %v7018_v0 = vpop.f32.mrb[97].mxu1  ;;  %v20583_v41 = vpack.c.bf16 %v7982_v17, %v7974_v6 }
 0x5ad   : > { %22459 = vst [vmem:[#allocation89_spill] sm:$0xff] %v20580_v51  ;;  %v7224_v22 = vadd.f32 %v20578_v21, %v7018_v0  ;;  %v7020_v60 = vpop.f32.mrb[98].mxu1 }
 0x5ae   : > { %22460 = vst [vmem:[#allocation60_spill] sm:$0xff] %v20583_v41  ;;  %v7479_v31 = vmul.f32 0.2, %v7223_v24  ;;  %v7231_v10 = vadd.f32 %v20574_v40, %v7020_v60  ;;  %v7022_v13 = vpop.f32.mrb[99].mxu1 }
 0x5af   : > { %v7480_v32 = vmul.f32 0.2, %v7224_v22  ;;  %v7232_v8 = vadd.f32 %v20578_v21, %v7022_v13  ;;  %10007 = vmatmul.mubr.bf16.gmra.mrb[172].mxu0 %v22461_v61 }
 0x5b0   : > { %v7487_v27 = vmul.f32 0.2, %v7231_v10  ;;  %10586 = vmatmul.mubr.bf16.gmra.mrb[204].mxu1 %v22404_v26  ;;  %10016 = vmatprep.mubr.bf16.mxu0 %v19689_v34  ;;  %v7735_v48 = vmax.f32 %v7223_v24, %v7479_v31  ;;  %v22463_v31 = vld [vmem:[#allocation74_spill] sm:$0xff] }
 0x5b1   : > { %v7488_v15 = vmul.f32 0.2, %v7232_v8  ;;  %10595 = vmatprep.mubr.bf16.mxu1 %v22405_v20  ;;  %v7736_v5 = vmax.f32 %v7224_v22, %v7480_v32 }
 0x5b2   : > { %v7743_v16 = vmax.f32 %v7231_v10, %v7487_v27 }
 0x5b3   : > { %v7744_v3 = vmax.f32 %v7232_v8, %v7488_v15  ;;  %v7026_v11 = vpop.f32.mrb[100].mxu1 }
 0x5b4   : > { %v20592_v60 = vpack.c.bf16 %v7743_v16, %v7735_v48  ;;  %v7239_v6 = vadd.f32 %v20574_v40, %v7026_v11  ;;  %v7028_v17 = vpop.f32.mrb[101].mxu1 }
 0x5b5   : > { %v7240_v7 = vadd.f32 %v20578_v21, %v7028_v17  ;;  %v7030_v0 = vpop.f32.mrb[102].mxu1  ;;  %v20596_v13 = vpack.c.bf16 %v7744_v3, %v7736_v5 }
 0x5b6   : > { %22462 = vst [vmem:[#allocation90_spill] sm:$0xff] %v20592_v60  ;;  %v7495_v26 = vmul.f32 0.2, %v7239_v6  ;;  %v7247_v51 = vadd.f32 %v20574_v40, %v7030_v0  ;;  %v7032_v41 = vpop.f32.mrb[103].mxu1 }
 0x5b7   : > { %v7496_v20 = vmul.f32 0.2, %v7240_v7  ;;  %v7248_v24 = vadd.f32 %v20578_v21, %v7032_v41  ;;  %10017 = vmatmul.mubr.bf16.gmra.mrb[176].mxu0 %v19686_v12 }
 0x5b8   : > { %v7503_v22 = vmul.f32 0.2, %v7247_v51  ;;  %10596 = vmatmul.mubr.bf16.gmra.mrb[208].mxu1 %v22408_v47  ;;  %10026 = vmatprep.mubr.bf16.mxu0 %v22463_v31  ;;  %v7751_v32 = vmax.f32 %v7239_v6, %v7495_v26  ;;  %v22465_v6 = vld [vmem:[#allocation73_spill] sm:$0xff] }
 0x5b9   : > { %v7504_v10 = vmul.f32 0.2, %v7248_v24  ;;  %10605 = vmatprep.mubr.bf16.mxu1 %v22409_v30  ;;  %v7752_v27 = vmax.f32 %v7240_v7, %v7496_v20 }
 0x5ba   : > { %v7759_v8 = vmax.f32 %v7247_v51, %v7503_v22 }
 0x5bb   : > { %v7760_v15 = vmax.f32 %v7248_v24, %v7504_v10  ;;  %v7036_v48 = vpop.f32.mrb[104].mxu1 }
 0x5bc   : > { %v7255_v16 = vadd.f32 %v20574_v40, %v7036_v48  ;;  %v7038_v5 = vpop.f32.mrb[105].mxu1  ;;  %v20605_v3 = vpack.c.bf16 %v7759_v8, %v7751_v32 }
 0x5bd   : > { %v7256_v41 = vadd.f32 %v20578_v21, %v7038_v5  ;;  %v7040_v11 = vpop.f32.mrb[106].mxu1  ;;  %v20608_v17 = vpack.c.bf16 %v7760_v15, %v7752_v27 }
 0x5be   : > { %22464 = vst [vmem:[#allocation91_spill] sm:$0xff] %v20605_v3  ;;  %v7511_v47 = vmul.f32 0.2, %v7255_v16  ;;  %v7263_v0 = vadd.f32 %v20574_v40, %v7040_v11  ;;  %v7042_v60 = vpop.f32.mrb[107].mxu1 }
 0x5bf   : > { %v7512_v30 = vmul.f32 0.2, %v7256_v41  ;;  %v7264_v51 = vadd.f32 %v20578_v21, %v7042_v60  ;;  %10027 = vmatmul.mubr.bf16.gmra.mrb[180].mxu0 %v22465_v6 }
 0x5c0   : > { %v7519_v7 = vmul.f32 0.2, %v7263_v0  ;;  %10606 = vmatmul.mubr.bf16.gmra.mrb[212].mxu1 %v22412_v19  ;;  %10036 = vmatprep.mubr.bf16.mxu0 %v19713_v29  ;;  %v7767_v20 = vmax.f32 %v7255_v16, %v7511_v47  ;;  %v22468_v47 = vld [vmem:[#allocation40_spill] sm:$0xff] }
 0x5c1   : > { %v7520_v26 = vmul.f32 0.2, %v7264_v51  ;;  %10615 = vmatprep.mubr.bf16.mxu1 %v22413_v23  ;;  %v7768_v22 = vmax.f32 %v7256_v41, %v7512_v30  ;;  %v22469_v30 = vld [vmem:[#allocation18_spill] sm:$0xff] }
 0x5c2   : > { %v7775_v24 = vmax.f32 %v7263_v0, %v7519_v7 }
 0x5c3   : > { %v7776_v10 = vmax.f32 %v7264_v51, %v7520_v26  ;;  %v7046_v32 = vpop.f32.mrb[108].mxu1 }
 0x5c4   : > { %v7271_v8 = vadd.f32 %v20574_v40, %v7046_v32  ;;  %v7048_v27 = vpop.f32.mrb[109].mxu1  ;;  %v20617_v15 = vpack.c.bf16 %v7775_v24, %v7767_v20 }
 0x5c5   : > { %v7272_v60 = vadd.f32 %v20578_v21, %v7048_v27  ;;  %v7050_v48 = vpop.f32.mrb[110].mxu1  ;;  %v20620_v5 = vpack.c.bf16 %v7776_v10, %v7768_v22 }
 0x5c6   : > { %22466 = vst [vmem:[#allocation92_spill] sm:$0xff] %v20617_v15  ;;  %v7527_v19 = vmul.f32 0.2, %v7271_v8  ;;  %v7279_v11 = vadd.f32 %v20574_v40, %v7050_v48  ;;  %v7052_v3 = vpop.f32.mrb[111].mxu1 }
 0x5c7   : > { %22467 = vst [vmem:[#allocation93_spill] sm:$0xff] %v20620_v5  ;;  %v7528_v23 = vmul.f32 0.2, %v7272_v60  ;;  %v7280_v16 = vadd.f32 %v20578_v21, %v7052_v3  ;;  %10037 = vmatmul.mubr.bf16.gmra.mrb[184].mxu0 %v19710_v62 }
 0x5c8   : > { %v7535_v41 = vmul.f32 0.2, %v7279_v11  ;;  %10616 = vmatmul.mubr.bf16.gmra.mrb[216].mxu1 %v22416_v14  ;;  %10046 = vmatprep.mubr.bf16.mxu0 %v22468_v47  ;;  %v7783_v51 = vmax.f32 %v7271_v8, %v7527_v19 }
 0x5c9   : > { %v7536_v0 = vmul.f32 0.2, %v7280_v16  ;;  %10625 = vmatprep.mubr.bf16.mxu1 %v22469_v30  ;;  %v7784_v26 = vmax.f32 %v7272_v60, %v7528_v23  ;;  %v22472_v60 = vld [vmem:[#allocation38_spill] sm:$0xff] }
 0x5ca   : > { %v7791_v7 = vmax.f32 %v7279_v11, %v7535_v41  ;;  %v22473_v11 = vld [vmem:[#allocation43_spill] sm:$0xff] }
 0x5cb   : > { %v7792_v20 = vmax.f32 %v7280_v16, %v7536_v0  ;;  %v7056_v24 = vpop.f32.mrb[112].mxu1 }
 0x5cc   : > { %v7287_v22 = vadd.f32 %v20574_v40, %v7056_v24  ;;  %v7058_v10 = vpop.f32.mrb[113].mxu1  ;;  %v20629_v32 = vpack.c.bf16 %v7791_v7, %v7783_v51 }
 0x5cd   : > { %v7288_v3 = vadd.f32 %v20578_v21, %v7058_v10  ;;  %v7060_v27 = vpop.f32.mrb[114].mxu1  ;;  %v20632_v48 = vpack.c.bf16 %v7792_v20, %v7784_v26 }
 0x5ce   : > { %22470 = vst [vmem:[#allocation94_spill] sm:$0xff] %v20629_v32  ;;  %v7543_v14 = vmul.f32 0.2, %v7287_v22  ;;  %v7295_v15 = vadd.f32 %v20574_v40, %v7060_v27  ;;  %v7062_v5 = vpop.f32.mrb[115].mxu1 }
 0x5cf   : > { %22471 = vst [vmem:[#allocation95_spill] sm:$0xff] %v20632_v48  ;;  %v7544_v30 = vmul.f32 0.2, %v7288_v3  ;;  %v7296_v8 = vadd.f32 %v20578_v21, %v7062_v5  ;;  %10047 = vmatmul.mubr.bf16.gmra.mrb[188].mxu0 %v22472_v60  ;;  %v16294_v5 = vld [vmem:[%s21703_s5 + $0x600] ss:$16 sps:$4 sm:$0xff]  }
 0x5d0   : > { %v7551_v19 = vmul.f32 0.2, %v7295_v15  ;;  %10626 = vmatmul.mubr.bf16.gmra.mrb[220].mxu1 %v22419_v25  ;;  %10089 = vmatprep.mubr.bf16.mxu0 %v22473_v11  ;;  %v7799_v16 = vmax.f32 %v7287_v22, %v7543_v14  ;;  %v16302_v14 = vld [vmem:[%s21703_s5 + $0x624] ss:$16 sps:$4 sm:$0xff]  }
 0x5d1   : > { %v7552_v23 = vmul.f32 0.2, %v7296_v8  ;;  %10668 = vmatprep.mubr.bf16.mxu1 %v22420_v54  ;;  %v7800_v0 = vmax.f32 %v7288_v3, %v7544_v30  ;;  %v16297_v54 = vld [vmem:[%s21703_s5 + $0x408] ss:$16 sps:$4 sm:$0xff]  }
 0x5d2   : > { %v7807_v41 = vmax.f32 %v7295_v15, %v7551_v19  ;;  %v22476_v19 = vld [vmem:[#allocation42_spill] sm:$0xff] }
 0x5d3   : > { %v7808_v51 = vmax.f32 %v7296_v8, %v7552_v23  ;;  %v7066_v7 = vpop.f32.mrb[116].mxu1  ;;  %v16305_v23 = vld [vmem:[%s21703_s5 + $0x42c] ss:$16 sps:$4 sm:$0xff]  }
 0x5d4   : > { %v7303_v26 = vadd.f32 %v20574_v40, %v7066_v7  ;;  %v7068_v20 = vpop.f32.mrb[117].mxu1  ;;  %v20644_v24 = vpack.c.bf16 %v7807_v41, %v7799_v16  ;;  %v16300_v41 = vld [vmem:[%s21703_s5 + $0x620] ss:$16 sps:$4 sm:$0xff]   ;;  %v16303_v7 = vld [vmem:[%s21703_s5 + $0x428] ss:$16 sps:$4 sm:$0xff]  }
 0x5d5   : > { %v7304_v25 = vadd.f32 %v20578_v21, %v7068_v20  ;;  %v7070_v10 = vpop.f32.mrb[118].mxu1  ;;  %v20650_v15 = vpack.c.bf16 %v7808_v51, %v7800_v0  ;;  %v22477_v51 = vld [vmem:[#allocation76_spill] sm:$0xff] }
 0x5d6   : > { %22474 = vst [vmem:[#allocation96_spill] sm:$0xff] %v20644_v24  ;;  %v7559_v22 = vmul.f32 0.2, %v7303_v26  ;;  %v7311_v3 = vadd.f32 %v20574_v40, %v7070_v10  ;;  %v7072_v27 = vpop.f32.mrb[119].mxu1  ;;  %v16308_v20 = vld [vmem:[%s21703_s5 + $0x644] ss:$16 sps:$4 sm:$0xff]  }
 0x5d7   : > { %22475 = vst [vmem:[#allocation97_spill] sm:$0xff] %v20650_v15  ;;  %v7560_v30 = vmul.f32 0.2, %v7304_v25  ;;  %v7312_v8 = vadd.f32 %v20578_v21, %v7072_v27  ;;  %10090 = vmatmul.mubr.bf16.vlgmr.msra.gmra.mrb[128].mxu0 %v22476_v19 }
 0x5d8   : > { %v7567_v16 = vmul.f32 0.2, %v7311_v3  ;;  %10251 = vmatpush1.bf16.msra.mxu0 %v16294_v5  ;;  %10669 = vmatmul.mubr.bf16.vlgmr.msra.gmra.mrb[160].mxu1 %v22423_v4  ;;  %v7815_v10 = vmax.f32 %v7303_v26, %v7559_v22  ;;  %v16311_v4 = vld [vmem:[%s21703_s5 + $0x44c] ss:$16 sps:$4 sm:$0xff]  }
 0x5d9   : > { %v7568_v0 = vmul.f32 0.2, %v7312_v8  ;;  %10830 = vmatpush1.bf16.msra.mxu1 %v16297_v54  ;;  %10099 = vmatprep.mubr.bf16.mxu0 %v22477_v51  ;;  %v7816_v54 = vmax.f32 %v7304_v25, %v7560_v30  ;;  %v16309_v25 = vld [vmem:[%s21703_s5 + $0x448] ss:$16 sps:$4 sm:$0xff]  }
 0x5da   : > { %v7823_v5 = vmax.f32 %v7311_v3, %v7567_v16  ;;  %10678 = vmatprep.mubr.bf16.mxu1 %v22424_v36  ;;  %10252 = vmatprep.subr.bf16.mxu0 %v16302_v14  ;;  %v16306_v36 = vld [vmem:[%s21703_s5 + $0x640] ss:$16 sps:$4 sm:$0xff]   ;;  %v22478_v16 = vld [vmem:[#allocation75_spill] sm:$0xff] }
 0x5db   : > { %v7824_v27 = vmax.f32 %v7312_v8, %v7568_v0  ;;  %v7076_v24 = vpop.f32.mrb[120].mxu1  ;;  %10831 = vmatprep.subr.bf16.mxu1 %v16305_v23 }
 0x5dc   : > { %v7319_v15 = vadd.f32 %v20574_v40, %v7076_v24  ;;  %v7078_v32 = vpop.f32.mrb[121].mxu1  ;;  %10253 = vmatpush1.bf16.msra.mxu0 %v16300_v41  ;;  %v20677_v48 = vpack.c.bf16 %v7823_v5, %v7815_v10  ;;  %v16317_v41 = vld [vmem:[%s21703_s5 + $0x46c] ss:$16 sps:$4 sm:$0xff]   ;;  %v16312_v10 = vld [vmem:[%s21703_s5 + $0x660] ss:$16 sps:$4 sm:$0xff]  }
 0x5dd   : > { %v7320_v26 = vadd.f32 %v20578_v21, %v7078_v32  ;;  %v7080_v22 = vpop.f32.mrb[122].mxu1  ;;  %10832 = vmatpush1.bf16.msra.mxu1 %v16303_v7  ;;  %10254 = vmatprep.subr.bf16.mxu0 %v16308_v20  ;;  %v20686_v3 = vpack.c.bf16 %v7824_v27, %v7816_v54  ;;  %v16314_v32 = vld [vmem:[%s21703_s5 + $0x664] ss:$16 sps:$4 sm:$0xff]   ;;  %v16315_v54 = vld [vmem:[%s21703_s5 + $0x468] ss:$16 sps:$4 sm:$0xff]  }
 0x5de   : > { %v7575_v24 = vmul.f32 0.2, %v7319_v15  ;;  %v7327_v14 = vadd.f32 %v20574_v40, %v7080_v22  ;;  %v7082_v30 = vpop.f32.mrb[123].mxu1  ;;  %10833 = vmatprep.subr.bf16.mxu1 %v16311_v4  ;;  %v22479_v7 = vld [vmem:[#allocation46_spill] sm:$0xff] }
 0x5df   : > { %v7576_v8 = vmul.f32 0.2, %v7320_v26  ;;  %v7328_v23 = vadd.f32 %v20578_v21, %v7082_v30  ;;  %10100 = vmatmul.mubr.bf16.gmra.mrb[132].mxu0 %v22478_v16 }
 0x5e0   : > { %v7583_v0 = vmul.f32 0.2, %v7327_v14  ;;  %10679 = vmatmul.mubr.bf16.gmra.mrb[164].mxu1 %v22426_v39  ;;  %10109 = vmatprep.mubr.bf16.mxu0 %v22479_v7  ;;  %v7831_v5 = vmax.f32 %v7319_v15, %v7575_v24  ;;  %v16320_v39 = vld [vmem:[%s21703_s5 + $0x684] ss:$16 sps:$4 sm:$0xff]  }
 0x5e1   : > { %v7584_v20 = vmul.f32 0.2, %v7328_v23  ;;  %10688 = vmatprep.mubr.bf16.mxu1 %v22427_v38  ;;  %10255 = vmatpush1.bf16.msra.mxu0 %v16306_v36  ;;  %v7832_v27 = vmax.f32 %v7320_v26, %v7576_v8  ;;  %v16323_v36 = vld [vmem:[%s21703_s5 + $0x48c] ss:$16 sps:$4 sm:$0xff]   ;;  %v16318_v26 = vld [vmem:[%s21703_s5 + $0x680] ss:$16 sps:$4 sm:$0xff]  }
 0x5e2   : > { %v7839_v4 = vmax.f32 %v7327_v14, %v7583_v0  ;;  %10834 = vmatpush1.bf16.msra.mxu1 %v16309_v25  ;;  %10256 = vmatprep.subr.bf16.mxu0 %v16314_v32  ;;  %v16321_v32 = vld [vmem:[%s21703_s5 + $0x488] ss:$16 sps:$4 sm:$0xff]  }
 0x5e3   : > { %v7840_v22 = vmax.f32 %v7328_v23, %v7584_v20  ;;  %v7086_v38 = vpop.f32.mrb[124].mxu1  ;;  %10835 = vmatprep.subr.bf16.mxu1 %v16317_v41  ;;  %v16326_v20 = vld [vmem:[%s21703_s5 + $0x6a4] ss:$16 sps:$4 sm:$0xff]  }
 0x5e4   : > { %v7335_v15 = vadd.f32 %v20574_v40, %v7086_v38  ;;  %v7088_v25 = vpop.f32.mrb[125].mxu1  ;;  %v20713_v24 = vpack.c.bf16 %v7839_v4, %v7831_v5  ;;  %v22480_v4 = vld [vmem:[#allocation44_spill] sm:$0xff] }
 0x5e5   : > { %v7336_v14 = vadd.f32 %v20578_v21, %v7088_v25  ;;  %v7090_v30 = vpop.f32.mrb[126].mxu1  ;;  %10257 = vmatpush1.bf16.msra.mxu0 %v16312_v10  ;;  %v20722_v8 = vpack.c.bf16 %v7840_v22, %v7832_v27  ;;  %v16329_v27 = vld [vmem:[%s21703_s5 + $0x4ac] ss:$16 sps:$4 sm:$0xff]  }
 0x5e6   : > { %v7591_v23 = vmul.f32 0.2, %v7335_v15  ;;  %v7343_v41 = vadd.f32 %v20574_v40, %v7090_v30  ;;  %v7092_v0 = vpop.f32.mrb[127].mxu1  ;;  %10836 = vmatpush1.bf16.msra.mxu1 %v16315_v54  ;;  %10258 = vmatprep.subr.bf16.mxu0 %v16320_v39  ;;  %v16324_v39 = vld [vmem:[%s21703_s5 + $0x6a0] ss:$16 sps:$4 sm:$0xff]  }
 0x5e7   : > { %v7592_v10 = vmul.f32 0.2, %v7336_v14  ;;  %v7344_v5 = vadd.f32 %v20578_v21, %v7092_v0  ;;  %10110 = vmatmul.mubr.bf16.gmra.mrb[136].mxu0 %v22480_v4  ;;  %10837 = vmatprep.subr.bf16.mxu1 %v16323_v36  ;;  %v16327_v36 = vld [vmem:[%s21703_s5 + $0x4a8] ss:$16 sps:$4 sm:$0xff]  }
 0x5e8   : > { %v7599_v22 = vmul.f32 0.2, %v7343_v41  ;;  %10689 = vmatmul.mubr.bf16.gmra.mrb[168].mxu1 %v22430_v50  ;;  %10119 = vmatprep.mubr.bf16.mxu0 %v20239_v33  ;;  %v7847_v38 = vmax.f32 %v7335_v15, %v7591_v23  ;;  %v16332_v50 = vld [vmem:[%s21703_s5 + $0x6c4] ss:$16 sps:$4 sm:$0xff]  }
 0x5e9   : > { %v7600_v54 = vmul.f32 0.2, %v7344_v5  ;;  %10698 = vmatprep.mubr.bf16.mxu1 %v22431_v35  ;;  %10259 = vmatpush1.bf16.msra.mxu0 %v16318_v26  ;;  %v7848_v30 = vmax.f32 %v7336_v14, %v7592_v10  ;;  %v16335_v26 = vld [vmem:[%s21703_s5 + $0x4cc] ss:$16 sps:$4 sm:$0xff]   ;;  %v16330_v14 = vld [vmem:[%s21703_s5 + $0x6c0] ss:$16 sps:$4 sm:$0xff]  }
 0x5ea   : > { %v7855_v25 = vmax.f32 %v7343_v41, %v7599_v22  ;;  %10838 = vmatpush1.bf16.msra.mxu1 %v16321_v32  ;;  %10260 = vmatprep.subr.bf16.mxu0 %v16326_v20  ;;  %v16333_v10 = vld [vmem:[%s21703_s5 + $0x4c8] ss:$16 sps:$4 sm:$0xff]  }
 0x5eb   : > { %v7856_v0 = vmax.f32 %v7344_v5, %v7600_v54  ;;  %v7096_v35 = vpop.f32.mrb[128].mxu1  ;;  %10839 = vmatprep.subr.bf16.mxu1 %v16329_v27 }
 0x5ec   : > { %v7351_v15 = vadd.f32 %v20574_v40, %v7096_v35  ;;  %v7098_v32 = vpop.f32.mrb[129].mxu1  ;;  %v20749_v23 = vpack.c.bf16 %v7855_v25, %v7847_v38  ;;  %v22483_v35 = vld [vmem:[#allocation48_spill] sm:$0xff] }
 0x5ed   : > { %v7352_v41 = vadd.f32 %v20578_v21, %v7098_v32  ;;  %v7100_v20 = vpop.f32.mrb[130].mxu1  ;;  %10261 = vmatpush1.bf16.msra.mxu0 %v16324_v39  ;;  %v20758_v5 = vpack.c.bf16 %v7856_v0, %v7848_v30  ;;  %v16338_v39 = vld [vmem:[%s21703_s5 + $0x6e4] ss:$16 sps:$4 sm:$0xff]   ;;  %v16341_v30 = vld [vmem:[%s21703_s5 + $0x4ec] ss:$16 sps:$4 sm:$0xff]  }
 0x5ee   : > { %22481 = vst [vmem:[#allocation98_spill] sm:$0xff] %v20749_v23  ;;  %v7607_v27 = vmul.f32 0.2, %v7351_v15  ;;  %v7359_v22 = vadd.f32 %v20574_v40, %v7100_v20  ;;  %v7102_v54 = vpop.f32.mrb[131].mxu1  ;;  %10840 = vmatpush1.bf16.msra.mxu1 %v16327_v36  ;;  %10262 = vmatprep.subr.bf16.mxu0 %v16332_v50  ;;  %v22484_v32 = vld [vmem:[#allocation77_spill] sm:$0xff] }
 0x5ef   : > { %22482 = vst [vmem:[#allocation99_spill] sm:$0xff] %v20758_v5  ;;  %v7608_v38 = vmul.f32 0.2, %v7352_v41  ;;  %v7360_v25 = vadd.f32 %v20578_v21, %v7102_v54  ;;  %10120 = vmatmul.mubr.bf16.gmra.mrb[140].mxu0 %v22483_v35  ;;  %10841 = vmatprep.subr.bf16.mxu1 %v16335_v26  ;;  %v16336_v50 = vld [vmem:[%s21703_s5 + $0x6e0] ss:$16 sps:$4 sm:$0xff]  }
 0x5f0   : > { %v7615_v0 = vmul.f32 0.2, %v7359_v22  ;;  %10699 = vmatmul.mubr.bf16.gmra.mrb[172].mxu1 %v22434_v46  ;;  %10129 = vmatprep.mubr.bf16.mxu0 %v22484_v32  ;;  %v7863_v20 = vmax.f32 %v7351_v15, %v7607_v27  ;;  %v16339_v26 = vld [vmem:[%s21703_s5 + $0x4e8] ss:$16 sps:$4 sm:$0xff]   ;;  %v16344_v46 = vld [vmem:[%s21703_s5 + $0x704] ss:$16 sps:$4 sm:$0xff]  }
 0x5f1   : > { %v7616_v36 = vmul.f32 0.2, %v7360_v25  ;;  %10708 = vmatprep.mubr.bf16.mxu1 %v22435_v49  ;;  %10263 = vmatpush1.bf16.msra.mxu0 %v16330_v14  ;;  %v7864_v23 = vmax.f32 %v7352_v41, %v7608_v38  ;;  %v16347_v14 = vld [vmem:[%s21703_s5 + $0x50c] ss:$16 sps:$4 sm:$0xff]   ;;  %v16342_v41 = vld [vmem:[%s21703_s5 + $0x700] ss:$16 sps:$4 sm:$0xff]  }
 0x5f2   : > { %v7871_v54 = vmax.f32 %v7359_v22, %v7615_v0  ;;  %10842 = vmatpush1.bf16.msra.mxu1 %v16333_v10  ;;  %10264 = vmatprep.subr.bf16.mxu0 %v16338_v39  ;;  %v16345_v38 = vld [vmem:[%s21703_s5 + $0x508] ss:$16 sps:$4 sm:$0xff]  }
 0x5f3   : > { %v7872_v5 = vmax.f32 %v7360_v25, %v7616_v36  ;;  %v7106_v49 = vpop.f32.mrb[132].mxu1  ;;  %10843 = vmatprep.subr.bf16.mxu1 %v16341_v30 }
 0x5f4   : > { %v7367_v15 = vadd.f32 %v20574_v40, %v7106_v49  ;;  %v7108_v10 = vpop.f32.mrb[133].mxu1  ;;  %v20785_v27 = vpack.c.bf16 %v7871_v54, %v7863_v20  ;;  %v22486_v49 = vld [vmem:[#allocation49_spill] sm:$0xff] }
 0x5f5   : > { %v7368_v22 = vadd.f32 %v20578_v21, %v7108_v10  ;;  %v7110_v39 = vpop.f32.mrb[134].mxu1  ;;  %10265 = vmatpush1.bf16.msra.mxu0 %v16336_v50  ;;  %v20794_v25 = vpack.c.bf16 %v7872_v5, %v7864_v23  ;;  %v16350_v50 = vld [vmem:[%s21703_s5 + $0x724] ss:$16 sps:$4 sm:$0xff]   ;;  %v16353_v23 = vld [vmem:[%s21703_s5 + $0x52c] ss:$16 sps:$4 sm:$0xff]  }
 0x5f6   : > { %22485 = vst [vmem:[#allocation100_spill] sm:$0xff] %v20785_v27  ;;  %v7623_v30 = vmul.f32 0.2, %v7367_v15  ;;  %v7375_v0 = vadd.f32 %v20574_v40, %v7110_v39  ;;  %v7112_v36 = vpop.f32.mrb[135].mxu1  ;;  %10844 = vmatpush1.bf16.msra.mxu1 %v16339_v26  ;;  %10266 = vmatprep.subr.bf16.mxu0 %v16344_v46  ;;  %v16348_v46 = vld [vmem:[%s21703_s5 + $0x720] ss:$16 sps:$4 sm:$0xff]  }
 0x5f7   : > { %v7624_v20 = vmul.f32 0.2, %v7368_v22  ;;  %v7376_v54 = vadd.f32 %v20578_v21, %v7112_v36  ;;  %10130 = vmatmul.mubr.bf16.gmra.mrb[144].mxu0 %v22486_v49  ;;  %10845 = vmatprep.subr.bf16.mxu1 %v16347_v14  ;;  %v16351_v14 = vld [vmem:[%s21703_s5 + $0x528] ss:$16 sps:$4 sm:$0xff]  }
 0x5f8   : > { %v7631_v5 = vmul.f32 0.2, %v7375_v0  ;;  %10709 = vmatmul.mubr.bf16.gmra.mrb[176].mxu1 %v22438_v59  ;;  %10139 = vmatprep.mubr.bf16.mxu0 %v20288_v44  ;;  %v7879_v10 = vmax.f32 %v7367_v15, %v7623_v30  ;;  %v16356_v59 = vld [vmem:[%s21703_s5 + $0x744] ss:$16 sps:$4 sm:$0xff]  }
 0x5f9   : > { %v7632_v26 = vmul.f32 0.2, %v7376_v54  ;;  %10718 = vmatprep.mubr.bf16.mxu1 %v19531_v43  ;;  %10267 = vmatpush1.bf16.msra.mxu0 %v16342_v41  ;;  %v7880_v36 = vmax.f32 %v7368_v22, %v7624_v20  ;;  %v16359_v41 = vld [vmem:[%s21703_s5 + $0x54c] ss:$16 sps:$4 sm:$0xff]   ;;  %v16354_v22 = vld [vmem:[%s21703_s5 + $0x740] ss:$16 sps:$4 sm:$0xff]  }
 0x5fa   : > { %v7887_v39 = vmax.f32 %v7375_v0, %v7631_v5  ;;  %10846 = vmatpush1.bf16.msra.mxu1 %v16345_v38  ;;  %10268 = vmatprep.subr.bf16.mxu0 %v16350_v50  ;;  %v16357_v20 = vld [vmem:[%s21703_s5 + $0x548] ss:$16 sps:$4 sm:$0xff]  }
 0x5fb   : > { %v7888_v27 = vmax.f32 %v7376_v54, %v7632_v26  ;;  %v7116_v43 = vpop.f32.mrb[136].mxu1  ;;  %10847 = vmatprep.subr.bf16.mxu1 %v16353_v23 }
 0x5fc   : > { %v7383_v15 = vadd.f32 %v20574_v40, %v7116_v43  ;;  %v7118_v38 = vpop.f32.mrb[137].mxu1  ;;  %v20821_v30 = vpack.c.bf16 %v7887_v39, %v7879_v10  ;;  %v22489_v43 = vld [vmem:[#allocation78_spill] sm:$0xff] }
 0x5fd   : > { %v7384_v0 = vadd.f32 %v20578_v21, %v7118_v38  ;;  %v7120_v50 = vpop.f32.mrb[138].mxu1  ;;  %10269 = vmatpush1.bf16.msra.mxu0 %v16348_v46  ;;  %v20830_v54 = vpack.c.bf16 %v7888_v27, %v7880_v36  ;;  %v16362_v46 = vld [vmem:[%s21703_s5 + $0x764] ss:$16 sps:$4 sm:$0xff]   ;;  %v16365_v27 = vld [vmem:[%s21703_s5 + $0x56c] ss:$16 sps:$4 sm:$0xff]  }
 0x5fe   : > { %22487 = vst [vmem:[#allocation101_spill] sm:$0xff] %v20821_v30  ;;  %v7639_v23 = vmul.f32 0.2, %v7383_v15  ;;  %v7391_v5 = vadd.f32 %v20574_v40, %v7120_v50  ;;  %v7122_v26 = vpop.f32.mrb[139].mxu1  ;;  %10848 = vmatpush1.bf16.msra.mxu1 %v16351_v14  ;;  %10270 = vmatprep.subr.bf16.mxu0 %v16356_v59  ;;  %v22490_v38 = vld [vmem:[#allocation80_spill] sm:$0xff] }
 0x5ff   : > { %22488 = vst [vmem:[#allocation102_spill] sm:$0xff] %v20830_v54  ;;  %v7640_v10 = vmul.f32 0.2, %v7384_v0  ;;  %v7392_v39 = vadd.f32 %v20578_v21, %v7122_v26  ;;  %10140 = vmatmul.mubr.bf16.gmra.mrb[148].mxu0 %v22489_v43  ;;  %10849 = vmatprep.subr.bf16.mxu1 %v16359_v41  ;;  %v16360_v59 = vld [vmem:[%s21703_s5 + $0x760] ss:$16 sps:$4 sm:$0xff]  }
 0x600   : > { %v7647_v36 = vmul.f32 0.2, %v7391_v5  ;;  %10719 = vmatmul.mubr.bf16.gmra.mrb[180].mxu1 %v19528_v9  ;;  %10149 = vmatprep.mubr.bf16.mxu0 %v22490_v38  ;;  %v7895_v50 = vmax.f32 %v7383_v15, %v7639_v23  ;;  %v16363_v41 = vld [vmem:[%s21703_s5 + $0x568] ss:$16 sps:$4 sm:$0xff]   ;;  %v16368_v9 = vld [vmem:[%s21703_s5 + $0x784] ss:$16 sps:$4 sm:$0xff]  }
 0x601   : > { %v7648_v14 = vmul.f32 0.2, %v7392_v39  ;;  %10728 = vmatprep.mubr.bf16.mxu1 %v19555_v63  ;;  %10271 = vmatpush1.bf16.msra.mxu0 %v16354_v22  ;;  %v7896_v30 = vmax.f32 %v7384_v0, %v7640_v10  ;;  %v16371_v22 = vld [vmem:[%s21703_s5 + $0x58c] ss:$16 sps:$4 sm:$0xff]   ;;  %v16366_v0 = vld [vmem:[%s21703_s5 + $0x780] ss:$16 sps:$4 sm:$0xff]  }
 0x602   : > { %v7903_v26 = vmax.f32 %v7391_v5, %v7647_v36  ;;  %10850 = vmatpush1.bf16.msra.mxu1 %v16357_v20  ;;  %10272 = vmatprep.subr.bf16.mxu0 %v16362_v46  ;;  %v16369_v10 = vld [vmem:[%s21703_s5 + $0x588] ss:$16 sps:$4 sm:$0xff]  }
 0x603   : > { %v7904_v54 = vmax.f32 %v7392_v39, %v7648_v14  ;;  %v7126_v63 = vpop.f32.mrb[140].mxu1  ;;  %10851 = vmatprep.subr.bf16.mxu1 %v16365_v27 }
 0x604   : > { %v7399_v15 = vadd.f32 %v20574_v40, %v7126_v63  ;;  %v7128_v20 = vpop.f32.mrb[141].mxu1  ;;  %v20857_v23 = vpack.c.bf16 %v7903_v26, %v7895_v50  ;;  %v22493_v63 = vld [vmem:[#allocation79_spill] sm:$0xff] }
 0x605   : > { %v7400_v5 = vadd.f32 %v20578_v21, %v7128_v20  ;;  %v7130_v46 = vpop.f32.mrb[142].mxu1  ;;  %10273 = vmatpush1.bf16.msra.mxu0 %v16360_v59  ;;  %v20866_v39 = vpack.c.bf16 %v7904_v54, %v7896_v30  ;;  %v16374_v59 = vld [vmem:[%s21703_s5 + $0x7a4] ss:$16 sps:$4 sm:$0xff]   ;;  %v16377_v30 = vld [vmem:[%s21703_s5 + $0x5ac] ss:$16 sps:$4 sm:$0xff]  }
 0x606   : > { %22491 = vst [vmem:[#allocation103_spill] sm:$0xff] %v20857_v23  ;;  %v7655_v27 = vmul.f32 0.2, %v7399_v15  ;;  %v7407_v36 = vadd.f32 %v20574_v40, %v7130_v46  ;;  %v7132_v14 = vpop.f32.mrb[143].mxu1  ;;  %10852 = vmatpush1.bf16.msra.mxu1 %v16363_v41  ;;  %10274 = vmatprep.subr.bf16.mxu0 %v16368_v9  ;;  %v22494_v20 = vld [vmem:[#allocation82_spill] sm:$0xff] }
 0x607   : > { %22492 = vst [vmem:[#allocation104_spill] sm:$0xff] %v20866_v39  ;;  %v7656_v50 = vmul.f32 0.2, %v7400_v5  ;;  %v7408_v26 = vadd.f32 %v20578_v21, %v7132_v14  ;;  %10150 = vmatmul.mubr.bf16.gmra.mrb[152].mxu0 %v22493_v63  ;;  %10853 = vmatprep.subr.bf16.mxu1 %v16371_v22  ;;  %v16372_v9 = vld [vmem:[%s21703_s5 + $0x7a0] ss:$16 sps:$4 sm:$0xff]  }
 0x608   : > { %v7663_v54 = vmul.f32 0.2, %v7407_v36  ;;  %10729 = vmatmul.mubr.bf16.gmra.mrb[184].mxu1 %v22443_v1  ;;  %10159 = vmatprep.mubr.bf16.mxu0 %v22494_v20  ;;  %v7911_v46 = vmax.f32 %v7399_v15, %v7655_v27  ;;  %v16375_v22 = vld [vmem:[%s21703_s5 + $0x5a8] ss:$16 sps:$4 sm:$0xff]   ;;  %v16380_v1 = vld [vmem:[%s21703_s5 + $0x7c4] ss:$16 sps:$4 sm:$0xff]  }
 0x609   : > { %v7664_v41 = vmul.f32 0.2, %v7408_v26  ;;  %10738 = vmatprep.mubr.bf16.mxu1 %v22444_v58  ;;  %10275 = vmatpush1.bf16.msra.mxu0 %v16366_v0  ;;  %v7912_v23 = vmax.f32 %v7400_v5, %v7656_v50  ;;  %v16383_v0 = vld [vmem:[%s21703_s5 + $0x5cc] ss:$16 sps:$4 sm:$0xff]   ;;  %v16378_v5 = vld [vmem:[%s21703_s5 + $0x7c0] ss:$16 sps:$4 sm:$0xff]  }
 0x60a   : > { %v7919_v14 = vmax.f32 %v7407_v36, %v7663_v54  ;;  %10854 = vmatpush1.bf16.msra.mxu1 %v16369_v10  ;;  %10276 = vmatprep.subr.bf16.mxu0 %v16374_v59  ;;  %v16381_v50 = vld [vmem:[%s21703_s5 + $0x5c8] ss:$16 sps:$4 sm:$0xff]  }
 0x60b   : > { %v7920_v39 = vmax.f32 %v7408_v26, %v7664_v41  ;;  %v7136_v58 = vpop.f32.mrb[144].mxu1  ;;  %10855 = vmatprep.subr.bf16.mxu1 %v16377_v30 }
 0x60c   : > { %v7415_v15 = vadd.f32 %v20574_v40, %v7136_v58  ;;  %v7138_v10 = vpop.f32.mrb[145].mxu1  ;;  %v20893_v27 = vpack.c.bf16 %v7919_v14, %v7911_v46  ;;  %v22497_v58 = vld [vmem:[#allocation81_spill] sm:$0xff] }
 0x60d   : > { %v7416_v36 = vadd.f32 %v20578_v21, %v7138_v10  ;;  %v7140_v59 = vpop.f32.mrb[146].mxu1  ;;  %10277 = vmatpush1.bf16.msra.mxu0 %v16372_v9  ;;  %v20902_v26 = vpack.c.bf16 %v7920_v39, %v7912_v23  ;;  %v16386_v9 = vld [vmem:[%s21703_s5 + $0x7e4] ss:$16 sps:$4 sm:$0xff]   ;;  %v16389_v23 = vld [vmem:[%s21703_s5 + $0x5ec] ss:$16 sps:$4 sm:$0xff]  }
 0x60e   : > { %22495 = vst [vmem:[#allocation105_spill] sm:$0xff] %v20893_v27  ;;  %v7671_v30 = vmul.f32 0.2, %v7415_v15  ;;  %v7423_v54 = vadd.f32 %v20574_v40, %v7140_v59  ;;  %v7142_v41 = vpop.f32.mrb[147].mxu1  ;;  %10856 = vmatpush1.bf16.msra.mxu1 %v16375_v22  ;;  %10278 = vmatprep.subr.bf16.mxu0 %v16380_v1  ;;  %v16384_v1 = vld [vmem:[%s21703_s5 + $0x7e0] ss:$16 sps:$4 sm:$0xff]  }
 0x60f   : > { %22496 = vst [vmem:[#allocation106_spill] sm:$0xff] %v20902_v26  ;;  %v7672_v46 = vmul.f32 0.2, %v7416_v36  ;;  %v7424_v14 = vadd.f32 %v20578_v21, %v7142_v41  ;;  %10160 = vmatmul.mubr.bf16.gmra.mrb[156].mxu0 %v22497_v58  ;;  %10857 = vmatprep.subr.bf16.mxu1 %v16383_v0  ;;  %v16387_v0 = vld [vmem:[%s21703_s5 + $0x5e8] ss:$16 sps:$4 sm:$0xff]  }
 0x610   : > { %v7679_v39 = vmul.f32 0.2, %v7423_v54  ;;  %10739 = vmatmul.mubr.bf16.gmra.mrb[188].mxu1 %v22447_v57  ;;  %10169 = vmatprep.mubr.bf16.mxu0 %v20396_v42  ;;  %v7927_v10 = vmax.f32 %v7415_v15, %v7671_v30 }
 0x611   : > { %v7680_v22 = vmul.f32 0.2, %v7424_v14  ;;  %10748 = vmatprep.mubr.bf16.mxu1 %v22448_v2  ;;  %10279 = vmatpush1.bf16.msra.mxu0 %v16378_v5  ;;  %v7928_v41 = vmax.f32 %v7416_v36, %v7672_v46  ;;  %v16392_v2 = vld [vmem:[%s21703_s5 + $0x60c] ss:$16 sps:$4 sm:$0xff]  }
 0x612   : > { %v7935_v59 = vmax.f32 %v7423_v54, %v7679_v39  ;;  %10858 = vmatpush1.bf16.msra.mxu1 %v16381_v50  ;;  %10280 = vmatprep.subr.bf16.mxu0 %v16386_v9  ;;  %v22501_v39 = vld [vmem:[#allocation72_spill] sm:$0xff] }
 0x613   : > { %v7936_v57 = vmax.f32 %v7424_v14, %v7680_v22  ;;  %v7146_v27 = vpop.f32.mrb[148].mxu1  ;;  %10859 = vmatprep.subr.bf16.mxu1 %v16389_v23  ;;  %v22500_v23 = vld [vmem:[#allocation83_spill] sm:$0xff] }
 0x614   : > { %v7431_v5 = vadd.f32 %v20574_v40, %v7146_v27  ;;  %v7148_v26 = vpop.f32.mrb[149].mxu1  ;;  %v20926_v42 = vpack.c.bf16 %v7935_v59, %v7927_v10 }
 0x615   : > { %v7432_v15 = vadd.f32 %v20578_v21, %v7148_v26  ;;  %v7150_v50 = vpop.f32.mrb[150].mxu1  ;;  %10281 = vmatpush1.bf16.msra.mxu0 %v16384_v1  ;;  %v20929_v30 = vpack.c.bf16 %v7936_v57, %v7928_v41 }
 0x616   : > { %22498 = vst [vmem:[#allocation107_spill] sm:$0xff] %v20926_v42  ;;  %v7687_v54 = vmul.f32 0.2, %v7431_v5  ;;  %v7439_v36 = vadd.f32 %v20574_v40, %v7150_v50  ;;  %v7152_v9 = vpop.f32.mrb[151].mxu1  ;;  %10860 = vmatpush1.bf16.msra.mxu1 %v16387_v0 }
 0x617   : > { %22499 = vst [vmem:[#allocation108_spill] sm:$0xff] %v20929_v30  ;;  %v7688_v46 = vmul.f32 0.2, %v7432_v15  ;;  %v7440_v14 = vadd.f32 %v20578_v21, %v7152_v9  ;;  %10170 = vmatmul.mubr.bf16.gmra.mrb[160].mxu0 %v22500_v23  ;;  %11022 = vmatprep.subr.bf16.mxu1 %v16392_v2 }
 0x618   : > { %v7695_v27 = vmul.f32 0.2, %v7439_v36  ;;  %10749 = vmatmul.mubr.bf16.gmra.mrb[192].mxu1 %v22451_v56  ;;  %10179 = vmatprep.mubr.bf16.mxu0 %v20432_v18  ;;  %v7943_v22 = vmax.f32 %v7431_v5, %v7687_v54 }
 0x619   : > { %v7696_v26 = vmul.f32 0.2, %v7440_v14  ;;  %10758 = vmatprep.mubr.bf16.mxu1 %v22501_v39  ;;  %v7944_v10 = vmax.f32 %v7432_v15, %v7688_v46  ;;  %v22504_v15 = vld [vmem:[#allocation84_spill] sm:$0xff] }
 0x61a   : > { %v7951_v1 = vmax.f32 %v7439_v36, %v7695_v27  ;;  %v22505_v36 = vld [vmem:[#allocation56_spill] sm:$0xff] }
 0x61b   : > { %v7952_v59 = vmax.f32 %v7440_v14, %v7696_v26  ;;  %v7156_v41 = vpop.f32.mrb[152].mxu1 }
 0x61c   : > { %v7447_v0 = vadd.f32 %v20574_v40, %v7156_v41  ;;  %v7158_v57 = vpop.f32.mrb[153].mxu1  ;;  %v20938_v50 = vpack.c.bf16 %v7951_v1, %v7943_v22 }
 0x61d   : > { %v7448_v2 = vadd.f32 %v20578_v21, %v7158_v57  ;;  %v7160_v9 = vpop.f32.mrb[154].mxu1  ;;  %v20941_v42 = vpack.c.bf16 %v7952_v59, %v7944_v10 }
 0x61e   : > { %22502 = vst [vmem:[#allocation109_spill] sm:$0xff] %v20938_v50  ;;  %v7703_v56 = vmul.f32 0.2, %v7447_v0  ;;  %v7455_v30 = vadd.f32 %v20574_v40, %v7160_v9  ;;  %v7162_v18 = vpop.f32.mrb[155].mxu1 }
 0x61f   : > { %22503 = vst [vmem:[#allocation110_spill] sm:$0xff] %v20941_v42  ;;  %v7704_v39 = vmul.f32 0.2, %v7448_v2  ;;  %v7456_v5 = vadd.f32 %v20578_v21, %v7162_v18  ;;  %10180 = vmatmul.mubr.bf16.gmra.mrb[164].mxu0 %v22504_v15 }
 0x620   : > { %v7711_v54 = vmul.f32 0.2, %v7455_v30  ;;  %10759 = vmatmul.mubr.bf16.gmra.mrb[196].mxu1 %v22455_v52  ;;  %10189 = vmatprep.mubr.bf16.mxu0 %v22505_v36  ;;  %v7959_v14 = vmax.f32 %v7447_v0, %v7703_v56  ;;  %v22506_v0 = vld [vmem:[#allocation85_spill] sm:$0xff] }
 0x621   : > { %v7712_v46 = vmul.f32 0.2, %v7456_v5  ;;  %10768 = vmatprep.mubr.bf16.mxu1 %v22456_v28  ;;  %v7960_v26 = vmax.f32 %v7448_v2, %v7704_v39  ;;  %v22507_v56 = vld [vmem:[#allocation57_spill] sm:$0xff] }
 0x622   : > { %v7967_v27 = vmax.f32 %v7455_v30, %v7711_v54 }
 0x623   : > { %v7968_v22 = vmax.f32 %v7456_v5, %v7712_v46  ;;  %v7166_v1 = vpop.f32.mrb[156].mxu1 }
 0x624   : > { %v7463_v10 = vadd.f32 %v20574_v40, %v7166_v1  ;;  %v7168_v59 = vpop.f32.mrb[157].mxu1  ;;  %v20950_v41 = vpack.c.bf16 %v7967_v27, %v7959_v14  ;;  %v16441_v1 = vld [vmem:[%s21705_s7 + $0x20] ss:$8 sps:$4 sm:$0xff]  }
 0x625   : > { %v7464_v18 = vadd.f32 %v20578_v21, %v7168_v59  ;;  %v7170_v57 = vpop.f32.mrb[158].mxu1  ;;  %v20953_v9 = vpack.c.bf16 %v7968_v22, %v7960_v26  ;;  %v22508_v26 = vld [vmem:[#allocation86_spill] sm:$0xff]  ;;  %v16401_v22 = vld [vmem:[%s21703_s5 + $0x66c] ss:$16 sps:$4 sm:$0xff]  }
 0x626   : > { %v7719_v52 = vmul.f32 0.2, %v7463_v10  ;;  %v7471_v50 = vadd.f32 %v20574_v40, %v7170_v57  ;;  %v7172_v42 = vpop.f32.mrb[159].mxu1  ;;  %v16449_v59 = vld [vmem:[%s21705_s7 + $0x34] ss:$8 sps:$4 sm:$0xff]  }
 0x627   : > { %v7720_v28 = vmul.f32 0.2, %v7464_v18  ;;  %v7472_v30 = vadd.f32 %v20578_v21, %v7172_v42  ;;  %10190 = vmatmul.mubr.bf16.gmra.mrb[168].mxu0 %v22506_v0  ;;  %v22509_v42 = vld [vmem:[#allocation58_spill] sm:$0xff]  ;;  %v22511_v21 = vld [vmem:[#allocation59_spill] sm:$0xff] }
 0x628   : > { %v7727_v2 = vmul.f32 0.2, %v7471_v50  ;;  %10769 = vmatmul.mubr.bf16.gmra.mrb[200].mxu1 %v22457_v45  ;;  %10199 = vmatprep.mubr.bf16.mxu0 %v22507_v56  ;;  %v7975_v5 = vmax.f32 %v7463_v10, %v7719_v52  ;;  %v16431_v45 = vld [vmem:[%s21705_s7 + $0x4] ss:$8 sps:$4 sm:$0xff]   ;;  %v16399_v57 = vld [vmem:[%s21703_s5 + $0x668] ss:$16 sps:$4 sm:$0xff]  }
 0x629   : > { %v7728_v39 = vmul.f32 0.2, %v7472_v30  ;;  %10778 = vmatprep.mubr.bf16.mxu1 %v22458_v55  ;;  %v7976_v46 = vmax.f32 %v7464_v18, %v7720_v28  ;;  %11931 = vmatprep.subr.bf16.mxu0 %v16431_v45  ;;  %v22510_v55 = vld [vmem:[#allocation87_spill] sm:$0xff]  ;;  %v22517_v18 = vld [vmem:[#allocation93_spill] sm:$0xff] }
 0x62a   : > { %v7983_v54 = vmax.f32 %v7471_v50, %v7727_v2  ;;  %v22512_v50 = vld [vmem:[#allocation88_spill] sm:$0xff]  ;;  %v22516_v10 = vld [vmem:[#allocation91_spill] sm:$0xff] }
 0x62b   : > { %v7984_v14 = vmax.f32 %v7472_v30, %v7728_v39  ;;  %v16404_v52 = vld [vmem:[%s21703_s5 + $0x68c] ss:$16 sps:$4 sm:$0xff]   ;;  %v16447_v28 = vld [vmem:[%s21705_s7 + $0x30] ss:$8 sps:$4 sm:$0xff]   ;;  %v16450_v2 = vld [vmem:[%s21705_s7 + $0x40] ss:$8 sps:$4 sm:$0xff]  }
 0x62c   : > { %v20961_v27 = vpack.c.bf16 %v7983_v54, %v7975_v5  ;;  %v16407_v30 = vld [vmem:[%s21703_s5 + $0x6ac] ss:$16 sps:$4 sm:$0xff]   ;;  %v22518_v39 = vld [vmem:[#allocation92_spill] sm:$0xff] }
 0x62d   : > { %v20963_v40 = vpack.c.bf16 %v7984_v14, %v7976_v46  ;;  %v16455_v5 = vld [vmem:[%s21705_s7 + $0x54] ss:$8 sps:$4 sm:$0xff]   ;;  %v22519_v54 = vld [vmem:[#allocation95_spill] sm:$0xff]  ;;  %v16453_v45 = vld [vmem:[%s21705_s7 + $0x50] ss:$8 sps:$4 sm:$0xff]  }
 0x62e   : > { %v16405_v46 = vld [vmem:[%s21703_s5 + $0x6a8] ss:$16 sps:$4 sm:$0xff]   ;;  %v16410_v14 = vld [vmem:[%s21703_s5 + $0x6cc] ss:$16 sps:$4 sm:$0xff]  }
 0x62f   : > { %10200 = vmatmul.mubr.bf16.gmra.mrb[172].mxu0 %v22508_v26 }
 0x630   : > { %10779 = vmatmul.mubr.bf16.gmra.mrb[204].mxu1 %v22461_v61  ;;  %10209 = vmatprep.mubr.bf16.mxu0 %v22509_v42  ;;  %v16429_v61 = vld [vmem:[%s21705_s7] ss:$8 sps:$4 sm:$0xff]  }
 0x631   : > { %10788 = vmatprep.mubr.bf16.mxu1 %v19689_v34  ;;  %v22513_v34 = vld [vmem:[#allocation60_spill] sm:$0xff] }
 0x637   : > { %10210 = vmatmul.mubr.bf16.gmra.mrb[176].mxu0 %v22510_v55 }
 0x638   : > { %10789 = vmatmul.mubr.bf16.gmra.mrb[208].mxu1 %v19686_v12  ;;  %10219 = vmatprep.mubr.bf16.mxu0 %v22511_v21  ;;  %v22514_v12 = vld [vmem:[#allocation89_spill] sm:$0xff] }
 0x639   : > { %10798 = vmatprep.mubr.bf16.mxu1 %v22463_v31  ;;  %v22515_v31 = vld [vmem:[#allocation90_spill] sm:$0xff] }
 0x63f   : > { %10220 = vmatmul.mubr.bf16.gmra.mrb[180].mxu0 %v22512_v50 }
 0x640   : > { %10799 = vmatmul.mubr.bf16.gmra.mrb[212].mxu1 %v22465_v6  ;;  %10229 = vmatprep.mubr.bf16.mxu0 %v20565_v37  ;;  %v16437_v6 = vld [vmem:[%s21705_s7 + $0x14] ss:$8 sps:$4 sm:$0xff]  }
 0x641   : > { %10808 = vmatprep.mubr.bf16.mxu1 %v19713_v29  ;;  %v16390_v29 = vld [vmem:[%s21703_s5 + $0x608] ss:$16 sps:$4 sm:$0xff]  }
 0x647   : > { %10230 = vmatmul.mubr.bf16.gmra.mrb[184].mxu0 %v20561_v53 }
 0x648   : > { %10809 = vmatmul.mubr.bf16.gmra.mrb[216].mxu1 %v19710_v62  ;;  %10239 = vmatprep.mubr.bf16.mxu0 %v22513_v34  ;;  %v16395_v62 = vld [vmem:[%s21703_s5 + $0x62c] ss:$16 sps:$4 sm:$0xff]  }
 0x649   : > { %10818 = vmatprep.mubr.bf16.mxu1 %v22468_v47  ;;  %v16393_v47 = vld [vmem:[%s21703_s5 + $0x628] ss:$16 sps:$4 sm:$0xff]  }
 0x64f   : > { %10240 = vmatmul.mubr.bf16.gmra.mrb[188].mxu0 %v22514_v12 }
 0x650   : > { %10819 = vmatmul.mubr.bf16.gmra.mrb[220].mxu1 %v22472_v60  ;;  %10282 = vmatprep.mubr.bf16.mxu0 %v20596_v13  ;;  %v16398_v60 = vld [vmem:[%s21703_s5 + $0x64c] ss:$16 sps:$4 sm:$0xff]  }
 0x651   : > { %10861 = vmatprep.mubr.bf16.mxu1 %v22473_v11  ;;  %v16435_v11 = vld [vmem:[%s21705_s7 + $0x10] ss:$8 sps:$4 sm:$0xff]  }
 0x657   : > { %10283 = vmatmul.mubr.bf16.vlgmr.msra.gmra.mrb[128].mxu0 %v22515_v31 }
 0x658   : > { %10862 = vmatmul.mubr.bf16.vlgmr.msra.gmra.mrb[160].mxu1 %v22476_v19  ;;  %10292 = vmatprep.mubr.bf16.mxu0 %v20608_v17  ;;  %v16443_v19 = vld [vmem:[%s21705_s7 + $0x24] ss:$8 sps:$4 sm:$0xff]  }
 0x659   : > { %11023 = vmatpush1.bf16.msra.mxu1 %v16390_v29  ;;  %10871 = vmatprep.mubr.bf16.mxu1 %v22477_v51  ;;  %v16396_v51 = vld [vmem:[%s21703_s5 + $0x648] ss:$16 sps:$4 sm:$0xff]   ;;  %v16413_v29 = vld [vmem:[%s21703_s5 + $0x6ec] ss:$16 sps:$4 sm:$0xff]  }
 0x65a   : > { %11024 = vmatprep.subr.bf16.mxu1 %v16395_v62  ;;  %11932 = vmatpush1.bf16.msra.mxu0 %v16429_v61  ;;  %v16456_v62 = vld [vmem:[%s21705_s7 + $0x60] ss:$8 sps:$4 sm:$0xff]  }
 0x65b   : > { %11933 = vmatprep.subr.bf16.mxu0 %v16437_v6  ;;  %v22520_v61 = vld [vmem:[#allocation94_spill] sm:$0xff]  ;;  %v16461_v6 = vld [vmem:[%s21705_s7 + $0x74] ss:$8 sps:$4 sm:$0xff]  }
 0x65d   : > { %11025 = vmatpush1.bf16.msra.mxu1 %v16393_v47  ;;  %v22521_v47 = vld [vmem:[#allocation97_spill] sm:$0xff] }
 0x65e   : > { %11026 = vmatprep.subr.bf16.mxu1 %v16398_v60  ;;  %11934 = vmatpush1.bf16.msra.mxu0 %v16435_v11  ;;  %v16411_v60 = vld [vmem:[%s21703_s5 + $0x6e8] ss:$16 sps:$4 sm:$0xff]   ;;  %v16416_v11 = vld [vmem:[%s21703_s5 + $0x70c] ss:$16 sps:$4 sm:$0xff]  }
 0x65f   : > { %10293 = vmatmul.mubr.bf16.gmra.mrb[132].mxu0 %v22516_v10  ;;  %11935 = vmatprep.subr.bf16.mxu0 %v16443_v19  ;;  %v16459_v19 = vld [vmem:[%s21705_s7 + $0x70] ss:$8 sps:$4 sm:$0xff]  }
 0x660   : > { %10872 = vmatmul.mubr.bf16.gmra.mrb[164].mxu1 %v22478_v16  ;;  %10302 = vmatprep.mubr.bf16.mxu0 %v22517_v18  ;;  %v16452_v16 = vld [vmem:[%s21705_s7 + $0x44] ss:$8 sps:$4 sm:$0xff]  }
 0x661   : > { %10881 = vmatprep.mubr.bf16.mxu1 %v22479_v7  ;;  %11027 = vmatpush1.bf16.msra.mxu1 %v16396_v51  ;;  %v16402_v7 = vld [vmem:[%s21703_s5 + $0x688] ss:$16 sps:$4 sm:$0xff]   ;;  %v16419_v51 = vld [vmem:[%s21703_s5 + $0x72c] ss:$16 sps:$4 sm:$0xff]  }
 0x662   : > { %11028 = vmatprep.subr.bf16.mxu1 %v16401_v22  ;;  %11936 = vmatpush1.bf16.msra.mxu0 %v16441_v1  ;;  %v16462_v22 = vld [vmem:[%s21705_s7 + $0x80] ss:$8 sps:$4 sm:$0xff]   ;;  %v22522_v1 = vld [vmem:[#allocation96_spill] sm:$0xff] }
 0x663   : > { %11937 = vmatprep.subr.bf16.mxu0 %v16449_v59  ;;  %v16417_v59 = vld [vmem:[%s21703_s5 + $0x728] ss:$16 sps:$4 sm:$0xff]  }
 0x665   : > { %11029 = vmatpush1.bf16.msra.mxu1 %v16399_v57  ;;  %v16467_v57 = vld [vmem:[%s21705_s7 + $0x94] ss:$8 sps:$4 sm:$0xff]  }
 0x666   : > { %11030 = vmatprep.subr.bf16.mxu1 %v16404_v52  ;;  %11938 = vmatpush1.bf16.msra.mxu0 %v16447_v28  ;;  %v16422_v52 = vld [vmem:[%s21703_s5 + $0x74c] ss:$16 sps:$4 sm:$0xff]  }
 0x667   : > { %10303 = vmatmul.mubr.bf16.gmra.mrb[136].mxu0 %v22518_v39  ;;  %11939 = vmatprep.subr.bf16.mxu0 %v16452_v16  ;;  %v16425_v28 = vld [vmem:[%s21703_s5 + $0x76c] ss:$16 sps:$4 sm:$0xff]   ;;  %v16423_v16 = vld [vmem:[%s21703_s5 + $0x768] ss:$16 sps:$4 sm:$0xff]  }
 0x668   : > { %10882 = vmatmul.mubr.bf16.gmra.mrb[168].mxu1 %v22480_v4  ;;  %10312 = vmatprep.mubr.bf16.mxu0 %v22519_v54  ;;  %v16408_v4 = vld [vmem:[%s21703_s5 + $0x6c8] ss:$16 sps:$4 sm:$0xff]  }
 0x669   : > { %10891 = vmatprep.mubr.bf16.mxu1 %v20239_v33  ;;  %11031 = vmatpush1.bf16.msra.mxu1 %v16402_v7  ;;  %v16458_v33 = vld [vmem:[%s21705_s7 + $0x64] ss:$8 sps:$4 sm:$0xff]   ;;  %v16468_v7 = vld [vmem:[%s21705_s7 + $0xa0] ss:$8 sps:$4 sm:$0xff]  }
 0x66a   : > { %11032 = vmatprep.subr.bf16.mxu1 %v16407_v30  ;;  %11940 = vmatpush1.bf16.msra.mxu0 %v16450_v2  ;;  %v16470_v30 = vld [vmem:[%s21705_s7 + $0xa4] ss:$8 sps:$4 sm:$0xff]  }
 0x66b   : > { %11941 = vmatprep.subr.bf16.mxu0 %v16455_v5  ;;  %v16434_v2 = vld [vmem:[%s21703_s5 + $0x7ac] ss:$16 sps:$4 sm:$0xff]  }
 0x66c   : > { %v22523_v5 = vld [vmem:[#allocation99_spill] sm:$0xff] }
 0x66d   : > { %11033 = vmatpush1.bf16.msra.mxu1 %v16405_v46  ;;  %v16432_v46 = vld [vmem:[%s21703_s5 + $0x7a8] ss:$16 sps:$4 sm:$0xff]  }
 0x66e   : > { %11034 = vmatprep.subr.bf16.mxu1 %v16410_v14  ;;  %11942 = vmatpush1.bf16.msra.mxu0 %v16453_v45  ;;  %v16471_v14 = vld [vmem:[%s21705_s7 + $0xb0] ss:$8 sps:$4 sm:$0xff]   ;;  %v16473_v45 = vld [vmem:[%s21705_s7 + $0xb4] ss:$8 sps:$4 sm:$0xff]  }
 0x66f   : > { %10313 = vmatmul.mubr.bf16.gmra.mrb[140].mxu0 %v22520_v61  ;;  %11943 = vmatprep.subr.bf16.mxu0 %v16458_v33  ;;  %v16446_v33 = vld [vmem:[%s21703_s5 + $0x7ec] ss:$16 sps:$4 sm:$0xff]  }
 0x670   : > { %10892 = vmatmul.mubr.bf16.gmra.mrb[172].mxu1 %v22483_v35  ;;  %10322 = vmatprep.mubr.bf16.mxu0 %v22521_v47  ;;  %v16464_v35 = vld [vmem:[%s21705_s7 + $0x84] ss:$8 sps:$4 sm:$0xff]  }
 0x671   : > { %10901 = vmatprep.mubr.bf16.mxu1 %v22484_v32  ;;  %11035 = vmatpush1.bf16.msra.mxu1 %v16408_v4  ;;  %v16414_v32 = vld [vmem:[%s21703_s5 + $0x708] ss:$16 sps:$4 sm:$0xff]   ;;  %v22524_v4 = vld [vmem:[#allocation98_spill] sm:$0xff] }
 0x672   : > { %11036 = vmatprep.subr.bf16.mxu1 %v16413_v29  ;;  %11944 = vmatpush1.bf16.msra.mxu0 %v16456_v62  ;;  %v22525_v29 = vld [vmem:[#allocation54_spill] sm:$0xff]  ;;  %v16444_v62 = vld [vmem:[%s21703_s5 + $0x7e8] ss:$16 sps:$4 sm:$0xff]  }
 0x673   : > { %11945 = vmatprep.subr.bf16.mxu0 %v16461_v6  ;;  %v16474_v6 = vld [vmem:[%s21705_s7 + $0xc0] ss:$8 sps:$4 sm:$0xff]  }
 0x675   : > { %11037 = vmatpush1.bf16.msra.mxu1 %v16411_v60  ;;  %v16476_v60 = vld [vmem:[%s21705_s7 + $0xc4] ss:$8 sps:$4 sm:$0xff]  }
 0x676   : > { %11038 = vmatprep.subr.bf16.mxu1 %v16416_v11  ;;  %11946 = vmatpush1.bf16.msra.mxu0 %v16459_v19  ;;  %v22527_v11 = vld [vmem:[#allocation102_spill] sm:$0xff]  ;;  %v22528_v19 = vld [vmem:[#allocation55_spill] sm:$0xff] }
 0x677   : > { %10323 = vmatmul.mubr.bf16.gmra.mrb[144].mxu0 %v22522_v1  ;;  %11947 = vmatprep.subr.bf16.mxu0 %v16464_v35  ;;  %v16477_v35 = vld [vmem:[%s21705_s7 + $0xd0] ss:$8 sps:$4 sm:$0xff]  }
 0x678   : > { %10902 = vmatmul.mubr.bf16.gmra.mrb[176].mxu1 %v22486_v49  ;;  %10332 = vmatprep.mubr.bf16.mxu0 %v20686_v3  ;;  %v16465_v49 = vld [vmem:[%s21705_s7 + $0x90] ss:$8 sps:$4 sm:$0xff]  }
 0x679   : > { %10911 = vmatprep.mubr.bf16.mxu1 %v20288_v44  ;;  %11039 = vmatpush1.bf16.msra.mxu1 %v16414_v32  ;;  %v16420_v44 = vld [vmem:[%s21703_s5 + $0x748] ss:$16 sps:$4 sm:$0xff]   ;;  %v16479_v32 = vld [vmem:[%s21705_s7 + $0xd4] ss:$8 sps:$4 sm:$0xff]  }
 0x67a   : > { %11040 = vmatprep.subr.bf16.mxu1 %v16419_v51  ;;  %11948 = vmatpush1.bf16.msra.mxu0 %v16462_v22  ;;  %v22529_v51 = vld [vmem:[#allocation101_spill] sm:$0xff]  ;;  %v22530_v22 = vld [vmem:[#allocation104_spill] sm:$0xff] }
 0x67b   : > { %11949 = vmatprep.subr.bf16.mxu0 %v16467_v57  ;;  %v22531_v57 = vld [vmem:[#allocation103_spill] sm:$0xff] }
 0x67d   : > { %11041 = vmatpush1.bf16.msra.mxu1 %v16417_v59  ;;  %v16482_v59 = vld [vmem:[%s21705_s7 + $0xe4] ss:$8 sps:$4 sm:$0xff]  }
 0x67e   : > { %11042 = vmatprep.subr.bf16.mxu1 %v16422_v52  ;;  %11950 = vmatpush1.bf16.msra.mxu0 %v16465_v49  ;;  %v22532_v52 = vld [vmem:[#allocation106_spill] sm:$0xff]  ;;  %v16483_v49 = vld [vmem:[%s21705_s7 + $0xf0] ss:$8 sps:$4 sm:$0xff]  }
 0x67f   : > { %10333 = vmatmul.mubr.bf16.gmra.mrb[148].mxu0 %v20677_v48  ;;  %11951 = vmatprep.subr.bf16.mxu0 %v16470_v30 }
 0x680   : > { %10912 = vmatmul.mubr.bf16.gmra.mrb[180].mxu1 %v22489_v43  ;;  %10342 = vmatprep.mubr.bf16.mxu0 %v20722_v8  ;;  %v16428_v43 = vld [vmem:[%s21703_s5 + $0x78c] ss:$16 sps:$4 sm:$0xff]  }
 0x681   : > { %10921 = vmatprep.mubr.bf16.mxu1 %v22490_v38  ;;  %11043 = vmatpush1.bf16.msra.mxu1 %v16420_v44  ;;  %v16426_v38 = vld [vmem:[%s21703_s5 + $0x788] ss:$16 sps:$4 sm:$0xff]  }
 0x682   : > { %11044 = vmatprep.subr.bf16.mxu1 %v16425_v28  ;;  %11952 = vmatpush1.bf16.msra.mxu0 %v16468_v7  ;;  %v22535_v44 = vld [vmem:[#allocation107_spill] sm:$0xff] }
 0x683   : > { %11953 = vmatprep.subr.bf16.mxu0 %v16473_v45  ;;  %v16491_v45 = vld [vmem:[%s21705_s7 + $0x114] ss:$8 sps:$4 sm:$0xff]  }
 0x685   : > { %11045 = vmatpush1.bf16.msra.mxu1 %v16423_v16 }
 0x686   : > { %11046 = vmatprep.subr.bf16.mxu1 %v16428_v43  ;;  %11954 = vmatpush1.bf16.msra.mxu0 %v16471_v14 }
 0x687   : > { %10343 = vmatmul.mubr.bf16.gmra.mrb[152].mxu0 %v20713_v24  ;;  %11955 = vmatprep.subr.bf16.mxu0 %v16476_v60  ;;  %v16494_v60 = vld [vmem:[%s21705_s7 + $0x124] ss:$8 sps:$4 sm:$0xff]  }
 0x688   : > { %10922 = vmatmul.mubr.bf16.gmra.mrb[184].mxu1 %v22493_v63  ;;  %10352 = vmatprep.mubr.bf16.mxu0 %v22523_v5  ;;  %v16440_v63 = vld [vmem:[%s21703_s5 + $0x7cc] ss:$16 sps:$4 sm:$0xff]  }
 0x689   : > { %10931 = vmatprep.mubr.bf16.mxu1 %v22494_v20  ;;  %11047 = vmatpush1.bf16.msra.mxu1 %v16426_v38  ;;  %v16438_v20 = vld [vmem:[%s21703_s5 + $0x7c8] ss:$16 sps:$4 sm:$0xff]  }
 0x68a   : > { %11048 = vmatprep.subr.bf16.mxu1 %v16434_v2  ;;  %11956 = vmatpush1.bf16.msra.mxu0 %v16474_v6  ;;  %v16486_v2 = vld [vmem:[%s21705_s7 + $0x100] ss:$8 sps:$4 sm:$0xff]  }
 0x68b   : > { %11957 = vmatprep.subr.bf16.mxu0 %v16479_v32 }
 0x68d   : > { %11049 = vmatpush1.bf16.msra.mxu1 %v16432_v46 }
 0x68e   : > { %11050 = vmatprep.subr.bf16.mxu1 %v16440_v63  ;;  %11958 = vmatpush1.bf16.msra.mxu0 %v16477_v35 }
 0x68f   : > { %10353 = vmatmul.mubr.bf16.gmra.mrb[156].mxu0 %v22524_v4  ;;  %11959 = vmatprep.subr.bf16.mxu0 %v16482_v59 }
 0x690   : > { %10932 = vmatmul.mubr.bf16.gmra.mrb[188].mxu1 %v22497_v58  ;;  %10362 = vmatprep.mubr.bf16.mxu0 %v20794_v25  ;;  %v22526_v58 = vld [vmem:[#allocation100_spill] sm:$0xff] }
 0x691   : > { %10941 = vmatprep.mubr.bf16.mxu1 %v22525_v29  ;;  %11051 = vmatpush1.bf16.msra.mxu1 %v16438_v20  ;;  %v16489_v29 = vld [vmem:[%s21705_s7 + $0x110] ss:$8 sps:$4 sm:$0xff]  }
 0x692   : > { %11052 = vmatprep.subr.bf16.mxu1 %v16446_v33 }
 0x695   : > { %11053 = vmatpush1.bf16.msra.mxu1 %v16444_v62 }
 0x697   : > { %10363 = vmatmul.mubr.bf16.gmra.mrb[160].mxu0 %v22526_v58 }
 0x698   : > { %10942 = vmatmul.mubr.bf16.gmra.mrb[192].mxu1 %v22500_v23  ;;  %10372 = vmatprep.mubr.bf16.mxu0 %v22527_v11  ;;  %v16480_v23 = vld [vmem:[%s21705_s7 + $0xe0] ss:$8 sps:$4 sm:$0xff]  }
 0x699   : > { %10951 = vmatprep.mubr.bf16.mxu1 %v22528_v19  ;;  %11960 = vmatpush1.bf16.msra.mxu0 %v16480_v23 }
 0x69f   : > { %10373 = vmatmul.mubr.bf16.gmra.mrb[164].mxu0 %v22529_v51 }
 0x6a0   : > { %10952 = vmatmul.mubr.bf16.gmra.mrb[196].mxu1 %v22504_v15  ;;  %10382 = vmatprep.mubr.bf16.mxu0 %v22530_v22  ;;  %v22533_v15 = vld [vmem:[#allocation105_spill] sm:$0xff] }
 0x6a1   : > { %10961 = vmatprep.mubr.bf16.mxu1 %v22505_v36  ;;  %v22534_v36 = vld [vmem:[#allocation108_spill] sm:$0xff] }
 0x6a7   : > { %10383 = vmatmul.mubr.bf16.gmra.mrb[168].mxu0 %v22531_v57 }
 0x6a8   : > { %10962 = vmatmul.mubr.bf16.gmra.mrb[200].mxu1 %v22506_v0  ;;  %10392 = vmatprep.mubr.bf16.mxu0 %v22532_v52  ;;  %v16485_v0 = vld [vmem:[%s21705_s7 + $0xf4] ss:$8 sps:$4 sm:$0xff]  }
 0x6a9   : > { %10971 = vmatprep.mubr.bf16.mxu1 %v22507_v56  ;;  %11961 = vmatprep.subr.bf16.mxu0 %v16485_v0  ;;  %v22536_v56 = vld [vmem:[#allocation110_spill] sm:$0xff] }
 0x6aa   : > { %11962 = vmatpush1.bf16.msra.mxu0 %v16483_v49  ;;  %v16497_v49 = vld [vmem:[%s21705_s7 + $0x134] ss:$8 sps:$4 sm:$0xff]  }
 0x6af   : > { %10393 = vmatmul.mubr.bf16.gmra.mrb[172].mxu0 %v22533_v15 }
 0x6b0   : > { %10972 = vmatmul.mubr.bf16.gmra.mrb[204].mxu1 %v22508_v26  ;;  %10402 = vmatprep.mubr.bf16.mxu0 %v22534_v36  ;;  %v16488_v26 = vld [vmem:[%s21705_s7 + $0x104] ss:$8 sps:$4 sm:$0xff]  }
 0x6b1   : > { %10981 = vmatprep.mubr.bf16.mxu1 %v22509_v42  ;;  %12124 = vmatprep.subr.bf16.mxu0 %v16488_v26  ;;  %v22537_v42 = vld [vmem:[#allocation109_spill] sm:$0xff] }
 0x6b7   : > { %10403 = vmatmul.mubr.bf16.gmra.mrb[176].mxu0 %v22535_v44 }
 0x6b8   : > { %10982 = vmatmul.mubr.bf16.gmra.mrb[208].mxu1 %v22510_v55  ;;  %10412 = vmatprep.mubr.bf16.mxu0 %v22536_v56 }
 0x6b9   : > { %10991 = vmatprep.mubr.bf16.mxu1 %v22511_v21 }
 0x6bf   : > { %10413 = vmatmul.mubr.bf16.gmra.mrb[180].mxu0 %v22537_v42 }
 0x6c0   : > { %10992 = vmatmul.mubr.bf16.gmra.mrb[212].mxu1 %v22512_v50  ;;  %10422 = vmatprep.mubr.bf16.mxu0 %v20953_v9 }
 0x6c1   : > { %11001 = vmatprep.mubr.bf16.mxu1 %v20565_v37  ;;  %v22538_v37 = vld [vmem:[#allocation3_spill] sm:$0xff] }
 0x6c7   : > { %10423 = vmatmul.mubr.bf16.gmra.mrb[184].mxu0 %v20950_v41 }
 0x6c8   : > { %11002 = vmatmul.mubr.bf16.gmra.mrb[216].mxu1 %v20561_v53  ;;  %10432 = vmatprep.mubr.bf16.mxu0 %v20963_v40  ;;  %v21263_v53 = vld [vmem:[%s21704_s6] sm:$0xf] }
 0x6c9   : > { %11011 = vmatprep.mubr.bf16.mxu1 %v22513_v34 }
 0x6cf   : > { %10433 = vmatmul.mubr.bf16.gmra.mrb[188].mxu0 %v20961_v27 }
 0x6d0   : > { %11012 = vmatmul.mubr.bf16.gmra.mrb[220].mxu1 %v22514_v12 }
 0x6d1   : > { %11054 = vmatprep.mubr.bf16.mxu1 %v20596_v13  ;;  %v21267_v13 = vrot.slane %v21263_v53, %v22538_v37 }
 0x6d8   : > { %11055 = vmatmul.mubr.bf16.vlgmr.msra.gmra.mrb[160].mxu1 %v22515_v31 }
 0x6d9   : > { %11064 = vmatprep.mubr.bf16.mxu1 %v20608_v17  ;;  %v22539_v17 = vld [vmem:[#allocation4_spill] sm:$0xff] }
 0x6e0   : > { %11065 = vmatmul.mubr.bf16.gmra.mrb[164].mxu1 %v22516_v10 }
 0x6e1   : > { %11074 = vmatprep.mubr.bf16.mxu1 %v22517_v18 }
 0x6e8   : > { %11075 = vmatmul.mubr.bf16.gmra.mrb[168].mxu1 %v22518_v39 }
 0x6e9   : > { %11084 = vmatprep.mubr.bf16.mxu1 %v22519_v54 }
 0x6f0   : > { %11085 = vmatmul.mubr.bf16.gmra.mrb[172].mxu1 %v22520_v61 }
 0x6f1   : > { %11094 = vmatprep.mubr.bf16.mxu1 %v22521_v47 }
 0x6f8   : > { %11095 = vmatmul.mubr.bf16.gmra.mrb[176].mxu1 %v22522_v1 }
 0x6f9   : > { %11104 = vmatprep.mubr.bf16.mxu1 %v20686_v3 }
 0x700   : > { %11105 = vmatmul.mubr.bf16.gmra.mrb[180].mxu1 %v20677_v48  ;;  %v21272_v48 = vrot.slane %v21263_v53, %v22539_v17 }
 0x701   : > { %11114 = vmatprep.mubr.bf16.mxu1 %v20722_v8 }
 0x708   : > { %11115 = vmatmul.mubr.bf16.gmra.mrb[184].mxu1 %v20713_v24 }
 0x709   : > { %11124 = vmatprep.mubr.bf16.mxu1 %v22523_v5 }
 0x710   : > { %11125 = vmatmul.mubr.bf16.gmra.mrb[188].mxu1 %v22524_v4 }
 0x711   : > { %11134 = vmatprep.mubr.bf16.mxu1 %v20794_v25 }
 0x718   : > { %11135 = vmatmul.mubr.bf16.gmra.mrb[192].mxu1 %v22526_v58 }
 0x719   : > { %11144 = vmatprep.mubr.bf16.mxu1 %v22527_v11 }
 0x720   : > { %11145 = vmatmul.mubr.bf16.gmra.mrb[196].mxu1 %v22529_v51 }
 0x721   : > { %11154 = vmatprep.mubr.bf16.mxu1 %v22530_v22 }
 0x728   : > { %11155 = vmatmul.mubr.bf16.gmra.mrb[200].mxu1 %v22531_v57  ;;  %v16492_v57 = vld [vmem:[%s21705_s7 + $0x120] ss:$8 sps:$4 sm:$0xff]  }
 0x729   : > { %11164 = vmatprep.mubr.bf16.mxu1 %v22532_v52 }
 0x72a   : > { %v10284_v3 = vpop.f32.mrb[128].mxu0 }
 0x72b   : > { %v14412_v24 = vadd.f32 %v10284_v3, %v21267_v13  ;;  %v10286_v8 = vpop.f32.mrb[129].mxu0  ;;  %v16495_v3 = vld [vmem:[%s21705_s7 + $0x130] ss:$8 sps:$4 sm:$0xff]  }
 0x72c   : > { %v14413_v25 = vadd.f32 %v10286_v8, %v21272_v48  ;;  %v10288_v55 = vpop.f32.mrb[130].mxu0 }
 0x72d   : > { %v11215_v21 = vmul.f32 0.2, %v14412_v24  ;;  %v14414_v50 = vadd.f32 %v10288_v55, %v21267_v13  ;;  %v10290_v34 = vpop.f32.mrb[131].mxu0 }
 0x72e   : > { %v11216_v12 = vmul.f32 0.2, %v14413_v25  ;;  %v14415_v31 = vadd.f32 %v10290_v34, %v21272_v48 }
 0x72f   : > { %v11219_v10 = vmul.f32 0.2, %v14414_v50  ;;  %v11343_v39 = vmax.f32 %v14412_v24, %v11215_v21 }
 0x730   : > { %v11220_v18 = vmul.f32 0.2, %v14415_v31  ;;  %11165 = vmatmul.mubr.bf16.gmra.mrb[204].mxu1 %v22533_v15  ;;  %v11344_v61 = vmax.f32 %v14413_v25, %v11216_v12  ;;  %v16500_v25 = vld [vmem:[%s21705_s7 + $0x144] ss:$8 sps:$4 sm:$0xff]  }
 0x731   : > { %v11347_v54 = vmax.f32 %v14414_v50, %v11219_v10  ;;  %11174 = vmatprep.mubr.bf16.mxu1 %v22534_v36 }
 0x732   : > { %v11348_v47 = vmax.f32 %v14415_v31, %v11220_v18  ;;  %v10294_v1 = vpop.f32.mrb[132].mxu0 }
 0x733   : > { %v11471_v28 = vpack.c.bf16 %v11347_v54, %v11343_v39  ;;  %v14416_v16 = vadd.f32 %v10294_v1, %v21267_v13  ;;  %v10296_v7 = vpop.f32.mrb[133].mxu0 }
 0x734   : > { %v14417_v30 = vadd.f32 %v10296_v7, %v21272_v48  ;;  %v10298_v43 = vpop.f32.mrb[134].mxu0  ;;  %v11472_v38 = vpack.c.bf16 %v11348_v47, %v11344_v61  ;;  %v16503_v47 = vld [vmem:[%s21705_s7 + $0x154] ss:$8 sps:$4 sm:$0xff]  }
 0x735   : > { %v11223_v5 = vmul.f32 0.2, %v14416_v16  ;;  %v14418_v46 = vadd.f32 %v10298_v43, %v21267_v13  ;;  %v10300_v14 = vpop.f32.mrb[135].mxu0 }
 0x736   : > { %v11224_v63 = vmul.f32 0.2, %v14417_v30  ;;  %v14419_v20 = vadd.f32 %v10300_v14, %v21272_v48  ;;  %11963 = vmatprep.mubr.bf16.mxu0 %v11472_v38 }
 0x737   : > { %v11227_v33 = vmul.f32 0.2, %v14418_v46  ;;  %11964 = vmatmul.mubr.bf16.vlgmr.msra.gmra.mrb[192].mxu0 %v11471_v28  ;;  %v11351_v62 = vmax.f32 %v14416_v16, %v11223_v5 }
 0x738   : > { %v11228_v4 = vmul.f32 0.2, %v14419_v20  ;;  %11175 = vmatmul.mubr.bf16.gmra.mrb[208].mxu1 %v22535_v44  ;;  %12125 = vmatpush1.bf16.msra.mxu0 %v16486_v2  ;;  %v11352_v58 = vmax.f32 %v14417_v30, %v11224_v63  ;;  %v16501_v30 = vld [vmem:[%s21705_s7 + $0x150] ss:$8 sps:$4 sm:$0xff]   ;;  %v16506_v2 = vld [vmem:[%s21705_s7 + $0x164] ss:$8 sps:$4 sm:$0xff]  }
 0x739   : > { %v11355_v6 = vmax.f32 %v14418_v46, %v11227_v33  ;;  %11184 = vmatprep.mubr.bf16.mxu1 %v22536_v56  ;;  %12126 = vmatprep.subr.bf16.mxu0 %v16491_v45 }
 0x73a   : > { %v11356_v11 = vmax.f32 %v14419_v20, %v11228_v4  ;;  %v10304_v19 = vpop.f32.mrb[136].mxu0 }
 0x73b   : > { %v14420_v35 = vadd.f32 %v10304_v19, %v21267_v13  ;;  %v10306_v32 = vpop.f32.mrb[137].mxu0  ;;  %v11475_v51 = vpack.c.bf16 %v11355_v6, %v11351_v62 }
 0x73c   : > { %v14421_v22 = vadd.f32 %v10306_v32, %v21272_v48  ;;  %v10308_v23 = vpop.f32.mrb[138].mxu0  ;;  %v11476_v59 = vpack.c.bf16 %v11356_v11, %v11352_v58  ;;  %12127 = vmatpush1.bf16.msra.mxu0 %v16489_v29  ;;  %v16507_v32 = vld [vmem:[%s21705_s7 + $0x170] ss:$8 sps:$4 sm:$0xff]  }
 0x73d   : > { %v11231_v52 = vmul.f32 0.2, %v14420_v35  ;;  %v14422_v15 = vadd.f32 %v10308_v23, %v21267_v13  ;;  %v10310_v36 = vpop.f32.mrb[139].mxu0  ;;  %12128 = vmatprep.subr.bf16.mxu0 %v16494_v60  ;;  %v16509_v60 = vld [vmem:[%s21705_s7 + $0x174] ss:$8 sps:$4 sm:$0xff]  }
 0x73e   : > { %v11232_v0 = vmul.f32 0.2, %v14421_v22  ;;  %v14423_v44 = vadd.f32 %v10310_v36, %v21272_v48  ;;  %11973 = vmatprep.mubr.bf16.mxu0 %v11476_v59  ;;  %v16512_v23 = vld [vmem:[%s21705_s7 + $0x184] ss:$8 sps:$4 sm:$0xff]  }
 0x73f   : > { %v11235_v56 = vmul.f32 0.2, %v14422_v15  ;;  %11974 = vmatmul.mubr.bf16.gmra.mrb[196].mxu0 %v11475_v51  ;;  %v11359_v24 = vmax.f32 %v14420_v35, %v11231_v52 }
 0x740   : > { %v11236_v26 = vmul.f32 0.2, %v14423_v44  ;;  %11185 = vmatmul.mubr.bf16.gmra.mrb[212].mxu1 %v22537_v42  ;;  %12129 = vmatpush1.bf16.msra.mxu0 %v16492_v57  ;;  %v11360_v55 = vmax.f32 %v14421_v22, %v11232_v0 }
 0x741   : > { %v11363_v8 = vmax.f32 %v14422_v15, %v11235_v56  ;;  %11194 = vmatprep.mubr.bf16.mxu1 %v20953_v9  ;;  %12130 = vmatprep.subr.bf16.mxu0 %v16497_v49  ;;  %v16498_v9 = vld [vmem:[%s21705_s7 + $0x140] ss:$8 sps:$4 sm:$0xff]  }
 0x742   : > { %v11364_v21 = vmax.f32 %v14423_v44, %v11236_v26  ;;  %v10314_v50 = vpop.f32.mrb[140].mxu0  ;;  %v16510_v56 = vld [vmem:[%s21705_s7 + $0x180] ss:$8 sps:$4 sm:$0xff]  }
 0x743   : > { %v14424_v34 = vadd.f32 %v10314_v50, %v21267_v13  ;;  %v10316_v42 = vpop.f32.mrb[141].mxu0  ;;  %v11479_v12 = vpack.c.bf16 %v11363_v8, %v11359_v24  ;;  %v16515_v8 = vld [vmem:[%s21705_s7 + $0x194] ss:$8 sps:$4 sm:$0xff]  }
 0x744   : > { %v14425_v31 = vadd.f32 %v10316_v42, %v21272_v48  ;;  %v10318_v10 = vpop.f32.mrb[142].mxu0  ;;  %v11480_v18 = vpack.c.bf16 %v11364_v21, %v11360_v55  ;;  %12131 = vmatpush1.bf16.msra.mxu0 %v16495_v3 }
 0x745   : > { %v11239_v39 = vmul.f32 0.2, %v14424_v34  ;;  %v14426_v54 = vadd.f32 %v10318_v10, %v21267_v13  ;;  %v10320_v61 = vpop.f32.mrb[143].mxu0  ;;  %12132 = vmatprep.subr.bf16.mxu0 %v16500_v25 }
 0x746   : > { %v11240_v1 = vmul.f32 0.2, %v14425_v31  ;;  %v14427_v28 = vadd.f32 %v10320_v61, %v21272_v48  ;;  %11983 = vmatprep.mubr.bf16.mxu0 %v11480_v18 }
 0x747   : > { %v11243_v16 = vmul.f32 0.2, %v14426_v54  ;;  %11984 = vmatmul.mubr.bf16.gmra.mrb[200].mxu0 %v11479_v12  ;;  %v11367_v43 = vmax.f32 %v14424_v34, %v11239_v39  ;;  %v16513_v34 = vld [vmem:[%s21705_s7 + $0x190] ss:$8 sps:$4 sm:$0xff]  }
 0x748   : > { %v11244_v7 = vmul.f32 0.2, %v14427_v28  ;;  %11195 = vmatmul.mubr.bf16.gmra.mrb[216].mxu1 %v20950_v41  ;;  %12133 = vmatpush1.bf16.msra.mxu0 %v16498_v9  ;;  %v11368_v5 = vmax.f32 %v14425_v31, %v11240_v1  ;;  %v16518_v31 = vld [vmem:[%s21705_s7 + $0x1a4] ss:$8 sps:$4 sm:$0xff]  }
 0x749   : > { %v11371_v38 = vmax.f32 %v14426_v54, %v11243_v16  ;;  %11204 = vmatprep.mubr.bf16.mxu1 %v20963_v40  ;;  %12134 = vmatprep.subr.bf16.mxu0 %v16503_v47  ;;  %v16504_v40 = vld [vmem:[%s21705_s7 + $0x160] ss:$8 sps:$4 sm:$0xff]  }
 0x74a   : > { %v11372_v46 = vmax.f32 %v14427_v28, %v11244_v7  ;;  %v10324_v14 = vpop.f32.mrb[144].mxu0  ;;  %v16516_v16 = vld [vmem:[%s21705_s7 + $0x1a0] ss:$8 sps:$4 sm:$0xff]  }
 0x74b   : > { %v14428_v45 = vadd.f32 %v10324_v14, %v21267_v13  ;;  %v10326_v41 = vpop.f32.mrb[145].mxu0  ;;  %v11483_v63 = vpack.c.bf16 %v11371_v38, %v11367_v43  ;;  %v16521_v38 = vld [vmem:[%s21705_s7 + $0x1b4] ss:$8 sps:$4 sm:$0xff]  }
 0x74c   : > { %v14429_v20 = vadd.f32 %v10326_v41, %v21272_v48  ;;  %v10328_v33 = vpop.f32.mrb[146].mxu0  ;;  %v11484_v4 = vpack.c.bf16 %v11372_v46, %v11368_v5  ;;  %12135 = vmatpush1.bf16.msra.mxu0 %v16501_v30 }
 0x74d   : > { %v11247_v29 = vmul.f32 0.2, %v14428_v45  ;;  %v14430_v62 = vadd.f32 %v10328_v33, %v21267_v13  ;;  %v10330_v6 = vpop.f32.mrb[147].mxu0  ;;  %12136 = vmatprep.subr.bf16.mxu0 %v16506_v2 }
 0x74e   : > { %v11248_v58 = vmul.f32 0.2, %v14429_v20  ;;  %v14431_v11 = vadd.f32 %v10330_v6, %v21272_v48  ;;  %11993 = vmatprep.mubr.bf16.mxu0 %v11484_v4 }
 0x74f   : > { %v11251_v19 = vmul.f32 0.2, %v14430_v62  ;;  %11994 = vmatmul.mubr.bf16.gmra.mrb[204].mxu0 %v11483_v63  ;;  %v11375_v51 = vmax.f32 %v14428_v45, %v11247_v29  ;;  %v16519_v45 = vld [vmem:[%s21705_s7 + $0x1b0] ss:$8 sps:$4 sm:$0xff]  }
 0x750   : > { %v11252_v35 = vmul.f32 0.2, %v14431_v11  ;;  %11205 = vmatmul.mubr.bf16.gmra.mrb[220].mxu1 %v20961_v27  ;;  %12137 = vmatpush1.bf16.msra.mxu0 %v16504_v40  ;;  %v11376_v59 = vmax.f32 %v14429_v20, %v11248_v58  ;;  %v16524_v20 = vld [vmem:[%s21705_s7 + $0x1c4] ss:$8 sps:$4 sm:$0xff]  }
 0x751   : > { %v11379_v22 = vmax.f32 %v14430_v62, %v11251_v19  ;;  %12138 = vmatprep.subr.bf16.mxu0 %v16509_v60  ;;  %v16522_v19 = vld [vmem:[%s21705_s7 + $0x1c0] ss:$8 sps:$4 sm:$0xff]  }
 0x752   : > { %v11380_v57 = vmax.f32 %v14431_v11, %v11252_v35  ;;  %v10334_v52 = vpop.f32.mrb[148].mxu0 }
 0x753   : > { %v14432_v15 = vadd.f32 %v10334_v52, %v21267_v13  ;;  %v10336_v36 = vpop.f32.mrb[149].mxu0  ;;  %v11487_v49 = vpack.c.bf16 %v11379_v22, %v11375_v51  ;;  %v16527_v22 = vld [vmem:[%s21705_s7 + $0x1d4] ss:$8 sps:$4 sm:$0xff]  }
 0x754   : > { %v14433_v27 = vadd.f32 %v10336_v36, %v21272_v48  ;;  %v10338_v0 = vpop.f32.mrb[150].mxu0  ;;  %v11488_v44 = vpack.c.bf16 %v11380_v57, %v11376_v59  ;;  %12139 = vmatpush1.bf16.msra.mxu0 %v16507_v32 }
 0x755   : > { %v11255_v26 = vmul.f32 0.2, %v14432_v15  ;;  %v14434_v3 = vadd.f32 %v10338_v0, %v21267_v13  ;;  %v10340_v24 = vpop.f32.mrb[151].mxu0  ;;  %12140 = vmatprep.subr.bf16.mxu0 %v16512_v23 }
 0x756   : > { %v11256_v25 = vmul.f32 0.2, %v14433_v27  ;;  %v14435_v55 = vadd.f32 %v10340_v24, %v21272_v48  ;;  %12003 = vmatprep.mubr.bf16.mxu0 %v11488_v44 }
 0x757   : > { %v11259_v21 = vmul.f32 0.2, %v14434_v3  ;;  %12004 = vmatmul.mubr.bf16.gmra.mrb[208].mxu0 %v11487_v49  ;;  %v11383_v42 = vmax.f32 %v14432_v15, %v11255_v26  ;;  %v16525_v15 = vld [vmem:[%s21705_s7 + $0x1d0] ss:$8 sps:$4 sm:$0xff]  }
 0x758   : > { %v11260_v50 = vmul.f32 0.2, %v14435_v55  ;;  %12141 = vmatpush1.bf16.msra.mxu0 %v16510_v56  ;;  %v11384_v10 = vmax.f32 %v14433_v27, %v11256_v25  ;;  %v16530_v27 = vld [vmem:[%s21705_s7 + $0x1e4] ss:$8 sps:$4 sm:$0xff]  }
 0x759   : > { %v11387_v12 = vmax.f32 %v14434_v3, %v11259_v21  ;;  %12142 = vmatprep.subr.bf16.mxu0 %v16515_v8  ;;  %v16528_v21 = vld [vmem:[%s21705_s7 + $0x1e0] ss:$8 sps:$4 sm:$0xff]  }
 0x75a   : > { %v11388_v18 = vmax.f32 %v14435_v55, %v11260_v50  ;;  %v10344_v9 = vpop.f32.mrb[152].mxu0 }
 0x75b   : > { %v14436_v39 = vadd.f32 %v10344_v9, %v21267_v13  ;;  %v10346_v54 = vpop.f32.mrb[153].mxu0  ;;  %v11491_v61 = vpack.c.bf16 %v11387_v12, %v11383_v42  ;;  %v16533_v12 = vld [vmem:[%s21705_s7 + $0x1f4] ss:$8 sps:$4 sm:$0xff]  }
 0x75c   : > { %v14437_v47 = vadd.f32 %v10346_v54, %v21272_v48  ;;  %v10348_v1 = vpop.f32.mrb[154].mxu0  ;;  %v11492_v28 = vpack.c.bf16 %v11388_v18, %v11384_v10  ;;  %12143 = vmatpush1.bf16.msra.mxu0 %v16513_v34 }
 0x75d   : > { %v11263_v7 = vmul.f32 0.2, %v14436_v39  ;;  %v14438_v30 = vadd.f32 %v10348_v1, %v21267_v13  ;;  %v10350_v43 = vpop.f32.mrb[155].mxu0  ;;  %12144 = vmatprep.subr.bf16.mxu0 %v16518_v31 }
 0x75e   : > { %v11264_v2 = vmul.f32 0.2, %v14437_v47  ;;  %v14439_v5 = vadd.f32 %v10350_v43, %v21272_v48  ;;  %12013 = vmatprep.mubr.bf16.mxu0 %v11492_v28 }
 0x75f   : > { %v11267_v46 = vmul.f32 0.2, %v14438_v30  ;;  %12014 = vmatmul.mubr.bf16.gmra.mrb[212].mxu0 %v11491_v61  ;;  %v11391_v41 = vmax.f32 %v14436_v39, %v11263_v7  ;;  %v16531_v39 = vld [vmem:[%s21705_s7 + $0x1f0] ss:$8 sps:$4 sm:$0xff]  }
 0x760   : > { %v11268_v14 = vmul.f32 0.2, %v14439_v5  ;;  %12145 = vmatpush1.bf16.msra.mxu0 %v16516_v16  ;;  %v11392_v33 = vmax.f32 %v14437_v47, %v11264_v2 }
 0x761   : > { %v11395_v63 = vmax.f32 %v14438_v30, %v11267_v46  ;;  %12146 = vmatprep.subr.bf16.mxu0 %v16521_v38 }
 0x762   : > { %v11396_v4 = vmax.f32 %v14439_v5, %v11268_v14  ;;  %v10354_v40 = vpop.f32.mrb[156].mxu0 }
 0x763   : > { %v14440_v29 = vadd.f32 %v10354_v40, %v21267_v13  ;;  %v10356_v62 = vpop.f32.mrb[157].mxu0  ;;  %v11495_v6 = vpack.c.bf16 %v11395_v63, %v11391_v41 }
 0x764   : > { %v14441_v60 = vadd.f32 %v10356_v62, %v21272_v48  ;;  %v10358_v58 = vpop.f32.mrb[158].mxu0  ;;  %v11496_v11 = vpack.c.bf16 %v11396_v4, %v11392_v33  ;;  %12147 = vmatpush1.bf16.msra.mxu0 %v16519_v45 }
 0x765   : > { %v11271_v35 = vmul.f32 0.2, %v14440_v29  ;;  %v14442_v32 = vadd.f32 %v10358_v58, %v21267_v13  ;;  %v10360_v51 = vpop.f32.mrb[159].mxu0  ;;  %12148 = vmatprep.subr.bf16.mxu0 %v16524_v20 }
 0x766   : > { %v11272_v23 = vmul.f32 0.2, %v14441_v60  ;;  %v14443_v59 = vadd.f32 %v10360_v51, %v21272_v48  ;;  %12023 = vmatprep.mubr.bf16.mxu0 %v11496_v11 }
 0x767   : > { %v11275_v57 = vmul.f32 0.2, %v14442_v32  ;;  %12024 = vmatmul.mubr.bf16.gmra.mrb[216].mxu0 %v11495_v6  ;;  %v11399_v36 = vmax.f32 %v14440_v29, %v11271_v35 }
 0x768   : > { %v11276_v52 = vmul.f32 0.2, %v14443_v59  ;;  %12149 = vmatpush1.bf16.msra.mxu0 %v16522_v19  ;;  %v11400_v0 = vmax.f32 %v14441_v60, %v11272_v23 }
 0x769   : > { %v11403_v49 = vmax.f32 %v14442_v32, %v11275_v57  ;;  %12150 = vmatprep.subr.bf16.mxu0 %v16527_v22 }
 0x76a   : > { %v11404_v44 = vmax.f32 %v14443_v59, %v11276_v52  ;;  %v10364_v56 = vpop.f32.mrb[160].mxu0 }
 0x76b   : > { %v14444_v26 = vadd.f32 %v10364_v56, %v21267_v13  ;;  %v10366_v3 = vpop.f32.mrb[161].mxu0  ;;  %v11499_v24 = vpack.c.bf16 %v11403_v49, %v11399_v36 }
 0x76c   : > { %v14445_v8 = vadd.f32 %v10366_v3, %v21272_v48  ;;  %v10368_v25 = vpop.f32.mrb[162].mxu0  ;;  %v11500_v55 = vpack.c.bf16 %v11404_v44, %v11400_v0  ;;  %12151 = vmatpush1.bf16.msra.mxu0 %v16525_v15 }
 0x76d   : > { %v11279_v50 = vmul.f32 0.2, %v14444_v26  ;;  %v14446_v34 = vadd.f32 %v10368_v25, %v21267_v13  ;;  %v10370_v42 = vpop.f32.mrb[163].mxu0  ;;  %12152 = vmatprep.subr.bf16.mxu0 %v16530_v27 }
 0x76e   : > { %v11280_v31 = vmul.f32 0.2, %v14445_v8  ;;  %v14447_v10 = vadd.f32 %v10370_v42, %v21272_v48  ;;  %12033 = vmatprep.mubr.bf16.mxu0 %v11500_v55 }
 0x76f   : > { %v11283_v18 = vmul.f32 0.2, %v14446_v34  ;;  %12034 = vmatmul.mubr.bf16.gmra.mrb[220].mxu0 %v11499_v24  ;;  %v11407_v54 = vmax.f32 %v14444_v26, %v11279_v50 }
 0x770   : > { %v11284_v9 = vmul.f32 0.2, %v14447_v10  ;;  %12153 = vmatpush1.bf16.msra.mxu0 %v16528_v21  ;;  %v11408_v47 = vmax.f32 %v14445_v8, %v11280_v31 }
 0x771   : > { %v11411_v61 = vmax.f32 %v14446_v34, %v11283_v18  ;;  %12154 = vmatprep.subr.bf16.mxu0 %v16533_v12 }
 0x772   : > { %v11412_v1 = vmax.f32 %v14447_v10, %v11284_v9  ;;  %v10374_v28 = vpop.f32.mrb[164].mxu0 }
 0x773   : > { %v14448_v16 = vadd.f32 %v10374_v28, %v21267_v13  ;;  %v10376_v7 = vpop.f32.mrb[165].mxu0  ;;  %v11503_v30 = vpack.c.bf16 %v11411_v61, %v11407_v54 }
 0x774   : > { %v14449_v43 = vadd.f32 %v10376_v7, %v21272_v48  ;;  %v10378_v38 = vpop.f32.mrb[166].mxu0  ;;  %v11504_v2 = vpack.c.bf16 %v11412_v1, %v11408_v47  ;;  %12155 = vmatpush1.bf16.msra.mxu0 %v16531_v39 }
 0x775   : > { %v11287_v5 = vmul.f32 0.2, %v14448_v16  ;;  %v14450_v46 = vadd.f32 %v10378_v38, %v21267_v13  ;;  %v10380_v14 = vpop.f32.mrb[167].mxu0 }
 0x776   : > { %v11288_v45 = vmul.f32 0.2, %v14449_v43  ;;  %v14451_v41 = vadd.f32 %v10380_v14, %v21272_v48  ;;  %12043 = vmatprep.mubr.bf16.mxu0 %v11504_v2 }
 0x777   : > { %v11291_v63 = vmul.f32 0.2, %v14450_v46  ;;  %12044 = vmatmul.mubr.bf16.gmra.mrb[224].mxu0 %v11503_v30  ;;  %v11415_v33 = vmax.f32 %v14448_v16, %v11287_v5 }
 0x778   : > { %v11292_v20 = vmul.f32 0.2, %v14451_v41  ;;  %v11416_v40 = vmax.f32 %v14449_v43, %v11288_v45 }
 0x779   : > { %v11419_v4 = vmax.f32 %v14450_v46, %v11291_v63 }
 0x77a   : > { %v11420_v29 = vmax.f32 %v14451_v41, %v11292_v20  ;;  %v10384_v62 = vpop.f32.mrb[168].mxu0 }
 0x77b   : > { %v14452_v6 = vadd.f32 %v10384_v62, %v21267_v13  ;;  %v10386_v60 = vpop.f32.mrb[169].mxu0  ;;  %v11507_v58 = vpack.c.bf16 %v11419_v4, %v11415_v33 }
 0x77c   : > { %v14453_v11 = vadd.f32 %v10386_v60, %v21272_v48  ;;  %v10388_v19 = vpop.f32.mrb[170].mxu0  ;;  %v11508_v35 = vpack.c.bf16 %v11420_v29, %v11416_v40 }
 0x77d   : > { %v11295_v32 = vmul.f32 0.2, %v14452_v6  ;;  %v14454_v51 = vadd.f32 %v10388_v19, %v21267_v13  ;;  %v10390_v22 = vpop.f32.mrb[171].mxu0 }
 0x77e   : > { %v11296_v23 = vmul.f32 0.2, %v14453_v11  ;;  %v14455_v59 = vadd.f32 %v10390_v22, %v21272_v48  ;;  %12053 = vmatprep.mubr.bf16.mxu0 %v11508_v35 }
 0x77f   : > { %v11299_v57 = vmul.f32 0.2, %v14454_v51  ;;  %12054 = vmatmul.mubr.bf16.gmra.mrb[228].mxu0 %v11507_v58  ;;  %v11423_v15 = vmax.f32 %v14452_v6, %v11295_v32 }
 0x780   : > { %v11300_v52 = vmul.f32 0.2, %v14455_v59  ;;  %v11424_v49 = vmax.f32 %v14453_v11, %v11296_v23 }
 0x781   : > { %v11427_v36 = vmax.f32 %v14454_v51, %v11299_v57 }
 0x782   : > { %v11428_v27 = vmax.f32 %v14455_v59, %v11300_v52  ;;  %v10394_v0 = vpop.f32.mrb[172].mxu0 }
 0x783   : > { %v14456_v44 = vadd.f32 %v10394_v0, %v21267_v13  ;;  %v10396_v56 = vpop.f32.mrb[173].mxu0  ;;  %v11511_v26 = vpack.c.bf16 %v11427_v36, %v11423_v15  ;;  %v16535_v0 = vld [vmem:[%s21707_s9] sm:$0xff]  }
 0x784   : > { %v14457_v3 = vadd.f32 %v10396_v56, %v21272_v48  ;;  %v10398_v24 = vpop.f32.mrb[174].mxu0  ;;  %v11512_v8 = vpack.c.bf16 %v11428_v27, %v11424_v49  ;;  %v16534_v27 = vld [vmem:[%s21707_s9 + $0x40] sm:$0xff]  }
 0x785   : > { %v11303_v25 = vmul.f32 0.2, %v14456_v44  ;;  %v14458_v55 = vadd.f32 %v10398_v24, %v21267_v13  ;;  %v10400_v21 = vpop.f32.mrb[175].mxu0  ;;  %14266 = vmatprep.subr.bf16.mxu1 %v16534_v27 }
 0x786   : > { %v11304_v50 = vmul.f32 0.2, %v14457_v3  ;;  %v14459_v34 = vadd.f32 %v10400_v21, %v21272_v48  ;;  %12063 = vmatprep.mubr.bf16.mxu0 %v11512_v8  ;;  %14267 = vmatpush3.bf16.msra.mxu1 %v16535_v0  ;;  %v16541_v0 = vld [vmem:[%s21707_s9 + $0x18] sm:$0xff]  }
 0x787   : > { %v11307_v42 = vmul.f32 0.2, %v14458_v55  ;;  %12064 = vmatmul.mubr.bf16.gmra.mrb[232].mxu0 %v11511_v26  ;;  %v11431_v31 = vmax.f32 %v14456_v44, %v11303_v25 }
 0x788   : > { %v11308_v12 = vmul.f32 0.2, %v14459_v34  ;;  %v11432_v18 = vmax.f32 %v14457_v3, %v11304_v50 }
 0x789   : > { %v11435_v10 = vmax.f32 %v14458_v55, %v11307_v42 }
 0x78a   : > { %v11436_v9 = vmax.f32 %v14459_v34, %v11308_v12  ;;  %v10404_v39 = vpop.f32.mrb[176].mxu0 }
 0x78b   : > { %v14460_v54 = vadd.f32 %v10404_v39, %v21267_v13  ;;  %v10406_v61 = vpop.f32.mrb[177].mxu0  ;;  %v11515_v47 = vpack.c.bf16 %v11435_v10, %v11431_v31 }
 0x78c   : > { %v14461_v1 = vadd.f32 %v10406_v61, %v21272_v48  ;;  %v10408_v28 = vpop.f32.mrb[178].mxu0  ;;  %v11516_v16 = vpack.c.bf16 %v11436_v9, %v11432_v18 }
 0x78d   : > { %v11311_v7 = vmul.f32 0.2, %v14460_v54  ;;  %v14462_v30 = vadd.f32 %v10408_v28, %v21267_v13  ;;  %v10410_v43 = vpop.f32.mrb[179].mxu0 }
 0x78e   : > { %v11312_v38 = vmul.f32 0.2, %v14461_v1  ;;  %v14463_v2 = vadd.f32 %v10410_v43, %v21272_v48  ;;  %12073 = vmatprep.mubr.bf16.mxu0 %v11516_v16 }
 0x78f   : > { %v11315_v5 = vmul.f32 0.2, %v14462_v30  ;;  %12074 = vmatmul.mubr.bf16.gmra.mrb[236].mxu0 %v11515_v47  ;;  %v11439_v14 = vmax.f32 %v14460_v54, %v11311_v7 }
 0x790   : > { %v11316_v46 = vmul.f32 0.2, %v14463_v2  ;;  %v11440_v41 = vmax.f32 %v14461_v1, %v11312_v38 }
 0x791   : > { %v11443_v45 = vmax.f32 %v14462_v30, %v11315_v5 }
 0x792   : > { %v11444_v63 = vmax.f32 %v14463_v2, %v11316_v46  ;;  %v10414_v20 = vpop.f32.mrb[180].mxu0  ;;  %v22540_v2 = vld [vmem:[#allocation2_spill] sm:$0xff] }
 0x793   : > { %v14464_v33 = vadd.f32 %v10414_v20, %v21267_v13  ;;  %v10416_v4 = vpop.f32.mrb[181].mxu0  ;;  %v11519_v40 = vpack.c.bf16 %v11443_v45, %v11439_v14  ;;  %v22541_v5 = vsub.s32 2, %v22540_v2 }
 0x794   : > { %v14465_v29 = vadd.f32 %v10416_v4, %v21272_v48  ;;  %v10418_v62 = vpop.f32.mrb[182].mxu0  ;;  %v11520_v6 = vpack.c.bf16 %v11444_v63, %v11440_v41  ;;  %v22542_v41 = vsub.s32 3, %v22540_v2  ;;  %v16536_v4 = vld [vmem:[%s21707_s9 + $0x48] sm:$0xff]  }
 0x795   : > { %v11319_v60 = vmul.f32 0.2, %v14464_v33  ;;  %v14466_v58 = vadd.f32 %v10418_v62, %v21267_v13  ;;  %v10420_v11 = vpop.f32.mrb[183].mxu0  ;;  %v21450_v46 = vrot.slane %v21263_v53, %v22541_v5  ;;  %14268 = vmatprep.subr.bf16.mxu1 %v16536_v4 }
 0x796   : > { %v11320_v19 = vmul.f32 0.2, %v14465_v29  ;;  %v14467_v35 = vadd.f32 %v10420_v11, %v21272_v48  ;;  %12083 = vmatprep.mubr.bf16.mxu0 %v11520_v6  ;;  %v21455_v63 = vrot.slane %v21263_v53, %v22542_v41 }
 0x797   : > { %v11323_v32 = vmul.f32 0.2, %v14466_v58  ;;  %12084 = vmatmul.mubr.bf16.gmra.mrb[240].mxu0 %v11519_v40  ;;  %v11447_v22 = vmax.f32 %v14464_v33, %v11319_v60  ;;  %v16537_v40 = vld [vmem:[%s21707_s9 + $0x8] sm:$0xff]  }
 0x798   : > { %v11324_v51 = vmul.f32 0.2, %v14467_v35  ;;  %v11448_v59 = vmax.f32 %v14465_v29, %v11320_v19  ;;  %14269 = vmatpush3.bf16.msra.mxu1 %v16537_v40 }
 0x799   : > { %v11451_v23 = vmax.f32 %v14466_v58, %v11323_v32 }
 0x79a   : > { %v11452_v57 = vmax.f32 %v14467_v35, %v11324_v51  ;;  %v10424_v52 = vpop.f32.mrb[184].mxu0 }
 0x79b   : > { %v14468_v15 = vadd.f32 %v10424_v52, %v21267_v13  ;;  %v10426_v36 = vpop.f32.mrb[185].mxu0  ;;  %v11523_v49 = vpack.c.bf16 %v11451_v23, %v11447_v22  ;;  %v16538_v22 = vld [vmem:[%s21707_s9 + $0x50] sm:$0xff]  }
 0x79c   : > { %v14469_v44 = vadd.f32 %v10426_v36, %v21272_v48  ;;  %v10428_v56 = vpop.f32.mrb[186].mxu0  ;;  %v11524_v26 = vpack.c.bf16 %v11452_v57, %v11448_v59  ;;  %v16539_v23 = vld [vmem:[%s21707_s9 + $0x10] sm:$0xff]   ;;  %v16540_v59 = vld [vmem:[%s21707_s9 + $0x58] sm:$0xff]   ;;  %14270 = vmatprep.subr.bf16.mxu1 %v16538_v22 }
 0x79d   : > { %v11327_v3 = vmul.f32 0.2, %v14468_v15  ;;  %v14470_v24 = vadd.f32 %v10428_v56, %v21267_v13  ;;  %v10430_v8 = vpop.f32.mrb[187].mxu0  ;;  %14271 = vmatpush3.bf16.msra.mxu1 %v16539_v23 }
 0x79e   : > { %v11328_v25 = vmul.f32 0.2, %v14469_v44  ;;  %v14471_v55 = vadd.f32 %v10430_v8, %v21272_v48  ;;  %12093 = vmatprep.mubr.bf16.mxu0 %v11524_v26  ;;  %14272 = vmatprep.subr.bf16.mxu1 %v16540_v59 }
 0x79f   : > { %v11331_v21 = vmul.f32 0.2, %v14470_v24  ;;  %12094 = vmatmul.mubr.bf16.gmra.mrb[244].mxu0 %v11523_v49  ;;  %v11455_v34 = vmax.f32 %v14468_v15, %v11327_v3  ;;  %v16542_v3 = vld [vmem:[%s21707_s9 + $0x60] sm:$0xff]  }
 0x7a0   : > { %v11332_v50 = vmul.f32 0.2, %v14471_v55  ;;  %v11456_v12 = vmax.f32 %v14469_v44, %v11328_v25 }
 0x7a1   : > { %v11459_v42 = vmax.f32 %v14470_v24, %v11331_v21  ;;  %14273 = vmatpush3.bf16.msra.mxu1 %v16541_v0 }
 0x7a2   : > { %v11460_v31 = vmax.f32 %v14471_v55, %v11332_v50  ;;  %v10434_v10 = vpop.f32.mrb[188].mxu0  ;;  %14274 = vmatprep.subr.bf16.mxu1 %v16542_v3 }
 0x7a3   : > { %v14472_v18 = vadd.f32 %v10434_v10, %v21267_v13  ;;  %v10436_v9 = vpop.f32.mrb[189].mxu0  ;;  %v11527_v39 = vpack.c.bf16 %v11459_v42, %v11455_v34  ;;  %v16544_v10 = vld [vmem:[%s21707_s9 + $0x68] sm:$0xff]  }
 0x7a4   : > { %v14473_v54 = vadd.f32 %v10436_v9, %v21272_v48  ;;  %v10438_v61 = vpop.f32.mrb[190].mxu0  ;;  %v11528_v47 = vpack.c.bf16 %v11460_v31, %v11456_v12  ;;  %v16543_v12 = vld [vmem:[%s21707_s9 + $0x20] sm:$0xff]  }
 0x7a5   : > { %v11335_v1 = vmul.f32 0.2, %v14472_v18  ;;  %v14474_v28 = vadd.f32 %v10438_v61, %v21267_v13  ;;  %v10440_v16 = vpop.f32.mrb[191].mxu0  ;;  %14275 = vmatpush3.bf16.msra.mxu1 %v16543_v12 }
 0x7a6   : > { %v11336_v7 = vmul.f32 0.2, %v14473_v54  ;;  %v14475_v30 = vadd.f32 %v10440_v16, %v21272_v48  ;;  %12103 = vmatprep.mubr.bf16.mxu0 %v11528_v47  ;;  %14276 = vmatprep.subr.bf16.mxu1 %v16544_v10 }
 0x7a7   : > { %v11339_v43 = vmul.f32 0.2, %v14474_v28  ;;  %12104 = vmatmul.mubr.bf16.gmra.mrb[248].mxu0 %v11527_v39  ;;  %v11463_v14 = vmax.f32 %v14472_v18, %v11335_v1  ;;  %v16545_v1 = vld [vmem:[%s21707_s9 + $0x28] sm:$0xff]  }
 0x7a8   : > { %v11340_v38 = vmul.f32 0.2, %v14475_v30  ;;  %v11464_v13 = vmax.f32 %v14473_v54, %v11336_v7 }
 0x7a9   : > { %v11467_v45 = vmax.f32 %v14474_v28, %v11339_v43  ;;  %14277 = vmatpush3.bf16.msra.mxu1 %v16545_v1 }
 0x7aa   : > { %v11468_v20 = vmax.f32 %v14475_v30, %v11340_v38  ;;  %v16546_v30 = vld [vmem:[%s21707_s9 + $0x70] sm:$0xff]  }
 0x7ab   : > { %v11056_v33 = vpop.f32.mrb[160].mxu1  ;;  %v11531_v48 = vpack.c.bf16 %v11467_v45, %v11463_v14  ;;  %14278 = vmatprep.subr.bf16.mxu1 %v16546_v30 }
 0x7ac   : > { %v14476_v29 = vadd.f32 %v11056_v33, %v21450_v46  ;;  %v11058_v62 = vpop.f32.mrb[161].mxu1  ;;  %v11532_v6 = vpack.c.bf16 %v11468_v20, %v11464_v13  ;;  %v16547_v20 = vld [vmem:[%s21707_s9 + $0x30] sm:$0xff]  }
 0x7ad   : > { %v14477_v60 = vadd.f32 %v11058_v62, %v21455_v63  ;;  %v11060_v53 = vpop.f32.mrb[162].mxu1  ;;  %14279 = vmatpush3.bf16.msra.mxu1 %v16547_v20 }
 0x7ae   : > { %v11217_v58 = vmul.f32 0.2, %v14476_v29  ;;  %v14478_v11 = vadd.f32 %v11060_v53, %v21450_v46  ;;  %v11062_v19 = vpop.f32.mrb[163].mxu1  ;;  %12113 = vmatprep.mubr.bf16.mxu0 %v11532_v6  ;;  %v16549_v53 = vld [vmem:[%s21707_s9 + $0x38] sm:$0xff]  }
 0x7af   : > { %v11218_v35 = vmul.f32 0.2, %v14477_v60  ;;  %v14479_v32 = vadd.f32 %v11062_v19, %v21455_v63  ;;  %12114 = vmatmul.mubr.bf16.gmra.mrb[252].mxu0 %v11531_v48  ;;  %v16548_v48 = vld [vmem:[%s21707_s9 + $0x78] sm:$0xff]  }
 0x7b0   : > { %v11221_v51 = vmul.f32 0.2, %v14478_v11  ;;  %v11345_v52 = vmax.f32 %v14476_v29, %v11217_v58  ;;  %14280 = vmatprep.subr.bf16.mxu1 %v16548_v48 }
 0x7b1   : > { %v11222_v57 = vmul.f32 0.2, %v14479_v32  ;;  %v11346_v36 = vmax.f32 %v14477_v60, %v11218_v35  ;;  %14281 = vmatpush3.bf16.msra.mxu1 %v16549_v53 }
 0x7b2   : > { %v11349_v15 = vmax.f32 %v14478_v11, %v11221_v51 }
 0x7b3   : > { %v11350_v49 = vmax.f32 %v14479_v32, %v11222_v57  ;;  %v11066_v27 = vpop.f32.mrb[164].mxu1 }
 0x7b4   : > { %v11473_v44 = vpack.c.bf16 %v11349_v15, %v11345_v52  ;;  %v14480_v56 = vadd.f32 %v11066_v27, %v21450_v46  ;;  %v11068_v26 = vpop.f32.mrb[165].mxu1 }
 0x7b5   : > { %v14481_v24 = vadd.f32 %v11068_v26, %v21455_v63  ;;  %v11070_v8 = vpop.f32.mrb[166].mxu1  ;;  %v11474_v25 = vpack.c.bf16 %v11350_v49, %v11346_v36 }
 0x7b6   : > { %v11225_v55 = vmul.f32 0.2, %v14480_v56  ;;  %v14482_v21 = vadd.f32 %v11070_v8, %v21450_v46  ;;  %v11072_v50 = vpop.f32.mrb[167].mxu1 }
 0x7b7   : > { %v11226_v34 = vmul.f32 0.2, %v14481_v24  ;;  %v14483_v42 = vadd.f32 %v11072_v50, %v21455_v63  ;;  %12156 = vmatprep.mubr.bf16.mxu0 %v11474_v25 }
 0x7b8   : > { %v11229_v31 = vmul.f32 0.2, %v14482_v21  ;;  %12157 = vmatmul.mubr.bf16.vlgmr.msra.gmra.mrb[192].mxu0 %v11473_v44  ;;  %v11353_v9 = vmax.f32 %v14480_v56, %v11225_v55 }
 0x7b9   : > { %v11230_v18 = vmul.f32 0.2, %v14483_v42  ;;  %v11354_v54 = vmax.f32 %v14481_v24, %v11226_v34 }
 0x7ba   : > { %v11357_v39 = vmax.f32 %v14482_v21, %v11229_v31 }
 0x7bb   : > { %v11358_v61 = vmax.f32 %v14483_v42, %v11230_v18  ;;  %v11076_v47 = vpop.f32.mrb[168].mxu1 }
 0x7bc   : > { %v14484_v28 = vadd.f32 %v11076_v47, %v21450_v46  ;;  %v11078_v16 = vpop.f32.mrb[169].mxu1  ;;  %v11477_v7 = vpack.c.bf16 %v11357_v39, %v11353_v9 }
 0x7bd   : > { %v14485_v43 = vadd.f32 %v11078_v16, %v21455_v63  ;;  %v11080_v38 = vpop.f32.mrb[170].mxu1  ;;  %v11478_v2 = vpack.c.bf16 %v11358_v61, %v11354_v54 }
 0x7be   : > { %v11233_v5 = vmul.f32 0.2, %v14484_v28  ;;  %v14486_v14 = vadd.f32 %v11080_v38, %v21450_v46  ;;  %v11082_v45 = vpop.f32.mrb[171].mxu1 }
 0x7bf   : > { %v11234_v41 = vmul.f32 0.2, %v14485_v43  ;;  %v14487_v13 = vadd.f32 %v11082_v45, %v21455_v63  ;;  %12166 = vmatprep.mubr.bf16.mxu0 %v11478_v2 }
 0x7c0   : > { %v11237_v33 = vmul.f32 0.2, %v14486_v14  ;;  %12167 = vmatmul.mubr.bf16.gmra.mrb[196].mxu0 %v11477_v7  ;;  %v11361_v40 = vmax.f32 %v14484_v28, %v11233_v5 }
 0x7c1   : > { %v11238_v4 = vmul.f32 0.2, %v14487_v13  ;;  %v11362_v62 = vmax.f32 %v14485_v43, %v11234_v41 }
 0x7c2   : > { %v11365_v29 = vmax.f32 %v14486_v14, %v11237_v33 }
 0x7c3   : > { %v11366_v6 = vmax.f32 %v14487_v13, %v11238_v4  ;;  %v11086_v60 = vpop.f32.mrb[172].mxu1 }
 0x7c4   : > { %v14488_v58 = vadd.f32 %v11086_v60, %v21450_v46  ;;  %v11088_v11 = vpop.f32.mrb[173].mxu1  ;;  %v11481_v19 = vpack.c.bf16 %v11365_v29, %v11361_v40 }
 0x7c5   : > { %v14489_v35 = vadd.f32 %v11088_v11, %v21455_v63  ;;  %v11090_v32 = vpop.f32.mrb[174].mxu1  ;;  %v11482_v51 = vpack.c.bf16 %v11366_v6, %v11362_v62 }
 0x7c6   : > { %v11241_v22 = vmul.f32 0.2, %v14488_v58  ;;  %v14490_v23 = vadd.f32 %v11090_v32, %v21450_v46  ;;  %v11092_v59 = vpop.f32.mrb[175].mxu1 }
 0x7c7   : > { %v11242_v57 = vmul.f32 0.2, %v14489_v35  ;;  %v14491_v52 = vadd.f32 %v11092_v59, %v21455_v63  ;;  %12176 = vmatprep.mubr.bf16.mxu0 %v11482_v51 }
 0x7c8   : > { %v11245_v15 = vmul.f32 0.2, %v14490_v23  ;;  %12177 = vmatmul.mubr.bf16.gmra.mrb[200].mxu0 %v11481_v19  ;;  %v11369_v49 = vmax.f32 %v14488_v58, %v11241_v22 }
 0x7c9   : > { %v11246_v36 = vmul.f32 0.2, %v14491_v52  ;;  %v11370_v0 = vmax.f32 %v14489_v35, %v11242_v57 }
 0x7ca   : > { %v11373_v27 = vmax.f32 %v14490_v23, %v11245_v15 }
 0x7cb   : > { %v11374_v44 = vmax.f32 %v14491_v52, %v11246_v36  ;;  %v11096_v56 = vpop.f32.mrb[176].mxu1 }
 0x7cc   : > { %v14492_v26 = vadd.f32 %v11096_v56, %v21450_v46  ;;  %v11098_v3 = vpop.f32.mrb[177].mxu1  ;;  %v11485_v24 = vpack.c.bf16 %v11373_v27, %v11369_v49 }
 0x7cd   : > { %v14493_v8 = vadd.f32 %v11098_v3, %v21455_v63  ;;  %v11100_v25 = vpop.f32.mrb[178].mxu1  ;;  %v11486_v55 = vpack.c.bf16 %v11374_v44, %v11370_v0 }
 0x7ce   : > { %v11249_v21 = vmul.f32 0.2, %v14492_v26  ;;  %v14494_v50 = vadd.f32 %v11100_v25, %v21450_v46  ;;  %v11102_v34 = vpop.f32.mrb[179].mxu1 }
 0x7cf   : > { %v11250_v42 = vmul.f32 0.2, %v14493_v8  ;;  %v14495_v12 = vadd.f32 %v11102_v34, %v21455_v63  ;;  %12186 = vmatprep.mubr.bf16.mxu0 %v11486_v55 }
 0x7d0   : > { %v11253_v31 = vmul.f32 0.2, %v14494_v50  ;;  %12187 = vmatmul.mubr.bf16.gmra.mrb[204].mxu0 %v11485_v24  ;;  %v11377_v18 = vmax.f32 %v14492_v26, %v11249_v21 }
 0x7d1   : > { %v11254_v10 = vmul.f32 0.2, %v14495_v12  ;;  %v11378_v39 = vmax.f32 %v14493_v8, %v11250_v42 }
 0x7d2   : > { %v11381_v9 = vmax.f32 %v14494_v50, %v11253_v31 }
 0x7d3   : > { %v11382_v54 = vmax.f32 %v14495_v12, %v11254_v10  ;;  %v11106_v61 = vpop.f32.mrb[180].mxu1 }
 0x7d4   : > { %v14496_v47 = vadd.f32 %v11106_v61, %v21450_v46  ;;  %v11108_v1 = vpop.f32.mrb[181].mxu1  ;;  %v11489_v28 = vpack.c.bf16 %v11381_v9, %v11377_v18 }
 0x7d5   : > { %v14497_v16 = vadd.f32 %v11108_v1, %v21455_v63  ;;  %v11110_v7 = vpop.f32.mrb[182].mxu1  ;;  %v11490_v30 = vpack.c.bf16 %v11382_v54, %v11378_v39 }
 0x7d6   : > { %v11257_v43 = vmul.f32 0.2, %v14496_v47  ;;  %v14498_v38 = vadd.f32 %v11110_v7, %v21450_v46  ;;  %v11112_v2 = vpop.f32.mrb[183].mxu1 }
 0x7d7   : > { %v11258_v5 = vmul.f32 0.2, %v14497_v16  ;;  %v14499_v14 = vadd.f32 %v11112_v2, %v21455_v63  ;;  %12196 = vmatprep.mubr.bf16.mxu0 %v11490_v30 }
 0x7d8   : > { %v11261_v45 = vmul.f32 0.2, %v14498_v38  ;;  %12197 = vmatmul.mubr.bf16.gmra.mrb[208].mxu0 %v11489_v28  ;;  %v11385_v13 = vmax.f32 %v14496_v47, %v11257_v43 }
 0x7d9   : > { %v11262_v41 = vmul.f32 0.2, %v14499_v14  ;;  %v11386_v33 = vmax.f32 %v14497_v16, %v11258_v5 }
 0x7da   : > { %v11389_v20 = vmax.f32 %v14498_v38, %v11261_v45 }
 0x7db   : > { %v11390_v48 = vmax.f32 %v14499_v14, %v11262_v41  ;;  %v11116_v4 = vpop.f32.mrb[184].mxu1 }
 0x7dc   : > { %v14500_v40 = vadd.f32 %v11116_v4, %v21450_v46  ;;  %v11118_v29 = vpop.f32.mrb[185].mxu1  ;;  %v11493_v62 = vpack.c.bf16 %v11389_v20, %v11385_v13 }
 0x7dd   : > { %v14501_v6 = vadd.f32 %v11118_v29, %v21455_v63  ;;  %v11120_v60 = vpop.f32.mrb[186].mxu1  ;;  %v11494_v53 = vpack.c.bf16 %v11390_v48, %v11386_v33 }
 0x7de   : > { %v11265_v58 = vmul.f32 0.2, %v14500_v40  ;;  %v14502_v11 = vadd.f32 %v11120_v60, %v21450_v46  ;;  %v11122_v19 = vpop.f32.mrb[187].mxu1 }
 0x7df   : > { %v11266_v35 = vmul.f32 0.2, %v14501_v6  ;;  %v14503_v32 = vadd.f32 %v11122_v19, %v21455_v63  ;;  %12206 = vmatprep.mubr.bf16.mxu0 %v11494_v53 }
 0x7e0   : > { %v11269_v51 = vmul.f32 0.2, %v14502_v11  ;;  %12207 = vmatmul.mubr.bf16.gmra.mrb[212].mxu0 %v11493_v62  ;;  %v11393_v23 = vmax.f32 %v14500_v40, %v11265_v58 }
 0x7e1   : > { %v11270_v22 = vmul.f32 0.2, %v14503_v32  ;;  %v11394_v57 = vmax.f32 %v14501_v6, %v11266_v35 }
 0x7e2   : > { %v11397_v59 = vmax.f32 %v14502_v11, %v11269_v51 }
 0x7e3   : > { %v11398_v52 = vmax.f32 %v14503_v32, %v11270_v22  ;;  %v11126_v15 = vpop.f32.mrb[188].mxu1 }
 0x7e4   : > { %v14504_v36 = vadd.f32 %v11126_v15, %v21450_v46  ;;  %v11128_v49 = vpop.f32.mrb[189].mxu1  ;;  %v11497_v27 = vpack.c.bf16 %v11397_v59, %v11393_v23 }
 0x7e5   : > { %v14505_v0 = vadd.f32 %v11128_v49, %v21455_v63  ;;  %v11130_v44 = vpop.f32.mrb[190].mxu1  ;;  %v11498_v56 = vpack.c.bf16 %v11398_v52, %v11394_v57 }
 0x7e6   : > { %v11273_v26 = vmul.f32 0.2, %v14504_v36  ;;  %v14506_v3 = vadd.f32 %v11130_v44, %v21450_v46  ;;  %v11132_v24 = vpop.f32.mrb[191].mxu1 }
 0x7e7   : > { %v11274_v8 = vmul.f32 0.2, %v14505_v0  ;;  %v14507_v25 = vadd.f32 %v11132_v24, %v21455_v63  ;;  %12216 = vmatprep.mubr.bf16.mxu0 %v11498_v56 }
 0x7e8   : > { %v11277_v55 = vmul.f32 0.2, %v14506_v3  ;;  %12217 = vmatmul.mubr.bf16.gmra.mrb[216].mxu0 %v11497_v27  ;;  %v11401_v50 = vmax.f32 %v14504_v36, %v11273_v26 }
 0x7e9   : > { %v11278_v21 = vmul.f32 0.2, %v14507_v25  ;;  %v11402_v42 = vmax.f32 %v14505_v0, %v11274_v8 }
 0x7ea   : > { %v11405_v34 = vmax.f32 %v14506_v3, %v11277_v55 }
 0x7eb   : > { %v11406_v12 = vmax.f32 %v14507_v25, %v11278_v21  ;;  %v11136_v31 = vpop.f32.mrb[192].mxu1 }
 0x7ec   : > { %v14508_v10 = vadd.f32 %v11136_v31, %v21450_v46  ;;  %v11138_v18 = vpop.f32.mrb[193].mxu1  ;;  %v11501_v9 = vpack.c.bf16 %v11405_v34, %v11401_v50 }
 0x7ed   : > { %v14509_v39 = vadd.f32 %v11138_v18, %v21455_v63  ;;  %v11140_v54 = vpop.f32.mrb[194].mxu1  ;;  %v11502_v61 = vpack.c.bf16 %v11406_v12, %v11402_v42 }
 0x7ee   : > { %v11281_v47 = vmul.f32 0.2, %v14508_v10  ;;  %v14510_v1 = vadd.f32 %v11140_v54, %v21450_v46  ;;  %v11142_v28 = vpop.f32.mrb[195].mxu1 }
 0x7ef   : > { %v11282_v16 = vmul.f32 0.2, %v14509_v39  ;;  %v14511_v7 = vadd.f32 %v11142_v28, %v21455_v63  ;;  %12226 = vmatprep.mubr.bf16.mxu0 %v11502_v61 }
 0x7f0   : > { %v11285_v30 = vmul.f32 0.2, %v14510_v1  ;;  %12227 = vmatmul.mubr.bf16.gmra.mrb[220].mxu0 %v11501_v9  ;;  %v11409_v38 = vmax.f32 %v14508_v10, %v11281_v47 }
 0x7f1   : > { %v11286_v43 = vmul.f32 0.2, %v14511_v7  ;;  %v11410_v5 = vmax.f32 %v14509_v39, %v11282_v16 }
 0x7f2   : > { %v11413_v2 = vmax.f32 %v14510_v1, %v11285_v30 }
 0x7f3   : > { %v11414_v14 = vmax.f32 %v14511_v7, %v11286_v43  ;;  %v11146_v45 = vpop.f32.mrb[196].mxu1 }
 0x7f4   : > { %v14512_v41 = vadd.f32 %v11146_v45, %v21450_v46  ;;  %v11148_v13 = vpop.f32.mrb[197].mxu1  ;;  %v11505_v20 = vpack.c.bf16 %v11413_v2, %v11409_v38 }
 0x7f5   : > { %v14513_v33 = vadd.f32 %v11148_v13, %v21455_v63  ;;  %v11150_v48 = vpop.f32.mrb[198].mxu1  ;;  %v11506_v4 = vpack.c.bf16 %v11414_v14, %v11410_v5 }
 0x7f6   : > { %v11289_v40 = vmul.f32 0.2, %v14512_v41  ;;  %v14514_v29 = vadd.f32 %v11150_v48, %v21450_v46  ;;  %v11152_v62 = vpop.f32.mrb[199].mxu1 }
 0x7f7   : > { %v11290_v6 = vmul.f32 0.2, %v14513_v33  ;;  %v14515_v60 = vadd.f32 %v11152_v62, %v21455_v63  ;;  %12236 = vmatprep.mubr.bf16.mxu0 %v11506_v4 }
 0x7f8   : > { %v11293_v53 = vmul.f32 0.2, %v14514_v29  ;;  %12237 = vmatmul.mubr.bf16.gmra.mrb[224].mxu0 %v11505_v20  ;;  %v11417_v11 = vmax.f32 %v14512_v41, %v11289_v40 }
 0x7f9   : > { %v11294_v58 = vmul.f32 0.2, %v14515_v60  ;;  %v11418_v35 = vmax.f32 %v14513_v33, %v11290_v6 }
 0x7fa   : > { %v11421_v19 = vmax.f32 %v14514_v29, %v11293_v53 }
 0x7fb   : > { %v11422_v32 = vmax.f32 %v14515_v60, %v11294_v58  ;;  %v11156_v51 = vpop.f32.mrb[200].mxu1 }
 0x7fc   : > { %v14516_v22 = vadd.f32 %v11156_v51, %v21450_v46  ;;  %v11158_v23 = vpop.f32.mrb[201].mxu1  ;;  %v11509_v59 = vpack.c.bf16 %v11421_v19, %v11417_v11 }
 0x7fd   : > { %v14517_v57 = vadd.f32 %v11158_v23, %v21455_v63  ;;  %v11160_v52 = vpop.f32.mrb[202].mxu1  ;;  %v11510_v15 = vpack.c.bf16 %v11422_v32, %v11418_v35 }
 0x7fe   : > { %v11297_v36 = vmul.f32 0.2, %v14516_v22  ;;  %v14518_v49 = vadd.f32 %v11160_v52, %v21450_v46  ;;  %v11162_v27 = vpop.f32.mrb[203].mxu1 }
 0x7ff   : > { %v11298_v0 = vmul.f32 0.2, %v14517_v57  ;;  %v14519_v44 = vadd.f32 %v11162_v27, %v21455_v63  ;;  %12246 = vmatprep.mubr.bf16.mxu0 %v11510_v15 }
 0x800   : > { %v11301_v56 = vmul.f32 0.2, %v14518_v49  ;;  %12247 = vmatmul.mubr.bf16.gmra.mrb[228].mxu0 %v11509_v59  ;;  %v11425_v3 = vmax.f32 %v14516_v22, %v11297_v36 }
 0x801   : > { %v11302_v26 = vmul.f32 0.2, %v14519_v44  ;;  %v11426_v8 = vmax.f32 %v14517_v57, %v11298_v0 }
 0x802   : > { %v11429_v24 = vmax.f32 %v14518_v49, %v11301_v56 }
 0x803   : > { %v11430_v25 = vmax.f32 %v14519_v44, %v11302_v26  ;;  %v11166_v55 = vpop.f32.mrb[204].mxu1 }
 0x804   : > { %v14520_v21 = vadd.f32 %v11166_v55, %v21450_v46  ;;  %v11168_v50 = vpop.f32.mrb[205].mxu1  ;;  %v11513_v34 = vpack.c.bf16 %v11429_v24, %v11425_v3 }
 0x805   : > { %v14521_v42 = vadd.f32 %v11168_v50, %v21455_v63  ;;  %v11170_v12 = vpop.f32.mrb[206].mxu1  ;;  %v11514_v31 = vpack.c.bf16 %v11430_v25, %v11426_v8 }
 0x806   : > { %v11305_v10 = vmul.f32 0.2, %v14520_v21  ;;  %v14522_v18 = vadd.f32 %v11170_v12, %v21450_v46  ;;  %v11172_v9 = vpop.f32.mrb[207].mxu1 }
 0x807   : > { %v11306_v39 = vmul.f32 0.2, %v14521_v42  ;;  %v14523_v54 = vadd.f32 %v11172_v9, %v21455_v63  ;;  %12256 = vmatprep.mubr.bf16.mxu0 %v11514_v31 }
 0x808   : > { %v11309_v61 = vmul.f32 0.2, %v14522_v18  ;;  %12257 = vmatmul.mubr.bf16.gmra.mrb[232].mxu0 %v11513_v34  ;;  %v11433_v1 = vmax.f32 %v14520_v21, %v11305_v10 }
 0x809   : > { %v11310_v47 = vmul.f32 0.2, %v14523_v54  ;;  %v11434_v16 = vmax.f32 %v14521_v42, %v11306_v39 }
 0x80a   : > { %v11437_v28 = vmax.f32 %v14522_v18, %v11309_v61 }
 0x80b   : > { %v11438_v7 = vmax.f32 %v14523_v54, %v11310_v47  ;;  %v11176_v30 = vpop.f32.mrb[208].mxu1 }
 0x80c   : > { %v14524_v43 = vadd.f32 %v11176_v30, %v21450_v46  ;;  %v11178_v38 = vpop.f32.mrb[209].mxu1  ;;  %v11517_v2 = vpack.c.bf16 %v11437_v28, %v11433_v1 }
 0x80d   : > { %v14525_v5 = vadd.f32 %v11178_v38, %v21455_v63  ;;  %v11180_v14 = vpop.f32.mrb[210].mxu1  ;;  %v11518_v45 = vpack.c.bf16 %v11438_v7, %v11434_v16 }
 0x80e   : > { %v11313_v41 = vmul.f32 0.2, %v14524_v43  ;;  %v14526_v13 = vadd.f32 %v11180_v14, %v21450_v46  ;;  %v11182_v20 = vpop.f32.mrb[211].mxu1 }
 0x80f   : > { %v11314_v33 = vmul.f32 0.2, %v14525_v5  ;;  %v14527_v48 = vadd.f32 %v11182_v20, %v21455_v63  ;;  %12266 = vmatprep.mubr.bf16.mxu0 %v11518_v45 }
 0x810   : > { %v11317_v4 = vmul.f32 0.2, %v14526_v13  ;;  %12267 = vmatmul.mubr.bf16.gmra.mrb[236].mxu0 %v11517_v2  ;;  %v11441_v29 = vmax.f32 %v14524_v43, %v11313_v41 }
 0x811   : > { %v11318_v40 = vmul.f32 0.2, %v14527_v48  ;;  %v11442_v6 = vmax.f32 %v14525_v5, %v11314_v33 }
 0x812   : > { %v11445_v62 = vmax.f32 %v14526_v13, %v11317_v4 }
 0x813   : > { %v11446_v60 = vmax.f32 %v14527_v48, %v11318_v40  ;;  %v11186_v53 = vpop.f32.mrb[212].mxu1 }
 0x814   : > { %v14528_v58 = vadd.f32 %v11186_v53, %v21450_v46  ;;  %v11188_v11 = vpop.f32.mrb[213].mxu1  ;;  %v11521_v19 = vpack.c.bf16 %v11445_v62, %v11441_v29 }
 0x815   : > { %v14529_v35 = vadd.f32 %v11188_v11, %v21455_v63  ;;  %v11190_v32 = vpop.f32.mrb[214].mxu1  ;;  %v11522_v51 = vpack.c.bf16 %v11446_v60, %v11442_v6 }
 0x816   : > { %v11321_v22 = vmul.f32 0.2, %v14528_v58  ;;  %v14530_v23 = vadd.f32 %v11190_v32, %v21450_v46  ;;  %v11192_v59 = vpop.f32.mrb[215].mxu1 }
 0x817   : > { %v11322_v57 = vmul.f32 0.2, %v14529_v35  ;;  %v14531_v52 = vadd.f32 %v11192_v59, %v21455_v63  ;;  %12276 = vmatprep.mubr.bf16.mxu0 %v11522_v51 }
 0x818   : > { %v11325_v15 = vmul.f32 0.2, %v14530_v23  ;;  %12277 = vmatmul.mubr.bf16.gmra.mrb[240].mxu0 %v11521_v19  ;;  %v11449_v49 = vmax.f32 %v14528_v58, %v11321_v22 }
 0x819   : > { %v11326_v36 = vmul.f32 0.2, %v14531_v52  ;;  %v11450_v0 = vmax.f32 %v14529_v35, %v11322_v57 }
 0x81a   : > { %v11453_v27 = vmax.f32 %v14530_v23, %v11325_v15 }
 0x81b   : > { %v11454_v44 = vmax.f32 %v14531_v52, %v11326_v36  ;;  %v11196_v56 = vpop.f32.mrb[216].mxu1 }
 0x81c   : > { %v14532_v26 = vadd.f32 %v11196_v56, %v21450_v46  ;;  %v11198_v3 = vpop.f32.mrb[217].mxu1  ;;  %v11525_v24 = vpack.c.bf16 %v11453_v27, %v11449_v49 }
 0x81d   : > { %v14533_v8 = vadd.f32 %v11198_v3, %v21455_v63  ;;  %v11200_v25 = vpop.f32.mrb[218].mxu1  ;;  %v11526_v55 = vpack.c.bf16 %v11454_v44, %v11450_v0 }
 0x81e   : > { %v11329_v21 = vmul.f32 0.2, %v14532_v26  ;;  %v14534_v50 = vadd.f32 %v11200_v25, %v21450_v46  ;;  %v11202_v34 = vpop.f32.mrb[219].mxu1 }
 0x81f   : > { %v11330_v42 = vmul.f32 0.2, %v14533_v8  ;;  %v14535_v12 = vadd.f32 %v11202_v34, %v21455_v63  ;;  %12286 = vmatprep.mubr.bf16.mxu0 %v11526_v55 }
 0x820   : > { %v11333_v31 = vmul.f32 0.2, %v14534_v50  ;;  %12287 = vmatmul.mubr.bf16.gmra.mrb[244].mxu0 %v11525_v24  ;;  %v11457_v18 = vmax.f32 %v14532_v26, %v11329_v21 }
 0x821   : > { %v11334_v10 = vmul.f32 0.2, %v14535_v12  ;;  %v11458_v39 = vmax.f32 %v14533_v8, %v11330_v42 }
 0x822   : > { %v11461_v9 = vmax.f32 %v14534_v50, %v11333_v31 }
 0x823   : > { %v11462_v54 = vmax.f32 %v14535_v12, %v11334_v10  ;;  %v11206_v61 = vpop.f32.mrb[220].mxu1 }
 0x824   : > { %v14536_v47 = vadd.f32 %v11206_v61, %v21450_v46  ;;  %v11208_v1 = vpop.f32.mrb[221].mxu1  ;;  %v11529_v28 = vpack.c.bf16 %v11461_v9, %v11457_v18 }
 0x825   : > { %v14537_v16 = vadd.f32 %v11208_v1, %v21455_v63  ;;  %v11210_v7 = vpop.f32.mrb[222].mxu1  ;;  %v11530_v30 = vpack.c.bf16 %v11462_v54, %v11458_v39 }
 0x826   : > { %v11337_v43 = vmul.f32 0.2, %v14536_v47  ;;  %v14538_v38 = vadd.f32 %v11210_v7, %v21450_v46  ;;  %v11212_v2 = vpop.f32.mrb[223].mxu1  ;;  %v11599_v46 = vld [vmem:[%s21706_s8] sm:$0x3] }
 0x827   : > { %v11338_v5 = vmul.f32 0.2, %v14537_v16  ;;  %v14539_v14 = vadd.f32 %v11212_v2, %v21455_v63  ;;  %12296 = vmatprep.mubr.bf16.mxu0 %v11530_v30  ;;  %v21567_v29 = vrot.slane %v11599_v46, %v22538_v37  ;;  %v21570_v63 = vrot.slane %v11599_v46, %v22539_v17 }
 0x828   : > { %v11341_v45 = vmul.f32 0.2, %v14538_v38  ;;  %12297 = vmatmul.mubr.bf16.gmra.mrb[248].mxu0 %v11529_v28  ;;  %v11465_v13 = vmax.f32 %v14536_v47, %v11337_v43 }
 0x829   : > { %v11342_v41 = vmul.f32 0.2, %v14539_v14  ;;  %v11466_v33 = vmax.f32 %v14537_v16, %v11338_v5 }
 0x82a   : > { %v11469_v20 = vmax.f32 %v14538_v38, %v11341_v45 }
 0x82b   : > { %v11470_v48 = vmax.f32 %v14539_v14, %v11342_v41 }
 0x82c   : > { %v11533_v4 = vpack.c.bf16 %v11469_v20, %v11465_v13 }
 0x82d   : > { %v11534_v40 = vpack.c.bf16 %v11470_v48, %v11466_v33 }
 0x82f   : > { %12306 = vmatprep.mubr.bf16.mxu0 %v11534_v40 }
 0x830   : > { %12307 = vmatmul.mubr.bf16.gmra.mrb[252].mxu0 %v11533_v4 }
 0x88b   : > { %v12158_v62 = vpop.f32.mrb[192].mxu0 }
 0x88c   : > { %v14540_v6 = vadd.f32 %v12158_v62, %v21567_v29  ;;  %v12160_v60 = vpop.f32.mrb[193].mxu0 }
 0x88d   : > { %v14541_v53 = vadd.f32 %v12160_v60, %v21570_v63  ;;  %v12162_v58 = vpop.f32.mrb[194].mxu0 }
 0x88e   : > { %v12317_v11 = vmul.f32 0.2, %v14540_v6  ;;  %v14542_v19 = vadd.f32 %v12162_v58, %v21567_v29  ;;  %v12164_v35 = vpop.f32.mrb[195].mxu0 }
 0x88f   : > { %v12318_v32 = vmul.f32 0.2, %v14541_v53  ;;  %v14543_v51 = vadd.f32 %v12164_v35, %v21570_v63 }
 0x890   : > { %v12319_v22 = vmul.f32 0.2, %v14542_v19  ;;  %v12381_v23 = vmax.f32 %v14540_v6, %v12317_v11 }
 0x891   : > { %v12320_v37 = vmul.f32 0.2, %v14543_v51  ;;  %v12382_v17 = vmax.f32 %v14541_v53, %v12318_v32 }
 0x892   : > { %v12383_v59 = vmax.f32 %v14542_v19, %v12319_v22 }
 0x893   : > { %v12384_v57 = vmax.f32 %v14543_v51, %v12320_v37  ;;  %v12168_v52 = vpop.f32.mrb[196].mxu0 }
 0x894   : > { %v12445_v15 = vpack.c.bf16 %v12383_v59, %v12381_v23  ;;  %v14544_v36 = vadd.f32 %v12168_v52, %v21567_v29  ;;  %v12170_v49 = vpop.f32.mrb[197].mxu0 }
 0x895   : > { %v14545_v27 = vadd.f32 %v12170_v49, %v21570_v63  ;;  %v12172_v0 = vpop.f32.mrb[198].mxu0  ;;  %v12446_v44 = vpack.c.bf16 %v12384_v57, %v12382_v17 }
 0x896   : > { %v12321_v56 = vmul.f32 0.2, %v14544_v36  ;;  %v14546_v26 = vadd.f32 %v12172_v0, %v21567_v29  ;;  %v12174_v3 = vpop.f32.mrb[199].mxu0 }
 0x897   : > { %v12322_v24 = vmul.f32 0.2, %v14545_v27  ;;  %v14547_v8 = vadd.f32 %v12174_v3, %v21570_v63  ;;  %12644 = vmatprep.mubr.bf16.mxu1 %v12446_v44 }
 0x898   : > { %v12323_v25 = vmul.f32 0.2, %v14546_v26  ;;  %12645 = vmatmul.mubr.bf16.vlgmr.msra.gmra.mrb[224].mxu1 %v12445_v15  ;;  %v12385_v21 = vmax.f32 %v14544_v36, %v12321_v56 }
 0x899   : > { %v12324_v55 = vmul.f32 0.2, %v14547_v8  ;;  %v12386_v34 = vmax.f32 %v14545_v27, %v12322_v24 }
 0x89a   : > { %v12387_v50 = vmax.f32 %v14546_v26, %v12323_v25 }
 0x89b   : > { %v12388_v42 = vmax.f32 %v14547_v8, %v12324_v55  ;;  %v12178_v12 = vpop.f32.mrb[200].mxu0 }
 0x89c   : > { %v14548_v31 = vadd.f32 %v12178_v12, %v21567_v29  ;;  %v12180_v10 = vpop.f32.mrb[201].mxu0  ;;  %v12447_v18 = vpack.c.bf16 %v12387_v50, %v12385_v21 }
 0x89d   : > { %v14549_v9 = vadd.f32 %v12180_v10, %v21570_v63  ;;  %v12182_v39 = vpop.f32.mrb[202].mxu0  ;;  %v12448_v54 = vpack.c.bf16 %v12388_v42, %v12386_v34 }
 0x89e   : > { %v12325_v61 = vmul.f32 0.2, %v14548_v31  ;;  %v14550_v47 = vadd.f32 %v12182_v39, %v21567_v29  ;;  %v12184_v1 = vpop.f32.mrb[203].mxu0 }
 0x89f   : > { %v12326_v28 = vmul.f32 0.2, %v14549_v9  ;;  %v14551_v16 = vadd.f32 %v12184_v1, %v21570_v63  ;;  %12652 = vmatprep.mubr.bf16.mxu1 %v12448_v54 }
 0x8a0   : > { %v12327_v7 = vmul.f32 0.2, %v14550_v47  ;;  %12653 = vmatmul.mubr.bf16.gmra.mrb[228].mxu1 %v12447_v18  ;;  %v12389_v43 = vmax.f32 %v14548_v31, %v12325_v61 }
 0x8a1   : > { %v12328_v30 = vmul.f32 0.2, %v14551_v16  ;;  %v12390_v2 = vmax.f32 %v14549_v9, %v12326_v28 }
 0x8a2   : > { %v12391_v38 = vmax.f32 %v14550_v47, %v12327_v7 }
 0x8a3   : > { %v12392_v5 = vmax.f32 %v14551_v16, %v12328_v30  ;;  %v12188_v14 = vpop.f32.mrb[204].mxu0 }
 0x8a4   : > { %v14552_v45 = vadd.f32 %v12188_v14, %v21567_v29  ;;  %v12190_v41 = vpop.f32.mrb[205].mxu0  ;;  %v12449_v13 = vpack.c.bf16 %v12391_v38, %v12389_v43 }
 0x8a5   : > { %v14553_v20 = vadd.f32 %v12190_v41, %v21570_v63  ;;  %v12192_v33 = vpop.f32.mrb[206].mxu0  ;;  %v12450_v48 = vpack.c.bf16 %v12392_v5, %v12390_v2 }
 0x8a6   : > { %v12329_v4 = vmul.f32 0.2, %v14552_v45  ;;  %v14554_v40 = vadd.f32 %v12192_v33, %v21567_v29  ;;  %v12194_v46 = vpop.f32.mrb[207].mxu0 }
 0x8a7   : > { %v12330_v62 = vmul.f32 0.2, %v14553_v20  ;;  %v14555_v6 = vadd.f32 %v12194_v46, %v21570_v63  ;;  %12660 = vmatprep.mubr.bf16.mxu1 %v12450_v48 }
 0x8a8   : > { %v12331_v60 = vmul.f32 0.2, %v14554_v40  ;;  %12661 = vmatmul.mubr.bf16.gmra.mrb[232].mxu1 %v12449_v13  ;;  %v12393_v58 = vmax.f32 %v14552_v45, %v12329_v4 }
 0x8a9   : > { %v12332_v53 = vmul.f32 0.2, %v14555_v6  ;;  %v12394_v19 = vmax.f32 %v14553_v20, %v12330_v62 }
 0x8aa   : > { %v12395_v11 = vmax.f32 %v14554_v40, %v12331_v60 }
 0x8ab   : > { %v12396_v35 = vmax.f32 %v14555_v6, %v12332_v53  ;;  %v12198_v32 = vpop.f32.mrb[208].mxu0 }
 0x8ac   : > { %v14556_v51 = vadd.f32 %v12198_v32, %v21567_v29  ;;  %v12200_v22 = vpop.f32.mrb[209].mxu0  ;;  %v12451_v37 = vpack.c.bf16 %v12395_v11, %v12393_v58 }
 0x8ad   : > { %v14557_v23 = vadd.f32 %v12200_v22, %v21570_v63  ;;  %v12202_v59 = vpop.f32.mrb[210].mxu0  ;;  %v12452_v17 = vpack.c.bf16 %v12396_v35, %v12394_v19 }
 0x8ae   : > { %v12333_v57 = vmul.f32 0.2, %v14556_v51  ;;  %v14558_v52 = vadd.f32 %v12202_v59, %v21567_v29  ;;  %v12204_v15 = vpop.f32.mrb[211].mxu0 }
 0x8af   : > { %v12334_v36 = vmul.f32 0.2, %v14557_v23  ;;  %v14559_v49 = vadd.f32 %v12204_v15, %v21570_v63  ;;  %12668 = vmatprep.mubr.bf16.mxu1 %v12452_v17 }
 0x8b0   : > { %v12335_v27 = vmul.f32 0.2, %v14558_v52  ;;  %12669 = vmatmul.mubr.bf16.gmra.mrb[236].mxu1 %v12451_v37  ;;  %v12397_v44 = vmax.f32 %v14556_v51, %v12333_v57 }
 0x8b1   : > { %v12336_v0 = vmul.f32 0.2, %v14559_v49  ;;  %v12398_v26 = vmax.f32 %v14557_v23, %v12334_v36 }
 0x8b2   : > { %v12399_v56 = vmax.f32 %v14558_v52, %v12335_v27 }
 0x8b3   : > { %v12400_v3 = vmax.f32 %v14559_v49, %v12336_v0  ;;  %v12208_v24 = vpop.f32.mrb[212].mxu0 }
 0x8b4   : > { %v14560_v8 = vadd.f32 %v12208_v24, %v21567_v29  ;;  %v12210_v25 = vpop.f32.mrb[213].mxu0  ;;  %v12453_v55 = vpack.c.bf16 %v12399_v56, %v12397_v44 }
 0x8b5   : > { %v14561_v21 = vadd.f32 %v12210_v25, %v21570_v63  ;;  %v12212_v50 = vpop.f32.mrb[214].mxu0  ;;  %v12454_v34 = vpack.c.bf16 %v12400_v3, %v12398_v26 }
 0x8b6   : > { %v12337_v42 = vmul.f32 0.2, %v14560_v8  ;;  %v14562_v12 = vadd.f32 %v12212_v50, %v21567_v29  ;;  %v12214_v31 = vpop.f32.mrb[215].mxu0 }
 0x8b7   : > { %v12338_v10 = vmul.f32 0.2, %v14561_v21  ;;  %v14563_v18 = vadd.f32 %v12214_v31, %v21570_v63  ;;  %12676 = vmatprep.mubr.bf16.mxu1 %v12454_v34 }
 0x8b8   : > { %v12339_v9 = vmul.f32 0.2, %v14562_v12  ;;  %12677 = vmatmul.mubr.bf16.gmra.mrb[240].mxu1 %v12453_v55  ;;  %v12401_v54 = vmax.f32 %v14560_v8, %v12337_v42 }
 0x8b9   : > { %v12340_v39 = vmul.f32 0.2, %v14563_v18  ;;  %v12402_v47 = vmax.f32 %v14561_v21, %v12338_v10 }
 0x8ba   : > { %v12403_v61 = vmax.f32 %v14562_v12, %v12339_v9 }
 0x8bb   : > { %v12404_v1 = vmax.f32 %v14563_v18, %v12340_v39  ;;  %v12218_v28 = vpop.f32.mrb[216].mxu0 }
 0x8bc   : > { %v14564_v16 = vadd.f32 %v12218_v28, %v21567_v29  ;;  %v12220_v7 = vpop.f32.mrb[217].mxu0  ;;  %v12455_v30 = vpack.c.bf16 %v12403_v61, %v12401_v54 }
 0x8bd   : > { %v14565_v43 = vadd.f32 %v12220_v7, %v21570_v63  ;;  %v12222_v38 = vpop.f32.mrb[218].mxu0  ;;  %v12456_v2 = vpack.c.bf16 %v12404_v1, %v12402_v47 }
 0x8be   : > { %v12341_v5 = vmul.f32 0.2, %v14564_v16  ;;  %v14566_v14 = vadd.f32 %v12222_v38, %v21567_v29  ;;  %v12224_v45 = vpop.f32.mrb[219].mxu0 }
 0x8bf   : > { %v12342_v41 = vmul.f32 0.2, %v14565_v43  ;;  %v14567_v13 = vadd.f32 %v12224_v45, %v21570_v63  ;;  %12684 = vmatprep.mubr.bf16.mxu1 %v12456_v2 }
 0x8c0   : > { %v12343_v20 = vmul.f32 0.2, %v14566_v14  ;;  %12685 = vmatmul.mubr.bf16.gmra.mrb[244].mxu1 %v12455_v30  ;;  %v12405_v48 = vmax.f32 %v14564_v16, %v12341_v5 }
 0x8c1   : > { %v12344_v33 = vmul.f32 0.2, %v14567_v13  ;;  %v12406_v40 = vmax.f32 %v14565_v43, %v12342_v41 }
 0x8c2   : > { %v12407_v4 = vmax.f32 %v14566_v14, %v12343_v20 }
 0x8c3   : > { %v12408_v46 = vmax.f32 %v14567_v13, %v12344_v33  ;;  %v12228_v62 = vpop.f32.mrb[220].mxu0 }
 0x8c4   : > { %v14568_v6 = vadd.f32 %v12228_v62, %v21567_v29  ;;  %v12230_v60 = vpop.f32.mrb[221].mxu0  ;;  %v12457_v53 = vpack.c.bf16 %v12407_v4, %v12405_v48 }
 0x8c5   : > { %v14569_v58 = vadd.f32 %v12230_v60, %v21570_v63  ;;  %v12232_v11 = vpop.f32.mrb[222].mxu0  ;;  %v12458_v19 = vpack.c.bf16 %v12408_v46, %v12406_v40 }
 0x8c6   : > { %v12345_v35 = vmul.f32 0.2, %v14568_v6  ;;  %v14570_v32 = vadd.f32 %v12232_v11, %v21567_v29  ;;  %v12234_v51 = vpop.f32.mrb[223].mxu0 }
 0x8c7   : > { %v12346_v22 = vmul.f32 0.2, %v14569_v58  ;;  %v14571_v37 = vadd.f32 %v12234_v51, %v21570_v63  ;;  %12692 = vmatprep.mubr.bf16.mxu1 %v12458_v19 }
 0x8c8   : > { %v12347_v23 = vmul.f32 0.2, %v14570_v32  ;;  %12693 = vmatmul.mubr.bf16.gmra.mrb[248].mxu1 %v12457_v53  ;;  %v12409_v17 = vmax.f32 %v14568_v6, %v12345_v35 }
 0x8c9   : > { %v12348_v59 = vmul.f32 0.2, %v14571_v37  ;;  %v12410_v52 = vmax.f32 %v14569_v58, %v12346_v22 }
 0x8ca   : > { %v12411_v57 = vmax.f32 %v14570_v32, %v12347_v23 }
 0x8cb   : > { %v12412_v15 = vmax.f32 %v14571_v37, %v12348_v59  ;;  %v12238_v36 = vpop.f32.mrb[224].mxu0 }
 0x8cc   : > { %v14572_v49 = vadd.f32 %v12238_v36, %v21567_v29  ;;  %v12240_v27 = vpop.f32.mrb[225].mxu0  ;;  %v12459_v0 = vpack.c.bf16 %v12411_v57, %v12409_v17 }
 0x8cd   : > { %v14573_v44 = vadd.f32 %v12240_v27, %v21570_v63  ;;  %v12242_v56 = vpop.f32.mrb[226].mxu0  ;;  %v12460_v26 = vpack.c.bf16 %v12412_v15, %v12410_v52 }
 0x8ce   : > { %v12349_v3 = vmul.f32 0.2, %v14572_v49  ;;  %v14574_v24 = vadd.f32 %v12242_v56, %v21567_v29  ;;  %v12244_v8 = vpop.f32.mrb[227].mxu0 }
 0x8cf   : > { %v12350_v25 = vmul.f32 0.2, %v14573_v44  ;;  %v14575_v55 = vadd.f32 %v12244_v8, %v21570_v63  ;;  %12700 = vmatprep.mubr.bf16.mxu1 %v12460_v26 }
 0x8d0   : > { %v12351_v21 = vmul.f32 0.2, %v14574_v24  ;;  %12701 = vmatmul.mubr.bf16.gmra.mrb[252].mxu1 %v12459_v0  ;;  %v12413_v34 = vmax.f32 %v14572_v49, %v12349_v3 }
 0x8d1   : > { %v12352_v50 = vmul.f32 0.2, %v14575_v55  ;;  %v12414_v12 = vmax.f32 %v14573_v44, %v12350_v25 }
 0x8d2   : > { %v12415_v42 = vmax.f32 %v14574_v24, %v12351_v21 }
 0x8d3   : > { %v12416_v31 = vmax.f32 %v14575_v55, %v12352_v50  ;;  %v12248_v10 = vpop.f32.mrb[228].mxu0 }
 0x8d4   : > { %v12461_v18 = vpack.c.bf16 %v12415_v42, %v12413_v34  ;;  %v14576_v9 = vadd.f32 %v12248_v10, %v21567_v29  ;;  %v12250_v39 = vpop.f32.mrb[229].mxu0 }
 0x8d5   : > { %v14577_v54 = vadd.f32 %v12250_v39, %v21570_v63  ;;  %v12252_v61 = vpop.f32.mrb[230].mxu0  ;;  %v12462_v47 = vpack.c.bf16 %v12416_v31, %v12414_v12 }
 0x8d6   : > { %v12353_v1 = vmul.f32 0.2, %v14576_v9  ;;  %v14578_v28 = vadd.f32 %v12252_v61, %v21567_v29  ;;  %v12254_v16 = vpop.f32.mrb[231].mxu0 }
 0x8d7   : > { %v12354_v7 = vmul.f32 0.2, %v14577_v54  ;;  %v14579_v30 = vadd.f32 %v12254_v16, %v21570_v63  ;;  %12708 = vmatprep.mubr.bf16.mxu1 %v12462_v47 }
 0x8d8   : > { %v12355_v43 = vmul.f32 0.2, %v14578_v28  ;;  %12709 = vmatmul.mubr.bf16.gmra.mrb[0].mxu1 %v12461_v18  ;;  %v12417_v2 = vmax.f32 %v14576_v9, %v12353_v1 }
 0x8d9   : > { %v12356_v38 = vmul.f32 0.2, %v14579_v30  ;;  %v12418_v14 = vmax.f32 %v14577_v54, %v12354_v7 }
 0x8da   : > { %v12419_v5 = vmax.f32 %v14578_v28, %v12355_v43 }
 0x8db   : > { %v12420_v45 = vmax.f32 %v14579_v30, %v12356_v38  ;;  %v12258_v41 = vpop.f32.mrb[232].mxu0 }
 0x8dc   : > { %v12463_v13 = vpack.c.bf16 %v12419_v5, %v12417_v2  ;;  %v14580_v20 = vadd.f32 %v12258_v41, %v21567_v29  ;;  %v12260_v33 = vpop.f32.mrb[233].mxu0 }
 0x8dd   : > { %v14581_v48 = vadd.f32 %v12260_v33, %v21570_v63  ;;  %v12262_v4 = vpop.f32.mrb[234].mxu0  ;;  %v12464_v40 = vpack.c.bf16 %v12420_v45, %v12418_v14 }
 0x8de   : > { %v12357_v46 = vmul.f32 0.2, %v14580_v20  ;;  %v14582_v62 = vadd.f32 %v12262_v4, %v21567_v29  ;;  %v12264_v6 = vpop.f32.mrb[235].mxu0 }
 0x8df   : > { %v12358_v60 = vmul.f32 0.2, %v14581_v48  ;;  %v14583_v53 = vadd.f32 %v12264_v6, %v21570_v63  ;;  %12716 = vmatprep.mubr.bf16.mxu1 %v12464_v40 }
 0x8e0   : > { %v12359_v58 = vmul.f32 0.2, %v14582_v62  ;;  %12717 = vmatmul.mubr.bf16.gmra.mrb[4].mxu1 %v12463_v13  ;;  %v12421_v19 = vmax.f32 %v14580_v20, %v12357_v46 }
 0x8e1   : > { %v12360_v11 = vmul.f32 0.2, %v14583_v53  ;;  %v12422_v32 = vmax.f32 %v14581_v48, %v12358_v60 }
 0x8e2   : > { %v12423_v35 = vmax.f32 %v14582_v62, %v12359_v58 }
 0x8e3   : > { %v12424_v51 = vmax.f32 %v14583_v53, %v12360_v11  ;;  %v12268_v22 = vpop.f32.mrb[236].mxu0 }
 0x8e4   : > { %v12465_v37 = vpack.c.bf16 %v12423_v35, %v12421_v19  ;;  %v14584_v23 = vadd.f32 %v12268_v22, %v21567_v29  ;;  %v12270_v59 = vpop.f32.mrb[237].mxu0 }
 0x8e5   : > { %v14585_v17 = vadd.f32 %v12270_v59, %v21570_v63  ;;  %v12272_v57 = vpop.f32.mrb[238].mxu0  ;;  %v12466_v52 = vpack.c.bf16 %v12424_v51, %v12422_v32 }
 0x8e6   : > { %v12361_v15 = vmul.f32 0.2, %v14584_v23  ;;  %v14586_v36 = vadd.f32 %v12272_v57, %v21567_v29  ;;  %v12274_v49 = vpop.f32.mrb[239].mxu0 }
 0x8e7   : > { %v12362_v27 = vmul.f32 0.2, %v14585_v17  ;;  %v14587_v0 = vadd.f32 %v12274_v49, %v21570_v63  ;;  %12724 = vmatprep.mubr.bf16.mxu1 %v12466_v52 }
 0x8e8   : > { %v12363_v44 = vmul.f32 0.2, %v14586_v36  ;;  %12725 = vmatmul.mubr.bf16.gmra.mrb[8].mxu1 %v12465_v37  ;;  %v12425_v26 = vmax.f32 %v14584_v23, %v12361_v15 }
 0x8e9   : > { %v12364_v56 = vmul.f32 0.2, %v14587_v0  ;;  %v12426_v24 = vmax.f32 %v14585_v17, %v12362_v27 }
 0x8ea   : > { %v12427_v3 = vmax.f32 %v14586_v36, %v12363_v44 }
 0x8eb   : > { %v12428_v8 = vmax.f32 %v14587_v0, %v12364_v56  ;;  %v12278_v25 = vpop.f32.mrb[240].mxu0 }
 0x8ec   : > { %v12467_v55 = vpack.c.bf16 %v12427_v3, %v12425_v26  ;;  %v14588_v21 = vadd.f32 %v12278_v25, %v21567_v29  ;;  %v12280_v50 = vpop.f32.mrb[241].mxu0 }
 0x8ed   : > { %v14589_v34 = vadd.f32 %v12280_v50, %v21570_v63  ;;  %v12282_v42 = vpop.f32.mrb[242].mxu0  ;;  %v12468_v12 = vpack.c.bf16 %v12428_v8, %v12426_v24 }
 0x8ee   : > { %v12365_v31 = vmul.f32 0.2, %v14588_v21  ;;  %v14590_v10 = vadd.f32 %v12282_v42, %v21567_v29  ;;  %v12284_v18 = vpop.f32.mrb[243].mxu0 }
 0x8ef   : > { %v12366_v9 = vmul.f32 0.2, %v14589_v34  ;;  %v14591_v39 = vadd.f32 %v12284_v18, %v21570_v63  ;;  %12732 = vmatprep.mubr.bf16.mxu1 %v12468_v12 }
 0x8f0   : > { %v12367_v54 = vmul.f32 0.2, %v14590_v10  ;;  %12733 = vmatmul.mubr.bf16.gmra.mrb[12].mxu1 %v12467_v55  ;;  %v12429_v47 = vmax.f32 %v14588_v21, %v12365_v31 }
 0x8f1   : > { %v12368_v61 = vmul.f32 0.2, %v14591_v39  ;;  %v12430_v28 = vmax.f32 %v14589_v34, %v12366_v9 }
 0x8f2   : > { %v12431_v1 = vmax.f32 %v14590_v10, %v12367_v54 }
 0x8f3   : > { %v12432_v16 = vmax.f32 %v14591_v39, %v12368_v61  ;;  %v12288_v7 = vpop.f32.mrb[244].mxu0 }
 0x8f4   : > { %v12469_v30 = vpack.c.bf16 %v12431_v1, %v12429_v47  ;;  %v14592_v43 = vadd.f32 %v12288_v7, %v21567_v29  ;;  %v12290_v38 = vpop.f32.mrb[245].mxu0 }
 0x8f5   : > { %v14593_v2 = vadd.f32 %v12290_v38, %v21570_v63  ;;  %v12292_v5 = vpop.f32.mrb[246].mxu0  ;;  %v12470_v14 = vpack.c.bf16 %v12432_v16, %v12430_v28 }
 0x8f6   : > { %v12369_v45 = vmul.f32 0.2, %v14592_v43  ;;  %v14594_v41 = vadd.f32 %v12292_v5, %v21567_v29  ;;  %v12294_v13 = vpop.f32.mrb[247].mxu0 }
 0x8f7   : > { %v12370_v20 = vmul.f32 0.2, %v14593_v2  ;;  %v14595_v33 = vadd.f32 %v12294_v13, %v21570_v63  ;;  %12740 = vmatprep.mubr.bf16.mxu1 %v12470_v14 }
 0x8f8   : > { %v12371_v48 = vmul.f32 0.2, %v14594_v41  ;;  %12741 = vmatmul.mubr.bf16.gmra.mrb[16].mxu1 %v12469_v30  ;;  %v12433_v40 = vmax.f32 %v14592_v43, %v12369_v45 }
 0x8f9   : > { %v12372_v4 = vmul.f32 0.2, %v14595_v33  ;;  %v12434_v62 = vmax.f32 %v14593_v2, %v12370_v20 }
 0x8fa   : > { %v12435_v46 = vmax.f32 %v14594_v41, %v12371_v48 }
 0x8fb   : > { %v12436_v6 = vmax.f32 %v14595_v33, %v12372_v4  ;;  %v12298_v60 = vpop.f32.mrb[248].mxu0 }
 0x8fc   : > { %v12471_v53 = vpack.c.bf16 %v12435_v46, %v12433_v40  ;;  %v14596_v58 = vadd.f32 %v12298_v60, %v21567_v29  ;;  %v12300_v11 = vpop.f32.mrb[249].mxu0 }
 0x8fd   : > { %v14597_v19 = vadd.f32 %v12300_v11, %v21570_v63  ;;  %v12302_v35 = vpop.f32.mrb[250].mxu0  ;;  %v12472_v32 = vpack.c.bf16 %v12436_v6, %v12434_v62 }
 0x8fe   : > { %v12373_v51 = vmul.f32 0.2, %v14596_v58  ;;  %v14598_v22 = vadd.f32 %v12302_v35, %v21567_v29  ;;  %v12304_v37 = vpop.f32.mrb[251].mxu0 }
 0x8ff   : > { %v12374_v23 = vmul.f32 0.2, %v14597_v19  ;;  %v14599_v59 = vadd.f32 %v12304_v37, %v21570_v63  ;;  %12748 = vmatprep.mubr.bf16.mxu1 %v12472_v32 }
 0x900   : > { %v12375_v17 = vmul.f32 0.2, %v14598_v22  ;;  %12749 = vmatmul.mubr.bf16.gmra.mrb[20].mxu1 %v12471_v53  ;;  %v12437_v52 = vmax.f32 %v14596_v58, %v12373_v51 }
 0x901   : > { %v12376_v57 = vmul.f32 0.2, %v14599_v59  ;;  %v12438_v36 = vmax.f32 %v14597_v19, %v12374_v23 }
 0x902   : > { %v12439_v15 = vmax.f32 %v14598_v22, %v12375_v17 }
 0x903   : > { %v12440_v49 = vmax.f32 %v14599_v59, %v12376_v57  ;;  %v12308_v27 = vpop.f32.mrb[252].mxu0 }
 0x904   : > { %v12473_v0 = vpack.c.bf16 %v12439_v15, %v12437_v52  ;;  %v14600_v44 = vadd.f32 %v12308_v27, %v21567_v29  ;;  %v12310_v56 = vpop.f32.mrb[253].mxu0 }
 0x905   : > { %v14601_v26 = vadd.f32 %v12310_v56, %v21570_v63  ;;  %v12312_v3 = vpop.f32.mrb[254].mxu0  ;;  %v12474_v24 = vpack.c.bf16 %v12440_v49, %v12438_v36 }
 0x906   : > { %v12377_v8 = vmul.f32 0.2, %v14600_v44  ;;  %v14602_v25 = vadd.f32 %v12312_v3, %v21567_v29  ;;  %v12314_v55 = vpop.f32.mrb[255].mxu0  ;;  %v21639_v29 = vld [vmem:[%s21708_s10] ss:$0 sm:$0xff] }
 0x907   : > { %v12378_v21 = vmul.f32 0.2, %v14601_v26  ;;  %v14603_v50 = vadd.f32 %v12314_v55, %v21570_v63  ;;  %12756 = vmatprep.mubr.bf16.mxu1 %v12474_v24 }
 0x908   : > { %v12379_v34 = vmul.f32 0.2, %v14602_v25  ;;  %12757 = vmatmul.mubr.bf16.gmra.mrb[24].mxu1 %v12473_v0  ;;  %v12441_v12 = vmax.f32 %v14600_v44, %v12377_v8 }
 0x909   : > { %v12380_v42 = vmul.f32 0.2, %v14603_v50  ;;  %v12442_v10 = vmax.f32 %v14601_v26, %v12378_v21 }
 0x90a   : > { %v12443_v31 = vmax.f32 %v14602_v25, %v12379_v34 }
 0x90b   : > { %v12444_v18 = vmax.f32 %v14603_v50, %v12380_v42 }
 0x90c   : > { %v12475_v9 = vpack.c.bf16 %v12443_v31, %v12441_v12 }
 0x90d   : > { %v12476_v39 = vpack.c.bf16 %v12444_v18, %v12442_v10 }
 0x90f   : > { %12764 = vmatprep.mubr.bf16.mxu1 %v12476_v39 }
 0x910   : > { %12765 = vmatmul.mubr.bf16.gmra.mrb[28].mxu1 %v12475_v9 }
 0x96b   : > { %v14282_v54 = vpop.f32.mrb[224].mxu1 }
 0x96c   : > { %v14283_v61 = vpop.f32.mrb[225].mxu1 }
 0x96d   : > { %v14284_v63 = vadd.f32 %v14283_v61, %v14282_v54  ;;  %v14285_v47 = vpop.f32.mrb[226].mxu1 }
 0x96e   : > { %v14286_v1 = vpop.f32.mrb[227].mxu1 }
 0x96f   : > { %v12647_v28 = vadd.f32 %v14284_v63, %v21639_v29  ;;  %v14287_v16 = vadd.f32 %v14286_v1, %v14285_v47 }
 0x971   : > { %v14073_v7 = vmul.f32 -1.442695, %v12647_v28  ;;  %v12650_v30 = vadd.f32 %v14287_v16, %v21639_v29 }
 0x973   : > { %16550 = vpow2.f32 %v14073_v7  ;;  %v14074_v43 = vmul.f32 -1.442695, %v12650_v30  ;;  %v14288_v38 = vpop.f32.mrb[228].mxu1 }
 0x974   : > { %v14289_v2 = vpop.f32.mrb[229].mxu1 }
 0x975   : > { %16552 = vpow2.f32 %v14074_v43  ;;  %v14290_v5 = vadd.f32 %v14289_v2, %v14288_v38  ;;  %v14291_v14 = vpop.f32.mrb[230].mxu1 }
 0x976   : > { %v14292_v45 = vpop.f32.mrb[231].mxu1 }
 0x977   : > { %v12655_v41 = vadd.f32 %v14290_v5, %v21639_v29  ;;  %v14293_v13 = vadd.f32 %v14292_v45, %v14291_v14 }
 0x979   : > { %v14075_v20 = vmul.f32 -1.442695, %v12655_v41  ;;  %v12658_v33 = vadd.f32 %v14293_v13, %v21639_v29 }
 0x97b   : > { %16554 = vpow2.f32 %v14075_v20  ;;  %v14076_v48 = vmul.f32 -1.442695, %v12658_v33  ;;  %v14294_v4 = vpop.f32.mrb[232].mxu1 }
 0x97c   : > { %v14295_v40 = vpop.f32.mrb[233].mxu1 }
 0x97d   : > { %v16551_v46 = vpop.eup %16550  ;;  %16556 = vpow2.f32 %v14076_v48  ;;  %v14296_v62 = vadd.f32 %v14295_v40, %v14294_v4  ;;  %v14297_v6 = vpop.f32.mrb[234].mxu1 }
 0x97e   : > { %v12869_v60 = vadd.f32 1.0, %v16551_v46  ;;  %v14298_v53 = vpop.f32.mrb[235].mxu1 }
 0x97f   : > { %v16553_v58 = vpop.eup %16552  ;;  %v12663_v11 = vadd.f32 %v14296_v62, %v21639_v29  ;;  %v14299_v19 = vadd.f32 %v14298_v53, %v14297_v6 }
 0x980   : > { %v12870_v35 = vadd.f32 1.0, %v16553_v58  ;;  %16558 = vrcp.f32 %v12869_v60 }
 0x981   : > { %v14077_v32 = vmul.f32 -1.442695, %v12663_v11  ;;  %v12666_v51 = vadd.f32 %v14299_v19, %v21639_v29 }
 0x982   : > { %16560 = vrcp.f32 %v12870_v35 }
 0x983   : > { %16562 = vpow2.f32 %v14077_v32  ;;  %v14078_v22 = vmul.f32 -1.442695, %v12666_v51  ;;  %v14300_v37 = vpop.f32.mrb[236].mxu1 }
 0x984   : > { %v14301_v23 = vpop.f32.mrb[237].mxu1 }
 0x985   : > { %v16555_v59 = vpop.eup %16554  ;;  %16564 = vpow2.f32 %v14078_v22  ;;  %v14302_v17 = vadd.f32 %v14301_v23, %v14300_v37  ;;  %v14303_v57 = vpop.f32.mrb[238].mxu1 }
 0x986   : > { %v12871_v52 = vadd.f32 1.0, %v16555_v59  ;;  %v14304_v15 = vpop.f32.mrb[239].mxu1 }
 0x987   : > { %v16557_v36 = vpop.eup %16556  ;;  %v12671_v49 = vadd.f32 %v14302_v17, %v21639_v29  ;;  %v14305_v27 = vadd.f32 %v14304_v15, %v14303_v57 }
 0x988   : > { %v12872_v0 = vadd.f32 1.0, %v16557_v36  ;;  %16566 = vrcp.f32 %v12871_v52 }
 0x989   : > { %v14079_v44 = vmul.f32 -1.442695, %v12671_v49  ;;  %v12674_v56 = vadd.f32 %v14305_v27, %v21639_v29 }
 0x98a   : > { %16568 = vrcp.f32 %v12872_v0  ;;  %v16559_v26 = vpop.eup %16558 }
 0x98b   : > { %16570 = vpow2.f32 %v14079_v44  ;;  %v14080_v3 = vmul.f32 -1.442695, %v12674_v56  ;;  %v14306_v24 = vpop.f32.mrb[240].mxu1 }
 0x98c   : > { %v16561_v8 = vpop.eup %16560  ;;  %v14307_v25 = vpop.f32.mrb[241].mxu1 }
 0x98d   : > { %v16563_v55 = vpop.eup %16562  ;;  %v14174_v21 = vpack.c.bf16 %v16561_v8, %v16559_v26  ;;  %16572 = vpow2.f32 %v14080_v3  ;;  %v14308_v50 = vadd.f32 %v14307_v25, %v14306_v24  ;;  %v14309_v34 = vpop.f32.mrb[242].mxu1 }
 0x98e   : > { %v12873_v42 = vadd.f32 1.0, %v16563_v55  ;;  %v14310_v12 = vpop.f32.mrb[243].mxu1 }
 0x98f   : > { %v16565_v31 = vpop.eup %16564  ;;  %14175 = vst [vmem:[%s21653_s29] sm:$0xff] %v14174_v21   ;;  %v12679_v10 = vadd.f32 %v14308_v50, %v21639_v29  ;;  %v14311_v18 = vadd.f32 %v14310_v12, %v14309_v34 }
 0x990   : > { %v12874_v9 = vadd.f32 1.0, %v16565_v31  ;;  %16574 = vrcp.f32 %v12873_v42 }
 0x991   : > { %v14081_v39 = vmul.f32 -1.442695, %v12679_v10  ;;  %v12682_v54 = vadd.f32 %v14311_v18, %v21639_v29 }
 0x992   : > { %16576 = vrcp.f32 %v12874_v9  ;;  %v16567_v61 = vpop.eup %16566 }
 0x993   : > { %16578 = vpow2.f32 %v14081_v39  ;;  %v14082_v63 = vmul.f32 -1.442695, %v12682_v54  ;;  %v14312_v47 = vpop.f32.mrb[244].mxu1 }
 0x994   : > { %v16569_v1 = vpop.eup %16568  ;;  %v14313_v28 = vpop.f32.mrb[245].mxu1 }
 0x995   : > { %v16571_v16 = vpop.eup %16570  ;;  %v14179_v7 = vpack.c.bf16 %v16569_v1, %v16567_v61  ;;  %16580 = vpow2.f32 %v14082_v63  ;;  %v14314_v30 = vadd.f32 %v14313_v28, %v14312_v47  ;;  %v14315_v43 = vpop.f32.mrb[246].mxu1 }
 0x996   : > { %v12875_v38 = vadd.f32 1.0, %v16571_v16  ;;  %v14316_v2 = vpop.f32.mrb[247].mxu1 }
 0x997   : > { %v16573_v5 = vpop.eup %16572  ;;  %14251 = vst [vmem:[%s21653_s29 + $0x8] sm:$0xff] %v14179_v7   ;;  %v12687_v14 = vadd.f32 %v14314_v30, %v21639_v29  ;;  %v14317_v45 = vadd.f32 %v14316_v2, %v14315_v43 }
 0x998   : > { %v12876_v41 = vadd.f32 1.0, %v16573_v5  ;;  %16582 = vrcp.f32 %v12875_v38 }
 0x999   : > { %v14083_v13 = vmul.f32 -1.442695, %v12687_v14  ;;  %v12690_v20 = vadd.f32 %v14317_v45, %v21639_v29 }
 0x99a   : > { %16584 = vrcp.f32 %v12876_v41  ;;  %v16575_v33 = vpop.eup %16574 }
 0x99b   : > { %16586 = vpow2.f32 %v14083_v13  ;;  %v14084_v48 = vmul.f32 -1.442695, %v12690_v20  ;;  %v14318_v4 = vpop.f32.mrb[248].mxu1 }
 0x99c   : > { %v16577_v40 = vpop.eup %16576  ;;  %v14319_v46 = vpop.f32.mrb[249].mxu1 }
 0x99d   : > { %v16579_v62 = vpop.eup %16578  ;;  %v14184_v6 = vpack.c.bf16 %v16577_v40, %v16575_v33  ;;  %16588 = vpow2.f32 %v14084_v48  ;;  %v14320_v60 = vadd.f32 %v14319_v46, %v14318_v4  ;;  %v14321_v53 = vpop.f32.mrb[250].mxu1 }
 0x99e   : > { %v12877_v58 = vadd.f32 1.0, %v16579_v62  ;;  %v14322_v11 = vpop.f32.mrb[251].mxu1 }
 0x99f   : > { %v16581_v19 = vpop.eup %16580  ;;  %14252 = vst [vmem:[%s21653_s29 + $0x10] sm:$0xff] %v14184_v6   ;;  %v12695_v35 = vadd.f32 %v14320_v60, %v21639_v29  ;;  %v14323_v32 = vadd.f32 %v14322_v11, %v14321_v53 }
 0x9a0   : > { %v12878_v51 = vadd.f32 1.0, %v16581_v19  ;;  %16590 = vrcp.f32 %v12877_v58 }
 0x9a1   : > { %v14085_v22 = vmul.f32 -1.442695, %v12695_v35  ;;  %v12698_v37 = vadd.f32 %v14323_v32, %v21639_v29 }
 0x9a2   : > { %16592 = vrcp.f32 %v12878_v51  ;;  %v16583_v23 = vpop.eup %16582 }
 0x9a3   : > { %16594 = vpow2.f32 %v14085_v22  ;;  %v14086_v59 = vmul.f32 -1.442695, %v12698_v37  ;;  %v14324_v17 = vpop.f32.mrb[252].mxu1 }
 0x9a4   : > { %v16585_v57 = vpop.eup %16584  ;;  %v14325_v52 = vpop.f32.mrb[253].mxu1 }
 0x9a5   : > { %v16587_v15 = vpop.eup %16586  ;;  %v14189_v36 = vpack.c.bf16 %v16585_v57, %v16583_v23  ;;  %16596 = vpow2.f32 %v14086_v59  ;;  %v14326_v49 = vadd.f32 %v14325_v52, %v14324_v17  ;;  %v14327_v27 = vpop.f32.mrb[254].mxu1 }
 0x9a6   : > { %v12879_v0 = vadd.f32 1.0, %v16587_v15  ;;  %v14328_v44 = vpop.f32.mrb[255].mxu1 }
 0x9a7   : > { %v16589_v56 = vpop.eup %16588  ;;  %14253 = vst [vmem:[%s21653_s29 + $0x18] sm:$0xff] %v14189_v36   ;;  %v12703_v26 = vadd.f32 %v14326_v49, %v21639_v29  ;;  %v14329_v3 = vadd.f32 %v14328_v44, %v14327_v27 }
 0x9a8   : > { %v12880_v24 = vadd.f32 1.0, %v16589_v56  ;;  %16598 = vrcp.f32 %v12879_v0 }
 0x9a9   : > { %v14087_v8 = vmul.f32 -1.442695, %v12703_v26  ;;  %v12706_v25 = vadd.f32 %v14329_v3, %v21639_v29 }
 0x9aa   : > { %16600 = vrcp.f32 %v12880_v24  ;;  %v16591_v55 = vpop.eup %16590 }
 0x9ab   : > { %16602 = vpow2.f32 %v14087_v8  ;;  %v14088_v21 = vmul.f32 -1.442695, %v12706_v25  ;;  %v14330_v50 = vpop.f32.mrb[0].mxu1 }
 0x9ac   : > { %v16593_v34 = vpop.eup %16592  ;;  %v14331_v42 = vpop.f32.mrb[1].mxu1 }
 0x9ad   : > { %v16595_v12 = vpop.eup %16594  ;;  %v14194_v31 = vpack.c.bf16 %v16593_v34, %v16591_v55  ;;  %16604 = vpow2.f32 %v14088_v21  ;;  %v14332_v10 = vadd.f32 %v14331_v42, %v14330_v50  ;;  %v14333_v18 = vpop.f32.mrb[2].mxu1 }
 0x9ae   : > { %v12881_v9 = vadd.f32 1.0, %v16595_v12  ;;  %v14334_v39 = vpop.f32.mrb[3].mxu1 }
 0x9af   : > { %v16597_v54 = vpop.eup %16596  ;;  %14254 = vst [vmem:[%s21653_s29 + $0x20] sm:$0xff] %v14194_v31   ;;  %v12711_v61 = vadd.f32 %v14332_v10, %v21639_v29  ;;  %v14335_v63 = vadd.f32 %v14334_v39, %v14333_v18 }
 0x9b0   : > { %v12882_v47 = vadd.f32 1.0, %v16597_v54  ;;  %16606 = vrcp.f32 %v12881_v9 }
 0x9b1   : > { %v14089_v1 = vmul.f32 -1.442695, %v12711_v61  ;;  %v12714_v28 = vadd.f32 %v14335_v63, %v21639_v29 }
 0x9b2   : > { %16608 = vrcp.f32 %v12882_v47  ;;  %v16599_v16 = vpop.eup %16598 }
 0x9b3   : > { %16610 = vpow2.f32 %v14089_v1  ;;  %v14090_v7 = vmul.f32 -1.442695, %v12714_v28  ;;  %v14336_v30 = vpop.f32.mrb[4].mxu1 }
 0x9b4   : > { %v16601_v43 = vpop.eup %16600  ;;  %v14337_v38 = vpop.f32.mrb[5].mxu1 }
 0x9b5   : > { %v16603_v2 = vpop.eup %16602  ;;  %v14199_v5 = vpack.c.bf16 %v16601_v43, %v16599_v16  ;;  %16612 = vpow2.f32 %v14090_v7  ;;  %v14338_v14 = vadd.f32 %v14337_v38, %v14336_v30  ;;  %v14339_v45 = vpop.f32.mrb[6].mxu1 }
 0x9b6   : > { %v12883_v41 = vadd.f32 1.0, %v16603_v2  ;;  %v14340_v13 = vpop.f32.mrb[7].mxu1 }
 0x9b7   : > { %v16605_v20 = vpop.eup %16604  ;;  %14255 = vst [vmem:[%s21653_s29 + $0x28] sm:$0xff] %v14199_v5   ;;  %v12719_v33 = vadd.f32 %v14338_v14, %v21639_v29  ;;  %v14341_v48 = vadd.f32 %v14340_v13, %v14339_v45 }
 0x9b8   : > { %v12884_v4 = vadd.f32 1.0, %v16605_v20  ;;  %16614 = vrcp.f32 %v12883_v41 }
 0x9b9   : > { %v14091_v40 = vmul.f32 -1.442695, %v12719_v33  ;;  %v12722_v46 = vadd.f32 %v14341_v48, %v21639_v29 }
 0x9ba   : > { %16616 = vrcp.f32 %v12884_v4  ;;  %v16607_v62 = vpop.eup %16606 }
 0x9bb   : > { %16618 = vpow2.f32 %v14091_v40  ;;  %v14092_v6 = vmul.f32 -1.442695, %v12722_v46  ;;  %v14342_v60 = vpop.f32.mrb[8].mxu1 }
 0x9bc   : > { %v16609_v53 = vpop.eup %16608  ;;  %v14343_v58 = vpop.f32.mrb[9].mxu1 }
 0x9bd   : > { %v16611_v11 = vpop.eup %16610  ;;  %v14204_v19 = vpack.c.bf16 %v16609_v53, %v16607_v62  ;;  %16620 = vpow2.f32 %v14092_v6  ;;  %v14344_v35 = vadd.f32 %v14343_v58, %v14342_v60  ;;  %v14345_v32 = vpop.f32.mrb[10].mxu1 }
 0x9be   : > { %v12885_v51 = vadd.f32 1.0, %v16611_v11  ;;  %v14346_v22 = vpop.f32.mrb[11].mxu1 }
 0x9bf   : > { %v16613_v37 = vpop.eup %16612  ;;  %14256 = vst [vmem:[%s21653_s29 + $0x30] sm:$0xff] %v14204_v19   ;;  %v12727_v23 = vadd.f32 %v14344_v35, %v21639_v29  ;;  %v14347_v59 = vadd.f32 %v14346_v22, %v14345_v32 }
 0x9c0   : > { %v12886_v17 = vadd.f32 1.0, %v16613_v37  ;;  %16622 = vrcp.f32 %v12885_v51 }
 0x9c1   : > { %v14093_v57 = vmul.f32 -1.442695, %v12727_v23  ;;  %v12730_v52 = vadd.f32 %v14347_v59, %v21639_v29 }
 0x9c2   : > { %16624 = vrcp.f32 %v12886_v17  ;;  %v16615_v15 = vpop.eup %16614 }
 0x9c3   : > { %16626 = vpow2.f32 %v14093_v57  ;;  %v14094_v36 = vmul.f32 -1.442695, %v12730_v52  ;;  %v14348_v49 = vpop.f32.mrb[12].mxu1 }
 0x9c4   : > { %v16617_v27 = vpop.eup %16616  ;;  %v14349_v0 = vpop.f32.mrb[13].mxu1 }
 0x9c5   : > { %v16619_v44 = vpop.eup %16618  ;;  %v14209_v56 = vpack.c.bf16 %v16617_v27, %v16615_v15  ;;  %16628 = vpow2.f32 %v14094_v36  ;;  %v14350_v26 = vadd.f32 %v14349_v0, %v14348_v49  ;;  %v14351_v3 = vpop.f32.mrb[14].mxu1 }
 0x9c6   : > { %v12887_v24 = vadd.f32 1.0, %v16619_v44  ;;  %v14352_v8 = vpop.f32.mrb[15].mxu1 }
 0x9c7   : > { %v16621_v25 = vpop.eup %16620  ;;  %14257 = vst [vmem:[%s21653_s29 + $0x38] sm:$0xff] %v14209_v56   ;;  %v12735_v55 = vadd.f32 %v14350_v26, %v21639_v29  ;;  %v14353_v21 = vadd.f32 %v14352_v8, %v14351_v3 }
 0x9c8   : > { %v12888_v50 = vadd.f32 1.0, %v16621_v25  ;;  %16630 = vrcp.f32 %v12887_v24 }
 0x9c9   : > { %v14095_v34 = vmul.f32 -1.442695, %v12735_v55  ;;  %v12738_v42 = vadd.f32 %v14353_v21, %v21639_v29 }
 0x9ca   : > { %16632 = vrcp.f32 %v12888_v50  ;;  %v16623_v12 = vpop.eup %16622 }
 0x9cb   : > { %16634 = vpow2.f32 %v14095_v34  ;;  %v14096_v31 = vmul.f32 -1.442695, %v12738_v42  ;;  %v14354_v10 = vpop.f32.mrb[16].mxu1 }
 0x9cc   : > { %v16625_v18 = vpop.eup %16624  ;;  %v14355_v9 = vpop.f32.mrb[17].mxu1 }
 0x9cd   : > { %v16627_v39 = vpop.eup %16626  ;;  %v14214_v54 = vpack.c.bf16 %v16625_v18, %v16623_v12  ;;  %16636 = vpow2.f32 %v14096_v31  ;;  %v14356_v61 = vadd.f32 %v14355_v9, %v14354_v10  ;;  %v14357_v63 = vpop.f32.mrb[18].mxu1 }
 0x9ce   : > { %v12889_v47 = vadd.f32 1.0, %v16627_v39  ;;  %v14358_v1 = vpop.f32.mrb[19].mxu1 }
 0x9cf   : > { %v16629_v28 = vpop.eup %16628  ;;  %14258 = vst [vmem:[%s21653_s29 + $0x40] sm:$0xff] %v14214_v54   ;;  %v12743_v16 = vadd.f32 %v14356_v61, %v21639_v29  ;;  %v14359_v7 = vadd.f32 %v14358_v1, %v14357_v63 }
 0x9d0   : > { %v12890_v30 = vadd.f32 1.0, %v16629_v28  ;;  %16638 = vrcp.f32 %v12889_v47 }
 0x9d1   : > { %v14097_v43 = vmul.f32 -1.442695, %v12743_v16  ;;  %v12746_v38 = vadd.f32 %v14359_v7, %v21639_v29 }
 0x9d2   : > { %16640 = vrcp.f32 %v12890_v30  ;;  %v16631_v2 = vpop.eup %16630 }
 0x9d3   : > { %16642 = vpow2.f32 %v14097_v43  ;;  %v14098_v5 = vmul.f32 -1.442695, %v12746_v38  ;;  %v14360_v14 = vpop.f32.mrb[20].mxu1 }
 0x9d4   : > { %v16633_v45 = vpop.eup %16632  ;;  %v14361_v41 = vpop.f32.mrb[21].mxu1 }
 0x9d5   : > { %v16635_v13 = vpop.eup %16634  ;;  %v14219_v20 = vpack.c.bf16 %v16633_v45, %v16631_v2  ;;  %16644 = vpow2.f32 %v14098_v5  ;;  %v14362_v33 = vadd.f32 %v14361_v41, %v14360_v14  ;;  %v14363_v48 = vpop.f32.mrb[22].mxu1 }
 0x9d6   : > { %v12891_v4 = vadd.f32 1.0, %v16635_v13  ;;  %v14364_v40 = vpop.f32.mrb[23].mxu1 }
 0x9d7   : > { %v16637_v46 = vpop.eup %16636  ;;  %14259 = vst [vmem:[%s21653_s29 + $0x48] sm:$0xff] %v14219_v20   ;;  %v12751_v62 = vadd.f32 %v14362_v33, %v21639_v29  ;;  %v14365_v6 = vadd.f32 %v14364_v40, %v14363_v48 }
 0x9d8   : > { %v12892_v60 = vadd.f32 1.0, %v16637_v46  ;;  %16646 = vrcp.f32 %v12891_v4 }
 0x9d9   : > { %v14099_v53 = vmul.f32 -1.442695, %v12751_v62  ;;  %v12754_v58 = vadd.f32 %v14365_v6, %v21639_v29 }
 0x9da   : > { %16648 = vrcp.f32 %v12892_v60  ;;  %v16639_v11 = vpop.eup %16638 }
 0x9db   : > { %16650 = vpow2.f32 %v14099_v53  ;;  %v14100_v19 = vmul.f32 -1.442695, %v12754_v58  ;;  %v14366_v35 = vpop.f32.mrb[24].mxu1 }
 0x9dc   : > { %v16641_v32 = vpop.eup %16640  ;;  %v14367_v51 = vpop.f32.mrb[25].mxu1 }
 0x9dd   : > { %v16643_v22 = vpop.eup %16642  ;;  %v14224_v37 = vpack.c.bf16 %v16641_v32, %v16639_v11  ;;  %16652 = vpow2.f32 %v14100_v19  ;;  %v14368_v23 = vadd.f32 %v14367_v51, %v14366_v35  ;;  %v14369_v59 = vpop.f32.mrb[26].mxu1 }
 0x9de   : > { %v12893_v17 = vadd.f32 1.0, %v16643_v22  ;;  %v14370_v57 = vpop.f32.mrb[27].mxu1 }
 0x9df   : > { %v16645_v52 = vpop.eup %16644  ;;  %14260 = vst [vmem:[%s21653_s29 + $0x50] sm:$0xff] %v14224_v37   ;;  %v12759_v15 = vadd.f32 %v14368_v23, %v21639_v29  ;;  %v14371_v36 = vadd.f32 %v14370_v57, %v14369_v59 }
 0x9e0   : > { %v12894_v49 = vadd.f32 1.0, %v16645_v52  ;;  %16654 = vrcp.f32 %v12893_v17 }
 0x9e1   : > { %v14101_v27 = vmul.f32 -1.442695, %v12759_v15  ;;  %v12762_v0 = vadd.f32 %v14371_v36, %v21639_v29 }
 0x9e2   : > { %16656 = vrcp.f32 %v12894_v49  ;;  %v16647_v44 = vpop.eup %16646 }
 0x9e3   : > { %16658 = vpow2.f32 %v14101_v27  ;;  %v14102_v56 = vmul.f32 -1.442695, %v12762_v0  ;;  %v14372_v26 = vpop.f32.mrb[28].mxu1 }
 0x9e4   : > { %v16649_v3 = vpop.eup %16648  ;;  %v14373_v24 = vpop.f32.mrb[29].mxu1 }
 0x9e5   : > { %v16651_v8 = vpop.eup %16650  ;;  %v14229_v25 = vpack.c.bf16 %v16649_v3, %v16647_v44  ;;  %16660 = vpow2.f32 %v14102_v56  ;;  %v14374_v55 = vadd.f32 %v14373_v24, %v14372_v26  ;;  %v14375_v21 = vpop.f32.mrb[30].mxu1 }
 0x9e6   : > { %v12895_v50 = vadd.f32 1.0, %v16651_v8  ;;  %v14376_v34 = vpop.f32.mrb[31].mxu1 }
 0x9e7   : > { %v16653_v42 = vpop.eup %16652  ;;  %14261 = vst [vmem:[%s21653_s29 + $0x58] sm:$0xff] %v14229_v25   ;;  %v12767_v12 = vadd.f32 %v14374_v55, %v21639_v29  ;;  %v14377_v31 = vadd.f32 %v14376_v34, %v14375_v21 }
 0x9e8   : > { %v12896_v10 = vadd.f32 1.0, %v16653_v42  ;;  %16662 = vrcp.f32 %v12895_v50 }
 0x9e9   : > { %v14103_v18 = vmul.f32 -1.442695, %v12767_v12  ;;  %v12770_v9 = vadd.f32 %v14377_v31, %v21639_v29 }
 0x9ea   : > { %16664 = vrcp.f32 %v12896_v10  ;;  %v16655_v39 = vpop.eup %16654 }
 0x9eb   : > { %16666 = vpow2.f32 %v14103_v18  ;;  %v14104_v54 = vmul.f32 -1.442695, %v12770_v9 }
 0x9ec   : > { %v16657_v61 = vpop.eup %16656 }
 0x9ed   : > { %v16659_v63 = vpop.eup %16658  ;;  %v14234_v47 = vpack.c.bf16 %v16657_v61, %v16655_v39  ;;  %16668 = vpow2.f32 %v14104_v54 }
 0x9ee   : > { %v12897_v1 = vadd.f32 1.0, %v16659_v63 }
 0x9ef   : > { %v16661_v28 = vpop.eup %16660  ;;  %14262 = vst [vmem:[%s21653_s29 + $0x60] sm:$0xff] %v14234_v47  }
 0x9f0   : > { %v12898_v16 = vadd.f32 1.0, %v16661_v28  ;;  %16670 = vrcp.f32 %v12897_v1 }
 0x9f2   : > { %16672 = vrcp.f32 %v12898_v16  ;;  %v16663_v7 = vpop.eup %16662 }
 0x9f4   : > { %v16665_v30 = vpop.eup %16664 }
 0x9f5   : > { %v16667_v29 = vpop.eup %16666  ;;  %v14239_v43 = vpack.c.bf16 %v16665_v30, %v16663_v7 }
 0x9f6   : > { %v12899_v38 = vadd.f32 1.0, %v16667_v29 }
 0x9f7   : > { %v16669_v2 = vpop.eup %16668  ;;  %14263 = vst [vmem:[%s21653_s29 + $0x68] sm:$0xff] %v14239_v43  }
 0x9f8   : > { %v12900_v5 = vadd.f32 1.0, %v16669_v2  ;;  %16674 = vrcp.f32 %v12899_v38 }
 0x9fa   : > { %16676 = vrcp.f32 %v12900_v5  ;;  %v16671_v14 = vpop.eup %16670 }
 0x9fc   : > { %v16673_v45 = vpop.eup %16672 }
 0x9fd   : > { %v14244_v41 = vpack.c.bf16 %v16673_v45, %v16671_v14 }
 0x9ff   : > { %14264 = vst [vmem:[%s21653_s29 + $0x70] sm:$0xff] %v14244_v41  }
 0xa02   : > { %v16675_v13 = vpop.eup %16674 }
 0xa04   : > { %v16677_v20 = vpop.eup %16676 }
 0xa05   : > { %v14249_v33 = vpack.c.bf16 %v16677_v20, %v16675_v13 }
 0xa07   : > { %14265 = vst [vmem:[%s21653_s29 + $0x78] sm:$0xff] %v14249_v33  }
 0xa08 PF: > { %s21_s17 = sadd.s32 1, %s16686_s17  }
 0xa09   : > { %p18_p4 = scmp.ge.s32.totalorder %s21_s17, 4  }
 0xa0b   :  { %20 = sbr.rel (!%p18_p4) target bundleno = 1 (0x1), region = 97 }

</bundles_post_ra>
